<compile_context>
chip_gen: v7x
topology: tpu7x:2x2x1
jax: 0.10.0
libtpu: 0.0.40
codegen_flags: <defaults>
</compile_context>

<pallas_src>
import functools

import jax
import jax.numpy as jnp
from jax.experimental import pallas as pl
from jax.experimental.pallas import tpu as pltpu


def _conv3x3_same_operator(w, H, W):
    """Exact (HW, HW) operator A with (img_flat @ A) == SAME conv2d(img, w) flat.

    Built by scatter of the raw weights (no matmul/rounding), so each entry is
    either 0 or a single conv weight.
    """
    HW = H * W
    n = jnp.arange(HW, dtype=jnp.int32)
    r = n // W
    c = n % W
    A = jnp.zeros((HW, HW), jnp.float32)
    for di in (-1, 0, 1):
        for dj in (-1, 0, 1):
            valid = (r + di >= 0) & (r + di < H) & (c + dj >= 0) & (c + dj < W)
            src = jnp.clip(n + di * W + dj, 0, HW - 1)
            A = A.at[src, n].add(jnp.where(valid, w[di + 1, dj + 1], 0.0))
    return A


def _choose_tb(B, chw_bytes, target_block_bytes=2 << 20):
    """Images per grid step.

    Block shape is (TB, C*H*W); its second-minor dim must be a multiple of 8
    or equal B.  Prefer a multiple of 8 that divides B, keeps >= 2 grid steps
    (ideally an even count so v7x can split them across its two TensorCores),
    and gives an input block around `target_block_bytes` (~85% of HBM roofline
    per the pipelined-copy measurements).
    """
    target = max(8, target_block_bytes // max(chw_bytes, 1))
    cands = [d for d in range(8, B // 2 + 1, 8) if B % d == 0]
    if not cands:
        return B                      # tiny / odd batches: one full-batch block
    fit = [d for d in cands if d <= target] or [min(cands)]
    tb = max(fit)
    even = [d for d in fit if (B // d) % 2 == 0]
    if even:
        tb = max(even)
    return tb


def _make_kernel(C, HW):
    CHW = C * HW
    inv_hw = 1.0 / HW

    def kernel(x_ref, m1_ref, a2_ref, s_ref, o_ref):
        # x_ref : (TB, C*HW) VMEM   raw NCHW memory of TB images, lane-dense.
        # m1_ref: (C*HW, HW) VMEM   repeat(A1, C, 0): fused view-contraction + conv1.
        # a2_ref: (HW, HW)   VMEM   conv2 operator.
        # s_ref : (3,)       SMEM   [b1, b2, k1].
        # o_ref : (TB, HW)   VMEM   k1 * body(NCA(x)), spatially flattened.
        x = x_ref[...]                                             # (TB, CHW)

        # ---- NCA: AdaptiveAvgPool2d(1) + softmax over channels --------------
        # Channel c occupies the contiguous lane range [c*HW, (c+1)*HW).
        sums = [jnp.sum(x[:, c * HW:(c + 1) * HW], axis=-1, keepdims=True) * inv_hw
                for c in range(C)]                                 # C x (TB, 1)
        m = functools.reduce(jnp.maximum, sums)
        es = [jnp.exp(s - m) for s in sums]
        d = functools.reduce(jnp.add, es)
        r = pl.reciprocal(d, approx=True)                          # EUP slot
        r = r * (2.0 - d * r)                                      # Newton refine
        r = r * (2.0 - d * r)                                      # (exact to f32)
        ps = [e * r for e in es]                                   # softmax cols (TB, 1)

        # ---- lane-periodic weighting: y[b, k] = x[b, k] * p[b, k mod C] -----
        lane_mod = jax.lax.broadcasted_iota(jnp.int32, (1, CHW), 1) % C
        pe = jnp.where(lane_mod == 0, ps[0], 0.0)
        for c in range(1, C):
            pe = pe + jnp.where(lane_mod == c, ps[c], 0.0)
        y = x * pe                                                 # (TB, CHW)

        # ---- fused raw-view contraction + conv1 (+b1, ReLU) on the MXU ------
        # ctx[b, n] = sum_j y[b, n*C + j]; conv1 folded in via M1 = repeat(A1, C).
        h1 = jnp.dot(y, m1_ref[...],
                     precision=jax.lax.Precision.HIGHEST,
                     preferred_element_type=jnp.float32) + s_ref[0]
        h1 = jnp.maximum(h1, 0.0)                                  # (TB, HW)

        # ---- conv2 (+b2) and k1 scaling --------------------------------------
        h2 = jnp.dot(h1, a2_ref[...],
                     precision=jax.lax.Precision.HIGHEST,
                     preferred_element_type=jnp.float32) + s_ref[1]
        o_ref[...] = s_ref[2] * h2                                 # lane-dense store

    return kernel


def mablock_forward(x, w1, b1, w2, b2, k1):
    B, C, H, W = x.shape
    HW = H * W
    CHW = C * HW

    # Raw NCHW memory with channel+spatial flattened: single lane-dense DMA of x.
    # TODO(synk): optionally stream x as bf16 on v6e/v7x (f32 accumulate) behind
    # a flag; disabled here to preserve the strict f32 tolerance.
    x2 = jnp.reshape(x, (B, CHW)).astype(jnp.float32)

    # Conv3x3 (SAME) as banded operators; fold the raw-view group-sum into conv1.
    A1 = _conv3x3_same_operator(jnp.reshape(w1, (3, 3)).astype(jnp.float32), H, W)
    A2 = _conv3x3_same_operator(jnp.reshape(w2, (3, 3)).astype(jnp.float32), H, W)
    M1 = jnp.repeat(A1, C, axis=0)                                 # (CHW, HW), exact

    scalars = jnp.stack([b1.reshape(()), b2.reshape(()),
                         k1.reshape(())]).astype(jnp.float32)

    TB = _choose_tb(B, CHW * 4)
    assert B % TB == 0
    grid = (B // TB,)

    # VMEM budget: double-buffered in/out blocks + (double-buffered) constants
    # + large in-kernel intermediates (pe, y, h1, h2) + headroom.
    const_bytes = (CHW * HW + HW * HW) * 4
    block_bytes = TB * (CHW + HW) * 4
    interm_bytes = TB * (3 * CHW + 2 * HW) * 4
    vmem_limit = int(min(max(2 * block_bytes + 2 * const_bytes + interm_bytes
                             + (2 << 20), 16 << 20), 48 << 20))

    out_flat = pl.pallas_call(
        _make_kernel(C, HW),
        out_shape=jax.ShapeDtypeStruct((B, HW), jnp.float32),
        grid=grid,
        in_specs=[
            pl.BlockSpec((TB, CHW), lambda b: (b, 0)),
            pl.BlockSpec((CHW, HW), lambda b: (0, 0)),   # constant block: fetched once
            pl.BlockSpec((HW, HW), lambda b: (0, 0)),    # constant block: fetched once
            pl.BlockSpec(memory_space=pltpu.MemorySpace.SMEM),
        ],
        out_specs=pl.BlockSpec((TB, HW), lambda b: (b, 0)),
        compiler_params=pltpu.CompilerParams(
            dimension_semantics=("parallel",),           # batch-independent steps
            vmem_limit_bytes=vmem_limit,
        ),
    )(x2, M1, A2, scalars)

    return jnp.reshape(out_flat, (B, 1, H, W))


def mablock_reference(x, w1, b1, w2, b2, k1):
    """Pure-JAX reference reproducing the PyTorch forward."""
    B, C, H, W = x.shape
    pooled = jnp.mean(x, axis=(2, 3))                              # (B, C)
    p = jax.nn.softmax(pooled, axis=1)                             # (B, C)
    xr = jnp.reshape(x, (B, H * W, C))                             # raw .view
    ctx = jnp.einsum('bnc,bc->bn', xr, p).reshape(B, 1, H, W)

    def conv(a, w, b):
        y = jax.lax.conv_general_dilated(
            a, w, window_strides=(1, 1), padding='SAME',
            dimension_numbers=('NCHW', 'OIHW', 'NCHW'))
        return y + b.reshape(1, 1, 1, 1)

    h = jax.nn.relu(conv(ctx, w1, b1))
    out = conv(h, w2, b2)
    return k1.reshape(1, 1, 1, 1) * out


if __name__ == "__main__":
    B, C, H, W = 2, 4, 16, 16
    key = jax.random.PRNGKey(0)
    kx, ka, kb, kc, kd, ke = jax.random.split(key, 6)
    x = jax.random.normal(kx, (B, C, H, W), jnp.float32)

    # Parameter shapes per the module __init__: conv(1,1,3), conv(1,1,3), k1.
    # NOTE: the module zero-inits the last conv and k1 (output would be all
    # zeros); we use deterministic random values so the kernel is exercised.
    w1 = jax.random.normal(ka, (1, 1, 3, 3), jnp.float32) * 0.3
    b1 = jax.random.normal(kb, (1,), jnp.float32) * 0.1
    w2 = jax.random.normal(kc, (1, 1, 3, 3), jnp.float32) * 0.3
    b2 = jax.random.normal(kd, (1,), jnp.float32) * 0.1
    k1 = jax.random.normal(ke, (1,), jnp.float32)

    out = mablock_forward(x, w1, b1, w2, b2, k1)
    out = jax.block_until_ready(out)

    ref = mablock_reference(x, w1, b1, w2, b2, k1)
    assert out.shape == (B, 1, H, W)
    err = float(jnp.max(jnp.abs(out - ref)))
    assert jnp.allclose(out, ref, atol=1e-4, rtol=1e-4), err
    print("KERNEL_OK")
</pallas_src>

<mosaic_0001>
module attributes {stable_mosaic.version = 11 : i64} {
  func.func @kernel(%arg0: i32, %arg1: memref<2x1024xf32, #tpu.memory_space<vmem>>, %arg2: memref<1024x256xf32, #tpu.memory_space<vmem>>, %arg3: memref<256x256xf32, #tpu.memory_space<vmem>>, %arg4: memref<3xf32, #tpu.memory_space<smem>>, %arg5: memref<2x256xf32, #tpu.memory_space<vmem>>) attributes {dimension_semantics = [#tpu.dimension_semantics<parallel>], iteration_bounds = array<i64: 1>, scalar_prefetch = 0 : i64, scratch_operands = 0 : i64, tpu.core_type = #tpu.core_type<tc>, window_params = [{transform_indices = @transform_0, window_bounds = array<i64: 2, 1024>}, {pipeline_mode = #tpu.pipeline_mode<synchronous>, transform_indices = @transform_1, window_bounds = array<i64: 1024, 256>}, {pipeline_mode = #tpu.pipeline_mode<synchronous>, transform_indices = @transform_2, window_bounds = array<i64: 256, 256>}, {transform_indices = @transform_3, window_bounds = array<i64: 3>}, {transform_indices = @transform_4, window_bounds = array<i64: 2, 256>}]} {
    %c0 = arith.constant 0 : index
    %c0_0 = arith.constant 0 : index
    %0 = vector.load %arg1[%c0, %c0_0] : memref<2x1024xf32, #tpu.memory_space<vmem>>, vector<2x1024xf32>
    %1 = vector.extract_strided_slice %0 {offsets = [0, 0], sizes = [2, 256], strides = [1, 1]} : vector<2x1024xf32> to vector<2x256xf32>
    %cst = arith.constant dense<0.000000e+00> : vector<2xf32>
    %2 = vector.multi_reduction <add>, %1, %cst [1] : vector<2x256xf32> to vector<2xf32>
    %3 = vector.shape_cast %2 : vector<2xf32> to vector<2x1xf32>
    %cst_1 = arith.constant 3.906250e-03 : f32
    %4 = vector.broadcast %cst_1 : f32 to vector<2x1xf32>
    %5 = arith.mulf %3, %4 : vector<2x1xf32>
    %6 = vector.extract_strided_slice %0 {offsets = [0, 256], sizes = [2, 256], strides = [1, 1]} : vector<2x1024xf32> to vector<2x256xf32>
    %cst_2 = arith.constant dense<0.000000e+00> : vector<2xf32>
    %7 = vector.multi_reduction <add>, %6, %cst_2 [1] : vector<2x256xf32> to vector<2xf32>
    %8 = vector.shape_cast %7 : vector<2xf32> to vector<2x1xf32>
    %cst_3 = arith.constant 3.906250e-03 : f32
    %9 = vector.broadcast %cst_3 : f32 to vector<2x1xf32>
    %10 = arith.mulf %8, %9 : vector<2x1xf32>
    %11 = vector.extract_strided_slice %0 {offsets = [0, 512], sizes = [2, 256], strides = [1, 1]} : vector<2x1024xf32> to vector<2x256xf32>
    %cst_4 = arith.constant dense<0.000000e+00> : vector<2xf32>
    %12 = vector.multi_reduction <add>, %11, %cst_4 [1] : vector<2x256xf32> to vector<2xf32>
    %13 = vector.shape_cast %12 : vector<2xf32> to vector<2x1xf32>
    %cst_5 = arith.constant 3.906250e-03 : f32
    %14 = vector.broadcast %cst_5 : f32 to vector<2x1xf32>
    %15 = arith.mulf %13, %14 : vector<2x1xf32>
    %16 = vector.extract_strided_slice %0 {offsets = [0, 768], sizes = [2, 256], strides = [1, 1]} : vector<2x1024xf32> to vector<2x256xf32>
    %cst_6 = arith.constant dense<0.000000e+00> : vector<2xf32>
    %17 = vector.multi_reduction <add>, %16, %cst_6 [1] : vector<2x256xf32> to vector<2xf32>
    %18 = vector.shape_cast %17 : vector<2xf32> to vector<2x1xf32>
    %cst_7 = arith.constant 3.906250e-03 : f32
    %19 = vector.broadcast %cst_7 : f32 to vector<2x1xf32>
    %20 = arith.mulf %18, %19 : vector<2x1xf32>
    %21 = arith.maximumf %5, %10 : vector<2x1xf32>
    %22 = arith.maximumf %21, %15 : vector<2x1xf32>
    %23 = arith.maximumf %22, %20 : vector<2x1xf32>
    %24 = arith.subf %5, %23 : vector<2x1xf32>
    %25 = math.exp %24 : vector<2x1xf32>
    %26 = arith.subf %10, %23 : vector<2x1xf32>
    %27 = math.exp %26 : vector<2x1xf32>
    %28 = arith.subf %15, %23 : vector<2x1xf32>
    %29 = math.exp %28 : vector<2x1xf32>
    %30 = arith.subf %20, %23 : vector<2x1xf32>
    %31 = math.exp %30 : vector<2x1xf32>
    %32 = arith.addf %25, %27 : vector<2x1xf32>
    %33 = arith.addf %32, %29 : vector<2x1xf32>
    %34 = arith.addf %33, %31 : vector<2x1xf32>
    %35 = tpu.reciprocal %34 {approx = true} : vector<2x1xf32> -> vector<2x1xf32>
    %36 = arith.mulf %34, %35 : vector<2x1xf32>
    %cst_8 = arith.constant 2.000000e+00 : f32
    %37 = vector.broadcast %cst_8 : f32 to vector<2x1xf32>
    %38 = arith.subf %37, %36 : vector<2x1xf32>
    %39 = arith.mulf %35, %38 : vector<2x1xf32>
    %40 = arith.mulf %34, %39 : vector<2x1xf32>
    %cst_9 = arith.constant 2.000000e+00 : f32
    %41 = vector.broadcast %cst_9 : f32 to vector<2x1xf32>
    %42 = arith.subf %41, %40 : vector<2x1xf32>
    %43 = arith.mulf %39, %42 : vector<2x1xf32>
    %44 = arith.mulf %25, %43 : vector<2x1xf32>
    %45 = arith.mulf %27, %43 : vector<2x1xf32>
    %46 = arith.mulf %29, %43 : vector<2x1xf32>
    %47 = arith.mulf %31, %43 : vector<2x1xf32>
    %48 = tpu.iota {dimensions = array<i32: 1>} : vector<1x1024xi32>
    %c4_i32 = arith.constant 4 : i32
    %c0_i32 = arith.constant 0 : i32
    %49 = arith.cmpi eq, %c4_i32, %c0_i32 : i32
    %c1_i32 = arith.constant 1 : i32
    %50 = arith.select %49, %c1_i32, %c4_i32 : i32
    %51 = vector.broadcast %50 : i32 to vector<1x1024xi32>
    %52 = arith.remsi %48, %51 : vector<1x1024xi32>
    %c0_i32_10 = arith.constant 0 : i32
    %53 = vector.broadcast %c0_i32_10 : i32 to vector<1x1024xi32>
    %54 = arith.cmpi ne, %52, %53 : vector<1x1024xi32>
    %c0_i32_11 = arith.constant 0 : i32
    %55 = vector.broadcast %c0_i32_11 : i32 to vector<1x1024xi32>
    %56 = arith.cmpi slt, %52, %55 : vector<1x1024xi32>
    %c0_i32_12 = arith.constant 0 : i32
    %57 = arith.cmpi slt, %50, %c0_i32_12 : i32
    %58 = vector.broadcast %57 : i1 to vector<1x1024xi1>
    %59 = vector.broadcast %58 : vector<1x1024xi1> to vector<1x1024xi1>
    %60 = arith.xori %56, %59 : vector<1x1024xi1>
    %61 = arith.andi %60, %54 : vector<1x1024xi1>
    %62 = vector.broadcast %50 : i32 to vector<1x1024xi32>
    %63 = arith.addi %52, %62 : vector<1x1024xi32>
    %64 = arith.select %61, %63, %52 : vector<1x1024xi1>, vector<1x1024xi32>
    %c0_i32_13 = arith.constant 0 : i32
    %65 = vector.broadcast %c0_i32_13 : i32 to vector<1x1024xi32>
    %66 = arith.cmpi eq, %64, %65 : vector<1x1024xi32>
    %cst_14 = arith.constant 0.000000e+00 : f32
    %67 = vector.shape_cast %66 : vector<1x1024xi1> to vector<1x1024xi1>
    %68 = vector.broadcast %67 : vector<1x1024xi1> to vector<2x1024xi1>
    %69 = vector.shape_cast %44 : vector<2x1xf32> to vector<2x1xf32>
    %70 = vector.broadcast %69 : vector<2x1xf32> to vector<2x1024xf32>
    %71 = vector.broadcast %cst_14 : f32 to vector<2x1024xf32>
    %72 = arith.select %68, %70, %71 : vector<2x1024xi1>, vector<2x1024xf32>
    %c1_i32_15 = arith.constant 1 : i32
    %73 = vector.broadcast %c1_i32_15 : i32 to vector<1x1024xi32>
    %74 = arith.cmpi eq, %64, %73 : vector<1x1024xi32>
    %cst_16 = arith.constant 0.000000e+00 : f32
    %75 = vector.shape_cast %74 : vector<1x1024xi1> to vector<1x1024xi1>
    %76 = vector.broadcast %75 : vector<1x1024xi1> to vector<2x1024xi1>
    %77 = vector.shape_cast %45 : vector<2x1xf32> to vector<2x1xf32>
    %78 = vector.broadcast %77 : vector<2x1xf32> to vector<2x1024xf32>
    %79 = vector.broadcast %cst_16 : f32 to vector<2x1024xf32>
    %80 = arith.select %76, %78, %79 : vector<2x1024xi1>, vector<2x1024xf32>
    %81 = arith.addf %72, %80 : vector<2x1024xf32>
    %c2_i32 = arith.constant 2 : i32
    %82 = vector.broadcast %c2_i32 : i32 to vector<1x1024xi32>
    %83 = arith.cmpi eq, %64, %82 : vector<1x1024xi32>
    %cst_17 = arith.constant 0.000000e+00 : f32
    %84 = vector.shape_cast %83 : vector<1x1024xi1> to vector<1x1024xi1>
    %85 = vector.broadcast %84 : vector<1x1024xi1> to vector<2x1024xi1>
    %86 = vector.shape_cast %46 : vector<2x1xf32> to vector<2x1xf32>
    %87 = vector.broadcast %86 : vector<2x1xf32> to vector<2x1024xf32>
    %88 = vector.broadcast %cst_17 : f32 to vector<2x1024xf32>
    %89 = arith.select %85, %87, %88 : vector<2x1024xi1>, vector<2x1024xf32>
    %90 = arith.addf %81, %89 : vector<2x1024xf32>
    %c3_i32 = arith.constant 3 : i32
    %91 = vector.broadcast %c3_i32 : i32 to vector<1x1024xi32>
    %92 = arith.cmpi eq, %64, %91 : vector<1x1024xi32>
    %cst_18 = arith.constant 0.000000e+00 : f32
    %93 = vector.shape_cast %92 : vector<1x1024xi1> to vector<1x1024xi1>
    %94 = vector.broadcast %93 : vector<1x1024xi1> to vector<2x1024xi1>
    %95 = vector.shape_cast %47 : vector<2x1xf32> to vector<2x1xf32>
    %96 = vector.broadcast %95 : vector<2x1xf32> to vector<2x1024xf32>
    %97 = vector.broadcast %cst_18 : f32 to vector<2x1024xf32>
    %98 = arith.select %94, %96, %97 : vector<2x1024xi1>, vector<2x1024xf32>
    %99 = arith.addf %90, %98 : vector<2x1024xf32>
    %100 = arith.mulf %0, %99 : vector<2x1024xf32>
    %c0_19 = arith.constant 0 : index
    %c0_20 = arith.constant 0 : index
    %101 = vector.load %arg2[%c0_19, %c0_20] : memref<1024x256xf32, #tpu.memory_space<vmem>>, vector<1024x256xf32>
    %cst_21 = arith.constant dense<0.000000e+00> : vector<2x256xf32>
    %102 = tpu.matmul %100, %101, %cst_21 {dimension_numbers = #tpu.dot_dimension_numbers<[1], [0], [0], [1], [0, 0, 1, 1], [], []>, precision = #tpu.contract_precision<fp32>} : vector<2x1024xf32>, vector<1024x256xf32>, vector<2x256xf32> -> vector<2x256xf32>
    %c0_22 = arith.constant 0 : index
    %103 = memref.load %arg4[%c0_22] : memref<3xf32, #tpu.memory_space<smem>>
    %104 = vector.broadcast %103 : f32 to vector<2x256xf32>
    %105 = arith.addf %102, %104 : vector<2x256xf32>
    %cst_23 = arith.constant 0.000000e+00 : f32
    %106 = vector.broadcast %cst_23 : f32 to vector<2x256xf32>
    %107 = arith.maximumf %105, %106 : vector<2x256xf32>
    %c0_24 = arith.constant 0 : index
    %c0_25 = arith.constant 0 : index
    %108 = vector.load %arg3[%c0_24, %c0_25] : memref<256x256xf32, #tpu.memory_space<vmem>>, vector<256x256xf32>
    %cst_26 = arith.constant dense<0.000000e+00> : vector<2x256xf32>
    %109 = tpu.matmul %107, %108, %cst_26 {dimension_numbers = #tpu.dot_dimension_numbers<[1], [0], [0], [1], [0, 0, 1, 1], [], []>, precision = #tpu.contract_precision<fp32>} : vector<2x256xf32>, vector<256x256xf32>, vector<2x256xf32> -> vector<2x256xf32>
    %c1 = arith.constant 1 : index
    %110 = memref.load %arg4[%c1] : memref<3xf32, #tpu.memory_space<smem>>
    %111 = vector.broadcast %110 : f32 to vector<2x256xf32>
    %112 = arith.addf %109, %111 : vector<2x256xf32>
    %c2 = arith.constant 2 : index
    %113 = memref.load %arg4[%c2] : memref<3xf32, #tpu.memory_space<smem>>
    %114 = vector.broadcast %113 : f32 to vector<2x256xf32>
    %115 = arith.mulf %114, %112 : vector<2x256xf32>
    %c0_27 = arith.constant 0 : index
    %c0_28 = arith.constant 0 : index
    %116 = vector.load %arg5[%c0_27, %c0_28] : memref<2x256xf32, #tpu.memory_space<vmem>>, vector<2x256xf32>
    tpu.vector_store %arg5[%c0_27, %c0_28], %115 {strides = array<i32>} : memref<2x256xf32, #tpu.memory_space<vmem>>, vector<2x256xf32>,
    return
  }
  func.func @transform_0(%arg0: i32) -> (i32, i32) {
    %c0_i32 = arith.constant 0 : i32
    %c0_i32_0 = arith.constant 0 : i32
    return %arg0, %c0_i32 : i32, i32
  }
  func.func @transform_1(%arg0: i32) -> (i32, i32) {
    %c0_i32 = arith.constant 0 : i32
    %c0_i32_0 = arith.constant 0 : i32
    %c0_i32_1 = arith.constant 0 : i32
    return %c0_i32, %c0_i32_0 : i32, i32
  }
  func.func @transform_2(%arg0: i32) -> (i32, i32) {
    %c0_i32 = arith.constant 0 : i32
    %c0_i32_0 = arith.constant 0 : i32
    %c0_i32_1 = arith.constant 0 : i32
    return %c0_i32, %c0_i32_0 : i32, i32
  }
  func.func @transform_3(%arg0: i32) -> i32 {
    %c0_i32 = arith.constant 0 : i32
    %c0_i32_0 = arith.constant 0 : i32
    return %c0_i32 : i32
  }
  func.func @transform_4(%arg0: i32) -> (i32, i32) {
    %c0_i32 = arith.constant 0 : i32
    %c0_i32_0 = arith.constant 0 : i32
    return %arg0, %c0_i32 : i32, i32
  }
}

</mosaic_0001>

<bundles_post_ra>
// kernel: tpu_custom_call.1
= control target key start
LH: loop header
LB: loop body
LE: loop exit
PB: predicated region body
PF: predicated region fallthrough
CT: control target
= control target key end

     0   :  { %9 = vsyncpa [#allocation3], 0  ;;  %s14848_s0 = inlined_call_operand.hbm [shape: f32[2,1024], index: 0, kind: input, shape index: {}]   ;;  %s14849_s1 = inlined_call_operand.hbm [shape: f32[1024,256], index: 1, kind: input, shape index: {}]   ;;  %s14850_s2 = inlined_call_operand.hbm [shape: f32[256,256], index: 2, kind: input, shape index: {}]   ;;  %s14851_s3 = inlined_call_operand.vmem [shape: f32[3], index: 3, kind: input, shape index: {}]   ;;  %s14852_s4 = inlined_call_operand.hbm [shape: f32[2,256], index: 4, kind: output, shape index: {}]  }
   0x1   :  { %10 = vsyncpa [#allocation7], 0 }
   0x2   :  { %11 = vsyncpa [#allocation5], 0 }
   0x3   :  { %12 = vsyncpa [#allocation4], 0  ;;  %s9409_s15 = smov [#allocation6]   ;;  %s9301_s19 = scalar_lea.hbm %s14849_s1, 32768 }
   0x4   :  { %s28_s16 = sshll.u32 %s9409_s15, 4  ;;  %p9302_p0 = scmp.ne.s32.totalorder %s14849_s1, %s9301_s19  ;;  %s29_s16 = int_to_ptr.vmem [resolvable:$true] %s28_s16 }
   0x5   :  { %p9305_p1 = scmp.lt.u32.totalorder %s9301_s19, %s14849_s1 }
   0x7   :  { %p9307_p2 = pnand %p9305_p1, %p9302_p0 }
   0x9   :  { %9310 = shalt.err (!%p9307_p2)
}
   0xa   :  { %s9311_s24 = scalar_lea.vmem %s29_s16, 32768  ;;  %p9316_p4 = scmp.lt.s32.totalorder %s29_s16, %s29_s16 }
   0xb   :  { %p9312_p3 = scmp.ne.s32.totalorder %s29_s16, %s9311_s24  ;;  %p9317_p5 = scmp.lt.s32.totalorder %s9311_s24, %s9311_s24 }
   0xd   :  { %p9318_p6 = por %p9317_p5, %p9316_p4 }
   0xf   :  { %p9319_p7 = pnand %p9318_p6, %p9312_p3 }
  0x11   :  { %9322 = shalt.err (!%p9319_p7)
}
  0x12   :  { %s9410_s25 = smov 256   ;;  %s9411_s26 = smov 16  }
  0x13   :  { %34 = dma.hbm_to_vmem [thread:$0]  %s14849_s1, 32768, %s29_s16, [#allocation7], %s9410_s25, %s9410_s25, %s9411_s26  }
  0x14   :  { %s9412_s29 = smov [#allocation2]   ;;  %s9413_s5 = smov [#allocation8]  }
  0x15   :  { %s19_s30 = sshll.u32 %s9412_s29, 4  ;;  %s40_s6 = sshll.u32 %s9413_s5, 4  ;;  %s20_s30 = int_to_ptr.vmem [resolvable:$true] %s19_s30  ;;  %s41_s6 = int_to_ptr.vmem [resolvable:$true] %s40_s6 }
  0x16   :  { %s9323_s9 = scalar_lea.hbm %s14848_s0, 256 }
  0x17   :  { %p9324_p8 = scmp.ne.s32.totalorder %s14848_s0, %s9323_s9  ;;  %p9327_p9 = scmp.lt.u32.totalorder %s9323_s9, %s14848_s0 }
  0x19   :  { %p9329_p10 = pnand %p9327_p9, %p9324_p8 }
  0x1b   :  { %9332 = shalt.err (!%p9329_p10)
}
  0x1c   :  { %s9333_s1 = scalar_lea.vmem %s20_s30, 256  ;;  %p9338_p12 = scmp.lt.s32.totalorder %s20_s30, %s20_s30 }
  0x1d   :  { %p9334_p11 = scmp.ne.s32.totalorder %s20_s30, %s9333_s1  ;;  %p9339_p13 = scmp.lt.s32.totalorder %s9333_s1, %s9333_s1 }
  0x1f   :  { %p9340_p0 = por %p9339_p13, %p9338_p12 }
  0x21   :  { %p9341_p1 = pnand %p9340_p0, %p9334_p11 }
  0x23   :  { %9344 = shalt.err (!%p9341_p1)
}
  0x24   :  { %22 = dma.hbm_to_vmem [thread:$0]  %s14848_s0, 256, %s20_s30, [#allocation3]  }
  0x25   :  { %s53_s18 = sshll.u32 %s14851_s3, 4  ;;  %s9345_s21 = scalar_lea.hbm %s14850_s2, 8192  ;;  %s54_s18 = int_to_ptr.vmem [resolvable:$true] %s53_s18 }
  0x26   :  { %p9346_p2 = scmp.ne.s32.totalorder %s14850_s2, %s9345_s21  ;;  %p9349_p3 = scmp.lt.u32.totalorder %s9345_s21, %s14850_s2 }
  0x28   :  { %p9351_p4 = pnand %p9349_p3, %p9346_p2 }
  0x2a   :  { %9354 = shalt.err (!%p9351_p4)
}
  0x2b   :  { %s9355_s0 = scalar_lea.vmem %s41_s6, 8192  ;;  %p9360_p6 = scmp.lt.s32.totalorder %s41_s6, %s41_s6 }
  0x2c   :  { %p9356_p5 = scmp.ne.s32.totalorder %s41_s6, %s9355_s0  ;;  %p9361_p7 = scmp.lt.s32.totalorder %s9355_s0, %s9355_s0 }
  0x2e   :  { %p9362_p8 = por %p9361_p7, %p9360_p6 }
  0x30   :  { %p9363_p9 = pnand %p9362_p8, %p9356_p5 }
  0x32   :  { %9366 = shalt.err (!%p9363_p9)
}
  0x33   :  { %46 = dma.hbm_to_vmem [thread:$0]  %s14850_s2, 8192, %s41_s6, [#allocation7], %s9410_s25, %s9410_s25, %s9411_s26  }
  0x34   :  { %s9367_s29 = scalar_lea.vmem %s54_s18, 16  ;;  %p9372_p11 = scmp.lt.s32.totalorder %s54_s18, %s54_s18 }
  0x35   :  { %p9368_p10 = scmp.ne.s32.totalorder %s54_s18, %s9367_s29  ;;  %p9373_p12 = scmp.lt.s32.totalorder %s9367_s29, %s9367_s29 }
  0x37   :  { %p9374_p13 = por %p9373_p12, %p9372_p11 }
  0x39   :  { %p9375_p0 = pnand %p9374_p13, %p9368_p10 }
  0x3b   :  { %9378 = shalt.err (!%p9375_p0)
}
  0x3c   :  { %s9414_s30 = smov [#allocation9]  }
  0x3d   :  { %56 = dma.vmem_to_smem %s54_s18, 16, %s9414_s30, [#allocation5]  }
  0x3e   :  { %9401 = dma.done.wait [#allocation3], 256  }
  0x3f   :  { %9402 = vsyncadd [#allocation3], 4294967040 }
  0x40   :  { %9403 = dma.done.wait [#allocation7], 40960  }
  0x41   :  { %9404 = vsyncadd [#allocation7], 4294926336 }
  0x42   :  { %9405 = dma.done.wait [#allocation5], 16  }
  0x43   :  { %9406 = vsyncadd [#allocation5], 4294967280 }
  0x44   :  { %69 = sfence }
  0x45   :  { %v14853_v0 = vlaneseq  ;;  %v9415_v1 = vmov 1983009808   ;;  %v70_v3 = vld [vmem:[#allocation2] sm:$0xff]  ;;  %v71_v5 = vld [vmem:[#allocation2 + $0x8] sm:$0xff]  ;;  %vm83_vm0 = vcmask 1041408   ;;  %v9502_v30 = vld [vmem:[#allocation6 + $0x208] sm:$0xff] }
  0x46   :  { %v74_v2 = vunpack.c.l.s4 %v9415_v1  ;;  %v90_v7 = vcombine.high %v70_v3, %v70_v3  ;;  %v124_v8 = vcombine.high %v71_v5, %v71_v5  ;;  %v9504_v31 = vld [vmem:[#allocation6 + $0x218] sm:$0xff]  ;;  %v14885_v32 = vand.u32 4294901760, %v9502_v30  ;;  %v9508_v34 = vld [vmem:[#allocation6 + $0x200] sm:$0xff]  ;;  %v9510_v35 = vld [vmem:[#allocation6 + $0x210] sm:$0xff]  ;;  %s729_s2 = sld [smem:[#allocation9]]  ;;  %s7296_s25 = sld [smem:[#allocation9 + $0x1]] }
  0x47   :  { %v77_v4 = vshrl.u32 %v14853_v0, 7  ;;  %v14882_v33 = vand.u32 4294901760, %v9504_v31  ;;  %v14881_v36 = vand.u32 4294901760, %v9508_v34  ;;  %v14880_v37 = vand.u32 4294901760, %v9510_v35  ;;  %v9514_v38 = vld [vmem:[#allocation6 + $0x8] sm:$0xff]  ;;  %v9516_v39 = vld [vmem:[#allocation6 + $0x18] sm:$0xff] }
  0x48   :  { %v75_v6 = vunpack.c.0.s8 %v74_v2  ;;  %v14877_v41 = vand.u32 4294901760, %v9514_v38  ;;  %v14876_v42 = vand.u32 4294901760, %v9516_v39  ;;  %v9526_v43 = vld [vmem:[#allocation6] sm:$0xff]  ;;  %v9528_v44 = vld [vmem:[#allocation6 + $0x10] sm:$0xff]  ;;  %v9538_v48 = vld [vmem:[#allocation6 + $0x228] sm:$0xff]  ;;  %s7297_s26 = sld [smem:[#allocation9 + $0x2]] }
  0x49   :  { %v9522_v40 = vpack.c.bf16 %v14882_v33, %v14885_v32  ;;  %v9534_v45 = vpack.c.bf16 %v14880_v37, %v14881_v36  ;;  %v14875_v46 = vand.u32 4294901760, %v9526_v43  ;;  %v14872_v47 = vand.u32 4294901760, %v9528_v44  ;;  %v9540_v49 = vld [vmem:[#allocation6 + $0x238] sm:$0xff]  ;;  %v9551_v53 = vld [vmem:[#allocation6 + $0x220] sm:$0xff]  ;;  %v9553_v54 = vld [vmem:[#allocation6 + $0x230] sm:$0xff]  ;;  %s9416_s5 = smov [#allocation10]  }
  0x4a   :  { %v9488_v9 = vsub.s32 %v75_v6, %v77_v4  ;;  %v9547_v50 = vpack.c.bf16 %v14876_v42, %v14877_v41  ;;  %v14871_v51 = vand.u32 4294901760, %v9538_v48  ;;  %v14870_v52 = vand.u32 4294901760, %v9540_v49  ;;  %v9564_v58 = vld [vmem:[#allocation6 + $0x28] sm:$0xff]  ;;  %v9566_v59 = vld [vmem:[#allocation6 + $0x38] sm:$0xff]  ;;  %v9577_v63 = vld [vmem:[#allocation6 + $0x20] sm:$0xff]  ;;  %s7285_s6 = sshll.u32 %s9416_s5, 4  ;;  %s7286_s6 = int_to_ptr.vmem [resolvable:$true] %s7285_s6 }
  0x4b   :  { %16093 = vst [vmem:[#allocation16_spill] sm:$0xff] %v9522_v40  ;;  %16094 = vst [vmem:[#allocation17_spill] sm:$0xff] %v9534_v45  ;;  %7876 = vmatprep.subr.bf16.mxu0 %v9522_v40  ;;  %v9560_v55 = vpack.c.bf16 %v14872_v47, %v14875_v46  ;;  %v14867_v56 = vand.u32 4294901760, %v9551_v53  ;;  %v14866_v57 = vand.u32 4294901760, %v9553_v54  ;;  %v14865_v61 = vand.u32 4294901760, %v9564_v58  ;;  %v9579_v1 = vld [vmem:[#allocation6 + $0x30] sm:$0xff]  ;;  %p9384_p2 = scmp.lt.s32.totalorder %s7286_s6, %s7286_s6 }
  0x4c   :  { %16092 = vst [vmem:[#allocation15_spill] sm:$0xff] %v9488_v9  ;;  %v79_v10 = vrot.slane %v70_v3, %v9488_v9  ;;  %v114_v11 = vrot.slane %v71_v5, %v9488_v9  ;;  %v97_v12 = vrot.slane %v90_v7, %v9488_v9  ;;  %v131_v13 = vrot.slane %v124_v8, %v9488_v9  ;;  %v9590_v5 = vld [vmem:[#allocation6 + $0x248] sm:$0xff]  ;;  %v9592_v6 = vld [vmem:[#allocation6 + $0x258] sm:$0xff]  ;;  %v9709_v46 = vld [vmem:[#allocation6 + $0x290] sm:$0xff]  ;;  %s9379_s7 = scalar_lea.vmem %s7286_s6, 64 }
  0x4d   :  { %16095 = vst [vmem:[#allocation18_spill] sm:$0xff] %v9547_v50  ;;  %7878 = vmatpush1.bf16.msra.mxu0 %v9534_v45  ;;  %16096 = vst [vmem:[#allocation19_spill] sm:$0xff] %v9560_v55  ;;  %7300 = vmatprep.subr.bf16.mxu1 %v9547_v50  ;;  %v9573_v60 = vpack.c.bf16 %v14870_v52, %v14871_v51  ;;  %v14862_v62 = vand.u32 4294901760, %v9566_v59  ;;  %v9586_v2 = vpack.c.bf16 %v14866_v57, %v14867_v56  ;;  %v9696_v52 = vld [vmem:[#allocation6 + $0x298] sm:$0xff]  ;;  %v9735_v32 = vld [vmem:[#allocation6 + $0x90] sm:$0xff]  ;;  %p9380_p1 = scmp.ne.s32.totalorder %s7286_s6, %s9379_s7  ;;  %p9385_p3 = scmp.lt.s32.totalorder %s9379_s7, %s9379_s7 }
  0x4e   :  { %v80_v14 = vcombine.high %v79_v10, %v79_v10  ;;  %v84_v15 = vsel %vm83_vm0, %v79_v10, 0.0  ;;  %v115_v16 = vcombine.high %v114_v11, %v114_v11  ;;  %v118_v17 = vsel %vm83_vm0, %v114_v11, 0.0  ;;  %7302 = vmatpush1.bf16.msra.mxu1 %v9560_v55  ;;  %v9603_v11 = vld [vmem:[#allocation6 + $0x240] sm:$0xff]  ;;  %v9722_v37 = vld [vmem:[#allocation6 + $0x98] sm:$0xff]  ;;  %v9787_v50 = vld [vmem:[#allocation6 + $0xb0] sm:$0xff] }
  0x4f   :  { %v98_v18 = vcombine.high %v97_v12, %v97_v12  ;;  %v132_v19 = vcombine.high %v131_v13, %v131_v13  ;;  %v101_v22 = vsel %vm83_vm0, %v97_v12, 0.0  ;;  %v135_v23 = vsel %vm83_vm0, %v131_v13, 0.0  ;;  %16097 = vst [vmem:[#allocation20_spill] sm:$0xff] %v9573_v60  ;;  %16098 = vst [vmem:[#allocation21_spill] sm:$0xff] %v9586_v2  ;;  %7880 = vmatprep.subr.bf16.mxu0 %v9573_v60  ;;  %v9605_v12 = vld [vmem:[#allocation6 + $0x250] sm:$0xff]  ;;  %v9748_v33 = vld [vmem:[#allocation6 + $0x2b8] sm:$0xff]  ;;  %p9386_p4 = por %p9385_p3, %p9384_p2 }
  0x50   :  { %v85_v20 = vsel %vm83_vm0, %v80_v14, 0.0  ;;  %v119_v21 = vsel %vm83_vm0, %v115_v16, 0.0  ;;  %v14861_v3 = vand.u32 4294901760, %v9577_v63  ;;  %v14860_v4 = vand.u32 4294901760, %v9579_v1  ;;  %v9616_v16 = vld [vmem:[#allocation6 + $0x48] sm:$0xff]  ;;  %16120 = vst [vmem:[#allocation37_spill] sm:$0xff] %v9787_v50 }
  0x51   :  { %v86_v24 = vadd.f32 %v85_v20, %v84_v15  ;;  %v120_v25 = vadd.f32 %v119_v21, %v118_v17  ;;  %v102_v26 = vsel %vm83_vm0, %v98_v18, 0.0  ;;  %v136_v27 = vsel %vm83_vm0, %v132_v19, 0.0  ;;  %7882 = vmatpush1.bf16.msra.mxu0 %v9586_v2  ;;  %v9618_v17 = vld [vmem:[#allocation6 + $0x58] sm:$0xff]  ;;  %v9629_v21 = vld [vmem:[#allocation6 + $0x40] sm:$0xff]  ;;  %v9839_v45 = vld [vmem:[#allocation6 + $0xd0] sm:$0xff]  ;;  %p9387_p5 = pnand %p9386_p4, %p9380_p1 }
  0x52   :  { %v103_v28 = vadd.f32 %v102_v26, %v101_v22  ;;  %v137_v29 = vadd.f32 %v136_v27, %v135_v23  ;;  %v9599_v7 = vpack.c.bf16 %v14862_v62, %v14865_v61  ;;  %v14857_v8 = vand.u32 4294901760, %v9590_v5  ;;  %v9631_v22 = vld [vmem:[#allocation6 + $0x50] sm:$0xff]  ;;  %v9642_v26 = vld [vmem:[#allocation6 + $0x268] sm:$0xff]  ;;  %v9644_v27 = vld [vmem:[#allocation6 + $0x278] sm:$0xff]  ;;  %16140 = vst [vmem:[#allocation49_spill] sm:$0xff] %v9839_v45 }
  0x53   :  { %87 = vadd.xlane.f32.xlu0 %v86_v24  ;;  %121 = vadd.xlane.f32.xlu1 %v120_v25  ;;  %v14856_v10 = vand.u32 4294901760, %v9592_v6  ;;  %v9612_v13 = vpack.c.bf16 %v14860_v4, %v14861_v3  ;;  %v14855_v14 = vand.u32 4294901760, %v9603_v11  ;;  %v14854_v15 = vand.u32 4294901760, %v9605_v12  ;;  %v9670_v4 = vld [vmem:[#allocation6 + $0x78] sm:$0xff]  ;;  %v9683_v61 = vld [vmem:[#allocation6 + $0x70] sm:$0xff] }
  0x54   :  { %16099 = vst [vmem:[#allocation22_spill] sm:$0xff] %v9599_v7  ;;  %7304 = vmatprep.subr.bf16.mxu1 %v9599_v7  ;;  %v14859_v19 = vand.u32 4294901760, %v9616_v16  ;;  %v14858_v20 = vand.u32 4294901760, %v9618_v17  ;;  %v14864_v24 = vand.u32 4294901760, %v9629_v21  ;;  %v14863_v25 = vand.u32 4294901760, %v9631_v22  ;;  %v9826_v2 = vld [vmem:[#allocation6 + $0xd8] sm:$0xff] }
  0x55   :  { %16100 = vst [vmem:[#allocation23_spill] sm:$0xff] %v9612_v13  ;;  %v9625_v18 = vpack.c.bf16 %v14856_v10, %v14857_v8  ;;  %7306 = vmatpush1.bf16.msra.mxu1 %v9612_v13  ;;  %v9638_v23 = vpack.c.bf16 %v14854_v15, %v14855_v14  ;;  %v14868_v0 = vand.u32 4294901760, %v9644_v27  ;;  %v9655_v15 = vld [vmem:[#allocation6 + $0x260] sm:$0xff]  ;;  %v9657_v14 = vld [vmem:[#allocation6 + $0x270] sm:$0xff]  ;;  %v16115_v7 = vand.u32 4294901760, %v9735_v32  ;;  %v9774_v13 = vld [vmem:[#allocation6 + $0xb8] sm:$0xff] }
  0x56   :  { %v9664_v10 = vpack.c.bf16 %v14863_v25, %v14864_v24  ;;  %v14874_v8 = vand.u32 4294901760, %v9655_v15  ;;  %v14878_v25 = vand.u32 4294901760, %v9670_v4  ;;  %v9681_v24 = vld [vmem:[#allocation6 + $0x60] sm:$0xff]  ;;  %16135 = vst [vmem:[#allocation46_spill] sm:$0xff] %v9826_v2  ;;  %v9852_v9 = vld [vmem:[#allocation6 + $0x2f8] sm:$0xff] }
  0x57   :  { %104 = vadd.xlane.f32.xlu0 %v103_v28  ;;  %138 = vadd.xlane.f32.xlu1 %v137_v29  ;;  %16101 = vst [vmem:[#allocation24_spill] sm:$0xff] %v9625_v18  ;;  %16102 = vst [vmem:[#allocation25_spill] sm:$0xff] %v9638_v23  ;;  %v9651_v28 = vpack.c.bf16 %v14858_v20, %v14859_v19  ;;  %v14869_v29 = vand.u32 4294901760, %v9642_v26  ;;  %v14873_v20 = vand.u32 4294901760, %v9657_v14  ;;  %v9668_v19 = vld [vmem:[#allocation6 + $0x68] sm:$0xff]  ;;  %v14884_v56 = vand.u32 4294901760, %v9681_v24 }
  0x58   :  { %7884 = vmatprep.subr.bf16.mxu0 %v9625_v18  ;;  %16104 = vst [vmem:[#allocation27_spill] sm:$0xff] %v9664_v10  ;;  %v14879_v62 = vand.u32 4294901760, %v9668_v19  ;;  %16145 = vst [vmem:[#allocation52_spill] sm:$0xff] %v9852_v9 }
  0x59   :  { %16103 = vst [vmem:[#allocation26_spill] sm:$0xff] %v9651_v28  ;;  %7886 = vmatpush1.bf16.msra.mxu0 %v9638_v23  ;;  %7308 = vmatprep.subr.bf16.mxu1 %v9651_v28  ;;  %v9677_v3 = vpack.c.bf16 %v14868_v0, %v14869_v29  ;;  %v9690_v57 = vpack.c.bf16 %v14873_v20, %v14874_v8  ;;  %v14883_v0 = vand.u32 4294901760, %v9683_v61  ;;  %v9694_v29 = vld [vmem:[#allocation6 + $0x288] sm:$0xff]  ;;  %v14890_v20 = vand.u32 4294901760, %v9696_v52  ;;  %v9707_v8 = vld [vmem:[#allocation6 + $0x280] sm:$0xff]  ;;  %v9813_v23 = vld [vmem:[#allocation6 + $0x2d0] sm:$0xff] }
  0x5a   :  { %7310 = vmatpush1.bf16.msra.mxu1 %v9664_v10  ;;  %v9703_v51 = vpack.c.bf16 %v14878_v25, %v14879_v62  ;;  %v14891_v47 = vand.u32 4294901760, %v9694_v29  ;;  %v14899_v41 = vand.u32 4294901760, %v9707_v8  ;;  %v14898_v25 = vand.u32 4294901760, %v9709_v46  ;;  %v9720_v62 = vld [vmem:[#allocation6 + $0x88] sm:$0xff]  ;;  %v9761_v10 = vld [vmem:[#allocation6 + $0x2b0] sm:$0xff]  ;;  %16130 = vst [vmem:[#allocation43_spill] sm:$0xff] %v9813_v23 }
  0x5b   :  { %16105 = vst [vmem:[#allocation28_spill] sm:$0xff] %v9677_v3  ;;  %16106 = vst [vmem:[#allocation29_spill] sm:$0xff] %v9690_v57  ;;  %7888 = vmatprep.subr.bf16.mxu0 %v9677_v3  ;;  %v9716_v42 = vpack.c.bf16 %v14883_v0, %v14884_v56  ;;  %v9733_v56 = vld [vmem:[#allocation6 + $0x80] sm:$0xff]  ;;  %v16111_v0 = vand.u32 4294901760, %v9720_v62 }
  0x5c   :  { %16107 = vst [vmem:[#allocation30_spill] sm:$0xff] %v9703_v51  ;;  %7312 = vmatprep.subr.bf16.mxu1 %v9703_v51  ;;  %v9729_v36 = vpack.c.bf16 %v14890_v20, %v14891_v47  ;;  %v9742_v51 = vpack.c.bf16 %v14898_v25, %v14899_v41  ;;  %v9746_v47 = vld [vmem:[#allocation6 + $0x2a8] sm:$0xff]  ;;  %v9759_v41 = vld [vmem:[#allocation6 + $0x2a0] sm:$0xff]  ;;  %v16114_v20 = vand.u32 4294901760, %v9733_v56 }
  0x5d   :  { %7890 = vmatpush1.bf16.msra.mxu0 %v9690_v57  ;;  %16108 = vst [vmem:[#allocation31_spill] sm:$0xff] %v9716_v42  ;;  %v16117_v25 = vand.u32 4294901760, %v9746_v47  ;;  %v9800_v57 = vld [vmem:[#allocation6 + $0x2d8] sm:$0xff] }
  0x5e   :  { %16109 = vst [vmem:[#allocation32_spill] sm:$0xff] %v9729_v36  ;;  %7314 = vmatpush1.bf16.msra.mxu1 %v9716_v42  ;;  %16110 = vst [vmem:[#allocation33_spill] sm:$0xff] %v9742_v51  ;;  %7892 = vmatprep.subr.bf16.mxu0 %v9729_v36  ;;  %v16112_v42 = vand.u32 4294901760, %v9722_v37  ;;  %v9768_v55 = vpack.c.bf16 %v16115_v7, %v16114_v20  ;;  %v9785_v20 = vld [vmem:[#allocation6 + $0xa0] sm:$0xff] }
  0x5f   :  { %16125 = vst [vmem:[#allocation40_spill] sm:$0xff] %v9800_v57 }
  0x60   :  { %v9755_v28 = vpack.c.bf16 %v16112_v42, %v16111_v0  ;;  %16116 = vst [vmem:[#allocation35_spill] sm:$0xff] %v9768_v55  ;;  %v9772_v42 = vld [vmem:[#allocation6 + $0xa8] sm:$0xff]  ;;  %v16121_v0 = vand.u32 4294901760, %v9759_v41 }
  0x61   :  { %7894 = vmatpush1.bf16.msra.mxu0 %v9742_v51  ;;  %v16118_v51 = vand.u32 4294901760, %v9748_v33  ;;  %v16126_v7 = vand.u32 4294901760, %v9772_v42 }
  0x62   :  { %16113 = vst [vmem:[#allocation34_spill] sm:$0xff] %v9755_v28  ;;  %7316 = vmatprep.subr.bf16.mxu1 %v9755_v28  ;;  %v16122_v28 = vand.u32 4294901760, %v9761_v10 }
  0x63   :  { %v9781_v36 = vpack.c.bf16 %v16118_v51, %v16117_v25  ;;  %7318 = vmatpush1.bf16.msra.mxu1 %v9768_v55  ;;  %v9798_v25 = vld [vmem:[#allocation6 + $0x2c8] sm:$0xff]  ;;  %v16127_v55 = vand.u32 4294901760, %v9774_v13  ;;  %v16131_v51 = vand.u32 4294901760, %v9785_v20 }
  0x64   :  { %v9794_v3 = vpack.c.bf16 %v16122_v28, %v16121_v0  ;;  %16124 = vst [vmem:[#allocation39_spill] sm:$0xff] %v9798_v25  ;;  %v9811_v0 = vld [vmem:[#allocation6 + $0x2c0] sm:$0xff]  ;;  %v16136_v28 = vand.u32 4294901760, %v9798_v25 }
  0x65   :  { %16119 = vst [vmem:[#allocation36_spill] sm:$0xff] %v9781_v36  ;;  %7896 = vmatprep.subr.bf16.mxu0 %v9781_v36  ;;  %v9807_v18 = vpack.c.bf16 %v16127_v55, %v16126_v7  ;;  %16129 = vst [vmem:[#allocation42_spill] sm:$0xff] %v9811_v0  ;;  %v16132_v36 = vand.u32 4294901760, %v9787_v50  ;;  %v9824_v7 = vld [vmem:[#allocation6 + $0xc8] sm:$0xff]  ;;  %v16141_v55 = vand.u32 4294901760, %v9811_v0 }
  0x66   :  { %16123 = vst [vmem:[#allocation38_spill] sm:$0xff] %v9794_v3  ;;  %7898 = vmatpush1.bf16.msra.mxu0 %v9794_v3  ;;  %16134 = vst [vmem:[#allocation45_spill] sm:$0xff] %v9824_v7  ;;  %v16137_v3 = vand.u32 4294901760, %v9800_v57  ;;  %v9865_v57 = vld [vmem:[#allocation6 + $0x2f0] sm:$0xff] }
  0x67   :  { %16128 = vst [vmem:[#allocation41_spill] sm:$0xff] %v9807_v18  ;;  %v9820_v60 = vpack.c.bf16 %v16132_v36, %v16131_v51  ;;  %7320 = vmatprep.subr.bf16.mxu1 %v9807_v18  ;;  %v9837_v51 = vld [vmem:[#allocation6 + $0xc0] sm:$0xff]  ;;  %v16142_v18 = vand.u32 4294901760, %v9813_v23  ;;  %v16146_v36 = vand.u32 4294901760, %v9824_v7  ;;  %16150 = vst [vmem:[#allocation55_spill] sm:$0xff] %v9865_v57  ;;  %v9878_v23 = vld [vmem:[#allocation6 + $0xf8] sm:$0xff] }
  0x68   :  { %v9833_v40 = vpack.c.bf16 %v16137_v3, %v16136_v28  ;;  %16139 = vst [vmem:[#allocation48_spill] sm:$0xff] %v9837_v51  ;;  %v9850_v28 = vld [vmem:[#allocation6 + $0x2e8] sm:$0xff]  ;;  %v16151_v3 = vand.u32 4294901760, %v9837_v51  ;;  %16155 = vst [vmem:[#allocation58_spill] sm:$0xff] %v9878_v23 }
  0x69   :  { %16133 = vst [vmem:[#allocation44_spill] sm:$0xff] %v9820_v60  ;;  %7322 = vmatpush1.bf16.msra.mxu1 %v9820_v60  ;;  %v9846_v50 = vpack.c.bf16 %v16142_v18, %v16141_v55  ;;  %16144 = vst [vmem:[#allocation51_spill] sm:$0xff] %v9850_v28  ;;  %v16147_v60 = vand.u32 4294901760, %v9826_v2  ;;  %v9863_v55 = vld [vmem:[#allocation6 + $0x2e0] sm:$0xff]  ;;  %v16156_v18 = vand.u32 4294901760, %v9850_v28  ;;  %v9891_v2 = vld [vmem:[#allocation6 + $0xf0] sm:$0xff] }
  0x6a   :  { %16138 = vst [vmem:[#allocation47_spill] sm:$0xff] %v9833_v40  ;;  %7900 = vmatprep.subr.bf16.mxu0 %v9833_v40  ;;  %16149 = vst [vmem:[#allocation54_spill] sm:$0xff] %v9863_v55  ;;  %v16152_v40 = vand.u32 4294901760, %v9839_v45  ;;  %v9904_v45 = vld [vmem:[#allocation6 + $0x318] sm:$0xff] }
  0x6b   :  { %16143 = vst [vmem:[#allocation50_spill] sm:$0xff] %v9846_v50  ;;  %v9859_v25 = vpack.c.bf16 %v16147_v60, %v16146_v36  ;;  %7902 = vmatpush1.bf16.msra.mxu0 %v9846_v50  ;;  %v9876_v36 = vld [vmem:[#allocation6 + $0xe8] sm:$0xff]  ;;  %v16157_v50 = vand.u32 4294901760, %v9852_v9  ;;  %16160 = vst [vmem:[#allocation61_spill] sm:$0xff] %v9891_v2  ;;  %v16161_v60 = vand.u32 4294901760, %v9863_v55  ;;  %v9917_v9 = vld [vmem:[#allocation6 + $0x310] sm:$0xff] }
  0x6c   :  { %v9872_v0 = vpack.c.bf16 %v16152_v40, %v16151_v3  ;;  %16154 = vst [vmem:[#allocation57_spill] sm:$0xff] %v9876_v36  ;;  %v9889_v3 = vld [vmem:[#allocation6 + $0xe0] sm:$0xff]  ;;  %16165 = vst [vmem:[#allocation64_spill] sm:$0xff] %v9904_v45  ;;  %v16166_v40 = vand.u32 4294901760, %v9876_v36 }
  0x6d   :  { %16148 = vst [vmem:[#allocation53_spill] sm:$0xff] %v9859_v25  ;;  %7324 = vmatprep.subr.bf16.mxu1 %v9859_v25  ;;  %v9885_v7 = vpack.c.bf16 %v16157_v50, %v16156_v18  ;;  %16159 = vst [vmem:[#allocation60_spill] sm:$0xff] %v9889_v3  ;;  %v16162_v25 = vand.u32 4294901760, %v9865_v57  ;;  %v9902_v18 = vld [vmem:[#allocation6 + $0x308] sm:$0xff]  ;;  %v16170_v50 = vand.u32 4294901760, %v9889_v3  ;;  %v9930_v57 = vld [vmem:[#allocation6 + $0x118] sm:$0xff] }
  0x6e   :  { %16153 = vst [vmem:[#allocation56_spill] sm:$0xff] %v9872_v0  ;;  %7326 = vmatpush1.bf16.msra.mxu1 %v9872_v0  ;;  %16164 = vst [vmem:[#allocation63_spill] sm:$0xff] %v9902_v18  ;;  %v16167_v0 = vand.u32 4294901760, %v9878_v23  ;;  %v9943_v23 = vld [vmem:[#allocation6 + $0x110] sm:$0xff] }
  0x6f   :  { %16158 = vst [vmem:[#allocation59_spill] sm:$0xff] %v9885_v7  ;;  %v9898_v51 = vpack.c.bf16 %v16162_v25, %v16161_v60  ;;  %7904 = vmatprep.subr.bf16.mxu0 %v9885_v7  ;;  %v9915_v60 = vld [vmem:[#allocation6 + $0x300] sm:$0xff]  ;;  %16169 = vst [vmem:[#allocation66_spill] sm:$0xff] %v9917_v9  ;;  %v16171_v7 = vand.u32 4294901760, %v9891_v2  ;;  %v16174_v25 = vand.u32 4294901760, %v9902_v18 }
  0x70   :  { %v9911_v28 = vpack.c.bf16 %v16167_v0, %v16166_v40  ;;  %v9928_v40 = vld [vmem:[#allocation6 + $0x108] sm:$0xff]  ;;  %16173 = vst [vmem:[#allocation68_spill] sm:$0xff] %v9930_v57  ;;  %v16178_v0 = vand.u32 4294901760, %v9915_v60 }
  0x71   :  { %16163 = vst [vmem:[#allocation62_spill] sm:$0xff] %v9898_v51  ;;  %7906 = vmatpush1.bf16.msra.mxu0 %v9898_v51  ;;  %v9924_v55 = vpack.c.bf16 %v16171_v7, %v16170_v50  ;;  %v16175_v51 = vand.u32 4294901760, %v9904_v45  ;;  %v15003_v2 = vand.u32 4294901760, %v9928_v40  ;;  %v15002_v7 = vand.u32 4294901760, %v9930_v57  ;;  %v9941_v50 = vld [vmem:[#allocation6 + $0x100] sm:$0xff] }
  0x72   :  { %16168 = vst [vmem:[#allocation65_spill] sm:$0xff] %v9911_v28  ;;  %7328 = vmatprep.subr.bf16.mxu1 %v9911_v28  ;;  %16177 = vst [vmem:[#allocation70_spill] sm:$0xff] %v9941_v50  ;;  %v16179_v28 = vand.u32 4294901760, %v9917_v9  ;;  %v16184_v50 = vand.u32 4294901760, %v9504_v31  ;;  %v16186_v57 = vand.u32 4294901760, %v9508_v34 }
  0x73   :  { %16172 = vst [vmem:[#allocation67_spill] sm:$0xff] %v9924_v55  ;;  %v9937_v36 = vpack.c.bf16 %v16175_v51, %v16174_v25  ;;  %7330 = vmatpush1.bf16.msra.mxu1 %v9924_v55  ;;  %v9953_v51 = vld [vmem:[#allocation6 + $0x328] sm:$0xff]  ;;  %v9955_v25 = vld [vmem:[#allocation6 + $0x338] sm:$0xff]  ;;  %v9962_v18 = vpack.c.bf16 %v15002_v7, %v15003_v2  ;;  %v16188_v55 = vand.u32 4294901760, %v9510_v35 }
  0x74   :  { %v9950_v3 = vpack.c.bf16 %v16179_v28, %v16178_v0  ;;  %v16182_v0 = vand.u32 4294901760, %v9502_v30  ;;  %v9980_v7 = vsub.f32 %v9508_v34, %v16186_v57  ;;  %v16194_v34 = vand.u32 4294901760, %v9526_v43 }
  0x75   :  { %16176 = vst [vmem:[#allocation69_spill] sm:$0xff] %v9937_v36  ;;  %7908 = vmatprep.subr.bf16.mxu0 %v9937_v36  ;;  %16181 = vst [vmem:[#allocation72_spill] sm:$0xff] %v9962_v18  ;;  %v9975_v36 = vsub.f32 %v9504_v31, %v16184_v50  ;;  %v9985_v9 = vsub.f32 %v9510_v35, %v16188_v55  ;;  %v16192_v31 = vand.u32 4294901760, %v9516_v39  ;;  %v16196_v35 = vand.u32 4294901760, %v9528_v44 }
  0x76   :  { %16180 = vst [vmem:[#allocation71_spill] sm:$0xff] %v9950_v3  ;;  %v9970_v45 = vsub.f32 %v9502_v30, %v16182_v0  ;;  %16187 = vst [vmem:[#allocation75_spill] sm:$0xff] %v9980_v7  ;;  %7910 = vmatpush1.bf16.msra.mxu0 %v9950_v3  ;;  %v16190_v30 = vand.u32 4294901760, %v9514_v38  ;;  %v10001_v57 = vsub.f32 %v9526_v43, %v16194_v34  ;;  %7332 = vmatprep.subr.bf16.mxu1 %v9962_v18 }
  0x77   :  { %16185 = vst [vmem:[#allocation74_spill] sm:$0xff] %v9975_v36  ;;  %16189 = vst [vmem:[#allocation76_spill] sm:$0xff] %v9985_v9  ;;  %v9996_v50 = vsub.f32 %v9516_v39, %v16192_v31  ;;  %v10006_v55 = vsub.f32 %v9528_v44, %v16196_v35  ;;  %v16200_v39 = vand.u32 4294901760, %v9540_v49  ;;  %v16202_v43 = vand.u32 4294901760, %v9551_v53 }
  0x78   :  { %16183 = vst [vmem:[#allocation73_spill] sm:$0xff] %v9970_v45  ;;  %v9991_v0 = vsub.f32 %v9514_v38, %v16190_v30  ;;  %16195 = vst [vmem:[#allocation79_spill] sm:$0xff] %v10001_v57  ;;  %v16198_v38 = vand.u32 4294901760, %v9538_v48  ;;  %v16204_v44 = vand.u32 4294901760, %v9553_v54  ;;  %v16206_v28 = vand.u32 4294901760, %v9564_v58 }
  0x79   :  { %16193 = vst [vmem:[#allocation78_spill] sm:$0xff] %v9996_v50  ;;  %16197 = vst [vmem:[#allocation80_spill] sm:$0xff] %v10006_v55  ;;  %v10017_v31 = vsub.f32 %v9540_v49, %v16200_v39  ;;  %v10022_v34 = vsub.f32 %v9551_v53, %v16202_v43  ;;  %v16210_v39 = vand.u32 4294901760, %v9577_v63  ;;  %v16212_v43 = vand.u32 4294901760, %v9579_v1 }
  0x7a   :  { %16191 = vst [vmem:[#allocation77_spill] sm:$0xff] %v9991_v0  ;;  %v10012_v30 = vsub.f32 %v9538_v48, %v16198_v38  ;;  %v10027_v35 = vsub.f32 %v9553_v54, %v16204_v44  ;;  %v10032_v48 = vsub.f32 %v9564_v58, %v16206_v28  ;;  %v16208_v38 = vand.u32 4294901760, %v9566_v59 }
  0x7b   :  { %16201 = vst [vmem:[#allocation82_spill] sm:$0xff] %v10017_v31  ;;  %16203 = vst [vmem:[#allocation83_spill] sm:$0xff] %v10022_v34  ;;  %v10042_v53 = vsub.f32 %v9577_v63, %v16210_v39  ;;  %v10047_v54 = vsub.f32 %v9579_v1, %v16212_v43  ;;  %v16214_v44 = vand.u32 4294901760, %v9590_v5  ;;  %v16216_v28 = vand.u32 4294901760, %v9592_v6 }
  0x7c   :  { %16199 = vst [vmem:[#allocation81_spill] sm:$0xff] %v10012_v30  ;;  %16205 = vst [vmem:[#allocation84_spill] sm:$0xff] %v10027_v35  ;;  %v10037_v49 = vsub.f32 %v9566_v59, %v16208_v38  ;;  %v16218_v38 = vand.u32 4294901760, %v9603_v11  ;;  %v16220_v39 = vand.u32 4294901760, %v9605_v12  ;;  %v16222_v43 = vand.u32 4294901760, %v9616_v16 }
  0x7d   :  { %16207 = vst [vmem:[#allocation85_spill] sm:$0xff] %v10032_v48  ;;  %16211 = vst [vmem:[#allocation87_spill] sm:$0xff] %v10042_v53  ;;  %v10052_v58 = vsub.f32 %v9590_v5, %v16214_v44  ;;  %v10057_v59 = vsub.f32 %v9592_v6, %v16216_v28  ;;  %v16224_v44 = vand.u32 4294901760, %v9618_v17  ;;  %v16226_v28 = vand.u32 4294901760, %v9629_v21 }
  0x7e   :  { %16209 = vst [vmem:[#allocation86_spill] sm:$0xff] %v10037_v49  ;;  %16213 = vst [vmem:[#allocation88_spill] sm:$0xff] %v10047_v54  ;;  %v10062_v63 = vsub.f32 %v9603_v11, %v16218_v38  ;;  %v10067_v1 = vsub.f32 %v9605_v12, %v16220_v39  ;;  %v10072_v5 = vsub.f32 %v9616_v16, %v16222_v43  ;;  %v16228_v38 = vand.u32 4294901760, %v9631_v22 }
  0x7f   :  { %16215 = vst [vmem:[#allocation89_spill] sm:$0xff] %v10052_v58  ;;  %16217 = vst [vmem:[#allocation90_spill] sm:$0xff] %v10057_v59  ;;  %v10077_v6 = vsub.f32 %v9618_v17, %v16224_v44  ;;  %v10082_v11 = vsub.f32 %v9629_v21, %v16226_v28  ;;  %v16230_v39 = vand.u32 4294901760, %v9642_v26  ;;  %v16232_v43 = vand.u32 4294901760, %v9644_v27 }
  0x80   :  { %16219 = vst [vmem:[#allocation91_spill] sm:$0xff] %v10062_v63  ;;  %16221 = vst [vmem:[#allocation92_spill] sm:$0xff] %v10067_v1  ;;  %v10087_v12 = vsub.f32 %v9631_v22, %v16228_v38  ;;  %v16234_v44 = vand.u32 4294901760, %v9655_v15  ;;  %v16236_v28 = vand.u32 4294901760, %v9657_v14  ;;  %v16238_v38 = vand.u32 4294901760, %v9668_v19 }
  0x81   :  { %16223 = vst [vmem:[#allocation93_spill] sm:$0xff] %v10072_v5  ;;  %16225 = vst [vmem:[#allocation94_spill] sm:$0xff] %v10077_v6  ;;  %v10092_v16 = vsub.f32 %v9642_v26, %v16230_v39  ;;  %v10097_v17 = vsub.f32 %v9644_v27, %v16232_v43  ;;  %v16240_v39 = vand.u32 4294901760, %v9670_v4  ;;  %v16242_v43 = vand.u32 4294901760, %v9681_v24 }
  0x82   :  { %16227 = vst [vmem:[#allocation95_spill] sm:$0xff] %v10082_v11  ;;  %16229 = vst [vmem:[#allocation96_spill] sm:$0xff] %v10087_v12  ;;  %v10102_v21 = vsub.f32 %v9655_v15, %v16234_v44  ;;  %v10107_v22 = vsub.f32 %v9657_v14, %v16236_v28  ;;  %v10112_v26 = vsub.f32 %v9668_v19, %v16238_v38  ;;  %v16244_v44 = vand.u32 4294901760, %v9683_v61 }
  0x83   :  { %16231 = vst [vmem:[#allocation97_spill] sm:$0xff] %v10092_v16  ;;  %16233 = vst [vmem:[#allocation98_spill] sm:$0xff] %v10097_v17  ;;  %v10117_v27 = vsub.f32 %v9670_v4, %v16240_v39  ;;  %v10122_v15 = vsub.f32 %v9681_v24, %v16242_v43  ;;  %v16246_v28 = vand.u32 4294901760, %v9694_v29  ;;  %v16248_v38 = vand.u32 4294901760, %v9696_v52 }
  0x84   :  { %16235 = vst [vmem:[#allocation99_spill] sm:$0xff] %v10102_v21  ;;  %16237 = vst [vmem:[#allocation100_spill] sm:$0xff] %v10107_v22  ;;  %v10127_v14 = vsub.f32 %v9683_v61, %v16244_v44  ;;  %v16250_v39 = vand.u32 4294901760, %v9707_v8  ;;  %v16252_v43 = vand.u32 4294901760, %v9709_v46  ;;  %v16254_v44 = vand.u32 4294901760, %v9720_v62 }
  0x85   :  { %16239 = vst [vmem:[#allocation101_spill] sm:$0xff] %v10112_v26  ;;  %16241 = vst [vmem:[#allocation102_spill] sm:$0xff] %v10117_v27  ;;  %v10132_v19 = vsub.f32 %v9694_v29, %v16246_v28  ;;  %v10137_v4 = vsub.f32 %v9696_v52, %v16248_v38  ;;  %v16256_v28 = vand.u32 4294901760, %v9722_v37  ;;  %v16258_v38 = vand.u32 4294901760, %v9733_v56 }
  0x86   :  { %16243 = vst [vmem:[#allocation103_spill] sm:$0xff] %v10122_v15  ;;  %16245 = vst [vmem:[#allocation104_spill] sm:$0xff] %v10127_v14  ;;  %v10142_v24 = vsub.f32 %v9707_v8, %v16250_v39  ;;  %v10147_v61 = vsub.f32 %v9709_v46, %v16252_v43  ;;  %v10152_v29 = vsub.f32 %v9720_v62, %v16254_v44  ;;  %v16260_v39 = vand.u32 4294901760, %v9735_v32 }
  0x87   :  { %16247 = vst [vmem:[#allocation105_spill] sm:$0xff] %v10132_v19  ;;  %16249 = vst [vmem:[#allocation106_spill] sm:$0xff] %v10137_v4  ;;  %v10157_v52 = vsub.f32 %v9722_v37, %v16256_v28  ;;  %v10162_v8 = vsub.f32 %v9733_v56, %v16258_v38  ;;  %v16262_v43 = vand.u32 4294901760, %v9746_v47  ;;  %v16264_v44 = vand.u32 4294901760, %v9748_v33  ;;  %v582_v4 = vld [vmem:[#allocation6 + $0x368] sm:$0xff] }
  0x88   :  { %16251 = vst [vmem:[#allocation107_spill] sm:$0xff] %v10142_v24  ;;  %16253 = vst [vmem:[#allocation108_spill] sm:$0xff] %v10147_v61  ;;  %v10167_v46 = vsub.f32 %v9735_v32, %v16260_v39  ;;  %v16266_v28 = vand.u32 4294901760, %v9759_v41  ;;  %v16268_v38 = vand.u32 4294901760, %v9761_v10  ;;  %v16270_v39 = vand.u32 4294901760, %v9772_v42 }
  0x89   :  { %16255 = vst [vmem:[#allocation109_spill] sm:$0xff] %v10152_v29  ;;  %16257 = vst [vmem:[#allocation110_spill] sm:$0xff] %v10157_v52  ;;  %v10172_v62 = vsub.f32 %v9746_v47, %v16262_v43  ;;  %v10177_v37 = vsub.f32 %v9748_v33, %v16264_v44  ;;  %v16272_v43 = vand.u32 4294901760, %v9774_v13  ;;  %v16274_v44 = vand.u32 4294901760, %v9785_v20  ;;  %v513_v52 = vld [vmem:[#allocation6 + $0x140] sm:$0xff]  ;;  %v515_v29 = vld [vmem:[#allocation6 + $0x150] sm:$0xff] }
  0x8a   :  { %16259 = vst [vmem:[#allocation111_spill] sm:$0xff] %v10162_v8  ;;  %16261 = vst [vmem:[#allocation112_spill] sm:$0xff] %v10167_v46  ;;  %v10182_v56 = vsub.f32 %v9759_v41, %v16266_v28  ;;  %v10187_v32 = vsub.f32 %v9761_v10, %v16268_v38  ;;  %v10192_v47 = vsub.f32 %v9772_v42, %v16270_v39  ;;  %v16276_v28 = vld [vmem:[#allocation37_spill] sm:$0xff]  ;;  %v16279_v38 = vld [vmem:[#allocation39_spill] sm:$0xff] }
  0x8b   :  { %16263 = vst [vmem:[#allocation113_spill] sm:$0xff] %v10172_v62  ;;  %16265 = vst [vmem:[#allocation114_spill] sm:$0xff] %v10177_v37  ;;  %v10197_v33 = vsub.f32 %v9774_v13, %v16272_v43  ;;  %v10202_v41 = vsub.f32 %v9785_v20, %v16274_v44  ;;  %v16277_v2 = vand.u32 4294901760, %v16276_v28  ;;  %v16280_v18 = vand.u32 4294901760, %v16279_v38  ;;  %v16282_v39 = vld [vmem:[#allocation40_spill] sm:$0xff]  ;;  %v16285_v43 = vld [vmem:[#allocation42_spill] sm:$0xff] }
  0x8c   :  { %16267 = vst [vmem:[#allocation115_spill] sm:$0xff] %v10182_v56  ;;  %16269 = vst [vmem:[#allocation116_spill] sm:$0xff] %v10187_v32  ;;  %v16283_v3 = vand.u32 4294901760, %v16282_v39  ;;  %v16288_v44 = vld [vmem:[#allocation43_spill] sm:$0xff] }
  0x8d   :  { %16271 = vst [vmem:[#allocation117_spill] sm:$0xff] %v10192_v47  ;;  %16273 = vst [vmem:[#allocation118_spill] sm:$0xff] %v10197_v33  ;;  %v10207_v10 = vsub.f32 %v16276_v28, %v16277_v2  ;;  %v10212_v42 = vsub.f32 %v16279_v38, %v16280_v18  ;;  %v16286_v33 = vand.u32 4294901760, %v16285_v43  ;;  %v16291_v28 = vld [vmem:[#allocation45_spill] sm:$0xff]  ;;  %v16294_v38 = vld [vmem:[#allocation46_spill] sm:$0xff] }
  0x8e   :  { %16275 = vst [vmem:[#allocation119_spill] sm:$0xff] %v10202_v41  ;;  %v10217_v13 = vsub.f32 %v16282_v39, %v16283_v3  ;;  %v16289_v41 = vand.u32 4294901760, %v16288_v44  ;;  %v16297_v39 = vld [vmem:[#allocation48_spill] sm:$0xff]  ;;  %v16327_v47 = vld [vmem:[#allocation63_spill] sm:$0xff] }
  0x8f   :  { %16278 = vst [vmem:[#allocation37_spill] sm:$0xff] %v10207_v10  ;;  %16281 = vst [vmem:[#allocation39_spill] sm:$0xff] %v10212_v42  ;;  %v10222_v20 = vsub.f32 %v16285_v43, %v16286_v33  ;;  %v16292_v10 = vand.u32 4294901760, %v16291_v28  ;;  %v16295_v42 = vand.u32 4294901760, %v16294_v38  ;;  %v16300_v43 = vld [vmem:[#allocation49_spill] sm:$0xff]  ;;  %v509_v32 = vld [vmem:[#allocation6 + $0x120] sm:$0xff] }
  0x90   :  { %16284 = vst [vmem:[#allocation40_spill] sm:$0xff] %v10217_v13  ;;  %v10227_v2 = vsub.f32 %v16288_v44, %v16289_v41  ;;  %v16298_v13 = vand.u32 4294901760, %v16297_v39  ;;  %v16303_v44 = vld [vmem:[#allocation51_spill] sm:$0xff] }
  0x91   :  { %16287 = vst [vmem:[#allocation42_spill] sm:$0xff] %v10222_v20  ;;  %v10232_v18 = vsub.f32 %v16291_v28, %v16292_v10  ;;  %v10237_v3 = vsub.f32 %v16294_v38, %v16295_v42  ;;  %v16301_v20 = vand.u32 4294901760, %v16300_v43  ;;  %v16306_v28 = vld [vmem:[#allocation52_spill] sm:$0xff]  ;;  %v16309_v38 = vld [vmem:[#allocation54_spill] sm:$0xff] }
  0x92   :  { %16290 = vst [vmem:[#allocation43_spill] sm:$0xff] %v10227_v2  ;;  %v10242_v33 = vsub.f32 %v16297_v39, %v16298_v13  ;;  %v16304_v2 = vand.u32 4294901760, %v16303_v44  ;;  %v16312_v39 = vld [vmem:[#allocation55_spill] sm:$0xff] }
  0x93   :  { %16293 = vst [vmem:[#allocation45_spill] sm:$0xff] %v10232_v18  ;;  %16296 = vst [vmem:[#allocation46_spill] sm:$0xff] %v10237_v3  ;;  %v10247_v41 = vsub.f32 %v16300_v43, %v16301_v20  ;;  %v16307_v18 = vand.u32 4294901760, %v16306_v28  ;;  %v16310_v3 = vand.u32 4294901760, %v16309_v38  ;;  %v16315_v43 = vld [vmem:[#allocation57_spill] sm:$0xff]  ;;  %v578_v56 = vld [vmem:[#allocation6 + $0x348] sm:$0xff] }
  0x94   :  { %16299 = vst [vmem:[#allocation48_spill] sm:$0xff] %v10242_v33  ;;  %v10252_v10 = vsub.f32 %v16303_v44, %v16304_v2  ;;  %v16313_v33 = vand.u32 4294901760, %v16312_v39  ;;  %v16318_v44 = vld [vmem:[#allocation58_spill] sm:$0xff] }
  0x95   :  { %16302 = vst [vmem:[#allocation49_spill] sm:$0xff] %v10247_v41  ;;  %v10257_v42 = vsub.f32 %v16306_v28, %v16307_v18  ;;  %v10262_v13 = vsub.f32 %v16309_v38, %v16310_v3  ;;  %v16316_v41 = vand.u32 4294901760, %v16315_v43  ;;  %v16321_v28 = vld [vmem:[#allocation60_spill] sm:$0xff]  ;;  %v16324_v38 = vld [vmem:[#allocation61_spill] sm:$0xff] }
  0x96   :  { %16305 = vst [vmem:[#allocation51_spill] sm:$0xff] %v10252_v10  ;;  %v10267_v20 = vsub.f32 %v16312_v39, %v16313_v33  ;;  %v16319_v10 = vand.u32 4294901760, %v16318_v44  ;;  %v573_v39 = vld [vmem:[#allocation6 + $0x320] sm:$0xff] }
  0x97   :  { %16308 = vst [vmem:[#allocation52_spill] sm:$0xff] %v10257_v42  ;;  %16311 = vst [vmem:[#allocation54_spill] sm:$0xff] %v10262_v13  ;;  %v10272_v2 = vsub.f32 %v16315_v43, %v16316_v41  ;;  %v16322_v42 = vand.u32 4294901760, %v16321_v28  ;;  %v16325_v13 = vand.u32 4294901760, %v16324_v38  ;;  %v16328_v41 = vand.u32 4294901760, %v16327_v47 }
  0x98   :  { %16314 = vst [vmem:[#allocation55_spill] sm:$0xff] %v10267_v20  ;;  %v10277_v18 = vsub.f32 %v16318_v44, %v16319_v10  ;;  %v575_v20 = vld [vmem:[#allocation6 + $0x330] sm:$0xff] }
  0x99   :  { %16317 = vst [vmem:[#allocation57_spill] sm:$0xff] %v10272_v2  ;;  %v10282_v3 = vsub.f32 %v16321_v28, %v16322_v42  ;;  %v10287_v33 = vsub.f32 %v16324_v38, %v16325_v13  ;;  %v10292_v43 = vsub.f32 %v16327_v47, %v16328_v41  ;;  %v16330_v2 = vld [vmem:[#allocation64_spill] sm:$0xff]  ;;  %v16333_v42 = vand.u32 4294901760, %v9915_v60 }
  0x9a   :  { %16320 = vst [vmem:[#allocation58_spill] sm:$0xff] %v10277_v18  ;;  %v16331_v10 = vand.u32 4294901760, %v16330_v2  ;;  %v512_v18 = vld [vmem:[#allocation6 + $0x138] sm:$0xff]  ;;  %v16338_v47 = vand.u32 4294901760, %v9928_v40 }
  0x9b   :  { %16323 = vst [vmem:[#allocation60_spill] sm:$0xff] %v10282_v3  ;;  %16326 = vst [vmem:[#allocation61_spill] sm:$0xff] %v10287_v33  ;;  %v10302_v28 = vsub.f32 %v9915_v60, %v16333_v42  ;;  %v16335_v3 = vld [vmem:[#allocation66_spill] sm:$0xff]  ;;  %v510_v33 = vld [vmem:[#allocation6 + $0x128] sm:$0xff] }
  0x9c   :  { %16329 = vst [vmem:[#allocation63_spill] sm:$0xff] %v10292_v43  ;;  %v10297_v44 = vsub.f32 %v16330_v2, %v16331_v10  ;;  %v16336_v13 = vand.u32 4294901760, %v16335_v3  ;;  %v10312_v41 = vsub.f32 %v9928_v40, %v16338_v47  ;;  %v16340_v2 = vld [vmem:[#allocation68_spill] sm:$0xff]  ;;  %v16343_v60 = vld [vmem:[#allocation70_spill] sm:$0xff] }
  0x9d   :  { %16334 = vst [vmem:[#allocation120_spill] sm:$0xff] %v10302_v28  ;;  %v16341_v10 = vand.u32 4294901760, %v16340_v2  ;;  %v16344_v42 = vand.u32 4294901760, %v16343_v60  ;;  %v16345_v28 = vand.u32 4294901760, %v9943_v23  ;;  %v580_v40 = vld [vmem:[#allocation6 + $0x358] sm:$0xff] }
  0x9e   :  { %16332 = vst [vmem:[#allocation64_spill] sm:$0xff] %v10297_v44  ;;  %v10307_v38 = vsub.f32 %v16335_v3, %v16336_v13  ;;  %16339 = vst [vmem:[#allocation121_spill] sm:$0xff] %v10312_v41  ;;  %v2143_v46 = vand.u32 4294901760, %v580_v40  ;;  %v577_v41 = vld [vmem:[#allocation6 + $0x340] sm:$0xff] }
  0x9f   :  { %v10317_v44 = vsub.f32 %v16340_v2, %v16341_v10  ;;  %v10323_v43 = vpack.c.bf16 %v16345_v28, %v16344_v42  ;;  %v16347_v3 = vmov %v16344_v42  ;;  %v16349_v47 = vmov %v16345_v28 }
  0xa0   :  { %16337 = vst [vmem:[#allocation66_spill] sm:$0xff] %v10307_v38  ;;  %v10328_v13 = vsub.f32 %v16343_v60, %v16347_v3  ;;  %v511_v38 = vld [vmem:[#allocation6 + $0x130] sm:$0xff]  ;;  %v10333_v37 = vsub.f32 %v9943_v23, %v16349_v47  ;;  %v16351_v2 = vand.u32 4294901760, %v9953_v51  ;;  %v16352_v10 = vand.u32 4294901760, %v9955_v25 }
  0xa1   :  { %16342 = vst [vmem:[#allocation68_spill] sm:$0xff] %v10317_v44  ;;  %16346 = vst [vmem:[#allocation70_spill] sm:$0xff] %v10323_v43  ;;  %7334 = vmatpush1.bf16.msra.mxu1 %v10323_v43  ;;  %v2133_v23 = vand.u32 4294901760, %v573_v39  ;;  %v2137_v47 = vand.u32 4294901760, %v575_v20  ;;  %v2139_v44 = vand.u32 4294901760, %v578_v56  ;;  %v514_v43 = vld [vmem:[#allocation6 + $0x148] sm:$0xff] }
  0xa2   :  { %16348 = vst [vmem:[#allocation122_spill] sm:$0xff] %v10328_v13  ;;  %16350 = vst [vmem:[#allocation123_spill] sm:$0xff] %v10333_v37  ;;  %v10339_v62 = vpack.c.bf16 %v16352_v10, %v16351_v2  ;;  %v16354_v28 = vmov %v16351_v2  ;;  %v16356_v60 = vmov %v16352_v10  ;;  %v847_v37 = vand.u32 4294901760, %v510_v33 }
  0xa3   :  { %v10344_v42 = vsub.f32 %v9953_v51, %v16354_v28  ;;  %v10349_v3 = vsub.f32 %v9955_v25, %v16356_v60  ;;  %v851_v13 = vand.u32 4294901760, %v512_v18  ;;  %v849_v2 = vand.u32 4294901760, %v509_v32  ;;  %v579_v60 = vld [vmem:[#allocation6 + $0x350] sm:$0xff] }
  0xa4   :  { %16353 = vst [vmem:[#allocation124_spill] sm:$0xff] %v10339_v62  ;;  %7912 = vmatprep.subr.bf16.mxu0 %v10339_v62  ;;  %v853_v10 = vand.u32 4294901760, %v511_v38  ;;  %v10353_v51 = vpack.c.bf16 %v2137_v47, %v2133_v23  ;;  %v10355_v28 = vsub.f32 %v573_v39, %v2133_v23  ;;  %v10361_v8 = vsub.f32 %v510_v33, %v847_v37 }
  0xa5   :  { %16355 = vst [vmem:[#allocation125_spill] sm:$0xff] %v10344_v42  ;;  %16357 = vst [vmem:[#allocation126_spill] sm:$0xff] %v10349_v3  ;;  %v10357_v42 = vsub.f32 %v575_v20, %v2137_v47  ;;  %v10359_v25 = vpack.c.bf16 %v851_v13, %v847_v37  ;;  %v516_v3 = vld [vmem:[#allocation6 + $0x158] sm:$0xff]  ;;  %v10363_v61 = vsub.f32 %v512_v18, %v851_v13  ;;  %v2141_v37 = vand.u32 4294901760, %v577_v41 }
  0xa6   :  { %16358 = vst [vmem:[#allocation127_spill] sm:$0xff] %v10353_v51  ;;  %16359 = vst [vmem:[#allocation128_spill] sm:$0xff] %v10355_v28  ;;  %v10365_v62 = vpack.c.bf16 %v853_v10, %v849_v2  ;;  %v10367_v24 = vsub.f32 %v509_v32, %v849_v2  ;;  %7914 = vmatpush1.bf16.msra.mxu0 %v10353_v51  ;;  %v10371_v20 = vsub.f32 %v511_v38, %v853_v10  ;;  %v584_v47 = vld [vmem:[#allocation6 + $0x378] sm:$0xff]  ;;  %v581_v51 = vld [vmem:[#allocation6 + $0x360] sm:$0xff] }
  0xa7   :  { %16360 = vst [vmem:[#allocation129_spill] sm:$0xff] %v10357_v42  ;;  %16361 = vst [vmem:[#allocation130_spill] sm:$0xff] %v10359_v25  ;;  %7336 = vmatprep.subr.bf16.mxu1 %v10359_v25  ;;  %v10373_v39 = vpack.c.bf16 %v2143_v46, %v2139_v44  ;;  %v10375_v23 = vsub.f32 %v578_v56, %v2139_v44  ;;  %v10378_v18 = vsub.f32 %v580_v40, %v2143_v46  ;;  %v583_v42 = vld [vmem:[#allocation6 + $0x370] sm:$0xff]  ;;  %v518_v56 = vld [vmem:[#allocation6 + $0x168] sm:$0xff] }
  0xa8   :  { %16362 = vst [vmem:[#allocation131_spill] sm:$0xff] %v10361_v8  ;;  %16363 = vst [vmem:[#allocation132_spill] sm:$0xff] %v10363_v61  ;;  %7338 = vmatpush1.bf16.msra.mxu1 %v10365_v62  ;;  %v2145_v32 = vand.u32 4294901760, %v579_v60  ;;  %v855_v33 = vand.u32 4294901760, %v514_v43  ;;  %v859_v13 = vand.u32 4294901760, %v516_v3  ;;  %v10381_v2 = vsub.f32 %v577_v41, %v2141_v37  ;;  %v519_v28 = vld [vmem:[#allocation6 + $0x170] sm:$0xff] }
  0xa9   :  { %16364 = vst [vmem:[#allocation133_spill] sm:$0xff] %v10365_v62  ;;  %16365 = vst [vmem:[#allocation134_spill] sm:$0xff] %v10367_v24  ;;  %7916 = vmatprep.subr.bf16.mxu0 %v10373_v39  ;;  %v857_v25 = vand.u32 4294901760, %v513_v52  ;;  %v861_v38 = vand.u32 4294901760, %v515_v29  ;;  %v2147_v10 = vand.u32 4294901760, %v582_v4  ;;  %v520_v62 = vld [vmem:[#allocation6 + $0x178] sm:$0xff] }
  0xaa   :  { %16366 = vst [vmem:[#allocation135_spill] sm:$0xff] %v10371_v20  ;;  %16367 = vst [vmem:[#allocation136_spill] sm:$0xff] %v10373_v39  ;;  %v10383_v44 = vpack.c.bf16 %v2145_v32, %v2141_v37  ;;  %v10387_v46 = vpack.c.bf16 %v859_v13, %v855_v33  ;;  %v10389_v40 = vsub.f32 %v514_v43, %v855_v33  ;;  %v2149_v43 = vand.u32 4294901760, %v581_v51  ;;  %v524_v24 = vld [vmem:[#allocation6 + $0x198] sm:$0xff]  ;;  %v523_v61 = vld [vmem:[#allocation6 + $0x190] sm:$0xff] }
  0xab   :  { %16368 = vst [vmem:[#allocation137_spill] sm:$0xff] %v10375_v23  ;;  %16369 = vst [vmem:[#allocation138_spill] sm:$0xff] %v10378_v18  ;;  %v10385_v23 = vsub.f32 %v579_v60, %v2145_v32  ;;  %v517_v18 = vld [vmem:[#allocation6 + $0x160] sm:$0xff]  ;;  %v10391_v39 = vsub.f32 %v516_v3, %v859_v13  ;;  %v10393_v41 = vpack.c.bf16 %v861_v38, %v857_v25  ;;  %v2151_v60 = vand.u32 4294901760, %v584_v47 }
  0xac   :  { %16370 = vst [vmem:[#allocation139_spill] sm:$0xff] %v10381_v2  ;;  %16371 = vst [vmem:[#allocation140_spill] sm:$0xff] %v10383_v44  ;;  %v10395_v2 = vsub.f32 %v513_v52, %v857_v25  ;;  %v10397_v20 = vsub.f32 %v515_v29, %v861_v38  ;;  %7918 = vmatpush1.bf16.msra.mxu0 %v10383_v44  ;;  %7340 = vmatprep.subr.bf16.mxu1 %v10387_v46  ;;  %v2153_v32 = vand.u32 4294901760, %v583_v42  ;;  %v588_v52 = vld [vmem:[#allocation6 + $0x398] sm:$0xff]  ;;  %v587_v44 = vld [vmem:[#allocation6 + $0x390] sm:$0xff] }
  0xad   :  { %16372 = vst [vmem:[#allocation141_spill] sm:$0xff] %v10385_v23  ;;  %16373 = vst [vmem:[#allocation142_spill] sm:$0xff] %v10387_v46  ;;  %v10401_v37 = vsub.f32 %v582_v4, %v2147_v10  ;;  %7342 = vmatpush1.bf16.msra.mxu1 %v10393_v41  ;;  %v863_v33 = vand.u32 4294901760, %v518_v56  ;;  %v867_v3 = vand.u32 4294901760, %v520_v62  ;;  %v865_v13 = vand.u32 4294901760, %v517_v18  ;;  %v585_v4 = vld [vmem:[#allocation6 + $0x380] sm:$0xff] }
  0xae   :  { %16374 = vst [vmem:[#allocation143_spill] sm:$0xff] %v10389_v40  ;;  %16375 = vst [vmem:[#allocation144_spill] sm:$0xff] %v10391_v39  ;;  %v869_v23 = vand.u32 4294901760, %v519_v28  ;;  %v586_v39 = vld [vmem:[#allocation6 + $0x388] sm:$0xff]  ;;  %v10404_v25 = vpack.c.bf16 %v2151_v60, %v2147_v10  ;;  %v10406_v29 = vsub.f32 %v584_v47, %v2151_v60  ;;  %v10408_v38 = vpack.c.bf16 %v2153_v32, %v2149_v43  ;;  %v521_v10 = vld [vmem:[#allocation6 + $0x180] sm:$0xff] }
  0xaf   :  { %16376 = vst [vmem:[#allocation145_spill] sm:$0xff] %v10393_v41  ;;  %16377 = vst [vmem:[#allocation146_spill] sm:$0xff] %v10395_v2  ;;  %v10410_v46 = vsub.f32 %v581_v51, %v2149_v43  ;;  %v10414_v41 = vpack.c.bf16 %v867_v3, %v863_v33  ;;  %v10416_v2 = vsub.f32 %v518_v56, %v863_v33  ;;  %v2155_v43 = vand.u32 4294901760, %v586_v39 }
  0xb0   :  { %16378 = vst [vmem:[#allocation147_spill] sm:$0xff] %v10397_v20  ;;  %16379 = vst [vmem:[#allocation148_spill] sm:$0xff] %v10401_v37  ;;  %v522_v37 = vld [vmem:[#allocation6 + $0x188] sm:$0xff]  ;;  %v10412_v20 = vsub.f32 %v583_v42, %v2153_v32  ;;  %v10418_v40 = vsub.f32 %v520_v62, %v867_v3  ;;  %7920 = vmatprep.subr.bf16.mxu0 %v10404_v25  ;;  %v10421_v47 = vpack.c.bf16 %v869_v23, %v865_v13 }
  0xb1   :  { %16380 = vst [vmem:[#allocation149_spill] sm:$0xff] %v10404_v25  ;;  %16381 = vst [vmem:[#allocation150_spill] sm:$0xff] %v10406_v29  ;;  %v10423_v51 = vsub.f32 %v517_v18, %v865_v13  ;;  %v10425_v60 = vsub.f32 %v519_v28, %v869_v23  ;;  %7922 = vmatpush1.bf16.msra.mxu0 %v10408_v38  ;;  %7344 = vmatprep.subr.bf16.mxu1 %v10414_v41  ;;  %v2159_v42 = vand.u32 4294901760, %v588_v52  ;;  %v590_v18 = vld [vmem:[#allocation6 + $0x3a8] sm:$0xff]  ;;  %v592_v13 = vld [vmem:[#allocation6 + $0x3b8] sm:$0xff] }
  0xb2   :  { %16382 = vst [vmem:[#allocation151_spill] sm:$0xff] %v10408_v38  ;;  %16383 = vst [vmem:[#allocation152_spill] sm:$0xff] %v10410_v46  ;;  %v2157_v56 = vand.u32 4294901760, %v585_v4  ;;  %v2161_v62 = vand.u32 4294901760, %v587_v44  ;;  %v871_v32 = vand.u32 4294901760, %v522_v37  ;;  %7346 = vmatpush1.bf16.msra.mxu1 %v10421_v47  ;;  %v10430_v33 = vsub.f32 %v586_v39, %v2155_v43  ;;  %v589_v46 = vld [vmem:[#allocation6 + $0x3a0] sm:$0xff] }
  0xb3   :  { %16384 = vst [vmem:[#allocation153_spill] sm:$0xff] %v10412_v20  ;;  %16385 = vst [vmem:[#allocation154_spill] sm:$0xff] %v10414_v41  ;;  %v875_v3 = vand.u32 4294901760, %v524_v24  ;;  %v873_v25 = vand.u32 4294901760, %v521_v10  ;;  %v877_v20 = vand.u32 4294901760, %v523_v61  ;;  %v10432_v28 = vpack.c.bf16 %v2159_v42, %v2155_v43  ;;  %v591_v29 = vld [vmem:[#allocation6 + $0x3b0] sm:$0xff] }
  0xb4   :  { %16386 = vst [vmem:[#allocation155_spill] sm:$0xff] %v10416_v2  ;;  %16387 = vst [vmem:[#allocation156_spill] sm:$0xff] %v10418_v40  ;;  %v10434_v23 = vsub.f32 %v588_v52, %v2159_v42  ;;  %v10436_v38 = vpack.c.bf16 %v2161_v62, %v2157_v56  ;;  %v10438_v41 = vsub.f32 %v585_v4, %v2157_v56  ;;  %v528_v40 = vld [vmem:[#allocation6 + $0x1b8] sm:$0xff]  ;;  %v525_v43 = vld [vmem:[#allocation6 + $0x1a0] sm:$0xff]  ;;  %v2163_v56 = vand.u32 4294901760, %v590_v18 }
  0xb5   :  { %16388 = vst [vmem:[#allocation157_spill] sm:$0xff] %v10421_v47  ;;  %16389 = vst [vmem:[#allocation158_spill] sm:$0xff] %v10423_v51  ;;  %v10440_v51 = vsub.f32 %v587_v44, %v2161_v62  ;;  %v10442_v39 = vpack.c.bf16 %v875_v3, %v871_v32  ;;  %v10444_v47 = vsub.f32 %v522_v37, %v871_v32  ;;  %v527_v2 = vld [vmem:[#allocation6 + $0x1b0] sm:$0xff]  ;;  %7924 = vmatprep.subr.bf16.mxu0 %v10432_v28 }
  0xb6   :  { %16390 = vst [vmem:[#allocation159_spill] sm:$0xff] %v10425_v60  ;;  %16391 = vst [vmem:[#allocation160_spill] sm:$0xff] %v10430_v33  ;;  %v526_v60 = vld [vmem:[#allocation6 + $0x1a8] sm:$0xff]  ;;  %v10446_v33 = vsub.f32 %v524_v24, %v875_v3  ;;  %v10449_v52 = vpack.c.bf16 %v877_v20, %v873_v25  ;;  %v10451_v4 = vsub.f32 %v521_v10, %v873_v25  ;;  %7926 = vmatpush1.bf16.msra.mxu0 %v10436_v38  ;;  %v596_v10 = vld [vmem:[#allocation6 + $0x3d8] sm:$0xff] }
  0xb7   :  { %16392 = vst [vmem:[#allocation161_spill] sm:$0xff] %v10432_v28  ;;  %16393 = vst [vmem:[#allocation162_spill] sm:$0xff] %v10434_v23  ;;  %v10453_v42 = vsub.f32 %v523_v61, %v877_v20  ;;  %7348 = vmatprep.subr.bf16.mxu1 %v10442_v39  ;;  %v2167_v44 = vand.u32 4294901760, %v592_v13  ;;  %v2165_v37 = vand.u32 4294901760, %v589_v46  ;;  %v2169_v24 = vand.u32 4294901760, %v591_v29  ;;  %v594_v25 = vld [vmem:[#allocation6 + $0x3c8] sm:$0xff] }
  0xb8   :  { %16394 = vst [vmem:[#allocation163_spill] sm:$0xff] %v10436_v38  ;;  %16395 = vst [vmem:[#allocation164_spill] sm:$0xff] %v10438_v41  ;;  %v879_v62 = vand.u32 4294901760, %v526_v60  ;;  %7350 = vmatpush1.bf16.msra.mxu1 %v10449_v52  ;;  %v10458_v32 = vsub.f32 %v590_v18, %v2163_v56  ;;  %v883_v3 = vand.u32 4294901760, %v528_v40  ;;  %v881_v28 = vand.u32 4294901760, %v525_v43  ;;  %v593_v41 = vld [vmem:[#allocation6 + $0x3c0] sm:$0xff] }
  0xb9   :  { %16396 = vst [vmem:[#allocation165_spill] sm:$0xff] %v10440_v51  ;;  %16397 = vst [vmem:[#allocation166_spill] sm:$0xff] %v10442_v39  ;;  %v885_v51 = vand.u32 4294901760, %v527_v2  ;;  %v10460_v61 = vpack.c.bf16 %v2167_v44, %v2163_v56  ;;  %v10462_v20 = vsub.f32 %v592_v13, %v2167_v44  ;;  %v10464_v38 = vpack.c.bf16 %v2169_v24, %v2165_v37  ;;  %v595_v23 = vld [vmem:[#allocation6 + $0x3d0] sm:$0xff]  ;;  %v529_v56 = vld [vmem:[#allocation6 + $0x1c0] sm:$0xff] }
  0xba   :  { %16398 = vst [vmem:[#allocation167_spill] sm:$0xff] %v10444_v47  ;;  %16399 = vst [vmem:[#allocation168_spill] sm:$0xff] %v10446_v33  ;;  %v10466_v39 = vsub.f32 %v589_v46, %v2165_v37  ;;  %v10470_v18 = vpack.c.bf16 %v883_v3, %v879_v62  ;;  %v532_v33 = vld [vmem:[#allocation6 + $0x1d8] sm:$0xff]  ;;  %v531_v47 = vld [vmem:[#allocation6 + $0x1d0] sm:$0xff]  ;;  %v10479_v46 = vsub.f32 %v525_v43, %v881_v28  ;;  %v2171_v37 = vand.u32 4294901760, %v594_v25 }
  0xbb   :  { %16400 = vst [vmem:[#allocation169_spill] sm:$0xff] %v10449_v52  ;;  %16401 = vst [vmem:[#allocation170_spill] sm:$0xff] %v10451_v4  ;;  %v10468_v4 = vsub.f32 %v591_v29, %v2169_v24  ;;  %v10472_v52 = vsub.f32 %v526_v60, %v879_v62  ;;  %7928 = vmatprep.subr.bf16.mxu0 %v10460_v61  ;;  %v10477_v13 = vpack.c.bf16 %v885_v51, %v881_v28  ;;  %v598_v28 = vld [vmem:[#allocation6 + $0x3e8] sm:$0xff]  ;;  %v600_v43 = vld [vmem:[#allocation6 + $0x3f8] sm:$0xff] }
  0xbc   :  { %16402 = vst [vmem:[#allocation171_spill] sm:$0xff] %v10453_v42  ;;  %16403 = vst [vmem:[#allocation172_spill] sm:$0xff] %v10458_v32  ;;  %v530_v42 = vld [vmem:[#allocation6 + $0x1c8] sm:$0xff]  ;;  %v10474_v32 = vsub.f32 %v528_v40, %v883_v3  ;;  %v10481_v44 = vsub.f32 %v527_v2, %v885_v51  ;;  %7930 = vmatpush1.bf16.msra.mxu0 %v10464_v38  ;;  %7352 = vmatprep.subr.bf16.mxu1 %v10470_v18  ;;  %v2175_v29 = vand.u32 4294901760, %v596_v10 }
  0xbd   :  { %16404 = vst [vmem:[#allocation173_spill] sm:$0xff] %v10460_v61  ;;  %16405 = vst [vmem:[#allocation174_spill] sm:$0xff] %v10462_v20  ;;  %v2173_v60 = vand.u32 4294901760, %v593_v41  ;;  %v2177_v40 = vand.u32 4294901760, %v595_v23  ;;  %v887_v24 = vand.u32 4294901760, %v530_v42  ;;  %7354 = vmatpush1.bf16.msra.mxu1 %v10477_v13  ;;  %v10486_v62 = vsub.f32 %v594_v25, %v2171_v37  ;;  %v599_v20 = vld [vmem:[#allocation6 + $0x3f0] sm:$0xff] }
  0xbe   :  { %16406 = vst [vmem:[#allocation175_spill] sm:$0xff] %v10464_v38  ;;  %16407 = vst [vmem:[#allocation176_spill] sm:$0xff] %v10466_v39  ;;  %v891_v3 = vand.u32 4294901760, %v532_v33  ;;  %v889_v61 = vand.u32 4294901760, %v529_v56  ;;  %v10488_v2 = vpack.c.bf16 %v2175_v29, %v2171_v37  ;;  %v10490_v51 = vsub.f32 %v596_v10, %v2175_v29  ;;  %v597_v39 = vld [vmem:[#allocation6 + $0x3e0] sm:$0xff] }
  0xbf   :  { %16408 = vst [vmem:[#allocation177_spill] sm:$0xff] %v10468_v4  ;;  %16409 = vst [vmem:[#allocation178_spill] sm:$0xff] %v10470_v18  ;;  %v893_v4 = vand.u32 4294901760, %v531_v47  ;;  %v10492_v38 = vpack.c.bf16 %v2177_v40, %v2173_v60  ;;  %v10494_v18 = vsub.f32 %v593_v41, %v2173_v60  ;;  %v533_v37 = vld [vmem:[#allocation6 + $0x1e0] sm:$0xff]  ;;  %v2179_v60 = vand.u32 4294901760, %v598_v28 }
  0xc0   :  { %16410 = vst [vmem:[#allocation179_spill] sm:$0xff] %v10472_v52  ;;  %16411 = vst [vmem:[#allocation180_spill] sm:$0xff] %v10474_v32  ;;  %v10498_v25 = vpack.c.bf16 %v891_v3, %v887_v24  ;;  %v536_v32 = vld [vmem:[#allocation6 + $0x1f8] sm:$0xff]  ;;  %v535_v52 = vld [vmem:[#allocation6 + $0x1f0] sm:$0xff]  ;;  %7932 = vmatprep.subr.bf16.mxu0 %v10488_v2  ;;  %v10507_v41 = vsub.f32 %v529_v56, %v889_v61 }
  0xc1   :  { %16412 = vst [vmem:[#allocation181_spill] sm:$0xff] %v10477_v13  ;;  %16413 = vst [vmem:[#allocation182_spill] sm:$0xff] %v10479_v46  ;;  %v10496_v46 = vsub.f32 %v595_v23, %v2177_v40  ;;  %v10500_v13 = vsub.f32 %v530_v42, %v887_v24  ;;  %v10505_v10 = vpack.c.bf16 %v893_v4, %v889_v61  ;;  %7934 = vmatpush1.bf16.msra.mxu0 %v10492_v38 }
  0xc2   :  { %16414 = vst [vmem:[#allocation183_spill] sm:$0xff] %v10481_v44  ;;  %16415 = vst [vmem:[#allocation184_spill] sm:$0xff] %v10486_v62  ;;  %v534_v44 = vld [vmem:[#allocation6 + $0x1e8] sm:$0xff]  ;;  %v10502_v62 = vsub.f32 %v532_v33, %v891_v3  ;;  %v10509_v29 = vsub.f32 %v531_v47, %v893_v4  ;;  %7356 = vmatprep.subr.bf16.mxu1 %v10498_v25  ;;  %v2183_v23 = vand.u32 4294901760, %v600_v43  ;;  %v2181_v42 = vand.u32 4294901760, %v597_v39 }
  0xc3   :  { %16416 = vst [vmem:[#allocation185_spill] sm:$0xff] %v10488_v2  ;;  %16417 = vst [vmem:[#allocation186_spill] sm:$0xff] %v10490_v51  ;;  %v2185_v33 = vand.u32 4294901760, %v599_v20  ;;  %v895_v40 = vand.u32 4294901760, %v534_v44  ;;  %7358 = vmatpush1.bf16.msra.mxu1 %v10505_v10  ;;  %v10514_v24 = vsub.f32 %v598_v28, %v2179_v60  ;;  %v899_v3 = vand.u32 4294901760, %v536_v32  ;;  %v16499_v51 = vld [vmem:[#allocation114_spill] sm:$0xff] }
  0xc4   :  { %16418 = vst [vmem:[#allocation187_spill] sm:$0xff] %v10492_v38  ;;  %16419 = vst [vmem:[#allocation188_spill] sm:$0xff] %v10494_v18  ;;  %v897_v2 = vand.u32 4294901760, %v533_v37  ;;  %v10516_v61 = vpack.c.bf16 %v2183_v23, %v2179_v60  ;;  %v10518_v47 = vsub.f32 %v600_v43, %v2183_v23  ;;  %v10522_v56 = vsub.f32 %v597_v39, %v2181_v42 }
  0xc5   :  { %16420 = vst [vmem:[#allocation189_spill] sm:$0xff] %v10496_v46  ;;  %16421 = vst [vmem:[#allocation190_spill] sm:$0xff] %v10498_v25  ;;  %v901_v46 = vand.u32 4294901760, %v535_v52  ;;  %v10520_v4 = vpack.c.bf16 %v2185_v33, %v2181_v42  ;;  %v10524_v25 = vsub.f32 %v599_v20, %v2185_v33  ;;  %v10526_v38 = vpack.c.bf16 %v899_v3, %v895_v40 }
  0xc6   :  { %16422 = vst [vmem:[#allocation191_spill] sm:$0xff] %v10500_v13  ;;  %16423 = vst [vmem:[#allocation192_spill] sm:$0xff] %v10502_v62  ;;  %v10528_v18 = vsub.f32 %v534_v44, %v895_v40  ;;  %7936 = vmatprep.subr.bf16.mxu0 %v10516_v61  ;;  %v10535_v60 = vsub.f32 %v533_v37, %v897_v2  ;;  %v15140_v39 = vand.u32 4294901760, %v9970_v45  ;;  %v15139_v20 = vand.u32 4294901760, %v9975_v36 }
  0xc7   :  { %16424 = vst [vmem:[#allocation193_spill] sm:$0xff] %v10505_v10  ;;  %16425 = vst [vmem:[#allocation194_spill] sm:$0xff] %v10507_v41  ;;  %v10530_v10 = vsub.f32 %v536_v32, %v899_v3  ;;  %v10533_v28 = vpack.c.bf16 %v901_v46, %v897_v2  ;;  %v10537_v43 = vsub.f32 %v535_v52, %v901_v46  ;;  %7938 = vmatpush1.bf16.msra.mxu0 %v10520_v4  ;;  %v16439_v3 = vlaneseq }
  0xc8   :  { %16426 = vst [vmem:[#allocation195_spill] sm:$0xff] %v10509_v29  ;;  %16427 = vst [vmem:[#allocation196_spill] sm:$0xff] %v10514_v24  ;;  %7360 = vmatprep.subr.bf16.mxu1 %v10526_v38  ;;  %v7939_v32 = vpack.c.bf16 %v15139_v20, %v15140_v39  ;;  %v15149_v44 = vand.u32 4294901760, %v9991_v0  ;;  %v15152_v52 = vand.u32 4294901760, %v9996_v50 }
  0xc9   :  { %16428 = vst [vmem:[#allocation197_spill] sm:$0xff] %v10516_v61  ;;  %16429 = vst [vmem:[#allocation198_spill] sm:$0xff] %v10518_v47  ;;  %7362 = vmatpush1.bf16.msra.mxu1 %v10533_v28  ;;  %v10557_v20 = vand.u32 127, %v16439_v3 }
  0xca   :  { %16430 = vst [vmem:[#allocation199_spill] sm:$0xff] %v10520_v4  ;;  %16431 = vst [vmem:[#allocation200_spill] sm:$0xff] %v10522_v56  ;;  %7940 = vmatprep.subr.bf16.mxu0 %v7939_v32  ;;  %v923_v46 = vsub.f32 %v9991_v0, %v15149_v44  ;;  %v935_v2 = vsub.f32 %v9996_v50, %v15152_v52  ;;  %v16441_v0 = vand.u32 4294901760, %v9980_v7  ;;  %v16462_v7 = vand.u32 4294901760, %v10122_v15 }
  0xcb   :  { %16432 = vst [vmem:[#allocation201_spill] sm:$0xff] %v10524_v25  ;;  %16433 = vst [vmem:[#allocation202_spill] sm:$0xff] %v10526_v38  ;;  %v172_v4 = vadd.s32 128, %v10557_v20  ;;  %v173_v52 = vadd.s32 256, %v10557_v20 }
  0xcc   :  { %16434 = vst [vmem:[#allocation203_spill] sm:$0xff] %v10528_v18  ;;  %16435 = vst [vmem:[#allocation204_spill] sm:$0xff] %v10530_v10  ;;  %v924_v37 = vand.u32 4294901760, %v923_v46  ;;  %v936_v23 = vand.u32 4294901760, %v935_v2  ;;  %v174_v46 = vadd.s32 384, %v10557_v20  ;;  %v15161_v2 = vand.u32 4294901760, %v10001_v57 }
  0xcd   :  { %16436 = vst [vmem:[#allocation205_spill] sm:$0xff] %v10533_v28  ;;  %16437 = vst [vmem:[#allocation206_spill] sm:$0xff] %v10535_v60  ;;  %v10572_v61 = vand.u32 3, %v173_v52  ;;  %v16443_v52 = vand.u32 4294901760, %v10006_v55 }
  0xce   :  { %16438 = vst [vmem:[#allocation207_spill] sm:$0xff] %v10537_v43  ;;  %v7363_v42 = vpack.c.bf16 %v936_v23, %v924_v37  ;;  %16440 = vst [vmem:[#allocation208_spill] sm:$0xff] %v10557_v20  ;;  %v10574_v50 = vand.u32 3, %v174_v46 }
  0xcf   :  { %v941_v46 = vsub.f32 %v10006_v55, %v16443_v52  ;;  %v15166_v52 = vand.u32 4294901760, %v10042_v53  ;;  %vm277_vm3 = vcmp.eq.s32.totalorder %v10572_v61, 0  ;;  %vm309_vm7 = vcmp.eq.s32.totalorder %v10572_v61, 1 }
  0xd0   :  { %7364 = vmatprep.subr.bf16.mxu1 %v7363_v42  ;;  %vm278_vm4 = vcmp.eq.s32.totalorder %v10574_v50, 0  ;;  %vm310_vm8 = vcmp.eq.s32.totalorder %v10574_v50, 1  ;;  %vm349_vm11 = vcmp.eq.s32.totalorder %v10572_v61, 2  ;;  %vm350_vm12 = vcmp.eq.s32.totalorder %v10574_v50, 2 }
  0xd1   :  { %vm389_vm15 = vcmp.eq.s32.totalorder %v10572_v61, 3  ;;  %vm390_vm0 = vcmp.eq.s32.totalorder %v10574_v50, 3 }
  0xe0   :  { %v88_v33 = vpop.xlane.xlu0 %87  ;;  %v122_v40 = vpop.xlane.xlu1 %121 }
  0xe1   :  { %v89_v32 = vmul.f32 0.00390625, %v88_v33  ;;  %v123_v28 = vmul.f32 0.00390625, %v122_v40 }
  0xe4   :  { %v105_v39 = vpop.xlane.xlu0 %104  ;;  %v139_v36 = vpop.xlane.xlu1 %138 }
  0xe5   :  { %v106_v45 = vmul.f32 0.00390625, %v105_v39  ;;  %v140_v44 = vmul.f32 0.00390625, %v139_v36  ;;  %v10567_v39 = vand.u32 3, %v10557_v20  ;;  %v10569_v36 = vand.u32 3, %v172_v4 }
  0xe6   :  { %v16442_v4 = vand.u32 4294901760, %v9985_v9 }
  0xe7   :  { %v141_v38 = vmax.f32 %v89_v32, %v106_v45  ;;  %vm275_vm1 = vcmp.eq.s32.totalorder %v10567_v39, 0  ;;  %vm276_vm2 = vcmp.eq.s32.totalorder %v10569_v36, 0  ;;  %vm307_vm5 = vcmp.eq.s32.totalorder %v10567_v39, 1 }
  0xe8   :  { %v10584_v25 = vpack.c.bf16 %v16442_v4, %v16441_v0  ;;  %vm308_vm6 = vcmp.eq.s32.totalorder %v10569_v36, 1  ;;  %vm347_vm9 = vcmp.eq.s32.totalorder %v10567_v39, 2  ;;  %vm348_vm10 = vcmp.eq.s32.totalorder %v10569_v36, 2 }
  0xe9   :  { %v142_v37 = vmax.f32 %v141_v38, %v123_v28  ;;  %v929_v38 = vsub.f32 %v10001_v57, %v15161_v2  ;;  %v942_v2 = vand.u32 4294901760, %v941_v46  ;;  %vm387_vm13 = vcmp.eq.s32.totalorder %v10567_v39, 3 }
  0xea   :  { %vm388_vm14 = vcmp.eq.s32.totalorder %v10569_v36, 3 }
  0xeb   :  { %v143_v33 = vmax.f32 %v142_v37, %v140_v44  ;;  %v930_v0 = vand.u32 4294901760, %v929_v38  ;;  %v15173_v38 = vand.u32 4294901760, %v10052_v58 }
  0xed   :  { %v144_v23 = vsub.f32 %v89_v32, %v143_v33  ;;  %v147_v3 = vsub.f32 %v106_v45, %v143_v33  ;;  %v150_v37 = vsub.f32 %v123_v28, %v143_v33  ;;  %v153_v40 = vsub.f32 %v140_v44, %v143_v33 }
  0xee   :  { %v16444_v28 = vand.u32 4294901760, %v10032_v48  ;;  %v16445_v33 = vand.u32 4294901760, %v10037_v49 }
  0xef   :  { %v145_v57 = vmul.f32 1.442695, %v144_v23  ;;  %v148_v42 = vmul.f32 1.442695, %v147_v3  ;;  %v151_v9 = vmul.f32 1.442695, %v150_v37 }
  0xf0   :  { %v947_v32 = vsub.f32 %v10032_v48, %v16444_v28  ;;  %v959_v4 = vsub.f32 %v10037_v49, %v16445_v33  ;;  %v15167_v3 = vand.u32 4294901760, %v10072_v5  ;;  %v154_v45 = vmul.f32 1.442695, %v153_v40  ;;  %v16492_v48 = vld [vmem:[#allocation132_spill] sm:$0xff] }
  0xf1   :  { %9289 = vpow2.f32 %v145_v57  ;;  %v15170_v28 = vand.u32 4294901760, %v10077_v6  ;;  %v16446_v40 = vand.u32 4294901760, %v10047_v54  ;;  %v16449_v33 = vand.u32 4294901760, %v10022_v34 }
  0xf2   :  { %9291 = vpow2.f32 %v148_v42  ;;  %v948_v37 = vand.u32 4294901760, %v947_v32  ;;  %v960_v57 = vand.u32 4294901760, %v959_v4  ;;  %v953_v42 = vsub.f32 %v10042_v53, %v15166_v52 }
  0xf3   :  { %9293 = vpow2.f32 %v151_v9  ;;  %v965_v46 = vsub.f32 %v10047_v54, %v16446_v40  ;;  %v971_v32 = vsub.f32 %v10072_v5, %v15167_v3  ;;  %v16447_v9 = vand.u32 4294901760, %v10012_v30 }
  0xf4   :  { %9295 = vpow2.f32 %v154_v45  ;;  %v16448_v4 = vand.u32 4294901760, %v10017_v31  ;;  %v16450_v52 = vand.u32 4294901760, %v10027_v35  ;;  %v983_v40 = vsub.f32 %v10077_v6, %v15170_v28 }
  0xf5   :  { %v10633_v3 = vpack.c.bf16 %v942_v2, %v930_v0  ;;  %v16451_v45 = vand.u32 4294901760, %v10057_v59  ;;  %v16453_v28 = vand.u32 4294901760, %v10087_v12  ;;  %v16454_v0 = vand.u32 4294901760, %v10112_v26 }
  0xf6   :  { %v10622_v23 = vpack.c.bf16 %v16448_v4, %v16447_v9  ;;  %v10628_v44 = vpack.c.bf16 %v16450_v52, %v16449_v33  ;;  %v16452_v4 = vand.u32 4294901760, %v10082_v11  ;;  %v10645_v52 = vpack.c.bf16 %v960_v57, %v948_v37  ;;  %v16456_v37 = vld [vmem:[#allocation106_spill] sm:$0xff] }
  0xf7   :  { %v10639_v56 = vpack.c.bf16 %v16451_v45, %v15173_v38  ;;  %v989_v2 = vsub.f32 %v10087_v12, %v16453_v28  ;;  %v995_v59 = vsub.f32 %v10112_v26, %v16454_v0  ;;  %v954_v45 = vand.u32 4294901760, %v953_v42  ;;  %v16458_v26 = vld [vmem:[#allocation110_spill] sm:$0xff] }
  0xf8   :  { %v977_v35 = vsub.f32 %v10082_v11, %v16452_v4  ;;  %v966_v38 = vand.u32 4294901760, %v965_v46  ;;  %v972_v58 = vand.u32 4294901760, %v971_v32  ;;  %v16455_v9 = vand.u32 4294901760, %v10117_v27 }
  0xf9   :  { %v984_v4 = vand.u32 4294901760, %v983_v40  ;;  %v990_v0 = vand.u32 4294901760, %v989_v2  ;;  %v16459_v46 = vand.u32 4294901760, %v10062_v63  ;;  %v1001_v40 = vsub.f32 %v10122_v15, %v16462_v7 }
  0xfa   :  { %v1007_v34 = vsub.f32 %v10117_v27, %v16455_v9  ;;  %v978_v28 = vand.u32 4294901760, %v977_v35  ;;  %v996_v9 = vand.u32 4294901760, %v995_v59  ;;  %v16457_v27 = vld [vmem:[#allocation109_spill] sm:$0xff]  ;;  %v10675_v42 = vpack.c.bf16 %v966_v38, %v954_v45 }
  0xfb   :  { %v10660_v31 = vpop.eup %9289  ;;  %v16460_v59 = vand.u32 4294901760, %v10067_v1  ;;  %v10690_v11 = vpack.c.bf16 %v984_v4, %v972_v58  ;;  %v16464_v38 = vand.u32 4294901760, %v10092_v16  ;;  %v16465_v45 = vand.u32 4294901760, %v10097_v17  ;;  %v16480_v17 = vld [vmem:[#allocation121_spill] sm:$0xff] }
  0xfc   :  { %v10665_v32 = vpop.eup %9291  ;;  %v1008_v57 = vand.u32 4294901760, %v1007_v34  ;;  %v16463_v34 = vand.u32 4294901760, %v10127_v14  ;;  %v10706_v15 = vpack.c.bf16 %v990_v0, %v978_v28  ;;  %v16472_v58 = vand.u32 4294901760, %v16456_v37 }
  0xfd   :  { %v156_v33 = vadd.f32 %v10665_v32, %v10660_v31  ;;  %v10673_v12 = vpop.eup %9293  ;;  %v10681_v2 = vpack.c.bf16 %v16460_v59, %v16459_v46  ;;  %v10696_v63 = vpack.c.bf16 %v16465_v45, %v16464_v38  ;;  %v16467_v46 = vand.u32 4294901760, %v10102_v21  ;;  %v16475_v38 = vld [vmem:[#allocation108_spill] sm:$0xff] }
  0xfe   :  { %v1013_v35 = vsub.f32 %v10127_v14, %v16463_v34  ;;  %v16468_v59 = vand.u32 4294901760, %v10107_v22  ;;  %v10704_v7 = vpop.eup %9295  ;;  %16470 = vst [vmem:[#allocation212_spill] sm:$0xff] %v10706_v15  ;;  %v16474_v34 = vld [vmem:[#allocation107_spill] sm:$0xff]  ;;  %v10719_v22 = vpack.c.bf16 %v1008_v57, %v996_v9  ;;  %v16478_v0 = vand.u32 4294901760, %v16458_v26  ;;  %v16482_v57 = vld [vmem:[#allocation68_spill] sm:$0xff]  ;;  %v16483_v14 = vld [vmem:[#allocation122_spill] sm:$0xff] }
  0xff   :  { %16461 = vst [vmem:[#allocation209_spill] sm:$0xff] %v10681_v2  ;;  %v157_v30 = vadd.f32 %v10673_v12, %v156_v33  ;;  %16466 = vst [vmem:[#allocation210_spill] sm:$0xff] %v10696_v63  ;;  %v16471_v33 = vand.u32 4294901760, %v10132_v19  ;;  %v1002_v37 = vand.u32 4294901760, %v1001_v40  ;;  %v15221_v16 = vand.u32 4294901760, %v16480_v17  ;;  %v16487_v40 = vld [vmem:[#allocation113_spill] sm:$0xff] }
 0x100   :  { %v10702_v1 = vpack.c.bf16 %v16468_v59, %v16467_v46  ;;  %16476 = vst [vmem:[#allocation214_spill] sm:$0xff] %v10719_v22  ;;  %v16477_v46 = vand.u32 4294901760, %v16457_v27  ;;  %v1031_v59 = vsub.f32 %v16458_v26, %v16478_v0  ;;  %v15224_v9 = vand.u32 4294901760, %v16482_v57  ;;  %v16488_v19 = vld [vmem:[#allocation123_spill] sm:$0xff] }
 0x101   :  { %v10712_v4 = vpack.c.bf16 %v16472_v58, %v16471_v33  ;;  %v10717_v21 = vadd.f32 %v10704_v7, %v157_v30  ;;  %v1014_v33 = vand.u32 4294901760, %v1013_v35  ;;  %v16479_v58 = vld [vmem:[#allocation111_spill] sm:$0xff]  ;;  %v16481_v30 = vld [vmem:[#allocation112_spill] sm:$0xff]  ;;  %v1115_v0 = vsub.f32 %v16480_v17, %v15221_v16 }
 0x102   :  { %16469 = vst [vmem:[#allocation211_spill] sm:$0xff] %v10702_v1  ;;  %v1019_v28 = vsub.f32 %v16457_v27, %v16477_v46  ;;  %v16484_v46 = vand.u32 4294901760, %v16474_v34  ;;  %v16485_v27 = vand.u32 4294901760, %v16475_v38  ;;  %v15233_v26 = vand.u32 4294901760, %v16488_v19  ;;  %v16532_v63 = vld [vmem:[#allocation167_spill] sm:$0xff] }
 0x103   :  { %16473 = vst [vmem:[#allocation213_spill] sm:$0xff] %v10712_v4  ;;  %9297 = vrcp.f32 %v10717_v21  ;;  %v1032_v45 = vand.u32 4294901760, %v1031_v59  ;;  %v1127_v6 = vsub.f32 %v16482_v57, %v15224_v9  ;;  %v16489_v34 = vand.u32 4294901760, %v16483_v14 }
 0x104   :  { %v10737_v5 = vpack.c.bf16 %v16485_v27, %v16484_v46  ;;  %v1020_v54 = vand.u32 4294901760, %v1019_v28  ;;  %v16490_v27 = vand.u32 4294901760, %v16479_v58  ;;  %v1116_v35 = vand.u32 4294901760, %v1115_v0 }
 0x105   :  { %v1121_v38 = vsub.f32 %v16483_v14, %v16489_v34  ;;  %v1133_v16 = vsub.f32 %v16488_v19, %v15233_v26  ;;  %v15236_v28 = vand.u32 4294901760, %v10361_v8  ;;  %v16491_v59 = vand.u32 4294901760, %v16481_v30 }
 0x106   :  { %16486 = vst [vmem:[#allocation215_spill] sm:$0xff] %v10737_v5  ;;  %v1025_v46 = vsub.f32 %v16479_v58, %v16490_v27  ;;  %v1128_v9 = vand.u32 4294901760, %v1127_v6  ;;  %v15238_v55 = vand.u32 4294901760, %v16492_v48  ;;  %v10761_v34 = vpack.c.bf16 %v1014_v33, %v1002_v37  ;;  %v16494_v27 = vld [vmem:[#allocation134_spill] sm:$0xff]  ;;  %v16501_v5 = vld [vmem:[#allocation143_spill] sm:$0xff] }
 0x107   :  { %v1037_v53 = vsub.f32 %v16481_v30, %v16491_v59  ;;  %v1122_v49 = vand.u32 4294901760, %v1121_v38  ;;  %v1134_v47 = vand.u32 4294901760, %v1133_v16  ;;  %v1139_v0 = vsub.f32 %v10361_v8, %v15236_v28  ;;  %v16497_v38 = vld [vmem:[#allocation135_spill] sm:$0xff] }
 0x108   :  { %16493 = vst [vmem:[#allocation216_spill] sm:$0xff] %v10761_v34  ;;  %v15239_v58 = vand.u32 4294901760, %v16494_v27  ;;  %v10767_v26 = vpack.c.bf16 %v1032_v45, %v1020_v54  ;;  %v10769_v24 = vpack.c.bf16 %v1128_v9, %v1116_v35  ;;  %v1151_v6 = vsub.f32 %v16492_v48, %v15238_v55  ;;  %v16500_v35 = vld [vmem:[#allocation115_spill] sm:$0xff] }
 0x109   :  { %v15240_v59 = vand.u32 4294901760, %v16497_v38  ;;  %v1026_v30 = vand.u32 4294901760, %v1025_v46  ;;  %v10775_v37 = vpack.c.bf16 %v1134_v47, %v1122_v49  ;;  %v1140_v16 = vand.u32 4294901760, %v1139_v0  ;;  %v16502_v49 = vld [vmem:[#allocation144_spill] sm:$0xff]  ;;  %v16506_v55 = vld [vmem:[#allocation147_spill] sm:$0xff] }
 0x10a   :  { %16495 = vst [vmem:[#allocation217_spill] sm:$0xff] %v10767_v26  ;;  %16496 = vst [vmem:[#allocation218_spill] sm:$0xff] %v10769_v24  ;;  %v1145_v33 = vsub.f32 %v16494_v27, %v15239_v58  ;;  %v1038_v28 = vand.u32 4294901760, %v1037_v53  ;;  %v1152_v45 = vand.u32 4294901760, %v1151_v6  ;;  %v15241_v46 = vand.u32 4294901760, %v16501_v5  ;;  %v16505_v58 = vld [vmem:[#allocation146_spill] sm:$0xff] }
 0x10b   :  { %16498 = vst [vmem:[#allocation219_spill] sm:$0xff] %v10775_v37  ;;  %v1157_v9 = vsub.f32 %v16497_v38, %v15240_v59  ;;  %v15244_v47 = vand.u32 4294901760, %v16502_v49  ;;  %v16503_v37 = vld [vmem:[#allocation116_spill] sm:$0xff]  ;;  %v15245_v4 = vand.u32 4294901760, %v16506_v55  ;;  %v16507_v1 = vand.u32 4294901760, %v16487_v40  ;;  %v16517_v26 = vld [vmem:[#allocation155_spill] sm:$0xff] }
 0x10c   :  { %v1146_v24 = vand.u32 4294901760, %v1145_v33  ;;  %v10788_v34 = vpack.c.bf16 %v1152_v45, %v1140_v16  ;;  %v1163_v59 = vsub.f32 %v16501_v5, %v15241_v46  ;;  %v16508_v16 = vand.u32 4294901760, %v16499_v51  ;;  %v16523_v40 = vld [vmem:[#allocation159_spill] sm:$0xff] }
 0x10d   :  { %v9298_v0 = vpop.eup %9297  ;;  %v1158_v53 = vand.u32 4294901760, %v1157_v9  ;;  %v1175_v33 = vsub.f32 %v16502_v49, %v15244_v47  ;;  %v16510_v9 = vld [vmem:[#allocation117_spill] sm:$0xff]  ;;  %v1181_v47 = vsub.f32 %v16506_v55, %v15245_v4  ;;  %v15263_v2 = vand.u32 4294901760, %v16532_v63 }
 0x10e   :  { %16504 = vst [vmem:[#allocation220_spill] sm:$0xff] %v10788_v34  ;;  %v160_v6 = vmul.f32 %v9298_v0, %v10717_v21  ;;  %v10803_v45 = vpack.c.bf16 %v16508_v16, %v16507_v1  ;;  %v16512_v34 = vand.u32 4294901760, %v16505_v58  ;;  %v1164_v20 = vand.u32 4294901760, %v1163_v59 }
 0x10f   :  { %v10806_v54 = vpack.c.bf16 %v1158_v53, %v1146_v24  ;;  %v1176_v15 = vand.u32 4294901760, %v1175_v33  ;;  %v10818_v1 = vpack.c.bf16 %v1038_v28, %v1026_v30  ;;  %v16514_v24 = vld [vmem:[#allocation118_spill] sm:$0xff]  ;;  %v1182_v4 = vand.u32 4294901760, %v1181_v47 }
 0x110   :  { %16509 = vst [vmem:[#allocation221_spill] sm:$0xff] %v10803_v45  ;;  %v1169_v46 = vsub.f32 %v16505_v58, %v16512_v34  ;;  %v161_v22 = vsub.f32 2.0, %v160_v6  ;;  %v16515_v34 = vld [vmem:[#allocation119_spill] sm:$0xff]  ;;  %v15250_v30 = vand.u32 4294901760, %v16517_v26  ;;  %v16518_v28 = vand.u32 4294901760, %v16500_v35 }
 0x111   :  { %16511 = vst [vmem:[#allocation222_spill] sm:$0xff] %v10806_v54  ;;  %16513 = vst [vmem:[#allocation223_spill] sm:$0xff] %v10818_v1  ;;  %v10826_v16 = vpack.c.bf16 %v1176_v15, %v1164_v20  ;;  %v16519_v53 = vand.u32 4294901760, %v16503_v37  ;;  %v16524_v15 = vand.u32 4294901760, %v16510_v9 }
 0x112   :  { %v1170_v59 = vand.u32 4294901760, %v1169_v46  ;;  %v162_v33 = vmul.f32 %v9298_v0, %v161_v22  ;;  %v16521_v22 = vld [vmem:[#allocation156_spill] sm:$0xff]  ;;  %v16522_v0 = vld [vmem:[#allocation158_spill] sm:$0xff] }
 0x113   :  { %16516 = vst [vmem:[#allocation224_spill] sm:$0xff] %v10826_v16  ;;  %v10833_v6 = vpack.c.bf16 %v16519_v53, %v16518_v28  ;;  %v15249_v46 = vand.u32 4294901760, %v16521_v22  ;;  %v15251_v51 = vand.u32 4294901760, %v16522_v0  ;;  %v10846_v20 = vsub.f32 %v16510_v9, %v16524_v15 }
 0x114   :  { %v163_v1 = vmul.f32 %v162_v33, %v10717_v21  ;;  %v10848_v47 = vpack.c.bf16 %v1182_v4, %v1170_v59  ;;  %v1187_v53 = vsub.f32 %v16517_v26, %v15250_v30  ;;  %v16526_v21 = vand.u32 4294901760, %v16514_v24  ;;  %v16529_v30 = vld [vmem:[#allocation37_spill] sm:$0xff] }
 0x115   :  { %16520 = vst [vmem:[#allocation225_spill] sm:$0xff] %v10833_v6  ;;  %v1199_v54 = vsub.f32 %v16521_v22, %v15249_v46  ;;  %v1193_v15 = vsub.f32 %v16522_v0, %v15251_v51  ;;  %v16527_v4 = vand.u32 4294901760, %v16523_v40  ;;  %v16531_v6 = vld [vmem:[#allocation40_spill] sm:$0xff]  ;;  %v16537_v51 = vld [vmem:[#allocation171_spill] sm:$0xff]  ;;  %v1044_v36 = vand.u32 4294901760, %v10846_v20 }
 0x116   :  { %16525 = vst [vmem:[#allocation226_spill] sm:$0xff] %v10848_v47  ;;  %v10856_v28 = vsub.f32 %v16514_v24, %v16526_v21  ;;  %v164_v37 = vsub.f32 2.0, %v163_v1  ;;  %v16528_v21 = vand.u32 4294901760, %v16515_v34  ;;  %v1188_v35 = vand.u32 4294901760, %v1187_v53  ;;  %v16530_v24 = vld [vmem:[#allocation39_spill] sm:$0xff] }
 0x117   :  { %v1205_v59 = vsub.f32 %v16523_v40, %v16527_v4  ;;  %v1200_v4 = vand.u32 4294901760, %v1199_v54  ;;  %v1194_v1 = vand.u32 4294901760, %v1193_v15  ;;  %v16533_v40 = vld [vmem:[#allocation168_spill] sm:$0xff]  ;;  %v15260_v53 = vand.u32 4294901760, %v16537_v51  ;;  %v16548_v20 = vld [vmem:[#allocation179_spill] sm:$0xff] }
 0x118   :  { %v10874_v46 = vsub.f32 %v16515_v34, %v16528_v21  ;;  %v165_v16 = vmul.f32 %v164_v37, %v162_v33  ;;  %v15262_v0 = vand.u32 4294901760, %v16533_v40  ;;  %v16536_v21 = vld [vmem:[#allocation170_spill] sm:$0xff]  ;;  %v1056_v61 = vand.u32 4294901760, %v10856_v28  ;;  %v16549_v28 = vld [vmem:[#allocation180_spill] sm:$0xff] }
 0x119   :  { %v1206_v47 = vand.u32 4294901760, %v1205_v59  ;;  %v10881_v22 = vpack.c.bf16 %v1200_v4, %v1188_v35  ;;  %v15261_v34 = vand.u32 4294901760, %v16536_v21  ;;  %v1211_v35 = vsub.f32 %v16532_v63, %v15263_v2 }
 0x11a   :  { %v10888_v9 = vmul.f32 %v10660_v31, %v165_v16  ;;  %v10891_v54 = vmul.f32 %v10665_v32, %v165_v16  ;;  %v10894_v37 = vmul.f32 %v10673_v12, %v165_v16  ;;  %v10897_v33 = vmul.f32 %v10704_v7, %v165_v16 }
 0x11b   :  { %16534 = vst [vmem:[#allocation227_spill] sm:$0xff] %v10881_v22  ;;  %v10883_v26 = vpack.c.bf16 %v1206_v47, %v1194_v1  ;;  %v1223_v47 = vsub.f32 %v16533_v40, %v15262_v0  ;;  %v1217_v31 = vsub.f32 %v16536_v21, %v15261_v34  ;;  %v1229_v12 = vsub.f32 %v16537_v51, %v15260_v53  ;;  %v16542_v51 = vld [vmem:[#allocation42_spill] sm:$0xff] }
 0x11c   :  { %16538 = vst [vmem:[#allocation229_spill] sm:$0xff] %v10888_v9  ;;  %16539 = vst [vmem:[#allocation230_spill] sm:$0xff] %v10891_v54  ;;  %v299_v32 = vsel %vm275_vm1, %v10888_v9, 0.0  ;;  %v300_v7 = vsel %vm276_vm2, %v10888_v9, 0.0  ;;  %v301_v16 = vsel %vm277_vm3, %v10888_v9, 0.0  ;;  %v302_v15 = vsel %vm278_vm4, %v10888_v9, 0.0 }
 0x11d   :  { %16535 = vst [vmem:[#allocation228_spill] sm:$0xff] %v10883_v26  ;;  %16540 = vst [vmem:[#allocation231_spill] sm:$0xff] %v10894_v37  ;;  %v331_v59 = vsel %vm307_vm5, %v10891_v54, 0.0  ;;  %v332_v4 = vsel %vm308_vm6, %v10891_v54, 0.0  ;;  %v333_v1 = vsel %vm309_vm7, %v10891_v54, 0.0  ;;  %v334_v53 = vsel %vm310_vm8, %v10891_v54, 0.0 }
 0x11e   :  { %16541 = vst [vmem:[#allocation232_spill] sm:$0xff] %v10897_v33  ;;  %v339_v34 = vadd.f32 %v331_v59, %v299_v32  ;;  %v340_v0 = vadd.f32 %v332_v4, %v300_v7  ;;  %v341_v2 = vadd.f32 %v333_v1, %v301_v16  ;;  %v342_v45 = vadd.f32 %v334_v53, %v302_v15 }
 0x11f   :  { %v371_v26 = vsel %vm347_vm9, %v10894_v37, 0.0  ;;  %v372_v22 = vsel %vm348_vm10, %v10894_v37, 0.0  ;;  %v373_v9 = vsel %vm349_vm11, %v10894_v37, 0.0  ;;  %v374_v54 = vsel %vm350_vm12, %v10894_v37, 0.0 }
 0x120   :  { %v379_v32 = vadd.f32 %v371_v26, %v339_v34  ;;  %v380_v7 = vadd.f32 %v372_v22, %v340_v0  ;;  %v381_v16 = vadd.f32 %v373_v9, %v341_v2  ;;  %v382_v53 = vadd.f32 %v374_v54, %v342_v45 }
 0x121   :  { %v411_v15 = vsel %vm387_vm13, %v10897_v33, 0.0  ;;  %v412_v59 = vsel %vm388_vm14, %v10897_v33, 0.0  ;;  %v413_v4 = vsel %vm389_vm15, %v10897_v33, 0.0  ;;  %v414_v1 = vsel %vm390_vm0, %v10897_v33, 0.0  ;;  %v16571_v33 = vld [vmem:[#allocation51_spill] sm:$0xff] }
 0x122   :  { %v419_v26 = vadd.f32 %v411_v15, %v379_v32  ;;  %v420_v34 = vadd.f32 %v412_v59, %v380_v7  ;;  %v421_v2 = vadd.f32 %v413_v4, %v381_v16  ;;  %v422_v45 = vadd.f32 %v414_v1, %v382_v53  ;;  %v16550_v4 = vld [vmem:[#allocation182_spill] sm:$0xff] }
 0x123   :  { %v1212_v9 = vand.u32 4294901760, %v1211_v35  ;;  %v1224_v22 = vand.u32 4294901760, %v1223_v47  ;;  %v1218_v39 = vand.u32 4294901760, %v1217_v31  ;;  %v1230_v0 = vand.u32 4294901760, %v1229_v12  ;;  %v16546_v35 = vld [vmem:[#allocation15_spill] sm:$0xff] }
 0x124   :  { %v435_v54 = vcombine.low %v419_v26, %v420_v34  ;;  %v436_v37 = vcombine.low %v421_v2, %v422_v45  ;;  %v16543_v40 = vand.u32 4294901760, %v16529_v30  ;;  %v16547_v12 = vld [vmem:[#allocation43_spill] sm:$0xff]  ;;  %v15273_v53 = vand.u32 4294901760, %v16548_v20 }
 0x125   :  { %v10967_v32 = vpack.c.bf16 %v1224_v22, %v1212_v9  ;;  %v10969_v7 = vpack.c.bf16 %v1230_v0, %v1218_v39  ;;  %v15275_v59 = vand.u32 4294901760, %v16549_v28  ;;  %v15278_v1 = vand.u32 4294901760, %v16550_v4  ;;  %v16556_v0 = vld [vmem:[#allocation46_spill] sm:$0xff] }
 0x126   :  { %v10965_v50 = vsub.f32 %v16529_v30, %v16543_v40  ;;  %v443_v47 = vrot.slane %v435_v54, %v16546_v35  ;;  %v450_v31 = vrot.slane %v436_v37, %v16546_v35  ;;  %v16551_v40 = vld [vmem:[#allocation183_spill] sm:$0xff]  ;;  %v16552_v2 = vand.u32 4294901760, %v16530_v24  ;;  %v16555_v37 = vld [vmem:[#allocation45_spill] sm:$0xff] }
 0x127   :  { %16544 = vst [vmem:[#allocation233_spill] sm:$0xff] %v10967_v32  ;;  %16545 = vst [vmem:[#allocation234_spill] sm:$0xff] %v10969_v7  ;;  %v15279_v26 = vand.u32 4294901760, %v16551_v40  ;;  %v16553_v45 = vand.u32 4294901760, %v16531_v6  ;;  %v1235_v39 = vsub.f32 %v16548_v20, %v15273_v53  ;;  %v1247_v16 = vsub.f32 %v16549_v28, %v15275_v59 }
 0x128   :  { %v451_v34 = vcombine.low %v443_v47, %v450_v31  ;;  %v1241_v47 = vsub.f32 %v16550_v4, %v15278_v1  ;;  %v10999_v21 = vpack.c.bf16 %v1056_v61, %v1044_v36  ;;  %v15280_v59 = vand.u32 4294901760, %v10500_v13  ;;  %v16558_v1 = vld [vmem:[#allocation48_spill] sm:$0xff] }
 0x129   :  { %v10983_v9 = vpack.c.bf16 %v16553_v45, %v16552_v2  ;;  %v1253_v31 = vsub.f32 %v16551_v40, %v15279_v26  ;;  %v9299_v2 = vld [vmem:[#allocation2] sm:$0xff]  ;;  %v1236_v15 = vand.u32 4294901760, %v1235_v39  ;;  %v1248_v54 = vand.u32 4294901760, %v1247_v16  ;;  %v16624_v40 = vld [vmem:[#allocation231_spill] sm:$0xff] }
 0x12a   :  { %v471_v45 = vmul.f32 %v9299_v2, %v451_v34  ;;  %16557 = vst [vmem:[#allocation236_spill] sm:$0xff] %v10999_v21  ;;  %v1242_v22 = vand.u32 4294901760, %v1241_v47  ;;  %v15281_v32 = vand.u32 4294901760, %v10502_v62  ;;  %v1259_v36 = vsub.f32 %v10500_v13, %v15280_v59 }
 0x12b   :  { %16554 = vst [vmem:[#allocation235_spill] sm:$0xff] %v10983_v9  ;;  %v1254_v6 = vand.u32 4294901760, %v1253_v31  ;;  %v11006_v26 = vpack.c.bf16 %v1248_v54, %v1236_v15  ;;  %v15282_v61 = vand.u32 4294901760, %v10507_v41  ;;  %v16562_v15 = vand.u32 4294901760, %v16555_v37 }
 0x12c   :  { %v733_v24 = vcombine.high %v471_v45, %v471_v45  ;;  %v740_v30 = vrot.slane %v471_v45, %v16546_v35  ;;  %v1271_v31 = vsub.f32 %v10502_v62, %v15281_v32  ;;  %v15290_v2 = vand.u32 4294901760, %v10509_v29 }
 0x12d   :  { %16559 = vst [vmem:[#allocation237_spill] sm:$0xff] %v11006_v26  ;;  %v11008_v34 = vpack.c.bf16 %v1254_v6, %v1242_v22  ;;  %v11023_v6 = vsub.f32 %v16555_v37, %v16562_v15  ;;  %v1260_v22 = vand.u32 4294901760, %v1259_v36  ;;  %v1265_v54 = vsub.f32 %v10507_v41, %v15282_v61  ;;  %v16575_v26 = vld [vmem:[#allocation52_spill] sm:$0xff] }
 0x12e   :  { %v747_v16 = vrot.slane %v733_v24, %v16546_v35  ;;  %v748_v39 = vcombine.high %v740_v30, %v740_v30  ;;  %v11015_v47 = vand.u32 4294901760, %v740_v30  ;;  %v16566_v32 = vand.u32 4294901760, %v16556_v0  ;;  %v16569_v35 = vld [vmem:[#allocation49_spill] sm:$0xff] }
 0x12f   :  { %16560 = vst [vmem:[#allocation238_spill] sm:$0xff] %v11008_v34  ;;  %v1272_v7 = vand.u32 4294901760, %v1271_v31  ;;  %v1266_v36 = vand.u32 4294901760, %v1265_v54  ;;  %v1277_v61 = vsub.f32 %v10509_v29, %v15290_v2  ;;  %v16615_v29 = vld [vmem:[#allocation216_spill] sm:$0xff] }
 0x130   :  { %16561 = vst [vmem:[#allocation239_spill] sm:$0xff] %v11015_v47  ;;  %v749_v24 = vcombine.high %v747_v16, %v747_v16  ;;  %v11029_v45 = vand.u32 4294901760, %v747_v16  ;;  %v11031_v59 = vand.u32 4294901760, %v748_v39  ;;  %v11034_v53 = vsub.f32 %v740_v30, %v11015_v47 }
 0x131   :  { %v1079_v15 = vsub.f32 %v16556_v0, %v16566_v32  ;;  %v11053_v31 = vpack.c.bf16 %v1272_v7, %v1260_v22  ;;  %v1278_v54 = vand.u32 4294901760, %v1277_v61  ;;  %v15299_v7 = vand.u32 4294901760, %v10528_v18  ;;  %v16622_v62 = vld [vmem:[#allocation236_spill] sm:$0xff] }
 0x132   :  { %16563 = vst [vmem:[#allocation240_spill] sm:$0xff] %v11029_v45  ;;  %16564 = vst [vmem:[#allocation241_spill] sm:$0xff] %v11031_v59  ;;  %v11042_v37 = vand.u32 4294901760, %v749_v24  ;;  %v11045_v34 = vsub.f32 %v748_v39, %v11031_v59  ;;  %v11050_v47 = vsub.f32 %v747_v16, %v11029_v45  ;;  %v16574_v39 = vand.u32 4294901760, %v16558_v1 }
 0x133   :  { %16565 = vst [vmem:[#allocation242_spill] sm:$0xff] %v11034_v53  ;;  %16572 = vst [vmem:[#allocation246_spill] sm:$0xff] %v11053_v31  ;;  %v16576_v16 = vand.u32 4294901760, %v11034_v53  ;;  %v11068_v32 = vpack.c.bf16 %v1278_v54, %v1266_v36  ;;  %v15300_v61 = vand.u32 4294901760, %v10530_v10  ;;  %v16579_v31 = vld [vmem:[#allocation58_spill] sm:$0xff]  ;;  %v1283_v36 = vsub.f32 %v10528_v18, %v15299_v7 }
 0x134   :  { %16567 = vst [vmem:[#allocation243_spill] sm:$0xff] %v11042_v37  ;;  %16568 = vst [vmem:[#allocation244_spill] sm:$0xff] %v11045_v34  ;;  %v11056_v0 = vsub.f32 %v749_v24, %v11042_v37  ;;  %v15294_v2 = vand.u32 4294901760, %v11045_v34  ;;  %v11062_v9 = vsub.f32 %v16558_v1, %v16574_v39  ;;  %v16578_v39 = vld [vmem:[#allocation57_spill] sm:$0xff]  ;;  %v15302_v21 = vand.u32 4294901760, %v11050_v47 }
 0x135   :  { %16570 = vst [vmem:[#allocation245_spill] sm:$0xff] %v11050_v47  ;;  %v912_v45 = vsub.f32 %v11034_v53, %v16576_v16  ;;  %16577 = vst [vmem:[#allocation248_spill] sm:$0xff] %v11068_v32  ;;  %v1295_v54 = vsub.f32 %v10530_v10, %v15300_v61  ;;  %v15304_v16 = vand.u32 4294901760, %v10535_v60  ;;  %v1068_v1 = vand.u32 4294901760, %v11023_v6 }
 0x136   :  { %16573 = vst [vmem:[#allocation247_spill] sm:$0xff] %v11056_v0  ;;  %v15301_v22 = vand.u32 4294901760, %v11056_v0  ;;  %v906_v24 = vsub.f32 %v11045_v34, %v15294_v2  ;;  %v1080_v53 = vand.u32 4294901760, %v1079_v15  ;;  %v15303_v30 = vand.u32 4294901760, %v10537_v43  ;;  %v16610_v0 = vld [vmem:[#allocation214_spill] sm:$0xff] }
 0x137   :  { %v913_v34 = vand.u32 4294901760, %v912_v45  ;;  %v1284_v7 = vand.u32 4294901760, %v1283_v36  ;;  %v1296_v32 = vand.u32 4294901760, %v1295_v54  ;;  %v1289_v61 = vsub.f32 %v10535_v60, %v15304_v16  ;;  %v16588_v54 = vld [vmem:[#allocation54_spill] sm:$0xff]  ;;  %v16612_v60 = vld [vmem:[#allocation211_spill] sm:$0xff] }
 0x138   :  { %2931 = vmatprep.mubr.f32.mxu0 %v15301_v22  ;;  %v907_v2 = vand.u32 4294901760, %v906_v24  ;;  %v16580_v24 = vand.u32 4294901760, %v16569_v35  ;;  %v16581_v15 = vand.u32 4294901760, %v16578_v39  ;;  %v1301_v45 = vsub.f32 %v10537_v43, %v15303_v30  ;;  %v16614_v43 = vld [vmem:[#allocation213_spill] sm:$0xff] }
 0x139   :  { %2935 = vmatmul.mubr.f32.vlgmr.msra.gmra.mrb[0].mxu0 %v15302_v21  ;;  %v16582_v36 = vand.u32 4294901760, %v16579_v31  ;;  %v11110_v21 = vpack.c.bf16 %v1296_v32, %v1284_v7  ;;  %v16585_v30 = vand.u32 4294901760, %v10965_v50  ;;  %v16587_v47 = vand.u32 4294901760, %v16547_v12  ;;  %v16592_v32 = vld [vmem:[#allocation61_spill] sm:$0xff] }
 0x13a   :  { %7942 = vmatpush1.bf16.msra.mxu0 %v10584_v25  ;;  %908 = vmatprep.mubr.f32.mxu1 %v907_v2  ;;  %v1085_v6 = vsub.f32 %v16569_v35, %v16580_v24  ;;  %v1091_v22 = vsub.f32 %v16578_v39, %v16581_v15  ;;  %v16583_v2 = vld [vmem:[#allocation60_spill] sm:$0xff]  ;;  %v1290_v24 = vand.u32 4294901760, %v1289_v61  ;;  %v16584_v15 = vand.u32 4294901760, %v10874_v46 }
 0x13b   :  { %3198 = vmatprep.mubr.f32.mxu0 %v11042_v37  ;;  %914 = vmatmul.mubr.f32.vlgmr.msra.gmra.mrb[0].mxu1 %v913_v34  ;;  %v1103_v25 = vsub.f32 %v16579_v31, %v16582_v36  ;;  %v16586_v34 = vand.u32 4294901760, %v16542_v51  ;;  %v1302_v7 = vand.u32 4294901760, %v1301_v45  ;;  %v1074_v46 = vand.u32 4294901760, %v11062_v9  ;;  %v16625_v9 = vld [vmem:[#allocation235_spill] sm:$0xff] }
 0x13c   :  { %7366 = vmatpush1.bf16.msra.mxu1 %v10633_v3  ;;  %1305 = vmatprep.mubr.f32.mxu1 %v11031_v59  ;;  %v11118_v16 = vpack.c.bf16 %v16585_v30, %v16584_v15  ;;  %v11129_v3 = vpack.c.bf16 %v1080_v53, %v1068_v1  ;;  %v16589_v50 = vand.u32 4294901760, %v16571_v33  ;;  %v16590_v30 = vand.u32 4294901760, %v16575_v26  ;;  %v16591_v15 = vld [vmem:[#allocation55_spill] sm:$0xff] }
 0x13d   :  { %v11124_v36 = vpack.c.bf16 %v16587_v47, %v16586_v34  ;;  %7944 = vmatprep.subr.bf16.mxu0 %v10622_v23  ;;  %7368 = vmatprep.subr.bf16.mxu1 %v10645_v52  ;;  %v1086_v34 = vand.u32 4294901760, %v1085_v6  ;;  %v1092_v45 = vand.u32 4294901760, %v1091_v22  ;;  %v11141_v12 = vpack.c.bf16 %v1302_v7, %v1290_v24  ;;  %v16594_v24 = vld [vmem:[#allocation155_spill] sm:$0xff]  ;;  %v16595_v7 = vld [vmem:[#allocation156_spill] sm:$0xff]  ;;  %v16601_v47 = vld [vmem:[#allocation209_spill] sm:$0xff] }
 0x13e   :  { %v11136_v61 = vpack.c.bf16 %v16590_v30, %v16589_v50  ;;  %7946 = vmatpush1.bf16.msra.mxu0 %v10628_v44  ;;  %v1104_v52 = vand.u32 4294901760, %v1103_v25  ;;  %v16593_v53 = vand.u32 4294901760, %v16583_v2  ;;  %v16596_v30 = vld [vmem:[#allocation158_spill] sm:$0xff]  ;;  %v16598_v44 = vld [vmem:[#allocation168_spill] sm:$0xff]  ;;  %v16600_v23 = vld [vmem:[#allocation171_spill] sm:$0xff]  ;;  %v16603_v22 = vand.u32 4294901760, %v16588_v54 }
 0x13f   :  { %7948 = vmatprep.subr.bf16.mxu0 %v10639_v56  ;;  %v16602_v25 = vld [vmem:[#allocation210_spill] sm:$0xff]  ;;  %v16604_v56 = vand.u32 4294901760, %v16591_v15  ;;  %v16607_v54 = vld [vmem:[#allocation63_spill] sm:$0xff]  ;;  %v16608_v15 = vld [vmem:[#allocation64_spill] sm:$0xff] }
 0x140   :  { %v11147_v1 = vsub.f32 %v16583_v2, %v16593_v53  ;;  %7370 = vmatpush1.bf16.msra.mxu1 %v10675_v42  ;;  %v16597_v53 = vld [vmem:[#allocation159_spill] sm:$0xff]  ;;  %v16606_v42 = vld [vmem:[#allocation212_spill] sm:$0xff] }
 0x141   :  { %7372 = vmatprep.subr.bf16.mxu1 %v10690_v11  ;;  %v11185_v26 = vpack.c.bf16 %v16604_v56, %v16603_v22  ;;  %v16609_v56 = vld [vmem:[#allocation208_spill] sm:$0xff]  ;;  %v16621_v22 = vld [vmem:[#allocation223_spill] sm:$0xff] }
 0x142   :  { %7950 = vmatpush1.bf16.msra.mxu0 %v16601_v47  ;;  %v16605_v47 = vand.u32 4294901760, %v16592_v32  ;;  %v175_v51 = vadd.s32 512, %v16609_v56  ;;  %v176_v41 = vadd.s32 640, %v16609_v56  ;;  %v177_v11 = vadd.s32 768, %v16609_v56 }
 0x143   :  { %7952 = vmatprep.subr.bf16.mxu0 %v16602_v25  ;;  %v11197_v25 = vpack.c.bf16 %v1086_v34, %v1074_v46  ;;  %v178_v50 = vadd.s32 896, %v16609_v56  ;;  %v11208_v46 = vpack.c.bf16 %v1104_v52, %v1092_v45  ;;  %v16617_v45 = vld [vmem:[#allocation229_spill] sm:$0xff]  ;;  %v16618_v52 = vld [vmem:[#allocation215_spill] sm:$0xff] }
 0x144   :  { %v11190_v6 = vsub.f32 %v16592_v32, %v16605_v47  ;;  %7374 = vmatpush1.bf16.msra.mxu1 %v16606_v42  ;;  %v16611_v47 = vld [vmem:[#allocation120_spill] sm:$0xff]  ;;  %v16613_v42 = vld [vmem:[#allocation66_spill] sm:$0xff]  ;;  %v211_v33 = vand.u32 3, %v175_v51  ;;  %v218_v59 = vand.u32 3, %v176_v41  ;;  %v225_v18 = vand.u32 3, %v177_v11 }
 0x145   :  { %7376 = vmatprep.subr.bf16.mxu1 %v16610_v0  ;;  %v232_v10 = vand.u32 3, %v178_v50  ;;  %v16620_v11 = vld [vmem:[#allocation230_spill] sm:$0xff] }
 0x146   :  { %7954 = vmatpush1.bf16.msra.mxu0 %v16612_v60  ;;  %vm279_vm1 = vcmp.eq.s32.totalorder %v211_v33, 0  ;;  %vm311_vm2 = vcmp.eq.s32.totalorder %v211_v33, 1  ;;  %vm351_vm3 = vcmp.eq.s32.totalorder %v211_v33, 2  ;;  %vm391_vm4 = vcmp.eq.s32.totalorder %v211_v33, 3  ;;  %v16616_v60 = vld [vmem:[#allocation217_spill] sm:$0xff] }
 0x147   :  { %7956 = vmatprep.subr.bf16.mxu0 %v16614_v43  ;;  %vm280_vm5 = vcmp.eq.s32.totalorder %v218_v59, 0  ;;  %vm281_vm6 = vcmp.eq.s32.totalorder %v225_v18, 0  ;;  %vm282_vm7 = vcmp.eq.s32.totalorder %v232_v10, 0  ;;  %v303_v51 = vsel %vm279_vm1, %v16617_v45, 0.0 }
 0x148   :  { %7378 = vmatpush1.bf16.msra.mxu1 %v16615_v29  ;;  %v304_v43 = vsel %vm280_vm5, %v16617_v45, 0.0  ;;  %v305_v41 = vsel %vm281_vm6, %v16617_v45, 0.0  ;;  %v306_v50 = vsel %vm282_vm7, %v16617_v45, 0.0  ;;  %vm312_vm8 = vcmp.eq.s32.totalorder %v218_v59, 1  ;;  %v16619_v29 = vld [vmem:[#allocation221_spill] sm:$0xff] }
 0x149   :  { %7380 = vmatprep.subr.bf16.mxu1 %v16616_v60  ;;  %vm313_vm9 = vcmp.eq.s32.totalorder %v225_v18, 1  ;;  %vm314_vm10 = vcmp.eq.s32.totalorder %v232_v10, 1  ;;  %v335_v56 = vsel %vm311_vm2, %v16620_v11, 0.0  ;;  %v336_v60 = vsel %vm312_vm8, %v16620_v11, 0.0 }
 0x14a   :  { %7958 = vmatpush1.bf16.msra.mxu0 %v16618_v52  ;;  %v337_v52 = vsel %vm313_vm9, %v16620_v11, 0.0  ;;  %v338_v0 = vsel %vm314_vm10, %v16620_v11, 0.0  ;;  %v343_v34 = vadd.f32 %v335_v56, %v303_v51  ;;  %v344_v13 = vadd.f32 %v336_v60, %v304_v43 }
 0x14b   :  { %7960 = vmatprep.subr.bf16.mxu0 %v16619_v29  ;;  %v345_v45 = vadd.f32 %v337_v52, %v305_v41  ;;  %v346_v4 = vadd.f32 %v338_v0, %v306_v50  ;;  %vm352_vm11 = vcmp.eq.s32.totalorder %v218_v59, 2  ;;  %vm353_vm12 = vcmp.eq.s32.totalorder %v225_v18, 2  ;;  %v16623_v29 = vld [vmem:[#allocation225_spill] sm:$0xff]  ;;  %v16626_v50 = vld [vmem:[#allocation232_spill] sm:$0xff] }
 0x14c   :  { %7382 = vmatpush1.bf16.msra.mxu1 %v16621_v22  ;;  %vm354_vm13 = vcmp.eq.s32.totalorder %v232_v10, 2  ;;  %v375_v20 = vsel %vm351_vm3, %v16624_v40, 0.0  ;;  %v376_v22 = vsel %vm352_vm11, %v16624_v40, 0.0  ;;  %v377_v28 = vsel %vm353_vm12, %v16624_v40, 0.0 }
 0x14d   :  { %7384 = vmatprep.subr.bf16.mxu1 %v16622_v62  ;;  %v378_v51 = vsel %vm354_vm13, %v16624_v40, 0.0  ;;  %v383_v43 = vadd.f32 %v375_v20, %v343_v34  ;;  %v384_v62 = vadd.f32 %v376_v22, %v344_v13  ;;  %v385_v41 = vadd.f32 %v377_v28, %v345_v45 }
 0x14e   :  { %7962 = vmatpush1.bf16.msra.mxu0 %v16623_v29  ;;  %v386_v0 = vadd.f32 %v378_v51, %v346_v4  ;;  %vm392_vm14 = vcmp.eq.s32.totalorder %v218_v59, 3  ;;  %vm393_vm15 = vcmp.eq.s32.totalorder %v225_v18, 3  ;;  %vm394_vm0 = vcmp.eq.s32.totalorder %v232_v10, 3  ;;  %v16629_v59 = vld [vmem:[#allocation125_spill] sm:$0xff] }
 0x14f   :  { %7964 = vmatprep.subr.bf16.mxu0 %v16625_v9  ;;  %v415_v11 = vsel %vm391_vm4, %v16626_v50, 0.0  ;;  %v416_v56 = vsel %vm392_vm14, %v16626_v50, 0.0  ;;  %v417_v9 = vsel %vm393_vm15, %v16626_v50, 0.0  ;;  %v418_v40 = vsel %vm394_vm0, %v16626_v50, 0.0  ;;  %v16638_v50 = vld [vmem:[#allocation137_spill] sm:$0xff] }
 0x150   :  { %7386 = vmatpush1.bf16.msra.mxu1 %v11118_v16  ;;  %v423_v13 = vadd.f32 %v415_v11, %v383_v43  ;;  %v424_v20 = vadd.f32 %v416_v56, %v384_v62  ;;  %v425_v28 = vadd.f32 %v417_v9, %v385_v41  ;;  %v426_v4 = vadd.f32 %v418_v40, %v386_v0  ;;  %v16635_v43 = vld [vmem:[#allocation128_spill] sm:$0xff]  ;;  %v16636_v41 = vld [vmem:[#allocation129_spill] sm:$0xff]  ;;  %v16637_v0 = vld [vmem:[#allocation15_spill] sm:$0xff] }
 0x151   :  { %7388 = vmatprep.subr.bf16.mxu1 %v11129_v3  ;;  %v16627_v18 = vand.u32 4294901760, %v16607_v54  ;;  %v16628_v10 = vand.u32 4294901760, %v16608_v15  ;;  %v15344_v16 = vand.u32 4294901760, %v16629_v59  ;;  %v16630_v3 = vld [vmem:[#allocation126_spill] sm:$0xff]  ;;  %v16631_v60 = vand.u32 4294901760, %v11147_v1  ;;  %v16702_v59 = vld [vmem:[#allocation109_spill] sm:$0xff] }
 0x152   :  { %7966 = vmatpush1.bf16.msra.mxu0 %v11124_v36  ;;  %v15343_v34 = vand.u32 4294901760, %v16630_v3  ;;  %v16632_v36 = vand.u32 4294901760, %v11190_v6  ;;  %v452_v45 = vcombine.low %v423_v13, %v424_v20  ;;  %v453_v29 = vcombine.low %v425_v28, %v426_v4  ;;  %v16639_v56 = vld [vmem:[#allocation138_spill] sm:$0xff]  ;;  %v16641_v20 = vld [vmem:[#allocation139_spill] sm:$0xff]  ;;  %v16642_v4 = vld [vmem:[#allocation141_spill] sm:$0xff] }
 0x153   :  { %7968 = vmatprep.subr.bf16.mxu0 %v11136_v61  ;;  %v7971_v33 = vpack.c.bf16 %v16628_v10, %v16627_v18  ;;  %v16633_v61 = vand.u32 4294901760, %v16611_v47  ;;  %v16634_v22 = vand.u32 4294901760, %v16613_v42  ;;  %v15340_v62 = vand.u32 4294901760, %v16635_v43  ;;  %v16640_v40 = vld [vmem:[#allocation218_spill] sm:$0xff]  ;;  %v16701_v43 = vld [vmem:[#allocation104_spill] sm:$0xff] }
 0x154   :  { %7390 = vmatpush1.bf16.msra.mxu1 %v11197_v25  ;;  %v7393_v52 = vpack.c.bf16 %v16632_v36, %v16631_v60  ;;  %v15339_v25 = vand.u32 4294901760, %v16636_v41  ;;  %v11265_v1 = vrot.slane %v452_v45, %v16637_v0  ;;  %v11268_v6 = vrot.slane %v453_v29, %v16637_v0  ;;  %v16644_v36 = vld [vmem:[#allocation150_spill] sm:$0xff]  ;;  %v16645_v45 = vld [vmem:[#allocation219_spill] sm:$0xff]  ;;  %v16646_v29 = vld [vmem:[#allocation220_spill] sm:$0xff] }
 0x155   :  { %7392 = vmatprep.subr.bf16.mxu1 %v11208_v46  ;;  %v7973_v51 = vpack.c.bf16 %v16634_v22, %v16633_v61  ;;  %v7975_v46 = vpack.c.bf16 %v15343_v34, %v15344_v16  ;;  %v15338_v11 = vand.u32 4294901760, %v16638_v50  ;;  %v15342_v28 = vand.u32 4294901760, %v16641_v20  ;;  %v16647_v22 = vld [vmem:[#allocation152_spill] sm:$0xff]  ;;  %v16654_v34 = vld [vmem:[#allocation165_spill] sm:$0xff]  ;;  %v16656_v9 = vld [vmem:[#allocation174_spill] sm:$0xff] }
 0x156   :  { %7970 = vmatpush1.bf16.msra.mxu0 %v11185_v26  ;;  %v15337_v26 = vand.u32 4294901760, %v16639_v56  ;;  %v7977_v13 = vpack.c.bf16 %v15339_v25, %v15340_v62  ;;  %v15341_v18 = vand.u32 4294901760, %v16642_v4  ;;  %v16650_v25 = vld [vmem:[#allocation162_spill] sm:$0xff]  ;;  %v16652_v62 = vld [vmem:[#allocation224_spill] sm:$0xff]  ;;  %v15356_v16 = vand.u32 4294901760, %v16654_v34  ;;  %v16696_v20 = vld [vmem:[#allocation101_spill] sm:$0xff] }
 0x157   :  { %7972 = vmatprep.subr.bf16.mxu0 %v7971_v33  ;;  %v16643_v33 = vld [vmem:[#allocation148_spill] sm:$0xff]  ;;  %v16698_v50 = vld [vmem:[#allocation25_spill] sm:$0xff]  ;;  %v16703_v42 = vld [vmem:[#allocation110_spill] sm:$0xff] }
 0x158   :  { %7394 = vmatpush1.bf16.msra.mxu1 %v7393_v52  ;;  %v7979_v10 = vpack.c.bf16 %v15337_v26, %v15338_v11  ;;  %v15346_v60 = vand.u32 4294901760, %v16643_v33  ;;  %v15345_v52 = vand.u32 4294901760, %v16644_v36  ;;  %v7981_v61 = vpack.c.bf16 %v15341_v18, %v15342_v28  ;;  %v16649_v11 = vld [vmem:[#allocation160_spill] sm:$0xff]  ;;  %v16694_v36 = vld [vmem:[#allocation95_spill] sm:$0xff] }
 0x159   :  { %7396 = vmatprep.subr.bf16.mxu1 %v16640_v40  ;;  %v16695_v33 = vld [vmem:[#allocation96_spill] sm:$0xff]  ;;  %v7443_v47 = vpack.c.bf16 %v16703_v42, %v16702_v59 }
 0x15a   :  { %7974 = vmatpush1.bf16.msra.mxu0 %v7973_v51  ;;  %v15349_v51 = vand.u32 4294901760, %v16647_v22  ;;  %v7983_v26 = vpack.c.bf16 %v15345_v52, %v15346_v60  ;;  %v16655_v60 = vld [vmem:[#allocation172_spill] sm:$0xff]  ;;  %v16658_v22 = vld [vmem:[#allocation227_spill] sm:$0xff]  ;;  %v7437_v4 = vpack.c.bf16 %v16695_v33, %v16694_v36 }
 0x15b   :  { %7976 = vmatprep.subr.bf16.mxu0 %v7975_v46  ;;  %v16648_v46 = vld [vmem:[#allocation153_spill] sm:$0xff]  ;;  %v16699_v41 = vld [vmem:[#allocation28_spill] sm:$0xff] }
 0x15c   :  { %7398 = vmatpush1.bf16.msra.mxu1 %v16645_v45  ;;  %v15348_v40 = vand.u32 4294901760, %v16648_v46  ;;  %v15353_v45 = vand.u32 4294901760, %v16649_v11  ;;  %v16660_v11 = vld [vmem:[#allocation177_spill] sm:$0xff]  ;;  %v16705_v15 = vld [vmem:[#allocation32_spill] sm:$0xff] }
 0x15d   :  { %7400 = vmatprep.subr.bf16.mxu1 %v16646_v29  ;;  %v15352_v29 = vand.u32 4294901760, %v16650_v25  ;;  %v15364_v46 = vand.u32 4294901760, %v16660_v11  ;;  %v16662_v25 = vld [vmem:[#allocation186_spill] sm:$0xff]  ;;  %v16707_v54 = vld [vmem:[#allocation112_spill] sm:$0xff] }
 0x15e   :  { %7978 = vmatpush1.bf16.msra.mxu0 %v7977_v13  ;;  %v16651_v13 = vld [vmem:[#allocation222_spill] sm:$0xff]  ;;  %v7985_v18 = vpack.c.bf16 %v15348_v40, %v15349_v51  ;;  %v627_v59 = vld [vmem:[#allocation6 + $0x4d0] sm:$0xff]  ;;  %v634_v33 = vld [vmem:[#allocation6 + $0x508] sm:$0xff] }
 0x15f   :  { %7980 = vmatprep.subr.bf16.mxu0 %v7979_v10  ;;  %v16653_v10 = vld [vmem:[#allocation164_spill] sm:$0xff]  ;;  %v7987_v52 = vpack.c.bf16 %v15352_v29, %v15353_v45 }
 0x160   :  { %7402 = vmatpush1.bf16.msra.mxu1 %v16651_v13  ;;  %v15357_v28 = vand.u32 4294901760, %v16653_v10  ;;  %v15361_v13 = vand.u32 4294901760, %v16655_v60  ;;  %v16661_v45 = vld [vmem:[#allocation184_spill] sm:$0xff]  ;;  %v16664_v10 = vld [vmem:[#allocation233_spill] sm:$0xff] }
 0x161   :  { %7404 = vmatprep.subr.bf16.mxu1 %v16652_v62  ;;  %v15360_v62 = vand.u32 4294901760, %v16656_v9  ;;  %v16666_v60 = vld [vmem:[#allocation189_spill] sm:$0xff]  ;;  %v16668_v9 = vld [vmem:[#allocation198_spill] sm:$0xff] }
 0x162   :  { %7982 = vmatpush1.bf16.msra.mxu0 %v7981_v61  ;;  %v16657_v61 = vld [vmem:[#allocation226_spill] sm:$0xff]  ;;  %v7989_v40 = vpack.c.bf16 %v15356_v16, %v15357_v28  ;;  %v15370_v34 = vand.u32 4294901760, %v16666_v60 }
 0x163   :  { %7984 = vmatprep.subr.bf16.mxu0 %v7983_v26  ;;  %v16659_v26 = vld [vmem:[#allocation176_spill] sm:$0xff]  ;;  %v7991_v29 = vpack.c.bf16 %v15360_v62, %v15361_v13 }
 0x164   :  { %7406 = vmatpush1.bf16.msra.mxu1 %v16657_v61  ;;  %v15365_v51 = vand.u32 4294901760, %v16659_v26  ;;  %v15369_v61 = vand.u32 4294901760, %v16661_v45  ;;  %v16667_v13 = vld [vmem:[#allocation196_spill] sm:$0xff]  ;;  %v16670_v26 = vld [vmem:[#allocation237_spill] sm:$0xff] }
 0x165   :  { %7408 = vmatprep.subr.bf16.mxu1 %v16658_v22  ;;  %v15368_v22 = vand.u32 4294901760, %v16662_v25  ;;  %v16672_v45 = vld [vmem:[#allocation201_spill] sm:$0xff]  ;;  %v16693_v25 = vld [vmem:[#allocation24_spill] sm:$0xff] }
 0x166   :  { %7986 = vmatpush1.bf16.msra.mxu0 %v7985_v18  ;;  %v16663_v18 = vld [vmem:[#allocation228_spill] sm:$0xff]  ;;  %v7993_v16 = vpack.c.bf16 %v15364_v46, %v15365_v51  ;;  %v15374_v11 = vand.u32 4294901760, %v16672_v45 }
 0x167   :  { %7988 = vmatprep.subr.bf16.mxu0 %v7987_v52  ;;  %v16665_v52 = vld [vmem:[#allocation188_spill] sm:$0xff]  ;;  %v7995_v62 = vpack.c.bf16 %v15368_v22, %v15369_v61  ;;  %v16673_v61 = vld [vmem:[#allocation238_spill] sm:$0xff] }
 0x168   :  { %7410 = vmatpush1.bf16.msra.mxu1 %v16663_v18  ;;  %v15371_v28 = vand.u32 4294901760, %v16665_v52  ;;  %v15373_v18 = vand.u32 4294901760, %v16667_v13  ;;  %v16687_v45 = vld [vmem:[#allocation244_spill] sm:$0xff]  ;;  %v16690_v13 = vld [vmem:[#allocation93_spill] sm:$0xff] }
 0x169   :  { %7412 = vmatprep.subr.bf16.mxu1 %v16664_v10  ;;  %v15372_v10 = vand.u32 4294901760, %v16668_v9  ;;  %v16692_v52 = vld [vmem:[#allocation21_spill] sm:$0xff] }
 0x16a   :  { %7990 = vmatpush1.bf16.msra.mxu0 %v7989_v40  ;;  %v16669_v40 = vld [vmem:[#allocation234_spill] sm:$0xff]  ;;  %v7997_v46 = vpack.c.bf16 %v15370_v34, %v15371_v28 }
 0x16b   :  { %7992 = vmatprep.subr.bf16.mxu0 %v7991_v29  ;;  %v16671_v29 = vld [vmem:[#allocation200_spill] sm:$0xff]  ;;  %v7999_v22 = vpack.c.bf16 %v15372_v10, %v15373_v18  ;;  %v16677_v34 = vld [vmem:[#allocation78_spill] sm:$0xff] }
 0x16c   :  { %7414 = vmatpush1.bf16.msra.mxu1 %v16669_v40  ;;  %v15375_v51 = vand.u32 4294901760, %v16671_v29  ;;  %v16674_v40 = vld [vmem:[#allocation246_spill] sm:$0xff]  ;;  %v16678_v10 = vld [vmem:[#allocation16_spill] sm:$0xff] }
 0x16d   :  { %7416 = vmatprep.subr.bf16.mxu1 %v16670_v26  ;;  %v16675_v26 = vld [vmem:[#allocation248_spill] sm:$0xff] }
 0x16e   :  { %7994 = vmatpush1.bf16.msra.mxu0 %v7993_v16  ;;  %v8001_v16 = vpack.c.bf16 %v15374_v11, %v15375_v51  ;;  %v16681_v18 = vld [vmem:[#allocation240_spill] sm:$0xff]  ;;  %v16682_v11 = vld [vmem:[#allocation85_spill] sm:$0xff] }
 0x16f   :  { %7996 = vmatprep.subr.bf16.mxu0 %v7995_v62  ;;  %v16676_v62 = vld [vmem:[#allocation77_spill] sm:$0xff]  ;;  %v16689_v29 = vld [vmem:[#allocation88_spill] sm:$0xff] }
 0x170   :  { %7418 = vmatpush1.bf16.msra.mxu1 %v16673_v61  ;;  %v7427_v28 = vpack.c.bf16 %v16677_v34, %v16676_v62  ;;  %v16679_v61 = vld [vmem:[#allocation79_spill] sm:$0xff] }
 0x171   :  { %7420 = vmatprep.subr.bf16.mxu1 %v16674_v40 }
 0x172   :  { %7998 = vmatpush1.bf16.msra.mxu0 %v7997_v46  ;;  %v16680_v46 = vld [vmem:[#allocation80_spill] sm:$0xff] }
 0x173   :  { %8000 = vmatprep.subr.bf16.mxu0 %v7999_v22  ;;  %v7429_v40 = vpack.c.bf16 %v16680_v46, %v16679_v61  ;;  %v16683_v22 = vld [vmem:[#allocation86_spill] sm:$0xff] }
 0x174   :  { %7422 = vmatpush1.bf16.msra.mxu1 %v16675_v26  ;;  %v7431_v51 = vpack.c.bf16 %v16683_v22, %v16682_v11  ;;  %v16684_v26 = vld [vmem:[#allocation17_spill] sm:$0xff] }
 0x175   :  { %7424 = vmatprep.subr.bf16.mxu1 %v11110_v21  ;;  %v16685_v21 = vld [vmem:[#allocation239_spill] sm:$0xff]  ;;  %v655_v22 = vld [vmem:[#allocation6 + $0x5b0] sm:$0xff] }
 0x176   :  { %8002 = vmatpush1.bf16.msra.mxu0 %v8001_v16  ;;  %v16686_v16 = vld [vmem:[#allocation20_spill] sm:$0xff] }
 0x177   :  { %8004 = vmatprep.subr.bf16.mxu0 %v16678_v10  ;;  %v16715_v10 = vld [vmem:[#allocation46_spill] sm:$0xff] }
 0x178   :  { %7426 = vmatpush1.bf16.msra.mxu1 %v11141_v12  ;;  %v16688_v12 = vld [vmem:[#allocation87_spill] sm:$0xff] }
 0x179   :  { %3200 = vmatmul.mubr.f32.vlgmr.msra.gmra.mrb[0].mxu0 %v16681_v18  ;;  %7428 = vmatprep.subr.bf16.mxu1 %v7427_v28  ;;  %v7433_v9 = vpack.c.bf16 %v16689_v29, %v16688_v12  ;;  %v16691_v28 = vld [vmem:[#allocation94_spill] sm:$0xff] }
 0x17a   :  { %8006 = vmatpush1.bf16.msra.mxu0 %v16684_v26  ;;  %3335 = vmatprep.mubr.f32.mxu0 %v11042_v37  ;;  %v7435_v60 = vpack.c.bf16 %v16691_v28, %v16690_v13  ;;  %v635_v13 = vld [vmem:[#allocation6 + $0x510] sm:$0xff] }
 0x17b   :  { %1307 = vmatmul.mubr.f32.vlgmr.msra.gmra.mrb[0].mxu1 %v16685_v21  ;;  %8008 = vmatprep.subr.bf16.mxu0 %v16686_v16  ;;  %v16713_v16 = vld [vmem:[#allocation37_spill] sm:$0xff]  ;;  %v16717_v21 = vld [vmem:[#allocation47_spill] sm:$0xff] }
 0x17c   :  { %7430 = vmatpush1.bf16.msra.mxu1 %v7429_v40  ;;  %1507 = vmatprep.mubr.f32.mxu1 %v16687_v45  ;;  %v16697_v40 = vld [vmem:[#allocation102_spill] sm:$0xff] }
 0x17d   :  { %7432 = vmatprep.subr.bf16.mxu1 %v7431_v51  ;;  %v7439_v56 = vpack.c.bf16 %v16697_v40, %v16696_v20  ;;  %v16700_v51 = vld [vmem:[#allocation103_spill] sm:$0xff] }
 0x17e   :  { %8010 = vmatpush1.bf16.msra.mxu0 %v16692_v52  ;;  %v7441_v3 = vpack.c.bf16 %v16701_v43, %v16700_v51  ;;  %v16711_v52 = vld [vmem:[#allocation36_spill] sm:$0xff]  ;;  %v16818_v20 = vld [vmem:[#allocation35_spill] sm:$0xff] }
 0x17f   :  { %8012 = vmatprep.subr.bf16.mxu0 %v16693_v25  ;;  %v16709_v25 = vld [vmem:[#allocation118_spill] sm:$0xff] }
 0x180   :  { %7434 = vmatpush1.bf16.msra.mxu1 %v7433_v9  ;;  %v16704_v9 = vld [vmem:[#allocation29_spill] sm:$0xff] }
 0x181   :  { %7436 = vmatprep.subr.bf16.mxu1 %v7435_v60  ;;  %v16706_v60 = vld [vmem:[#allocation111_spill] sm:$0xff] }
 0x182   :  { %8014 = vmatpush1.bf16.msra.mxu0 %v16698_v50  ;;  %v7445_v37 = vpack.c.bf16 %v16707_v54, %v16706_v60  ;;  %v16708_v50 = vld [vmem:[#allocation117_spill] sm:$0xff] }
 0x183   :  { %8016 = vmatprep.subr.bf16.mxu0 %v16699_v41  ;;  %v7447_v41 = vpack.c.bf16 %v16709_v25, %v16708_v50  ;;  %v628_v50 = vld [vmem:[#allocation6 + $0x4d8] sm:$0xff] }
 0x184   :  { %7438 = vmatpush1.bf16.msra.mxu1 %v7437_v4  ;;  %v16710_v4 = vld [vmem:[#allocation33_spill] sm:$0xff] }
 0x185   :  { %7440 = vmatprep.subr.bf16.mxu1 %v7439_v56  ;;  %v16712_v56 = vld [vmem:[#allocation119_spill] sm:$0xff] }
 0x186   :  { %8018 = vmatpush1.bf16.msra.mxu0 %v16704_v9  ;;  %v7449_v26 = vpack.c.bf16 %v16713_v16, %v16712_v56  ;;  %v16714_v9 = vld [vmem:[#allocation45_spill] sm:$0xff] }
 0x187   :  { %8020 = vmatprep.subr.bf16.mxu0 %v16705_v15  ;;  %v7451_v15 = vpack.c.bf16 %v16715_v10, %v16714_v9  ;;  %v624_v10 = vld [vmem:[#allocation6 + $0x4b8] sm:$0xff] }
 0x188   :  { %7442 = vmatpush1.bf16.msra.mxu1 %v7441_v3  ;;  %v16716_v3 = vld [vmem:[#allocation38_spill] sm:$0xff] }
 0x189   :  { %7444 = vmatprep.subr.bf16.mxu1 %v7443_v47  ;;  %v16718_v47 = vld [vmem:[#allocation48_spill] sm:$0xff] }
 0x18a   :  { %8022 = vmatpush1.bf16.msra.mxu0 %v16710_v4  ;;  %v7453_v25 = vpack.c.bf16 %v16569_v35, %v16718_v47  ;;  %v16720_v4 = vld [vmem:[#allocation59_spill] sm:$0xff] }
 0x18b   :  { %8024 = vmatprep.subr.bf16.mxu0 %v16711_v52  ;;  %v7455_v52 = vpack.c.bf16 %v16579_v31, %v16578_v39  ;;  %v16725_v31 = vld [vmem:[#allocation124_spill] sm:$0xff] }
 0x18c   :  { %7446 = vmatpush1.bf16.msra.mxu1 %v7445_v37  ;;  %v16719_v37 = vld [vmem:[#allocation50_spill] sm:$0xff] }
 0x18d   :  { %7448 = vmatprep.subr.bf16.mxu1 %v7447_v41  ;;  %v7457_v41 = vpack.c.bf16 %v16592_v32, %v16583_v2 }
 0x18e   :  { %8026 = vmatpush1.bf16.msra.mxu0 %v16716_v3  ;;  %v16721_v3 = vld [vmem:[#allocation62_spill] sm:$0xff] }
 0x18f   :  { %8028 = vmatprep.subr.bf16.mxu0 %v16717_v21  ;;  %v16722_v21 = vld [vmem:[#allocation69_spill] sm:$0xff] }
 0x190   :  { %7450 = vmatpush1.bf16.msra.mxu1 %v7449_v26  ;;  %v16724_v26 = vld [vmem:[#allocation71_spill] sm:$0xff] }
 0x191   :  { %7452 = vmatprep.subr.bf16.mxu1 %v7451_v15  ;;  %v16723_v15 = vpack.c.bf16 %v16482_v57, %v16480_v17  ;;  %v614_v57 = vld [vmem:[#allocation6 + $0x468] sm:$0xff]  ;;  %v616_v17 = vld [vmem:[#allocation6 + $0x478] sm:$0xff] }
 0x192   :  { %8030 = vmatpush1.bf16.msra.mxu0 %v16719_v37  ;;  %v16749_v37 = vld [vmem:[#allocation179_spill] sm:$0xff] }
 0x193   :  { %8032 = vmatprep.subr.bf16.mxu0 %v16720_v4  ;;  %v9300_v4 = vld [vmem:[#allocation2 + $0x8] sm:$0xff] }
 0x194   :  { %7454 = vmatpush1.bf16.msra.mxu1 %v7453_v25  ;;  %v16726_v25 = vpack.c.bf16 %v16488_v19, %v16483_v14  ;;  %v611_v19 = vld [vmem:[#allocation6 + $0x450] sm:$0xff] }
 0x195   :  { %7456 = vmatprep.subr.bf16.mxu1 %v7455_v52  ;;  %v16727_v52 = vcombine.low %v11265_v1, %v11268_v6  ;;  %v16733_v1 = vpack.c.bf16 %v16502_v49, %v16501_v5  ;;  %v16734_v6 = vld [vmem:[#allocation140_spill] sm:$0xff]  ;;  %v3365_v2 = vand.u32 4294901760, %v611_v19 }
 0x196   :  { %8034 = vmatpush1.bf16.msra.mxu0 %v16721_v3  ;;  %v607_v49 = vld [vmem:[#allocation6 + $0x430] sm:$0xff] }
 0x197   :  { %8036 = vmatprep.subr.bf16.mxu0 %v16722_v21  ;;  %v11432_v3 = vmul.f32 %v9300_v4, %v16727_v52  ;;  %v16730_v21 = vld [vmem:[#allocation127_spill] sm:$0xff]  ;;  %v16735_v4 = vld [vmem:[#allocation149_spill] sm:$0xff]  ;;  %v16736_v52 = vpack.c.bf16 %v16506_v55, %v16505_v58  ;;  %v16768_v5 = vld [vmem:[#allocation204_spill] sm:$0xff] }
 0x198   :  { %7458 = vmatpush1.bf16.msra.mxu1 %v7457_v41  ;;  %v16729_v41 = vpack.c.bf16 %v16492_v48, %v10361_v8  ;;  %v605_v58 = vld [vmem:[#allocation6 + $0x420] sm:$0xff] }
 0x199   :  { %7460 = vmatprep.subr.bf16.mxu1 %v16723_v15  ;;  %16728 = vst [vmem:[#allocation209_spill] sm:$0xff] %v11432_v3  ;;  %v16731_v15 = vld [vmem:[#allocation136_spill] sm:$0xff] }
 0x19a   :  { %8038 = vmatpush1.bf16.msra.mxu0 %v16724_v26  ;;  %v16748_v26 = vld [vmem:[#allocation180_spill] sm:$0xff] }
 0x19b   :  { %8040 = vmatprep.subr.bf16.mxu0 %v16725_v31  ;;  %v16732_v31 = vpack.c.bf16 %v16497_v38, %v16494_v27  ;;  %v16769_v38 = vld [vmem:[#allocation203_spill] sm:$0xff] }
 0x19c   :  { %7462 = vmatpush1.bf16.msra.mxu1 %v16726_v25  ;;  %v11444_v25 = vrot.slane %v11432_v3, %v16637_v0  ;;  %v16738_v0 = vld [vmem:[#allocation151_spill] sm:$0xff]  ;;  %v16739_v3 = vld [vmem:[#allocation161_spill] sm:$0xff]  ;;  %v16770_v27 = vpack.c.bf16 %v16768_v5, %v16769_v38 }
 0x19d   :  { %7464 = vmatprep.subr.bf16.mxu1 %v16729_v41  ;;  %v16776_v5 = vld [vmem:[#allocation207_spill] sm:$0xff] }
 0x19e   :  { %8042 = vmatpush1.bf16.msra.mxu0 %v16730_v21  ;;  %v765_v41 = vcombine.high %v11444_v25, %v11444_v25 }
 0x19f   :  { %8044 = vmatprep.subr.bf16.mxu0 %v16731_v15  ;;  %v16744_v15 = vld [vmem:[#allocation173_spill] sm:$0xff] }
 0x1a0   :  { %7466 = vmatpush1.bf16.msra.mxu1 %v16732_v31  ;;  %v16737_v31 = vpack.c.bf16 %v16595_v7, %v16594_v24  ;;  %v16760_v24 = vld [vmem:[#allocation197_spill] sm:$0xff] }
 0x1a1   :  { %7468 = vmatprep.subr.bf16.mxu1 %v16733_v1  ;;  %v16740_v1 = vpack.c.bf16 %v16597_v53, %v16596_v30  ;;  %v16750_v53 = vpack.c.bf16 %v16748_v26, %v16749_v37  ;;  %v606_v26 = vld [vmem:[#allocation6 + $0x428] sm:$0xff] }
 0x1a2   :  { %8046 = vmatpush1.bf16.msra.mxu0 %v16734_v6  ;;  %v16743_v6 = vld [vmem:[#allocation163_spill] sm:$0xff]  ;;  %v16756_v37 = vld [vmem:[#allocation192_spill] sm:$0xff]  ;;  %v3351_v30 = vand.u32 4294901760, %v606_v26 }
 0x1a3   :  { %8048 = vmatprep.subr.bf16.mxu0 %v16735_v4  ;;  %v11464_v4 = vand.u32 4294901760, %v765_v41 }
 0x1a4   :  { %7470 = vmatpush1.bf16.msra.mxu1 %v16736_v52  ;;  %v16742_v52 = vpack.c.bf16 %v16598_v44, %v16532_v63  ;;  %v16753_v44 = vld [vmem:[#allocation183_spill] sm:$0xff]  ;;  %v16754_v63 = vld [vmem:[#allocation182_spill] sm:$0xff] }
 0x1a5   :  { %7472 = vmatprep.subr.bf16.mxu1 %v16737_v31  ;;  %16741 = vst [vmem:[#allocation210_spill] sm:$0xff] %v11464_v4  ;;  %v16745_v31 = vld [vmem:[#allocation170_spill] sm:$0xff] }
 0x1a6   :  { %8050 = vmatpush1.bf16.msra.mxu0 %v16738_v0  ;;  %v16746_v21 = vpack.c.bf16 %v16600_v23, %v16745_v31  ;;  %v11474_v0 = vld [vmem:[#allocation6 + $0x408] sm:$0xff]  ;;  %v11490_v31 = vld [vmem:[#allocation6 + $0x410] sm:$0xff] }
 0x1a7   :  { %8052 = vmatprep.subr.bf16.mxu0 %v16739_v3  ;;  %v11476_v3 = vld [vmem:[#allocation6 + $0x418] sm:$0xff]  ;;  %v16761_v55 = vand.u32 4294901760, %v11474_v0  ;;  %v16773_v48 = vand.u32 4294901760, %v11490_v31 }
 0x1a8   :  { %7474 = vmatpush1.bf16.msra.mxu1 %v16740_v1  ;;  %v11479_v1 = vsub.f32 %v765_v41, %v11464_v4  ;;  %v16755_v41 = vpack.c.bf16 %v16753_v44, %v16754_v63 }
 0x1a9   :  { %7476 = vmatprep.subr.bf16.mxu1 %v16742_v52  ;;  %v16751_v52 = vld [vmem:[#allocation175_spill] sm:$0xff] }
 0x1aa   :  { %8054 = vmatpush1.bf16.msra.mxu0 %v16743_v6  ;;  %16747 = vst [vmem:[#allocation212_spill] sm:$0xff] %v11479_v1  ;;  %v16752_v6 = vld [vmem:[#allocation185_spill] sm:$0xff]  ;;  %v16767_v23 = vand.u32 4294901760, %v11479_v1 }
 0x1ab   :  { %8056 = vmatprep.subr.bf16.mxu0 %v16744_v15 }
 0x1ac   :  { %7478 = vmatpush1.bf16.msra.mxu1 %v16746_v21  ;;  %v11488_v21 = vld [vmem:[#allocation6 + $0x400] sm:$0xff]  ;;  %v3474_v15 = vsub.f32 %v11479_v1, %v16767_v23 }
 0x1ad   :  { %7480 = vmatprep.subr.bf16.mxu1 %v16750_v53  ;;  %v608_v53 = vld [vmem:[#allocation6 + $0x438] sm:$0xff] }
 0x1ae   :  { %8058 = vmatpush1.bf16.msra.mxu0 %v16751_v52  ;;  %v16757_v52 = vld [vmem:[#allocation191_spill] sm:$0xff]  ;;  %v3355_v63 = vand.u32 4294901760, %v608_v53 }
 0x1af   :  { %8060 = vmatprep.subr.bf16.mxu0 %v16752_v6  ;;  %v16758_v7 = vpack.c.bf16 %v16756_v37, %v16757_v52  ;;  %v16759_v6 = vld [vmem:[#allocation187_spill] sm:$0xff] }
 0x1b0   :  { %7482 = vmatpush1.bf16.msra.mxu1 %v16755_v41  ;;  %v16762_v41 = vand.u32 4294901760, %v11476_v3  ;;  %v16764_v37 = vld [vmem:[#allocation195_spill] sm:$0xff]  ;;  %v11526_v23 = vpack.c.bf16 %v3355_v63, %v3351_v30  ;;  %v11535_v32 = vsub.f32 %v608_v53, %v3355_v63  ;;  %v3371_v63 = vand.u32 4294901760, %v616_v17  ;;  %v615_v53 = vld [vmem:[#allocation6 + $0x470] sm:$0xff] }
 0x1b1   :  { %7484 = vmatprep.subr.bf16.mxu1 %v16758_v7  ;;  %v16765_v7 = vld [vmem:[#allocation194_spill] sm:$0xff]  ;;  %v3373_v47 = vand.u32 4294901760, %v615_v53 }
 0x1b2   :  { %8062 = vmatpush1.bf16.msra.mxu0 %v16759_v6  ;;  %v11507_v44 = vpack.c.bf16 %v16762_v41, %v16761_v55  ;;  %v16766_v52 = vpack.c.bf16 %v16764_v37, %v16765_v7  ;;  %v610_v6 = vld [vmem:[#allocation6 + $0x448] sm:$0xff]  ;;  %v16772_v41 = vand.u32 4294901760, %v11488_v21  ;;  %v3353_v37 = vand.u32 4294901760, %v605_v58  ;;  %v609_v7 = vld [vmem:[#allocation6 + $0x440] sm:$0xff]  ;;  %16775 = vst [vmem:[#allocation211_spill] sm:$0xff] %v11526_v23 }
 0x1b3   :  { %8064 = vmatprep.subr.bf16.mxu0 %v16760_v24  ;;  %v612_v24 = vld [vmem:[#allocation6 + $0x458] sm:$0xff]  ;;  %v16771_v55 = vld [vmem:[#allocation199_spill] sm:$0xff]  ;;  %v3359_v1 = vand.u32 4294901760, %v610_v6  ;;  %v11585_v16 = vsub.f32 %v615_v53, %v3373_v47 }
 0x1b4   :  { %16763 = vst [vmem:[#allocation208_spill] sm:$0xff] %v11507_v44  ;;  %7486 = vmatpush1.bf16.msra.mxu1 %v16766_v52  ;;  %v11523_v8 = vpack.c.bf16 %v16773_v48, %v16772_v41  ;;  %v3357_v52 = vand.u32 4294901760, %v607_v49  ;;  %v3363_v14 = vand.u32 4294901760, %v612_v24  ;;  %v16779_v48 = vld [vmem:[#allocation18_spill] sm:$0xff]  ;;  %v11533_v41 = vsub.f32 %v606_v26, %v3351_v30 }
 0x1b5   :  { %7488 = vmatprep.subr.bf16.mxu1 %v16770_v27  ;;  %v16777_v27 = vld [vmem:[#allocation206_spill] sm:$0xff]  ;;  %v3367_v30 = vand.u32 4294901760, %v614_v57  ;;  %16800 = vst [vmem:[#allocation219_spill] sm:$0xff] %v11585_v16 }
 0x1b6   :  { %8066 = vmatpush1.bf16.msra.mxu0 %v16771_v55  ;;  %16774 = vst [vmem:[#allocation214_spill] sm:$0xff] %v11523_v8  ;;  %v16778_v38 = vpack.c.bf16 %v16776_v5, %v16777_v27  ;;  %v3475_v55 = vand.u32 4294901760, %v3474_v15  ;;  %v11538_v39 = vpack.c.bf16 %v3357_v52, %v3353_v37  ;;  %v11540_v5 = vsub.f32 %v605_v58, %v3353_v37  ;;  %v16783_v15 = vld [vmem:[#allocation242_spill] sm:$0xff] }
 0x1b7   :  { %8068 = vmatprep.subr.bf16.mxu0 %v11507_v44  ;;  %v3361_v44 = vand.u32 4294901760, %v609_v7  ;;  %v613_v26 = vld [vmem:[#allocation6 + $0x460] sm:$0xff]  ;;  %v620_v58 = vld [vmem:[#allocation6 + $0x498] sm:$0xff]  ;;  %v11558_v27 = vsub.f32 %v612_v24, %v3363_v14  ;;  %v11568_v37 = vpack.c.bf16 %v3371_v63, %v3367_v30  ;;  %v622_v24 = vld [vmem:[#allocation6 + $0x4a8] sm:$0xff] }
 0x1b8   :  { %7490 = vmatpush1.bf16.msra.mxu1 %v16778_v38  ;;  %16780 = vst [vmem:[#allocation213_spill] sm:$0xff] %v11538_v39  ;;  %16781 = vst [vmem:[#allocation216_spill] sm:$0xff] %v11540_v5  ;;  %v11542_v38 = vsub.f32 %v607_v49, %v3357_v52  ;;  %v16787_v52 = vld [vmem:[#allocation22_spill] sm:$0xff] }
 0x1b9   :  { %3337 = vmatmul.mubr.f32.vlgmr.msra.gmra.mrb[0].mxu0 %v16681_v18  ;;  %7492 = vmatprep.subr.bf16.mxu1 %v16779_v48  ;;  %v11546_v18 = vpack.c.bf16 %v3363_v14, %v3359_v1  ;;  %v16785_v48 = vld [vmem:[#allocation19_spill] sm:$0xff]  ;;  %16789 = vst [vmem:[#allocation221_spill] sm:$0xff] %v11558_v27  ;;  %v11560_v35 = vpack.c.bf16 %v3365_v2, %v3361_v44  ;;  %16793 = vst [vmem:[#allocation225_spill] sm:$0xff] %v11568_v37 }
 0x1ba   :  { %8070 = vmatpush1.bf16.msra.mxu0 %v11523_v8  ;;  %3476 = vmatprep.mubr.f32.mxu0 %v3475_v55  ;;  %16782 = vst [vmem:[#allocation217_spill] sm:$0xff] %v11542_v38  ;;  %v16786_v55 = vand.u32 4294901760, %v16687_v45  ;;  %v618_v8 = vld [vmem:[#allocation6 + $0x488] sm:$0xff]  ;;  %v11563_v45 = vsub.f32 %v609_v7, %v3361_v44  ;;  %v617_v49 = vld [vmem:[#allocation6 + $0x480] sm:$0xff]  ;;  %v11576_v7 = vsub.f32 %v614_v57, %v3367_v30  ;;  %v623_v30 = vld [vmem:[#allocation6 + $0x4b0] sm:$0xff] }
 0x1bb   :  { %1510 = vmatmul.mubr.f32.vlgmr.msra.gmra.mrb[0].mxu1 %v16783_v15  ;;  %8072 = vmatprep.subr.bf16.mxu0 %v11526_v23  ;;  %16784 = vst [vmem:[#allocation229_spill] sm:$0xff] %v11546_v18  ;;  %v11556_v23 = vsub.f32 %v610_v6, %v3359_v1  ;;  %16790 = vst [vmem:[#allocation230_spill] sm:$0xff] %v11560_v35  ;;  %v3379_v6 = vand.u32 4294901760, %v620_v58  ;;  %v619_v1 = vld [vmem:[#allocation6 + $0x490] sm:$0xff]  ;;  %v16794_v14 = vld [vmem:[#allocation23_spill] sm:$0xff]  ;;  %v3389_v42 = vand.u32 4294901760, %v623_v30 }
 0x1bc   :  { %7494 = vmatpush1.bf16.msra.mxu1 %v16785_v48  ;;  %1647 = vmatprep.mubr.f32.mxu1 %v16786_v55  ;;  %16791 = vst [vmem:[#allocation223_spill] sm:$0xff] %v11563_v45  ;;  %v11565_v55 = vsub.f32 %v611_v19, %v3365_v2  ;;  %v3369_v48 = vand.u32 4294901760, %v613_v26  ;;  %v16795_v2 = vld [vmem:[#allocation26_spill] sm:$0xff]  ;;  %16796 = vst [vmem:[#allocation231_spill] sm:$0xff] %v11576_v7  ;;  %v3381_v56 = vand.u32 4294901760, %v619_v1  ;;  %v3383_v19 = vand.u32 4294901760, %v622_v24 }
 0x1bd   :  { %7496 = vmatprep.subr.bf16.mxu1 %v16787_v52  ;;  %16788 = vst [vmem:[#allocation215_spill] sm:$0xff] %v11556_v23  ;;  %v3375_v52 = vand.u32 4294901760, %v618_v8  ;;  %v621_v57 = vld [vmem:[#allocation6 + $0x4a0] sm:$0xff]  ;;  %v11598_v53 = vsub.f32 %v620_v58, %v3379_v6  ;;  %v11625_v40 = vsub.f32 %v623_v30, %v3389_v42 }
 0x1be   :  { %8074 = vmatpush1.bf16.msra.mxu0 %v11538_v39  ;;  %16792 = vst [vmem:[#allocation236_spill] sm:$0xff] %v11565_v55  ;;  %v3377_v39 = vand.u32 4294901760, %v617_v49  ;;  %v11581_v9 = vpack.c.bf16 %v3373_v47, %v3369_v48  ;;  %v3385_v60 = vand.u32 4294901760, %v621_v57  ;;  %v16810_v58 = vld [vmem:[#allocation31_spill] sm:$0xff] }
 0x1bf   :  { %8076 = vmatprep.subr.bf16.mxu0 %v11546_v18  ;;  %v11578_v18 = vsub.f32 %v616_v17, %v3371_v63  ;;  %v11588_v44 = vpack.c.bf16 %v3379_v6, %v3375_v52  ;;  %v16802_v17 = vld [vmem:[#allocation27_spill] sm:$0xff]  ;;  %16805 = vst [vmem:[#allocation224_spill] sm:$0xff] %v11598_v53  ;;  %v632_v6 = vld [vmem:[#allocation6 + $0x4f8] sm:$0xff]  ;;  %16816 = vst [vmem:[#allocation248_spill] sm:$0xff] %v11625_v40 }
 0x1c0   :  { %7498 = vmatpush1.bf16.msra.mxu1 %v16794_v14  ;;  %16798 = vst [vmem:[#allocation232_spill] sm:$0xff] %v11581_v9  ;;  %v11583_v14 = vsub.f32 %v613_v26, %v3369_v48  ;;  %v626_v63 = vld [vmem:[#allocation6 + $0x4c8] sm:$0xff]  ;;  %v16803_v48 = vld [vmem:[#allocation30_spill] sm:$0xff]  ;;  %v11596_v26 = vsub.f32 %v618_v8, %v3375_v52  ;;  %v11603_v54 = vpack.c.bf16 %v3381_v56, %v3377_v39  ;;  %v3395_v52 = vand.u32 4294901760, %v628_v50  ;;  %v16829_v40 = vld [vmem:[#allocation53_spill] sm:$0xff] }
 0x1c1   :  { %7500 = vmatprep.subr.bf16.mxu1 %v16795_v2  ;;  %16797 = vst [vmem:[#allocation235_spill] sm:$0xff] %v11578_v18  ;;  %16801 = vst [vmem:[#allocation220_spill] sm:$0xff] %v11588_v44  ;;  %v3387_v2 = vand.u32 4294901760, %v624_v10  ;;  %v3391_v8 = vand.u32 4294901760, %v626_v63  ;;  %v11621_v51 = vpack.c.bf16 %v3389_v42, %v3385_v60  ;;  %v16819_v42 = vld [vmem:[#allocation41_spill] sm:$0xff]  ;;  %v649_v15 = vld [vmem:[#allocation6 + $0x580] sm:$0xff] }
 0x1c2   :  { %8078 = vmatpush1.bf16.msra.mxu0 %v11560_v35  ;;  %16799 = vst [vmem:[#allocation218_spill] sm:$0xff] %v11583_v14  ;;  %16804 = vst [vmem:[#allocation222_spill] sm:$0xff] %v11596_v26  ;;  %v625_v35 = vld [vmem:[#allocation6 + $0x4c0] sm:$0xff] }
 0x1c3   :  { %8080 = vmatprep.subr.bf16.mxu0 %v11568_v37  ;;  %v11600_v37 = vsub.f32 %v617_v49, %v3377_v39  ;;  %16807 = vst [vmem:[#allocation227_spill] sm:$0xff] %v11603_v54  ;;  %v11608_v47 = vpack.c.bf16 %v3387_v2, %v3383_v19  ;;  %v630_v49 = vld [vmem:[#allocation6 + $0x4e8] sm:$0xff]  ;;  %v11619_v43 = vsub.f32 %v624_v10, %v3387_v2  ;;  %16814 = vst [vmem:[#allocation238_spill] sm:$0xff] %v11621_v51  ;;  %v633_v10 = vld [vmem:[#allocation6 + $0x500] sm:$0xff] }
 0x1c4   :  { %7502 = vmatpush1.bf16.msra.mxu1 %v16802_v17  ;;  %v11605_v17 = vsub.f32 %v619_v1, %v3381_v56  ;;  %v16811_v1 = vld [vmem:[#allocation34_spill] sm:$0xff]  ;;  %v11628_v39 = vpack.c.bf16 %v3395_v52, %v3391_v8  ;;  %v3399_v56 = vand.u32 4294901760, %v630_v49  ;;  %v11636_v2 = vsub.f32 %v626_v63, %v3391_v8 }
 0x1c5   :  { %7504 = vmatprep.subr.bf16.mxu1 %v16803_v48  ;;  %16806 = vst [vmem:[#allocation226_spill] sm:$0xff] %v11600_v37  ;;  %16809 = vst [vmem:[#allocation233_spill] sm:$0xff] %v11608_v47  ;;  %v3393_v48 = vand.u32 4294901760, %v625_v35  ;;  %v3407_v63 = vand.u32 4294901760, %v634_v33  ;;  %v653_v37 = vld [vmem:[#allocation6 + $0x5a0] sm:$0xff] }
 0x1c6   :  { %8082 = vmatpush1.bf16.msra.mxu0 %v11581_v9  ;;  %16808 = vst [vmem:[#allocation228_spill] sm:$0xff] %v11605_v17  ;;  %v11616_v9 = vsub.f32 %v622_v24, %v3383_v19  ;;  %16813 = vst [vmem:[#allocation237_spill] sm:$0xff] %v11619_v43  ;;  %v629_v24 = vld [vmem:[#allocation6 + $0x4e0] sm:$0xff]  ;;  %v631_v19 = vld [vmem:[#allocation6 + $0x4f0] sm:$0xff] }
 0x1c7   :  { %8084 = vmatprep.subr.bf16.mxu0 %v11588_v44  ;;  %v3397_v44 = vand.u32 4294901760, %v627_v59  ;;  %16817 = vst [vmem:[#allocation77_spill] sm:$0xff] %v11628_v39  ;;  %16820 = vst [vmem:[#allocation78_spill] sm:$0xff] %v11636_v2  ;;  %v3401_v36 = vand.u32 4294901760, %v629_v24  ;;  %v3405_v28 = vand.u32 4294901760, %v631_v19  ;;  %v16850_v43 = vld [vmem:[#allocation72_spill] sm:$0xff] }
 0x1c8   :  { %7506 = vmatpush1.bf16.msra.mxu1 %v16810_v58  ;;  %16812 = vst [vmem:[#allocation234_spill] sm:$0xff] %v11616_v9  ;;  %v11623_v58 = vsub.f32 %v621_v57, %v3385_v60  ;;  %v11638_v57 = vsub.f32 %v628_v50, %v3395_v52  ;;  %v16826_v50 = vand.u32 4294901760, %v11474_v0 }
 0x1c9   :  { %7508 = vmatprep.subr.bf16.mxu1 %v16811_v1  ;;  %v3403_v1 = vand.u32 4294901760, %v632_v6  ;;  %v11640_v30 = vpack.c.bf16 %v3397_v44, %v3393_v48  ;;  %v11671_v29 = vpack.c.bf16 %v3405_v28, %v3401_v36 }
 0x1ca   :  { %8086 = vmatpush1.bf16.msra.mxu0 %v11603_v54  ;;  %16815 = vst [vmem:[#allocation246_spill] sm:$0xff] %v11623_v58  ;;  %v636_v54 = vld [vmem:[#allocation6 + $0x518] sm:$0xff]  ;;  %16821 = vst [vmem:[#allocation79_spill] sm:$0xff] %v11638_v57  ;;  %v11653_v52 = vsub.f32 %v11474_v0, %v16826_v50  ;;  %v11666_v58 = vsub.f32 %v630_v49, %v3399_v56  ;;  %v3409_v0 = vand.u32 4294901760, %v633_v10  ;;  %v3413_v50 = vand.u32 4294901760, %v635_v13 }
 0x1cb   :  { %8088 = vmatprep.subr.bf16.mxu0 %v11608_v47  ;;  %16822 = vst [vmem:[#allocation80_spill] sm:$0xff] %v11640_v30  ;;  %v11643_v47 = vsub.f32 %v625_v35, %v3393_v48  ;;  %v11648_v60 = vpack.c.bf16 %v3403_v1, %v3399_v56  ;;  %v3411_v8 = vand.u32 4294901760, %v636_v54  ;;  %v638_v35 = vld [vmem:[#allocation6 + $0x528] sm:$0xff]  ;;  %16832 = vst [vmem:[#allocation253_spill] sm:$0xff] %v11671_v29 }
 0x1cc   :  { %7510 = vmatpush1.bf16.msra.mxu1 %v16818_v20  ;;  %v11645_v20 = vsub.f32 %v627_v59, %v3397_v44  ;;  %v640_v59 = vld [vmem:[#allocation6 + $0x538] sm:$0xff]  ;;  %16830 = vst [vmem:[#allocation251_spill] sm:$0xff] %v11666_v58  ;;  %v11673_v44 = vsub.f32 %v629_v24, %v3401_v36  ;;  %v11675_v48 = vsub.f32 %v631_v19, %v3405_v28  ;;  %v3415_v56 = vand.u32 4294901760, %v638_v35  ;;  %v16838_v24 = vld [vmem:[#allocation56_spill] sm:$0xff] }
 0x1cd   :  { %7512 = vmatprep.subr.bf16.mxu1 %v16819_v42  ;;  %16823 = vst [vmem:[#allocation244_spill] sm:$0xff] %v11643_v47  ;;  %16825 = vst [vmem:[#allocation250_spill] sm:$0xff] %v11648_v60  ;;  %v639_v47 = vld [vmem:[#allocation6 + $0x530] sm:$0xff]  ;;  %v11683_v49 = vpack.c.bf16 %v3411_v8, %v3407_v63  ;;  %v16837_v36 = vand.u32 4294901760, %v11490_v31  ;;  %v11691_v19 = vsub.f32 %v634_v33, %v3407_v63  ;;  %v648_v58 = vld [vmem:[#allocation6 + $0x578] sm:$0xff] }
 0x1ce   :  { %8090 = vmatpush1.bf16.msra.mxu0 %v11621_v51  ;;  %16824 = vst [vmem:[#allocation249_spill] sm:$0xff] %v11645_v20  ;;  %v16827_v51 = vld [vmem:[#allocation44_spill] sm:$0xff]  ;;  %16833 = vst [vmem:[#allocation254_spill] sm:$0xff] %v11673_v44  ;;  %v637_v20 = vld [vmem:[#allocation6 + $0x520] sm:$0xff]  ;;  %v11698_v57 = vsub.f32 %v636_v54, %v3411_v8  ;;  %v11700_v2 = vpack.c.bf16 %v3413_v50, %v3409_v0  ;;  %v11703_v33 = vsub.f32 %v633_v10, %v3409_v0 }
 0x1cf   :  { %8092 = vmatprep.subr.bf16.mxu0 %v11628_v39  ;;  %v16828_v39 = vand.u32 4294901760, %v11476_v3  ;;  %16834 = vst [vmem:[#allocation255_spill] sm:$0xff] %v11675_v48  ;;  %16836 = vst [vmem:[#allocation256_spill] sm:$0xff] %v11683_v49  ;;  %v11688_v28 = vsub.f32 %v11490_v31, %v16837_v36  ;;  %v3417_v12 = vand.u32 4294901760, %v637_v20  ;;  %v3421_v31 = vand.u32 4294901760, %v639_v47  ;;  %v643_v36 = vld [vmem:[#allocation6 + $0x550] sm:$0xff] }
 0x1d0   :  { %7514 = vmatpush1.bf16.msra.mxu1 %v16827_v51  ;;  %v11669_v51 = vsub.f32 %v632_v6, %v3403_v1  ;;  %v3419_v6 = vand.u32 4294901760, %v640_v59  ;;  %v642_v1 = vld [vmem:[#allocation6 + $0x548] sm:$0xff]  ;;  %16839 = vst [vmem:[#allocation257_spill] sm:$0xff] %v11691_v19  ;;  %16841 = vst [vmem:[#allocation258_spill] sm:$0xff] %v11698_v57  ;;  %v11705_v63 = vsub.f32 %v635_v13, %v3413_v50  ;;  %v645_v48 = vld [vmem:[#allocation6 + $0x560] sm:$0xff]  ;;  %v3429_v0 = vand.u32 4294901760, %v643_v36 }
 0x1d1   :  { %v11663_v42 = vsub.f32 %v11476_v3, %v16828_v39  ;;  %7516 = vmatprep.subr.bf16.mxu1 %v16829_v40  ;;  %v16835_v3 = vand.u32 4294901760, %v11488_v21  ;;  %v641_v40 = vld [vmem:[#allocation6 + $0x540] sm:$0xff]  ;;  %16842 = vst [vmem:[#allocation259_spill] sm:$0xff] %v11700_v2  ;;  %16843 = vst [vmem:[#allocation260_spill] sm:$0xff] %v11703_v33  ;;  %v11713_v8 = vsub.f32 %v638_v35, %v3415_v56  ;;  %v650_v50 = vld [vmem:[#allocation6 + $0x588] sm:$0xff]  ;;  %v3435_v4 = vand.u32 4294901760, %v648_v58 }
 0x1d2   :  { %8094 = vmatpush1.bf16.msra.mxu0 %v11640_v30  ;;  %16831 = vst [vmem:[#allocation252_spill] sm:$0xff] %v11669_v51  ;;  %v644_v30 = vld [vmem:[#allocation6 + $0x558] sm:$0xff]  ;;  %16844 = vst [vmem:[#allocation261_spill] sm:$0xff] %v11705_v63  ;;  %v646_v51 = vld [vmem:[#allocation6 + $0x568] sm:$0xff]  ;;  %v11711_v54 = vpack.c.bf16 %v3419_v6, %v3415_v56  ;;  %v11716_v13 = vsub.f32 %v640_v59, %v3419_v6  ;;  %v11723_v35 = vpack.c.bf16 %v3421_v31, %v3417_v12 }
 0x1d3   :  { %v11680_v39 = vsub.f32 %v11488_v21, %v16835_v3  ;;  %8096 = vmatprep.subr.bf16.mxu0 %v11648_v60  ;;  %v16840_v60 = vld [vmem:[#allocation65_spill] sm:$0xff]  ;;  %v3427_v21 = vand.u32 4294901760, %v644_v30  ;;  %v11708_v3 = vand.u32 4294901760, %v11444_v25  ;;  %16847 = vst [vmem:[#allocation264_spill] sm:$0xff] %v11713_v8  ;;  %v16848_v10 = vld [vmem:[#allocation67_spill] sm:$0xff]  ;;  %v11725_v56 = vsub.f32 %v637_v20, %v3417_v12  ;;  %v16857_v63 = vld [vmem:[#allocation70_spill] sm:$0xff] }
 0x1d4   :  { %7518 = vmatpush1.bf16.msra.mxu1 %v16838_v24  ;;  %v3423_v24 = vand.u32 4294901760, %v642_v1  ;;  %16846 = vst [vmem:[#allocation263_spill] sm:$0xff] %v11711_v54  ;;  %16849 = vst [vmem:[#allocation265_spill] sm:$0xff] %v11716_v13  ;;  %v652_v44 = vld [vmem:[#allocation6 + $0x598] sm:$0xff]  ;;  %v3431_v9 = vand.u32 4294901760, %v646_v51  ;;  %v11728_v59 = vsub.f32 %v639_v47, %v3421_v31  ;;  %v651_v57 = vld [vmem:[#allocation6 + $0x590] sm:$0xff] }
 0x1d5   :  { %7520 = vmatprep.subr.bf16.mxu1 %v16840_v60  ;;  %16845 = vst [vmem:[#allocation262_spill] sm:$0xff] %v11708_v3  ;;  %v3425_v60 = vand.u32 4294901760, %v641_v40  ;;  %16851 = vst [vmem:[#allocation266_spill] sm:$0xff] %v11723_v35  ;;  %v3439_v20 = vand.u32 4294901760, %v650_v50  ;;  %v3443_v12 = vand.u32 4294901760, %v652_v44  ;;  %v654_v31 = vld [vmem:[#allocation6 + $0x5a8] sm:$0xff] }
 0x1d6   :  { %8098 = vmatpush1.bf16.msra.mxu0 %v11671_v29  ;;  %v647_v29 = vld [vmem:[#allocation6 + $0x570] sm:$0xff]  ;;  %16852 = vst [vmem:[#allocation267_spill] sm:$0xff] %v11725_v56  ;;  %16853 = vst [vmem:[#allocation268_spill] sm:$0xff] %v11728_v59  ;;  %v11730_v6 = vpack.c.bf16 %v3427_v21, %v3423_v24  ;;  %v658_v59 = vld [vmem:[#allocation6 + $0x5c8] sm:$0xff] }
 0x1d7   :  { %8100 = vmatprep.subr.bf16.mxu0 %v11683_v49  ;;  %v3437_v17 = vand.u32 4294901760, %v647_v29  ;;  %v11733_v49 = vsub.f32 %v642_v1, %v3423_v24  ;;  %v11738_v33 = vpack.c.bf16 %v3429_v0, %v3425_v60  ;;  %v11740_v47 = vsub.f32 %v641_v40, %v3425_v60  ;;  %v16859_v1 = vld [vmem:[#allocation130_spill] sm:$0xff] }
 0x1d8   :  { %7522 = vmatpush1.bf16.msra.mxu1 %v16848_v10  ;;  %16854 = vst [vmem:[#allocation269_spill] sm:$0xff] %v11730_v6  ;;  %v3433_v10 = vand.u32 4294901760, %v645_v48  ;;  %v11749_v24 = vpack.c.bf16 %v3435_v4, %v3431_v9  ;;  %v11752_v40 = vsub.f32 %v646_v51, %v3431_v9  ;;  %v11754_v60 = vsub.f32 %v648_v58, %v3435_v4  ;;  %v660_v56 = vld [vmem:[#allocation6 + $0x5d8] sm:$0xff]  ;;  %v657_v8 = vld [vmem:[#allocation6 + $0x5c0] sm:$0xff]  ;;  %v659_v4 = vld [vmem:[#allocation6 + $0x5d0] sm:$0xff] }
 0x1d9   :  { %7524 = vmatprep.subr.bf16.mxu1 %v16850_v43  ;;  %16855 = vst [vmem:[#allocation270_spill] sm:$0xff] %v11733_v49  ;;  %v11735_v43 = vsub.f32 %v644_v30, %v3427_v21  ;;  %16858 = vst [vmem:[#allocation272_spill] sm:$0xff] %v11738_v33  ;;  %v11747_v30 = vsub.f32 %v643_v36, %v3429_v0  ;;  %v3441_v21 = vand.u32 4294901760, %v649_v15  ;;  %v3449_v51 = vand.u32 4294901760, %v653_v37  ;;  %v664_v49 = vld [vmem:[#allocation6 + $0x5f8] sm:$0xff] }
 0x1da   :  { %8102 = vmatpush1.bf16.msra.mxu0 %v11700_v2  ;;  %v656_v2 = vld [vmem:[#allocation6 + $0x5b8] sm:$0xff]  ;;  %16860 = vst [vmem:[#allocation273_spill] sm:$0xff] %v11749_v24  ;;  %v11756_v19 = vpack.c.bf16 %v3437_v17, %v3433_v10  ;;  %v11758_v13 = vsub.f32 %v645_v48, %v3433_v10  ;;  %v11761_v36 = vsub.f32 %v647_v29, %v3437_v17  ;;  %v3453_v9 = vand.u32 4294901760, %v655_v22 }
 0x1db   :  { %8104 = vmatprep.subr.bf16.mxu0 %v11711_v54  ;;  %16856 = vst [vmem:[#allocation271_spill] sm:$0xff] %v11735_v43  ;;  %v11763_v0 = vpack.c.bf16 %v3443_v12, %v3439_v20  ;;  %v3447_v54 = vand.u32 4294901760, %v654_v31  ;;  %v16864_v29 = vld [vmem:[#allocation142_spill] sm:$0xff]  ;;  %v11771_v17 = vsub.f32 %v650_v50, %v3439_v20  ;;  %v11773_v10 = vsub.f32 %v652_v44, %v3443_v12  ;;  %v662_v43 = vld [vmem:[#allocation6 + $0x5e8] sm:$0xff] }
 0x1dc   :  { %7526 = vmatpush1.bf16.msra.mxu1 %v16857_v63  ;;  %v3445_v63 = vand.u32 4294901760, %v651_v57  ;;  %16861 = vst [vmem:[#allocation274_spill] sm:$0xff] %v11756_v19  ;;  %v11777_v11 = vsub.f32 %v649_v15, %v3441_v21  ;;  %v3455_v53 = vand.u32 4294901760, %v658_v59  ;;  %v3459_v26 = vand.u32 4294901760, %v660_v56  ;;  %v16872_v15 = vld [vmem:[#allocation145_spill] sm:$0xff] }
 0x1dd   :  { %7528 = vmatprep.subr.bf16.mxu1 %v16859_v1  ;;  %16862 = vst [vmem:[#allocation275_spill] sm:$0xff] %v11763_v0  ;;  %v3451_v1 = vand.u32 4294901760, %v656_v2  ;;  %16865 = vst [vmem:[#allocation276_spill] sm:$0xff] %v11773_v10  ;;  %v3457_v58 = vand.u32 4294901760, %v657_v8  ;;  %v11785_v50 = vsub.f32 %v654_v31, %v3447_v54  ;;  %v3461_v20 = vand.u32 4294901760, %v659_v4 }
 0x1de   :  { %8106 = vmatpush1.bf16.msra.mxu0 %v11723_v35  ;;  %v16863_v35 = vld [vmem:[#allocation133_spill] sm:$0xff]  ;;  %16867 = vst [vmem:[#allocation278_spill] sm:$0xff] %v11777_v11  ;;  %v11790_v12 = vpack.c.bf16 %v3453_v9, %v3449_v51  ;;  %v3467_v31 = vand.u32 4294901760, %v664_v49 }
 0x1df   :  { %8108 = vmatprep.subr.bf16.mxu0 %v11730_v6  ;;  %v11775_v6 = vpack.c.bf16 %v3445_v63, %v3441_v21  ;;  %v11783_v48 = vpack.c.bf16 %v3451_v1, %v3447_v54  ;;  %16870 = vst [vmem:[#allocation281_spill] sm:$0xff] %v11785_v50  ;;  %v11787_v44 = vsub.f32 %v656_v2, %v3451_v1  ;;  %v663_v21 = vld [vmem:[#allocation6 + $0x5f0] sm:$0xff]  ;;  %v3463_v2 = vand.u32 4294901760, %v662_v43 }
 0x1e0   :  { %7530 = vmatpush1.bf16.msra.mxu1 %v16863_v35  ;;  %v11780_v35 = vsub.f32 %v651_v57, %v3445_v63  ;;  %16873 = vst [vmem:[#allocation283_spill] sm:$0xff] %v11790_v12  ;;  %v11792_v57 = vsub.f32 %v653_v37, %v3449_v51  ;;  %v661_v63 = vld [vmem:[#allocation6 + $0x5e0] sm:$0xff]  ;;  %v11799_v54 = vsub.f32 %v655_v22, %v3453_v9 }
 0x1e1   :  { %7532 = vmatprep.subr.bf16.mxu1 %v16864_v29  ;;  %16866 = vst [vmem:[#allocation277_spill] sm:$0xff] %v11775_v6  ;;  %16869 = vst [vmem:[#allocation280_spill] sm:$0xff] %v11783_v48  ;;  %v16875_v29 = vld [vmem:[#allocation154_spill] sm:$0xff]  ;;  %v11803_v1 = vsub.f32 %v11444_v25, %v11708_v3  ;;  %v11806_v37 = vpack.c.bf16 %v3459_v26, %v3455_v53  ;;  %v11808_v51 = vsub.f32 %v658_v59, %v3455_v53  ;;  %v16882_v25 = vld [vmem:[#allocation157_spill] sm:$0xff] }
 0x1e2   :  { %8110 = vmatpush1.bf16.msra.mxu0 %v11738_v33  ;;  %16868 = vst [vmem:[#allocation279_spill] sm:$0xff] %v11780_v35  ;;  %16871 = vst [vmem:[#allocation282_spill] sm:$0xff] %v11787_v44  ;;  %v11813_v22 = vsub.f32 %v660_v56, %v3459_v26  ;;  %v11815_v9 = vpack.c.bf16 %v3461_v20, %v3457_v58  ;;  %v11825_v26 = vsub.f32 %v657_v8, %v3457_v58 }
 0x1e3   :  { %8112 = vmatprep.subr.bf16.mxu0 %v11749_v24  ;;  %16874 = vst [vmem:[#allocation284_spill] sm:$0xff] %v11792_v57  ;;  %16876 = vst [vmem:[#allocation285_spill] sm:$0xff] %v11799_v54  ;;  %v16883_v24 = vld [vmem:[#allocation166_spill] sm:$0xff]  ;;  %v11827_v56 = vsub.f32 %v659_v4, %v3461_v20  ;;  %v11829_v33 = vpack.c.bf16 %v3467_v31, %v3463_v2  ;;  %v16887_v3 = vand.u32 4294901760, %v11653_v52  ;;  %v16888_v53 = vand.u32 4294901760, %v11663_v42 }
 0x1e4   :  { %7534 = vmatpush1.bf16.msra.mxu1 %v16872_v15  ;;  %16877 = vst [vmem:[#allocation286_spill] sm:$0xff] %v11803_v1  ;;  %16878 = vst [vmem:[#allocation287_spill] sm:$0xff] %v11806_v37  ;;  %v3469_v15 = vand.u32 4294901760, %v663_v21  ;;  %v11842_v4 = vsub.f32 %v662_v43, %v3463_v2  ;;  %v11844_v58 = vsub.f32 %v664_v49, %v3467_v31  ;;  %v16896_v2 = vld [vmem:[#allocation178_spill] sm:$0xff]  ;;  %v16899_v43 = vand.u32 4294901760, %v11533_v41 }
 0x1e5   :  { %7536 = vmatprep.subr.bf16.mxu1 %v16875_v29  ;;  %16879 = vst [vmem:[#allocation288_spill] sm:$0xff] %v11808_v51  ;;  %16880 = vst [vmem:[#allocation289_spill] sm:$0xff] %v11813_v22  ;;  %v3465_v29 = vand.u32 4294901760, %v661_v63  ;;  %v3503_v59 = vsub.f32 %v11663_v42, %v16888_v53 }
 0x1e6   :  { %8114 = vmatpush1.bf16.msra.mxu0 %v11756_v19  ;;  %16881 = vst [vmem:[#allocation290_spill] sm:$0xff] %v11815_v9  ;;  %16884 = vst [vmem:[#allocation291_spill] sm:$0xff] %v11825_v26  ;;  %v3491_v19 = vsub.f32 %v11653_v52, %v16887_v3  ;;  %v16894_v3 = vand.u32 4294901760, %v11680_v39  ;;  %v3515_v49 = vsub.f32 %v11533_v41, %v16899_v43 }
 0x1e7   :  { %8116 = vmatprep.subr.bf16.mxu0 %v11763_v0  ;;  %16885 = vst [vmem:[#allocation292_spill] sm:$0xff] %v11827_v56  ;;  %16886 = vst [vmem:[#allocation293_spill] sm:$0xff] %v11829_v33  ;;  %v11846_v20 = vpack.c.bf16 %v3469_v15, %v3465_v29  ;;  %v11848_v0 = vsub.f32 %v661_v63, %v3465_v29  ;;  %v11862_v29 = vsub.f32 %v663_v21, %v3469_v15 }
 0x1e8   :  { %7538 = vmatpush1.bf16.msra.mxu1 %v16882_v25  ;;  %16889 = vst [vmem:[#allocation294_spill] sm:$0xff] %v11842_v4  ;;  %16890 = vst [vmem:[#allocation295_spill] sm:$0xff] %v11844_v58  ;;  %v3497_v53 = vsub.f32 %v11680_v39, %v16894_v3  ;;  %v16898_v63 = vand.u32 4294901760, %v11803_v1  ;;  %v16901_v21 = vand.u32 4294901760, %v16676_v62  ;;  %v3516_v43 = vand.u32 4294901760, %v3515_v49 }
 0x1e9   :  { %7540 = vmatprep.subr.bf16.mxu1 %v16883_v24  ;;  %16891 = vst [vmem:[#allocation296_spill] sm:$0xff] %v11846_v20  ;;  %16892 = vst [vmem:[#allocation297_spill] sm:$0xff] %v11848_v0  ;;  %v16895_v24 = vand.u32 4294901760, %v11688_v28 }
 0x1ea   :  { %8118 = vmatpush1.bf16.msra.mxu0 %v11775_v6  ;;  %v16893_v6 = vld [vmem:[#allocation169_spill] sm:$0xff]  ;;  %16897 = vst [vmem:[#allocation298_spill] sm:$0xff] %v11862_v29  ;;  %v3480_v31 = vsub.f32 %v11803_v1, %v16898_v63  ;;  %v16902_v63 = vand.u32 4294901760, %v16677_v34 }
 0x1eb   :  { %8120 = vmatprep.subr.bf16.mxu0 %v11783_v48  ;;  %v3509_v8 = vsub.f32 %v11688_v28, %v16895_v24  ;;  %v3492_v24 = vand.u32 4294901760, %v3491_v19  ;;  %v16903_v48 = vand.u32 4294901760, %v16679_v61  ;;  %v16904_v19 = vand.u32 4294901760, %v16680_v46  ;;  %v16905_v1 = vld [vmem:[#allocation181_spill] sm:$0xff] }
 0x1ec   :  { %7542 = vmatpush1.bf16.msra.mxu1 %v16893_v6  ;;  %v3504_v6 = vand.u32 4294901760, %v3503_v59  ;;  %v7555_v3 = vpack.c.bf16 %v16902_v63, %v16901_v21  ;;  %v16906_v21 = vld [vmem:[#allocation190_spill] sm:$0xff]  ;;  %v16907_v61 = vand.u32 4294901760, %v11540_v5 }
 0x1ed   :  { %7544 = vmatprep.subr.bf16.mxu1 %v16896_v2  ;;  %v16900_v2 = vand.u32 4294901760, %v11535_v32  ;;  %v11885_v59 = vpack.c.bf16 %v16904_v19, %v16903_v48  ;;  %v3510_v25 = vand.u32 4294901760, %v3509_v8  ;;  %v16908_v48 = vand.u32 4294901760, %v11542_v38 }
 0x1ee   :  { %8122 = vmatpush1.bf16.msra.mxu0 %v11790_v12  ;;  %v15543_v12 = vand.u32 4294901760, %v11556_v23  ;;  %v3521_v46 = vsub.f32 %v11540_v5, %v16907_v61  ;;  %v8131_v62 = vpack.c.bf16 %v3504_v6, %v3492_v24  ;;  %v16912_v19 = vand.u32 4294901760, %v11563_v45 }
 0x1ef   :  { %v3527_v15 = vsub.f32 %v11535_v32, %v16900_v2  ;;  %8124 = vmatprep.subr.bf16.mxu0 %v11806_v37  ;;  %v3498_v2 = vand.u32 4294901760, %v3497_v53  ;;  %v3533_v63 = vsub.f32 %v11542_v38, %v16908_v48  ;;  %v3481_v53 = vand.u32 4294901760, %v3480_v31  ;;  %v16914_v31 = vld [vmem:[#allocation222_spill] sm:$0xff]  ;;  %v16959_v38 = vld [vmem:[#allocation103_spill] sm:$0xff] }
 0x1f0   :  { %7546 = vmatpush1.bf16.msra.mxu1 %v16905_v1  ;;  %v3539_v61 = vsub.f32 %v11556_v23, %v15543_v12  ;;  %v16909_v37 = vand.u32 4294901760, %v11558_v27  ;;  %v3522_v12 = vand.u32 4294901760, %v3521_v46  ;;  %v3545_v8 = vsub.f32 %v11563_v45, %v16912_v19  ;;  %v16915_v1 = vld [vmem:[#allocation224_spill] sm:$0xff] }
 0x1f1   :  { %7548 = vmatprep.subr.bf16.mxu1 %v16906_v21  ;;  %v3528_v34 = vand.u32 4294901760, %v3527_v15  ;;  %v16910_v21 = vld [vmem:[#allocation193_spill] sm:$0xff]  ;;  %v16911_v15 = vld [vmem:[#allocation202_spill] sm:$0xff]  ;;  %v8133_v49 = vpack.c.bf16 %v3510_v25, %v3498_v2  ;;  %v16917_v19 = vand.u32 4294901760, %v11578_v18  ;;  %v16923_v24 = vand.u32 4294901760, %v11583_v14 }
 0x1f2   :  { %8126 = vmatpush1.bf16.msra.mxu0 %v11815_v9  ;;  %v3551_v48 = vsub.f32 %v11558_v27, %v16909_v37  ;;  %v3534_v37 = vand.u32 4294901760, %v3533_v63  ;;  %v16916_v63 = vand.u32 4294901760, %v11576_v7 }
 0x1f3   :  { %8128 = vmatprep.subr.bf16.mxu0 %v11829_v33  ;;  %v16913_v33 = vand.u32 4294901760, %v11565_v55  ;;  %v8135_v9 = vpack.c.bf16 %v3528_v34, %v3516_v43  ;;  %v3575_v45 = vsub.f32 %v11578_v18, %v16917_v19  ;;  %v16921_v43 = vld [vmem:[#allocation86_spill] sm:$0xff]  ;;  %v16926_v18 = vld [vmem:[#allocation228_spill] sm:$0xff] }
 0x1f4   :  { %7550 = vmatpush1.bf16.msra.mxu1 %v16910_v21  ;;  %v3552_v46 = vand.u32 4294901760, %v3551_v48  ;;  %v3563_v23 = vsub.f32 %v11576_v7, %v16916_v63  ;;  %v16922_v2 = vand.u32 4294901760, %v16921_v43  ;;  %v16925_v63 = vld [vmem:[#allocation226_spill] sm:$0xff]  ;;  %v8137_v19 = vpack.c.bf16 %v3534_v37, %v3522_v12  ;;  %v16936_v37 = vld [vmem:[#allocation88_spill] sm:$0xff] }
 0x1f5   :  { %7552 = vmatprep.subr.bf16.mxu1 %v16911_v15  ;;  %v3557_v6 = vsub.f32 %v11565_v55, %v16913_v33  ;;  %v3540_v15 = vand.u32 4294901760, %v3539_v61  ;;  %v16918_v33 = vld [vmem:[#allocation205_spill] sm:$0xff]  ;;  %v16924_v61 = vand.u32 4294901760, %v11585_v16  ;;  %v3546_v7 = vand.u32 4294901760, %v3545_v8  ;;  %v16927_v43 = vld [vmem:[#allocation210_spill] sm:$0xff] }
 0x1f6   :  { %8130 = vmatpush1.bf16.msra.mxu0 %v11846_v20  ;;  %v16919_v20 = vld [vmem:[#allocation85_spill] sm:$0xff]  ;;  %v16932_v12 = vld [vmem:[#allocation242_spill] sm:$0xff]  ;;  %v3564_v55 = vand.u32 4294901760, %v3563_v23  ;;  %v16944_v23 = vand.u32 4294901760, %v16926_v18 }
 0x1f7   :  { %8132 = vmatprep.subr.bf16.mxu0 %v8131_v62  ;;  %v16920_v25 = vand.u32 4294901760, %v16919_v20  ;;  %v3569_v62 = vsub.f32 %v11583_v14, %v16923_v24  ;;  %v3581_v48 = vsub.f32 %v11585_v16, %v16924_v61  ;;  %v16930_v14 = vld [vmem:[#allocation234_spill] sm:$0xff]  ;;  %v16933_v8 = vand.u32 4294901760, %v16932_v12 }
 0x1f8   :  { %7554 = vmatpush1.bf16.msra.mxu1 %v16918_v33  ;;  %v3558_v33 = vand.u32 4294901760, %v3557_v6  ;;  %v16934_v6 = vld [vmem:[#allocation87_spill] sm:$0xff]  ;;  %v16937_v20 = vand.u32 4294901760, %v16936_v37  ;;  %v8139_v16 = vpack.c.bf16 %v3552_v46, %v3540_v15  ;;  %v16946_v46 = vld [vmem:[#allocation248_spill] sm:$0xff]  ;;  %v16953_v15 = vld [vmem:[#allocation78_spill] sm:$0xff] }
 0x1f9   :  { %v7559_v34 = vpack.c.bf16 %v16922_v2, %v16920_v25  ;;  %3482 = vmatmul.mubr.f32.vlgmr.msra.gmra.mrb[0].mxu0 %v3481_v53  ;;  %7556 = vmatprep.subr.bf16.mxu1 %v7555_v3  ;;  %v16928_v25 = vand.u32 4294901760, %v16914_v31  ;;  %v16929_v2 = vand.u32 4294901760, %v16915_v1  ;;  %v16931_v53 = vld [vmem:[#allocation237_spill] sm:$0xff]  ;;  %v3570_v12 = vand.u32 4294901760, %v3569_v62 }
 0x1fa   :  { %8134 = vmatpush1.bf16.msra.mxu0 %v8133_v49  ;;  %3873 = vmatprep.mubr.f32.mxu0 %v16927_v43  ;;  %v16935_v49 = vand.u32 4294901760, %v16934_v6 }
 0x1fb   :  { %v3587_v24 = vsub.f32 %v16914_v31, %v16928_v25  ;;  %v3599_v61 = vsub.f32 %v16915_v1, %v16929_v2  ;;  %1651 = vmatmul.mubr.f32.vlgmr.msra.gmra.mrb[0].mxu1 %v16933_v8  ;;  %8136 = vmatprep.subr.bf16.mxu0 %v8135_v9  ;;  %v3576_v25 = vand.u32 4294901760, %v3575_v45  ;;  %v16938_v31 = vld [vmem:[#allocation241_spill] sm:$0xff]  ;;  %v16941_v1 = vld [vmem:[#allocation94_spill] sm:$0xff]  ;;  %v3582_v8 = vand.u32 4294901760, %v3581_v48 }
 0x1fc   :  { %v7561_v43 = vpack.c.bf16 %v16937_v20, %v16935_v49  ;;  %7558 = vmatpush1.bf16.msra.mxu1 %v11885_v59  ;;  %1914 = vmatprep.mubr.f32.mxu1 %v16938_v31  ;;  %v16939_v2 = vld [vmem:[#allocation93_spill] sm:$0xff]  ;;  %v16942_v3 = vand.u32 4294901760, %v16941_v1  ;;  %v16943_v9 = vand.u32 4294901760, %v16925_v63  ;;  %v8141_v20 = vpack.c.bf16 %v3558_v33, %v3546_v7  ;;  %v16945_v59 = vld [vmem:[#allocation246_spill] sm:$0xff]  ;;  %v16949_v7 = vld [vmem:[#allocation95_spill] sm:$0xff] }
 0x1fd   :  { %v16940_v21 = vand.u32 4294901760, %v16939_v2  ;;  %7560 = vmatprep.subr.bf16.mxu1 %v7559_v34  ;;  %v3605_v45 = vsub.f32 %v16926_v18, %v16944_v23  ;;  %v3588_v37 = vand.u32 4294901760, %v3587_v24  ;;  %v3600_v1 = vand.u32 4294901760, %v3599_v61 }
 0x1fe   :  { %v3593_v6 = vsub.f32 %v16925_v63, %v16943_v9  ;;  %8138 = vmatpush1.bf16.msra.mxu0 %v8137_v19  ;;  %v16948_v48 = vand.u32 4294901760, %v16931_v53  ;;  %v16950_v33 = vand.u32 4294901760, %v16949_v7  ;;  %v8143_v23 = vpack.c.bf16 %v3576_v25, %v3564_v55  ;;  %v16954_v19 = vld [vmem:[#allocation79_spill] sm:$0xff]  ;;  %v16955_v63 = vld [vmem:[#allocation101_spill] sm:$0xff] }
 0x1ff   :  { %v7563_v27 = vpack.c.bf16 %v16942_v3, %v16940_v21  ;;  %v16947_v21 = vand.u32 4294901760, %v16930_v14  ;;  %8140 = vmatprep.subr.bf16.mxu0 %v8139_v16  ;;  %v16951_v3 = vld [vmem:[#allocation96_spill] sm:$0xff]  ;;  %v15576_v49 = vand.u32 4294901760, %v16953_v15  ;;  %v15579_v24 = vand.u32 4294901760, %v16954_v19 }
 0x200   :  { %v3623_v34 = vsub.f32 %v16931_v53, %v16948_v48  ;;  %v16952_v2 = vand.u32 4294901760, %v16951_v3  ;;  %7562 = vmatpush1.bf16.msra.mxu1 %v7561_v43  ;;  %v8145_v61 = vpack.c.bf16 %v3582_v8, %v3570_v12  ;;  %v16956_v18 = vand.u32 4294901760, %v16955_v63  ;;  %v16961_v16 = vld [vmem:[#allocation104_spill] sm:$0xff]  ;;  %v16966_v8 = vld [vmem:[#allocation249_spill] sm:$0xff] }
 0x201   :  { %v3611_v62 = vsub.f32 %v16930_v14, %v16947_v21  ;;  %v16957_v21 = vld [vmem:[#allocation102_spill] sm:$0xff]  ;;  %v16960_v48 = vand.u32 4294901760, %v16959_v38  ;;  %v16962_v53 = vand.u32 4294901760, %v16961_v16  ;;  %v3594_v31 = vand.u32 4294901760, %v3593_v6  ;;  %7564 = vmatprep.subr.bf16.mxu1 %v7563_v27  ;;  %v16965_v12 = vld [vmem:[#allocation244_spill] sm:$0xff]  ;;  %v16967_v6 = vld [vmem:[#allocation251_spill] sm:$0xff] }
 0x202   :  { %v7565_v9 = vpack.c.bf16 %v16952_v2, %v16950_v33  ;;  %v16958_v14 = vand.u32 4294901760, %v16957_v21  ;;  %v16963_v55 = vand.u32 4294901760, %v16945_v59  ;;  %v16964_v33 = vand.u32 4294901760, %v16946_v46  ;;  %8142 = vmatpush1.bf16.msra.mxu0 %v8141_v20 }
 0x203   :  { %v7569_v7 = vpack.c.bf16 %v16962_v53, %v16960_v48  ;;  %v3606_v38 = vand.u32 4294901760, %v3605_v45  ;;  %v3624_v2 = vand.u32 4294901760, %v3623_v34  ;;  %8144 = vmatprep.subr.bf16.mxu0 %v8143_v23  ;;  %v3635_v27 = vsub.f32 %v16953_v15, %v15576_v49  ;;  %v16968_v48 = vld [vmem:[#allocation252_spill] sm:$0xff]  ;;  %v16977_v49 = vld [vmem:[#allocation254_spill] sm:$0xff]  ;;  %v16978_v15 = vld [vmem:[#allocation255_spill] sm:$0xff] }
 0x204   :  { %v7567_v5 = vpack.c.bf16 %v16958_v14, %v16956_v18  ;;  %v3617_v25 = vsub.f32 %v16945_v59, %v16963_v55  ;;  %v3629_v43 = vsub.f32 %v16946_v46, %v16964_v33  ;;  %v8147_v18 = vpack.c.bf16 %v3600_v1, %v3588_v37  ;;  %7566 = vmatpush1.bf16.msra.mxu1 %v7565_v9  ;;  %v16969_v55 = vld [vmem:[#allocation109_spill] sm:$0xff]  ;;  %v16971_v37 = vld [vmem:[#allocation110_spill] sm:$0xff]  ;;  %v16975_v23 = vld [vmem:[#allocation112_spill] sm:$0xff] }
 0x205   :  { %v3612_v14 = vand.u32 4294901760, %v3611_v62  ;;  %v3647_v53 = vsub.f32 %v16954_v19, %v15579_v24  ;;  %v16970_v20 = vand.u32 4294901760, %v16969_v55  ;;  %v16972_v45 = vand.u32 4294901760, %v16971_v37  ;;  %v16973_v62 = vld [vmem:[#allocation111_spill] sm:$0xff] }
 0x206   :  { %v16974_v34 = vand.u32 4294901760, %v16973_v62  ;;  %v16976_v33 = vand.u32 4294901760, %v16975_v23  ;;  %7568 = vmatprep.subr.bf16.mxu1 %v7567_v5  ;;  %v3618_v24 = vand.u32 4294901760, %v3617_v25  ;;  %v3630_v21 = vand.u32 4294901760, %v3629_v43  ;;  %8146 = vmatpush1.bf16.msra.mxu0 %v8145_v61  ;;  %v16981_v62 = vld [vmem:[#allocation257_spill] sm:$0xff]  ;;  %v16982_v23 = vld [vmem:[#allocation258_spill] sm:$0xff] }
 0x207   :  { %v7571_v1 = vpack.c.bf16 %v16972_v45, %v16970_v20  ;;  %v16979_v16 = vand.u32 4294901760, %v16965_v12  ;;  %v16980_v55 = vand.u32 4294901760, %v16966_v8  ;;  %v8149_v37 = vpack.c.bf16 %v3606_v38, %v3594_v31  ;;  %8148 = vmatprep.subr.bf16.mxu0 %v8147_v18  ;;  %v16987_v31 = vld [vmem:[#allocation118_spill] sm:$0xff] }
 0x208   :  { %v7573_v3 = vpack.c.bf16 %v16976_v33, %v16974_v34  ;;  %v8151_v45 = vpack.c.bf16 %v3624_v2, %v3612_v14  ;;  %v3636_v59 = vand.u32 4294901760, %v3635_v27  ;;  %v3648_v5 = vand.u32 4294901760, %v3647_v53  ;;  %7570 = vmatpush1.bf16.msra.mxu1 %v7569_v7  ;;  %v16991_v33 = vld [vmem:[#allocation260_spill] sm:$0xff]  ;;  %v16992_v7 = vld [vmem:[#allocation261_spill] sm:$0xff] }
 0x209   :  { %v3641_v9 = vsub.f32 %v16965_v12, %v16979_v16  ;;  %v3653_v20 = vsub.f32 %v16966_v8, %v16980_v55  ;;  %v16983_v25 = vand.u32 4294901760, %v16967_v6  ;;  %v16984_v16 = vand.u32 4294901760, %v16968_v48  ;;  %v16985_v55 = vld [vmem:[#allocation117_spill] sm:$0xff]  ;;  %7572 = vmatprep.subr.bf16.mxu1 %v7571_v1  ;;  %v16997_v1 = vld [vmem:[#allocation119_spill] sm:$0xff] }
 0x20a   :  { %v16986_v61 = vand.u32 4294901760, %v16985_v55  ;;  %v16988_v38 = vand.u32 4294901760, %v16987_v31  ;;  %v16989_v2 = vand.u32 4294901760, %v16977_v49  ;;  %v16990_v27 = vand.u32 4294901760, %v16978_v15  ;;  %8150 = vmatpush1.bf16.msra.mxu0 %v8149_v37  ;;  %v17001_v12 = vld [vmem:[#allocation45_spill] sm:$0xff] }
 0x20b   :  { %v3659_v43 = vsub.f32 %v16967_v6, %v16983_v25  ;;  %v3671_v63 = vsub.f32 %v16968_v48, %v16984_v16  ;;  %v8153_v34 = vpack.c.bf16 %v3630_v21, %v3618_v24  ;;  %v3642_v6 = vand.u32 4294901760, %v3641_v9  ;;  %8152 = vmatprep.subr.bf16.mxu0 %v8151_v45  ;;  %v16999_v21 = vld [vmem:[#allocation37_spill] sm:$0xff] }
 0x20c   :  { %v7575_v14 = vpack.c.bf16 %v16988_v38, %v16986_v61  ;;  %v3665_v18 = vsub.f32 %v16977_v49, %v16989_v2  ;;  %v3677_v53 = vsub.f32 %v16978_v15, %v16990_v27  ;;  %v3654_v16 = vand.u32 4294901760, %v3653_v20  ;;  %v16995_v2 = vld [vmem:[#allocation264_spill] sm:$0xff]  ;;  %v16996_v27 = vld [vmem:[#allocation265_spill] sm:$0xff]  ;;  %7574 = vmatpush1.bf16.msra.mxu1 %v7573_v3 }
 0x20d   :  { %v16993_v55 = vand.u32 4294901760, %v16981_v62  ;;  %v16994_v31 = vand.u32 4294901760, %v16982_v23  ;;  %v15592_v15 = vand.u32 4294901760, %v16996_v27  ;;  %v16998_v24 = vand.u32 4294901760, %v16997_v1  ;;  %v17008_v3 = vld [vmem:[#allocation268_spill] sm:$0xff] }
 0x20e   :  { %v17000_v9 = vand.u32 4294901760, %v16999_v21  ;;  %v8155_v48 = vpack.c.bf16 %v3648_v5, %v3636_v59  ;;  %v3660_v37 = vand.u32 4294901760, %v3659_v43  ;;  %v3672_v25 = vand.u32 4294901760, %v3671_v63  ;;  %7576 = vmatprep.subr.bf16.mxu1 %v7575_v14  ;;  %v17007_v5 = vld [vmem:[#allocation267_spill] sm:$0xff]  ;;  %8154 = vmatpush1.bf16.msra.mxu0 %v8153_v34  ;;  %v17016_v43 = vld [vmem:[#allocation57_spill] sm:$0xff] }
 0x20f   :  { %v3683_v61 = vsub.f32 %v16981_v62, %v16993_v55  ;;  %v3695_v38 = vsub.f32 %v16982_v23, %v16994_v31  ;;  %v17002_v55 = vand.u32 4294901760, %v17001_v12  ;;  %v17003_v62 = vld [vmem:[#allocation46_spill] sm:$0xff]  ;;  %v3666_v31 = vand.u32 4294901760, %v3665_v18  ;;  %v17015_v34 = vld [vmem:[#allocation271_spill] sm:$0xff] }
 0x210   :  { %v7577_v20 = vpack.c.bf16 %v17000_v9, %v16998_v24  ;;  %v17004_v8 = vand.u32 4294901760, %v17003_v62  ;;  %v3678_v23 = vand.u32 4294901760, %v3677_v53  ;;  %v17005_v49 = vand.u32 4294901760, %v16991_v33  ;;  %8156 = vmatprep.subr.bf16.mxu0 %v8155_v48  ;;  %v17012_v53 = vld [vmem:[#allocation49_spill] sm:$0xff] }
 0x211   :  { %v8157_v1 = vpack.c.bf16 %v3654_v16, %v3642_v6  ;;  %v17006_v21 = vand.u32 4294901760, %v16992_v7  ;;  %v3684_v12 = vand.u32 4294901760, %v3683_v61  ;;  %v3696_v62 = vand.u32 4294901760, %v3695_v38  ;;  %v17010_v6 = vld [vmem:[#allocation48_spill] sm:$0xff]  ;;  %v17022_v48 = vld [vmem:[#allocation61_spill] sm:$0xff] }
 0x212   :  { %v7579_v19 = vpack.c.bf16 %v17004_v8, %v17002_v55  ;;  %v3689_v45 = vsub.f32 %v16991_v33, %v17005_v49  ;;  %v17009_v8 = vand.u32 4294901760, %v16995_v2  ;;  %v3719_v49 = vsub.f32 %v16996_v27, %v15592_v15  ;;  %v17014_v55 = vld [vmem:[#allocation270_spill] sm:$0xff]  ;;  %7578 = vmatpush1.bf16.msra.mxu1 %v7577_v20 }
 0x213   :  { %v3701_v59 = vsub.f32 %v16992_v7, %v17006_v21  ;;  %v17011_v14 = vand.u32 4294901760, %v17010_v6  ;;  %v17013_v16 = vand.u32 4294901760, %v17012_v53  ;;  %v8159_v9 = vpack.c.bf16 %v3672_v25, %v3660_v37  ;;  %v17020_v7 = vld [vmem:[#allocation60_spill] sm:$0xff]  ;;  %8158 = vmatpush1.bf16.msra.mxu0 %v8157_v1  ;;  %v17026_v53 = vld [vmem:[#allocation121_spill] sm:$0xff] }
 0x214   :  { %v3707_v18 = vsub.f32 %v16995_v2, %v17009_v8  ;;  %v15603_v21 = vand.u32 4294901760, %v17014_v55  ;;  %v15595_v61 = vand.u32 4294901760, %v17015_v34  ;;  %v8161_v38 = vpack.c.bf16 %v3678_v23, %v3666_v31  ;;  %v17018_v8 = vld [vmem:[#allocation58_spill] sm:$0xff]  ;;  %7580 = vmatprep.subr.bf16.mxu1 %v7579_v19 }
 0x215   :  { %v7581_v24 = vpack.c.bf16 %v17013_v16, %v17011_v14  ;;  %v17017_v63 = vand.u32 4294901760, %v17016_v43  ;;  %v17019_v2 = vand.u32 4294901760, %v17018_v8  ;;  %v17021_v15 = vand.u32 4294901760, %v17020_v7  ;;  %8160 = vmatprep.subr.bf16.mxu0 %v8159_v9  ;;  %v17032_v16 = vld [vmem:[#allocation123_spill] sm:$0xff] }
 0x216   :  { %v17023_v27 = vand.u32 4294901760, %v17022_v48  ;;  %v3690_v46 = vand.u32 4294901760, %v3689_v45  ;;  %v17024_v25 = vand.u32 4294901760, %v17007_v5  ;;  %v17025_v14 = vand.u32 4294901760, %v17008_v3 }
 0x217   :  { %v7583_v33 = vpack.c.bf16 %v17019_v2, %v17017_v63  ;;  %v15602_v20 = vand.u32 4294901760, %v11740_v47  ;;  %v15601_v31 = vand.u32 4294901760, %v11747_v30  ;;  %v8163_v2 = vpack.c.bf16 %v3696_v62, %v3684_v12  ;;  %7582 = vmatpush1.bf16.msra.mxu1 %v7581_v24  ;;  %v17028_v12 = vld [vmem:[#allocation68_spill] sm:$0xff]  ;;  %8162 = vmatpush1.bf16.msra.mxu0 %v8161_v38 }
 0x218   :  { %v7585_v6 = vpack.c.bf16 %v17023_v27, %v17021_v15  ;;  %v3713_v37 = vsub.f32 %v17007_v5, %v17024_v25  ;;  %v3725_v23 = vsub.f32 %v17008_v3, %v17025_v14  ;;  %v3702_v7 = vand.u32 4294901760, %v3701_v59 }
 0x219   :  { %v3708_v63 = vand.u32 4294901760, %v3707_v18  ;;  %v3720_v43 = vand.u32 4294901760, %v3719_v49  ;;  %v3731_v15 = vsub.f32 %v17014_v55, %v15603_v21  ;;  %v3743_v19 = vsub.f32 %v17015_v34, %v15595_v61  ;;  %v17030_v18 = vld [vmem:[#allocation122_spill] sm:$0xff]  ;;  %7584 = vmatprep.subr.bf16.mxu1 %v7583_v33  ;;  %8164 = vmatprep.subr.bf16.mxu0 %v8163_v2 }
 0x21a   :  { %v15599_v27 = vand.u32 4294901760, %v11752_v40  ;;  %v15596_v45 = vand.u32 4294901760, %v11754_v60  ;;  %v17027_v1 = vand.u32 4294901760, %v17026_v53  ;;  %v17029_v59 = vand.u32 4294901760, %v17028_v12 }
 0x21b   :  { %v17031_v49 = vand.u32 4294901760, %v17030_v18  ;;  %v17033_v9 = vand.u32 4294901760, %v17032_v16  ;;  %v15598_v48 = vand.u32 4294901760, %v11758_v13  ;;  %v15597_v25 = vand.u32 4294901760, %v11761_v36  ;;  %7586 = vmatpush1.bf16.msra.mxu1 %v7585_v6  ;;  %v17034_v16 = vld [vmem:[#allocation131_spill] sm:$0xff] }
 0x21c   :  { %v7587_v62 = vpack.c.bf16 %v17029_v59, %v17027_v1  ;;  %v3714_v14 = vand.u32 4294901760, %v3713_v37  ;;  %v3726_v61 = vand.u32 4294901760, %v3725_v23  ;;  %v3737_v24 = vsub.f32 %v11740_v47, %v15602_v20 }
 0x21d   :  { %v7589_v8 = vpack.c.bf16 %v17033_v9, %v17031_v49  ;;  %v3749_v53 = vsub.f32 %v11747_v30, %v15601_v31  ;;  %v8165_v1 = vpack.c.bf16 %v3702_v7, %v3690_v46  ;;  %v8167_v12 = vpack.c.bf16 %v3720_v43, %v3708_v63  ;;  %v17036_v46 = vld [vmem:[#allocation132_spill] sm:$0xff] }
 0x21e   :  { %v15600_v59 = vand.u32 4294901760, %v11771_v17  ;;  %v15604_v18 = vand.u32 4294901760, %v11773_v10  ;;  %v3732_v49 = vand.u32 4294901760, %v3731_v15  ;;  %v3744_v33 = vand.u32 4294901760, %v3743_v19  ;;  %7588 = vmatprep.subr.bf16.mxu1 %v7587_v62  ;;  %v17038_v62 = vld [vmem:[#allocation134_spill] sm:$0xff]  ;;  %v17044_v31 = vld [vmem:[#allocation144_spill] sm:$0xff] }
 0x21f   :  { %v3755_v37 = vsub.f32 %v11752_v40, %v15599_v27  ;;  %v3767_v23 = vsub.f32 %v11754_v60, %v15596_v45  ;;  %v17035_v38 = vand.u32 4294901760, %v17034_v16  ;;  %v17037_v7 = vand.u32 4294901760, %v17036_v46  ;;  %8166 = vmatpush1.bf16.msra.mxu0 %v8165_v1  ;;  %7590 = vmatpush1.bf16.msra.mxu1 %v7589_v8  ;;  %v17042_v27 = vld [vmem:[#allocation143_spill] sm:$0xff] }
 0x220   :  { %v3761_v2 = vsub.f32 %v11758_v13, %v15598_v48  ;;  %v3773_v43 = vsub.f32 %v11761_v36, %v15597_v25  ;;  %v15606_v15 = vand.u32 4294901760, %v11777_v11  ;;  %v8169_v19 = vpack.c.bf16 %v3726_v61, %v3714_v14  ;;  %8168 = vmatprep.subr.bf16.mxu0 %v8167_v12  ;;  %v17040_v14 = vld [vmem:[#allocation135_spill] sm:$0xff] }
 0x221   :  { %v7591_v63 = vpack.c.bf16 %v17037_v7, %v17035_v38  ;;  %v3738_v9 = vand.u32 4294901760, %v3737_v24  ;;  %v3750_v45 = vand.u32 4294901760, %v3749_v53  ;;  %v3779_v16 = vsub.f32 %v11771_v17, %v15600_v59 }
 0x222   :  { %v3791_v38 = vsub.f32 %v11773_v10, %v15604_v18  ;;  %v15605_v46 = vand.u32 4294901760, %v11785_v50  ;;  %v15617_v7 = vand.u32 4294901760, %v11787_v44  ;;  %v17039_v61 = vand.u32 4294901760, %v17038_v62 }
 0x223   :  { %v17041_v24 = vand.u32 4294901760, %v17040_v14  ;;  %v8171_v25 = vpack.c.bf16 %v3744_v33, %v3732_v49  ;;  %v3756_v1 = vand.u32 4294901760, %v3755_v37  ;;  %v3768_v48 = vand.u32 4294901760, %v3767_v23  ;;  %7592 = vmatprep.subr.bf16.mxu1 %v7591_v63  ;;  %8170 = vmatpush1.bf16.msra.mxu0 %v8169_v19  ;;  %v17047_v63 = vld [vmem:[#allocation146_spill] sm:$0xff] }
 0x224   :  { %v17043_v59 = vand.u32 4294901760, %v17042_v27  ;;  %v17045_v20 = vand.u32 4294901760, %v17044_v31  ;;  %v3762_v18 = vand.u32 4294901760, %v3761_v2  ;;  %v3774_v6 = vand.u32 4294901760, %v3773_v43  ;;  %v17049_v43 = vld [vmem:[#allocation147_spill] sm:$0xff] }
 0x225   :  { %v7593_v53 = vpack.c.bf16 %v17041_v24, %v17039_v61  ;;  %v3785_v12 = vsub.f32 %v11777_v11, %v15606_v15  ;;  %v8173_v62 = vpack.c.bf16 %v3750_v45, %v3738_v9  ;;  %v17046_v14 = vand.u32 4294901760, %v11780_v35  ;;  %8172 = vmatprep.subr.bf16.mxu0 %v8171_v25  ;;  %v17053_v24 = vld [vmem:[#allocation156_spill] sm:$0xff] }
 0x226   :  { %v7595_v21 = vpack.c.bf16 %v17045_v20, %v17043_v59  ;;  %v15616_v33 = vand.u32 4294901760, %v11792_v57  ;;  %v15608_v8 = vand.u32 4294901760, %v11799_v54  ;;  %v3780_v27 = vand.u32 4294901760, %v3779_v16 }
 0x227   :  { %v3797_v49 = vsub.f32 %v11780_v35, %v17046_v14  ;;  %v3792_v31 = vand.u32 4294901760, %v3791_v38  ;;  %v3803_v20 = vsub.f32 %v11785_v50, %v15605_v46  ;;  %v3815_v59 = vsub.f32 %v11787_v44, %v15617_v7  ;;  %7594 = vmatpush1.bf16.msra.mxu1 %v7593_v53  ;;  %v17051_v38 = vld [vmem:[#allocation155_spill] sm:$0xff]  ;;  %8174 = vmatpush1.bf16.msra.mxu0 %v8173_v62  ;;  %v17055_v62 = vld [vmem:[#allocation158_spill] sm:$0xff]  ;;  %v17140_v7 = vld [vmem:[#allocation244_spill] sm:$0xff] }
 0x228   :  { %v8175_v45 = vpack.c.bf16 %v3768_v48, %v3756_v1  ;;  %v15607_v37 = vand.u32 4294901760, %v11808_v51  ;;  %v15609_v23 = vand.u32 4294901760, %v11813_v22  ;;  %v17048_v2 = vand.u32 4294901760, %v17047_v63  ;;  %7596 = vmatprep.subr.bf16.mxu1 %v7595_v21 }
 0x229   :  { %v17050_v19 = vand.u32 4294901760, %v17049_v43  ;;  %v8177_v16 = vpack.c.bf16 %v3774_v6, %v3762_v18  ;;  %v17052_v61 = vand.u32 4294901760, %v17051_v38  ;;  %v17054_v14 = vand.u32 4294901760, %v17053_v24  ;;  %v17061_v38 = vld [vmem:[#allocation168_spill] sm:$0xff] }
 0x22a   :  { %v3786_v15 = vand.u32 4294901760, %v3785_v12  ;;  %v3798_v25 = vand.u32 4294901760, %v3797_v49  ;;  %v3809_v48 = vsub.f32 %v11792_v57, %v15616_v33  ;;  %v3821_v53 = vsub.f32 %v11799_v54, %v15608_v8  ;;  %8176 = vmatprep.subr.bf16.mxu0 %v8175_v45  ;;  %v17138_v33 = vld [vmem:[#allocation53_spill] sm:$0xff] }
 0x22b   :  { %v7597_v9 = vpack.c.bf16 %v17050_v19, %v17048_v2  ;;  %v7599_v46 = vpack.c.bf16 %v17054_v14, %v17052_v61  ;;  %v15615_v1 = vand.u32 4294901760, %v11825_v26  ;;  %v8179_v18 = vpack.c.bf16 %v3792_v31, %v3780_v27  ;;  %v17057_v31 = vld [vmem:[#allocation159_spill] sm:$0xff]  ;;  %8178 = vmatpush1.bf16.msra.mxu0 %v8177_v16 }
 0x22c   :  { %v3804_v6 = vand.u32 4294901760, %v3803_v20  ;;  %v3816_v63 = vand.u32 4294901760, %v3815_v59  ;;  %v15614_v2 = vand.u32 4294901760, %v11827_v56  ;;  %v3827_v21 = vsub.f32 %v11808_v51, %v15607_v37  ;;  %v17059_v19 = vld [vmem:[#allocation167_spill] sm:$0xff] }
 0x22d   :  { %v3839_v12 = vsub.f32 %v11813_v22, %v15609_v23  ;;  %v15610_v49 = vand.u32 4294901760, %v11842_v4  ;;  %v15611_v43 = vand.u32 4294901760, %v11844_v58  ;;  %7598 = vmatpush1.bf16.msra.mxu1 %v7597_v9  ;;  %v17056_v27 = vand.u32 4294901760, %v17055_v62  ;;  %8180 = vmatprep.subr.bf16.mxu0 %v8179_v18 }
 0x22e   :  { %v17058_v20 = vand.u32 4294901760, %v17057_v31  ;;  %v17060_v45 = vand.u32 4294901760, %v17059_v19  ;;  %v17062_v61 = vand.u32 4294901760, %v17061_v38  ;;  %7600 = vmatprep.subr.bf16.mxu1 %v7599_v46  ;;  %v8181_v14 = vpack.c.bf16 %v3798_v25, %v3786_v15  ;;  %v17063_v25 = vld [vmem:[#allocation170_spill] sm:$0xff] }
 0x22f   :  { %v3810_v37 = vand.u32 4294901760, %v3809_v48  ;;  %v3822_v8 = vand.u32 4294901760, %v3821_v53  ;;  %v3833_v23 = vsub.f32 %v11825_v26, %v15615_v1  ;;  %v8183_v9 = vpack.c.bf16 %v3816_v63, %v3804_v6  ;;  %v17065_v53 = vld [vmem:[#allocation171_spill] sm:$0xff] }
 0x230   :  { %v7601_v59 = vpack.c.bf16 %v17058_v20, %v17056_v27  ;;  %v7603_v24 = vpack.c.bf16 %v17062_v61, %v17060_v45  ;;  %v3845_v62 = vsub.f32 %v11827_v56, %v15614_v2  ;;  %v15612_v27 = vand.u32 4294901760, %v11848_v0  ;;  %v17067_v45 = vld [vmem:[#allocation179_spill] sm:$0xff]  ;;  %8182 = vmatpush1.bf16.msra.mxu0 %v8181_v14 }
 0x231   :  { %v15613_v31 = vand.u32 4294901760, %v11862_v29  ;;  %v3828_v20 = vand.u32 4294901760, %v3827_v21  ;;  %v3840_v46 = vand.u32 4294901760, %v3839_v12  ;;  %v3851_v15 = vsub.f32 %v11842_v4, %v15610_v49  ;;  %v17069_v21 = vld [vmem:[#allocation180_spill] sm:$0xff]  ;;  %8184 = vmatprep.subr.bf16.mxu0 %v8183_v9 }
 0x232   :  { %v3863_v16 = vsub.f32 %v11844_v58, %v15611_v43  ;;  %7602 = vmatpush1.bf16.msra.mxu1 %v7601_v59  ;;  %v17064_v48 = vand.u32 4294901760, %v17063_v25  ;;  %v17066_v6 = vand.u32 4294901760, %v17065_v53  ;;  %v8185_v19 = vpack.c.bf16 %v3822_v8, %v3810_v37  ;;  %v17071_v37 = vld [vmem:[#allocation182_spill] sm:$0xff]  ;;  %v17073_v53 = vld [vmem:[#allocation183_spill] sm:$0xff] }
 0x233   :  { %7604 = vmatprep.subr.bf16.mxu1 %v7603_v24  ;;  %v17068_v18 = vand.u32 4294901760, %v17067_v45  ;;  %v17070_v12 = vand.u32 4294901760, %v17069_v21  ;;  %v3834_v61 = vand.u32 4294901760, %v3833_v23  ;;  %v3846_v49 = vand.u32 4294901760, %v3845_v62  ;;  %v17075_v23 = vld [vmem:[#allocation191_spill] sm:$0xff]  ;;  %v17077_v45 = vld [vmem:[#allocation192_spill] sm:$0xff] }
 0x234   :  { %v7605_v63 = vpack.c.bf16 %v17066_v6, %v17064_v48  ;;  %v3857_v43 = vsub.f32 %v11848_v0, %v15612_v27  ;;  %v3869_v59 = vsub.f32 %v11862_v29, %v15613_v31  ;;  %v8187_v25 = vpack.c.bf16 %v3840_v46, %v3828_v20  ;;  %8186 = vmatpush1.bf16.msra.mxu0 %v8185_v19  ;;  %v17079_v20 = vld [vmem:[#allocation194_spill] sm:$0xff] }
 0x235   :  { %v7607_v38 = vpack.c.bf16 %v17070_v12, %v17068_v18  ;;  %v3852_v24 = vand.u32 4294901760, %v3851_v15  ;;  %v3864_v8 = vand.u32 4294901760, %v3863_v16  ;;  %v17072_v48 = vand.u32 4294901760, %v17071_v37  ;;  %v17081_v15 = vld [vmem:[#allocation195_spill] sm:$0xff] }
 0x236   :  { %7606 = vmatpush1.bf16.msra.mxu1 %v7605_v63  ;;  %v17074_v6 = vand.u32 4294901760, %v17073_v53  ;;  %v17076_v62 = vand.u32 4294901760, %v17075_v23  ;;  %v17078_v18 = vand.u32 4294901760, %v17077_v45  ;;  %v8189_v12 = vpack.c.bf16 %v3846_v49, %v3834_v61  ;;  %8188 = vmatprep.subr.bf16.mxu0 %v8187_v25  ;;  %v17083_v37 = vld [vmem:[#allocation203_spill] sm:$0xff] }
 0x237   :  { %7608 = vmatprep.subr.bf16.mxu1 %v7607_v38  ;;  %v3858_v27 = vand.u32 4294901760, %v3857_v43  ;;  %v3870_v31 = vand.u32 4294901760, %v3869_v59  ;;  %v8191_v9 = vpack.c.bf16 %v3864_v8, %v3852_v24  ;;  %v17080_v46 = vand.u32 4294901760, %v17079_v20  ;;  %v17087_v43 = vld [vmem:[#allocation206_spill] sm:$0xff]  ;;  %v17089_v61 = vld [vmem:[#allocation207_spill] sm:$0xff] }
 0x238   :  { %v7609_v14 = vpack.c.bf16 %v17074_v6, %v17072_v48  ;;  %v7611_v21 = vpack.c.bf16 %v17078_v18, %v17076_v62  ;;  %v17082_v16 = vand.u32 4294901760, %v17081_v15  ;;  %v17084_v38 = vand.u32 4294901760, %v17083_v37  ;;  %v17085_v48 = vld [vmem:[#allocation204_spill] sm:$0xff]  ;;  %8190 = vmatpush1.bf16.msra.mxu0 %v8189_v12  ;;  %v17091_v8 = vld [vmem:[#allocation262_spill] sm:$0xff]  ;;  %v17096_v45 = vld [vmem:[#allocation19_spill] sm:$0xff] }
 0x239   :  { %v17086_v53 = vand.u32 4294901760, %v17085_v48  ;;  %v8193_v23 = vpack.c.bf16 %v3870_v31, %v3858_v27  ;;  %8192 = vmatprep.subr.bf16.mxu0 %v8191_v9  ;;  %v8195_v49 = vpack.c.bf16 %v11663_v42, %v11653_v52  ;;  %v17088_v19 = vand.u32 4294901760, %v17087_v43  ;;  %v17092_v27 = vld [vmem:[#allocation18_spill] sm:$0xff]  ;;  %v17093_v31 = vld [vmem:[#allocation212_spill] sm:$0xff]  ;;  %v17097_v18 = vld [vmem:[#allocation241_spill] sm:$0xff] }
 0x23a   :  { %7610 = vmatpush1.bf16.msra.mxu1 %v7609_v14  ;;  %v7613_v63 = vpack.c.bf16 %v17082_v16, %v17080_v46  ;;  %v17090_v59 = vand.u32 4294901760, %v17089_v61  ;;  %v8197_v24 = vpack.c.bf16 %v11688_v28, %v11680_v39  ;;  %v17094_v14 = vld [vmem:[#allocation239_spill] sm:$0xff]  ;;  %v17095_v62 = vpack.c.bf16 %v11535_v32, %v11533_v41  ;;  %v17099_v12 = vld [vmem:[#allocation217_spill] sm:$0xff]  ;;  %v17100_v9 = vld [vmem:[#allocation216_spill] sm:$0xff] }
 0x23b   :  { %7612 = vmatprep.subr.bf16.mxu1 %v7611_v21  ;;  %v7615_v6 = vpack.c.bf16 %v17086_v53, %v17084_v38  ;;  %v17098_v21 = vld [vmem:[#allocation22_spill] sm:$0xff]  ;;  %v17101_v20 = vpack.c.bf16 %v17099_v12, %v17100_v9  ;;  %v17102_v46 = vld [vmem:[#allocation221_spill] sm:$0xff]  ;;  %v17103_v15 = vld [vmem:[#allocation215_spill] sm:$0xff] }
 0x23c   :  { %v7617_v25 = vpack.c.bf16 %v17090_v59, %v17088_v19  ;;  %8194 = vmatpush1.bf16.msra.mxu0 %v8193_v23  ;;  %v17104_v16 = vpack.c.bf16 %v17102_v46, %v17103_v15  ;;  %v17106_v37 = vld [vmem:[#allocation26_spill] sm:$0xff]  ;;  %v17107_v38 = vld [vmem:[#allocation236_spill] sm:$0xff]  ;;  %v17108_v48 = vld [vmem:[#allocation223_spill] sm:$0xff] }
 0x23d   :  { %8196 = vmatprep.subr.bf16.mxu0 %v8195_v49  ;;  %v17109_v53 = vpack.c.bf16 %v17107_v38, %v17108_v48  ;;  %v17111_v23 = vld [vmem:[#allocation231_spill] sm:$0xff]  ;;  %v17114_v19 = vld [vmem:[#allocation30_spill] sm:$0xff] }
 0x23e   :  { %7614 = vmatpush1.bf16.msra.mxu1 %v7613_v63  ;;  %v17105_v63 = vld [vmem:[#allocation23_spill] sm:$0xff]  ;;  %v17116_v59 = vld [vmem:[#allocation218_spill] sm:$0xff] }
 0x23f   :  { %7616 = vmatprep.subr.bf16.mxu1 %v7615_v6  ;;  %3875 = vmatmul.mubr.f32.vlgmr.msra.gmra.mrb[0].mxu0 %v17091_v8  ;;  %v17110_v6 = vld [vmem:[#allocation235_spill] sm:$0xff] }
 0x240   :  { %8198 = vmatpush1.bf16.msra.mxu0 %v8197_v24  ;;  %4075 = vmatprep.mubr.f32.mxu0 %v17093_v31  ;;  %v17112_v49 = vpack.c.bf16 %v17110_v6, %v17111_v23  ;;  %v17113_v43 = vld [vmem:[#allocation27_spill] sm:$0xff]  ;;  %v17118_v24 = vld [vmem:[#allocation224_spill] sm:$0xff] }
 0x241   :  { %8200 = vmatprep.subr.bf16.mxu0 %v17095_v62  ;;  %v17115_v61 = vld [vmem:[#allocation219_spill] sm:$0xff] }
 0x242   :  { %7618 = vmatpush1.bf16.msra.mxu1 %v7617_v25  ;;  %v17117_v25 = vpack.c.bf16 %v17115_v61, %v17116_v59 }
 0x243   :  { %7620 = vmatprep.subr.bf16.mxu1 %v17092_v27  ;;  %v17119_v27 = vld [vmem:[#allocation222_spill] sm:$0xff] }
 0x244   :  { %8202 = vmatpush1.bf16.msra.mxu0 %v17101_v20  ;;  %v17120_v62 = vpack.c.bf16 %v17118_v24, %v17119_v27  ;;  %v17124_v20 = vld [vmem:[#allocation226_spill] sm:$0xff] }
 0x245   :  { %1916 = vmatmul.mubr.f32.vlgmr.msra.gmra.mrb[0].mxu1 %v17094_v14  ;;  %8204 = vmatprep.subr.bf16.mxu0 %v17104_v16 }
 0x246   :  { %7622 = vmatpush1.bf16.msra.mxu1 %v17096_v45  ;;  %2051 = vmatprep.mubr.f32.mxu1 %v17097_v18  ;;  %v17121_v45 = vld [vmem:[#allocation31_spill] sm:$0xff]  ;;  %v17122_v18 = vld [vmem:[#allocation34_spill] sm:$0xff] }
 0x247   :  { %7624 = vmatprep.subr.bf16.mxu1 %v17098_v21  ;;  %v17123_v21 = vld [vmem:[#allocation228_spill] sm:$0xff] }
 0x248   :  { %8206 = vmatpush1.bf16.msra.mxu0 %v17109_v53  ;;  %v17125_v16 = vpack.c.bf16 %v17123_v21, %v17124_v20 }
 0x249   :  { %8208 = vmatprep.subr.bf16.mxu0 %v17112_v49  ;;  %v17129_v49 = vld [vmem:[#allocation35_spill] sm:$0xff] }
 0x24a   :  { %7626 = vmatpush1.bf16.msra.mxu1 %v17105_v63  ;;  %v17126_v63 = vld [vmem:[#allocation237_spill] sm:$0xff] }
 0x24b   :  { %7628 = vmatprep.subr.bf16.mxu1 %v17106_v37  ;;  %v17127_v37 = vld [vmem:[#allocation234_spill] sm:$0xff] }
 0x24c   :  { %8210 = vmatpush1.bf16.msra.mxu0 %v17117_v25  ;;  %v17128_v53 = vpack.c.bf16 %v17126_v63, %v17127_v37  ;;  %v17132_v25 = vld [vmem:[#allocation246_spill] sm:$0xff] }
 0x24d   :  { %8212 = vmatprep.subr.bf16.mxu0 %v17120_v62  ;;  %v17134_v62 = vld [vmem:[#allocation79_spill] sm:$0xff] }
 0x24e   :  { %7630 = vmatpush1.bf16.msra.mxu1 %v17113_v43  ;;  %v17130_v43 = vld [vmem:[#allocation41_spill] sm:$0xff] }
 0x24f   :  { %7632 = vmatprep.subr.bf16.mxu1 %v17114_v19  ;;  %v17131_v19 = vld [vmem:[#allocation248_spill] sm:$0xff] }
 0x250   :  { %8214 = vmatpush1.bf16.msra.mxu0 %v17125_v16  ;;  %v17133_v2 = vpack.c.bf16 %v17131_v19, %v17132_v25  ;;  %v17139_v16 = vld [vmem:[#allocation249_spill] sm:$0xff]  ;;  %v17148_v25 = vld [vmem:[#allocation254_spill] sm:$0xff] }
 0x251   :  { %8216 = vmatprep.subr.bf16.mxu0 %v17128_v53  ;;  %v17141_v8 = vpack.c.bf16 %v17139_v16, %v17140_v7  ;;  %v17142_v53 = vld [vmem:[#allocation252_spill] sm:$0xff]  ;;  %v17146_v19 = vld [vmem:[#allocation65_spill] sm:$0xff] }
 0x252   :  { %7634 = vmatpush1.bf16.msra.mxu1 %v17121_v45  ;;  %v17135_v45 = vld [vmem:[#allocation78_spill] sm:$0xff]  ;;  %v17154_v16 = vld [vmem:[#allocation72_spill] sm:$0xff] }
 0x253   :  { %7636 = vmatprep.subr.bf16.mxu1 %v17122_v18  ;;  %v17136_v1 = vpack.c.bf16 %v17134_v62, %v17135_v45  ;;  %v17137_v18 = vld [vmem:[#allocation44_spill] sm:$0xff] }
 0x254   :  { %8218 = vmatpush1.bf16.msra.mxu0 %v17133_v2  ;;  %v17147_v2 = vld [vmem:[#allocation255_spill] sm:$0xff]  ;;  %v17156_v7 = vld [vmem:[#allocation260_spill] sm:$0xff] }
 0x255   :  { %8220 = vmatprep.subr.bf16.mxu0 %v17136_v1  ;;  %v17149_v62 = vpack.c.bf16 %v17147_v2, %v17148_v25  ;;  %v17150_v1 = vld [vmem:[#allocation258_spill] sm:$0xff] }
 0x256   :  { %7638 = vmatpush1.bf16.msra.mxu1 %v17129_v49  ;;  %v17143_v49 = vld [vmem:[#allocation251_spill] sm:$0xff]  ;;  %v17162_v2 = vld [vmem:[#allocation130_spill] sm:$0xff] }
 0x257   :  { %7640 = vmatprep.subr.bf16.mxu1 %v17130_v43  ;;  %v17144_v63 = vpack.c.bf16 %v17142_v53, %v17143_v49  ;;  %v17145_v43 = vld [vmem:[#allocation56_spill] sm:$0xff] }
 0x258   :  { %8222 = vmatpush1.bf16.msra.mxu0 %v17141_v8  ;;  %v17155_v8 = vld [vmem:[#allocation261_spill] sm:$0xff] }
 0x259   :  { %8224 = vmatprep.subr.bf16.mxu0 %v17144_v63  ;;  %v17157_v53 = vpack.c.bf16 %v17155_v8, %v17156_v7  ;;  %v17158_v63 = vld [vmem:[#allocation265_spill] sm:$0xff] }
 0x25a   :  { %7642 = vmatpush1.bf16.msra.mxu1 %v17137_v18  ;;  %v17151_v18 = vld [vmem:[#allocation257_spill] sm:$0xff] }
 0x25b   :  { %7644 = vmatprep.subr.bf16.mxu1 %v17138_v33  ;;  %v17152_v45 = vpack.c.bf16 %v17150_v1, %v17151_v18  ;;  %v17153_v33 = vld [vmem:[#allocation67_spill] sm:$0xff] }
 0x25c   :  { %8226 = vmatpush1.bf16.msra.mxu0 %v17149_v62  ;;  %v17163_v62 = vpack.c.bf16 %v17008_v3, %v17007_v5 }
 0x25d   :  { %8228 = vmatprep.subr.bf16.mxu0 %v17152_v45  ;;  %v17164_v45 = vpack.c.bf16 %v17015_v34, %v17014_v55 }
 0x25e   :  { %7646 = vmatpush1.bf16.msra.mxu1 %v17145_v43  ;;  %v17159_v43 = vld [vmem:[#allocation264_spill] sm:$0xff] }
 0x25f   :  { %7648 = vmatprep.subr.bf16.mxu1 %v17146_v19  ;;  %v17160_v49 = vpack.c.bf16 %v17158_v63, %v17159_v43  ;;  %v17161_v19 = vld [vmem:[#allocation70_spill] sm:$0xff] }
 0x260   :  { %8230 = vmatpush1.bf16.msra.mxu0 %v17157_v53  ;;  %v17167_v53 = vpack.c.bf16 %v11747_v30, %v11740_v47 }
 0x261   :  { %8232 = vmatprep.subr.bf16.mxu0 %v17160_v49  ;;  %v17168_v49 = vpack.c.bf16 %v11754_v60, %v11752_v40 }
 0x262   :  { %7650 = vmatpush1.bf16.msra.mxu1 %v17153_v33  ;;  %v17166_v33 = vld [vmem:[#allocation142_spill] sm:$0xff] }
 0x263   :  { %7652 = vmatprep.subr.bf16.mxu1 %v17154_v16  ;;  %v17165_v16 = vld [vmem:[#allocation133_spill] sm:$0xff] }
 0x264   :  { %8234 = vmatpush1.bf16.msra.mxu0 %v17163_v62  ;;  %v17171_v62 = vpack.c.bf16 %v11761_v36, %v11758_v13 }
 0x265   :  { %8236 = vmatprep.subr.bf16.mxu0 %v17164_v45  ;;  %v17172_v45 = vpack.c.bf16 %v11773_v10, %v11771_v17 }
 0x266   :  { %7654 = vmatpush1.bf16.msra.mxu1 %v17161_v19  ;;  %v17170_v19 = vld [vmem:[#allocation154_spill] sm:$0xff] }
 0x267   :  { %7656 = vmatprep.subr.bf16.mxu1 %v17162_v2  ;;  %v17169_v2 = vld [vmem:[#allocation145_spill] sm:$0xff] }
 0x268   :  { %8238 = vmatpush1.bf16.msra.mxu0 %v17167_v53  ;;  %v17175_v53 = vpack.c.bf16 %v11780_v35, %v11777_v11  ;;  %v17275_v11 = vld [vmem:[#allocation89_spill] sm:$0xff] }
 0x269   :  { %8240 = vmatprep.subr.bf16.mxu0 %v17168_v49  ;;  %v17176_v49 = vpack.c.bf16 %v11787_v44, %v11785_v50  ;;  %v17266_v44 = vld [vmem:[#allocation293_spill] sm:$0xff] }
 0x26a   :  { %7658 = vmatpush1.bf16.msra.mxu1 %v17165_v16  ;;  %v17173_v16 = vld [vmem:[#allocation157_spill] sm:$0xff] }
 0x26b   :  { %7660 = vmatprep.subr.bf16.mxu1 %v17166_v33  ;;  %v17174_v33 = vld [vmem:[#allocation166_spill] sm:$0xff] }
 0x26c   :  { %8242 = vmatpush1.bf16.msra.mxu0 %v17171_v62  ;;  %v17179_v62 = vpack.c.bf16 %v11799_v54, %v11792_v57  ;;  %v17264_v57 = vld [vmem:[#allocation245_spill] sm:$0xff] }
 0x26d   :  { %8244 = vmatprep.subr.bf16.mxu0 %v17172_v45  ;;  %v17180_v45 = vpack.c.bf16 %v11813_v22, %v11808_v51  ;;  %v17260_v22 = vld [vmem:[#allocation82_spill] sm:$0xff] }
 0x26e   :  { %7662 = vmatpush1.bf16.msra.mxu1 %v17169_v2  ;;  %v17177_v2 = vld [vmem:[#allocation169_spill] sm:$0xff]  ;;  %v17263_v51 = vld [vmem:[#allocation290_spill] sm:$0xff] }
 0x26f   :  { %7664 = vmatprep.subr.bf16.mxu1 %v17170_v19  ;;  %v17178_v19 = vld [vmem:[#allocation178_spill] sm:$0xff] }
 0x270   :  { %8246 = vmatpush1.bf16.msra.mxu0 %v17175_v53  ;;  %v17183_v53 = vpack.c.bf16 %v11827_v56, %v11825_v26  ;;  %v17191_v56 = vld [vmem:[#allocation205_spill] sm:$0xff] }
 0x271   :  { %8248 = vmatprep.subr.bf16.mxu0 %v17176_v49  ;;  %v17184_v49 = vpack.c.bf16 %v11844_v58, %v11842_v4  ;;  %v17193_v58 = vld [vmem:[#allocation16_spill] sm:$0xff]  ;;  %v17258_v26 = vld [vmem:[#allocation81_spill] sm:$0xff] }
 0x272   :  { %7666 = vmatpush1.bf16.msra.mxu1 %v17173_v16  ;;  %v17181_v16 = vld [vmem:[#allocation181_spill] sm:$0xff] }
 0x273   :  { %7668 = vmatprep.subr.bf16.mxu1 %v17174_v33  ;;  %v17182_v33 = vld [vmem:[#allocation190_spill] sm:$0xff] }
 0x274   :  { %8250 = vmatpush1.bf16.msra.mxu0 %v17179_v62  ;;  %v17187_v62 = vld [vmem:[#allocation247_spill] sm:$0xff] }
 0x275   :  { %8252 = vmatprep.subr.bf16.mxu0 %v17180_v45  ;;  %v17188_v54 = vand.u32 4294901760, %v17187_v62 }
 0x276   :  { %7670 = vmatpush1.bf16.msra.mxu1 %v17177_v2  ;;  %v17185_v2 = vld [vmem:[#allocation193_spill] sm:$0xff] }
 0x277   :  { %7672 = vmatprep.subr.bf16.mxu1 %v17178_v19  ;;  %v17186_v19 = vld [vmem:[#allocation202_spill] sm:$0xff]  ;;  %v2190_v45 = vsub.f32 %v17187_v62, %v17188_v54  ;;  %v17196_v54 = vld [vmem:[#allocation211_spill] sm:$0xff]  ;;  %v17197_v62 = vld [vmem:[#allocation17_spill] sm:$0xff] }
 0x278   :  { %8254 = vmatpush1.bf16.msra.mxu0 %v17183_v53  ;;  %v17192_v53 = vld [vmem:[#allocation286_spill] sm:$0xff] }
 0x279   :  { %8256 = vmatprep.subr.bf16.mxu0 %v17184_v49  ;;  %v17194_v49 = vld [vmem:[#allocation214_spill] sm:$0xff] }
 0x27a   :  { %7674 = vmatpush1.bf16.msra.mxu1 %v17181_v16  ;;  %v17189_v16 = vpack.c.bf16 %v11862_v29, %v11848_v0  ;;  %v17251_v29 = vld [vmem:[#allocation283_spill] sm:$0xff]  ;;  %v17256_v0 = vld [vmem:[#allocation76_spill] sm:$0xff] }
 0x27b   :  { %7676 = vmatprep.subr.bf16.mxu1 %v17182_v33  ;;  %v17190_v33 = vld [vmem:[#allocation208_spill] sm:$0xff] }
 0x27c   :  { %8258 = vmatpush1.bf16.msra.mxu0 %v17189_v16  ;;  %v17198_v16 = vld [vmem:[#allocation20_spill] sm:$0xff] }
 0x27d   :  { %8260 = vmatprep.subr.bf16.mxu0 %v17190_v33  ;;  %v17200_v33 = vld [vmem:[#allocation229_spill] sm:$0xff] }
 0x27e   :  { %7678 = vmatpush1.bf16.msra.mxu1 %v17185_v2  ;;  %v17195_v2 = vand.u32 4294901760, %v17093_v31  ;;  %v17203_v31 = vld [vmem:[#allocation230_spill] sm:$0xff] }
 0x27f   :  { %7680 = vmatprep.subr.bf16.mxu1 %v17186_v19  ;;  %4078 = vmatmul.mubr.f32.vlgmr.msra.gmra.mrb[0].mxu0 %v17192_v53  ;;  %v2191_v19 = vand.u32 4294901760, %v2190_v45  ;;  %v17204_v45 = vld [vmem:[#allocation225_spill] sm:$0xff] }
 0x280   :  { %8262 = vmatpush1.bf16.msra.mxu0 %v17194_v49  ;;  %4215 = vmatprep.mubr.f32.mxu0 %v17195_v2  ;;  %v17202_v49 = vld [vmem:[#allocation24_spill] sm:$0xff] }
 0x281   :  { %8264 = vmatprep.subr.bf16.mxu0 %v17196_v54  ;;  %v17206_v2 = vld [vmem:[#allocation28_spill] sm:$0xff]  ;;  %v17249_v54 = vld [vmem:[#allocation74_spill] sm:$0xff] }
 0x282   :  { %7682 = vmatpush1.bf16.msra.mxu1 %v17191_v56  ;;  %v17199_v56 = vld [vmem:[#allocation213_spill] sm:$0xff] }
 0x283   :  { %7684 = vmatprep.subr.bf16.mxu1 %v17193_v58  ;;  %v17201_v58 = vld [vmem:[#allocation21_spill] sm:$0xff] }
 0x284   :  { %8266 = vmatpush1.bf16.msra.mxu0 %v17199_v56  ;;  %v17210_v56 = vld [vmem:[#allocation32_spill] sm:$0xff] }
 0x285   :  { %2053 = vmatmul.mubr.f32.vlgmr.msra.gmra.mrb[0].mxu1 %v17094_v14  ;;  %8268 = vmatprep.subr.bf16.mxu0 %v17200_v33  ;;  %v17205_v14 = vld [vmem:[#allocation25_spill] sm:$0xff]  ;;  %v17211_v33 = vld [vmem:[#allocation227_spill] sm:$0xff] }
 0x286   :  { %7686 = vmatpush1.bf16.msra.mxu1 %v17197_v62  ;;  %2192 = vmatprep.mubr.f32.mxu1 %v2191_v19  ;;  %v17207_v62 = vld [vmem:[#allocation232_spill] sm:$0xff] }
 0x287   :  { %7688 = vmatprep.subr.bf16.mxu1 %v17198_v16  ;;  %v17208_v19 = vld [vmem:[#allocation220_spill] sm:$0xff]  ;;  %v17209_v16 = vld [vmem:[#allocation29_spill] sm:$0xff] }
 0x288   :  { %8270 = vmatpush1.bf16.msra.mxu0 %v17203_v31  ;;  %v17214_v31 = vld [vmem:[#allocation36_spill] sm:$0xff] }
 0x289   :  { %8272 = vmatprep.subr.bf16.mxu0 %v17204_v45  ;;  %v17215_v45 = vld [vmem:[#allocation238_spill] sm:$0xff] }
 0x28a   :  { %7690 = vmatpush1.bf16.msra.mxu1 %v17201_v58  ;;  %v17212_v58 = vld [vmem:[#allocation233_spill] sm:$0xff] }
 0x28b   :  { %7692 = vmatprep.subr.bf16.mxu1 %v17202_v49  ;;  %v17213_v49 = vld [vmem:[#allocation33_spill] sm:$0xff] }
 0x28c   :  { %8274 = vmatpush1.bf16.msra.mxu0 %v17207_v62  ;;  %v17218_v62 = vld [vmem:[#allocation47_spill] sm:$0xff] }
 0x28d   :  { %8276 = vmatprep.subr.bf16.mxu0 %v17208_v19  ;;  %v17219_v19 = vld [vmem:[#allocation80_spill] sm:$0xff] }
 0x28e   :  { %7694 = vmatpush1.bf16.msra.mxu1 %v17205_v14  ;;  %v17216_v14 = vld [vmem:[#allocation77_spill] sm:$0xff] }
 0x28f   :  { %7696 = vmatprep.subr.bf16.mxu1 %v17206_v2  ;;  %v17217_v2 = vld [vmem:[#allocation38_spill] sm:$0xff] }
 0x290   :  { %8278 = vmatpush1.bf16.msra.mxu0 %v17211_v33  ;;  %v17222_v33 = vld [vmem:[#allocation59_spill] sm:$0xff] }
 0x291   :  { %8280 = vmatprep.subr.bf16.mxu0 %v17212_v58  ;;  %v17223_v58 = vld [vmem:[#allocation253_spill] sm:$0xff] }
 0x292   :  { %7698 = vmatpush1.bf16.msra.mxu1 %v17209_v16  ;;  %v17220_v16 = vld [vmem:[#allocation250_spill] sm:$0xff] }
 0x293   :  { %7700 = vmatprep.subr.bf16.mxu1 %v17210_v56  ;;  %v17221_v56 = vld [vmem:[#allocation50_spill] sm:$0xff] }
 0x294   :  { %8282 = vmatpush1.bf16.msra.mxu0 %v17215_v45  ;;  %v17226_v45 = vld [vmem:[#allocation69_spill] sm:$0xff] }
 0x295   :  { %8284 = vmatprep.subr.bf16.mxu0 %v17216_v14  ;;  %v17227_v14 = vld [vmem:[#allocation259_spill] sm:$0xff] }
 0x296   :  { %7702 = vmatpush1.bf16.msra.mxu1 %v17213_v49  ;;  %v17224_v49 = vld [vmem:[#allocation256_spill] sm:$0xff] }
 0x297   :  { %7704 = vmatprep.subr.bf16.mxu1 %v17214_v31  ;;  %v17225_v31 = vld [vmem:[#allocation62_spill] sm:$0xff] }
 0x298   :  { %8286 = vmatpush1.bf16.msra.mxu0 %v17219_v19  ;;  %v17230_v19 = vld [vmem:[#allocation124_spill] sm:$0xff] }
 0x299   :  { %8288 = vmatprep.subr.bf16.mxu0 %v17220_v16  ;;  %v17231_v16 = vld [vmem:[#allocation266_spill] sm:$0xff] }
 0x29a   :  { %7706 = vmatpush1.bf16.msra.mxu1 %v17217_v2  ;;  %v17228_v2 = vld [vmem:[#allocation263_spill] sm:$0xff] }
 0x29b   :  { %7708 = vmatprep.subr.bf16.mxu1 %v17218_v62  ;;  %v17229_v62 = vld [vmem:[#allocation71_spill] sm:$0xff] }
 0x29c   :  { %8290 = vmatpush1.bf16.msra.mxu0 %v17223_v58  ;;  %v17234_v58 = vld [vmem:[#allocation136_spill] sm:$0xff] }
 0x29d   :  { %8292 = vmatprep.subr.bf16.mxu0 %v17224_v49  ;;  %v17235_v49 = vld [vmem:[#allocation272_spill] sm:$0xff] }
 0x29e   :  { %7710 = vmatpush1.bf16.msra.mxu1 %v17221_v56  ;;  %v17232_v56 = vld [vmem:[#allocation269_spill] sm:$0xff] }
 0x29f   :  { %7712 = vmatprep.subr.bf16.mxu1 %v17222_v33  ;;  %v17233_v33 = vld [vmem:[#allocation127_spill] sm:$0xff] }
 0x2a0   :  { %8294 = vmatpush1.bf16.msra.mxu0 %v17227_v14  ;;  %v17238_v14 = vld [vmem:[#allocation149_spill] sm:$0xff] }
 0x2a1   :  { %8296 = vmatprep.subr.bf16.mxu0 %v17228_v2  ;;  %v17239_v2 = vld [vmem:[#allocation274_spill] sm:$0xff] }
 0x2a2   :  { %7714 = vmatpush1.bf16.msra.mxu1 %v17225_v31  ;;  %v17236_v31 = vld [vmem:[#allocation273_spill] sm:$0xff] }
 0x2a3   :  { %7716 = vmatprep.subr.bf16.mxu1 %v17226_v45  ;;  %v17237_v45 = vld [vmem:[#allocation140_spill] sm:$0xff] }
 0x2a4   :  { %8298 = vmatpush1.bf16.msra.mxu0 %v17231_v16  ;;  %v17242_v16 = vld [vmem:[#allocation161_spill] sm:$0xff] }
 0x2a5   :  { %8300 = vmatprep.subr.bf16.mxu0 %v17232_v56  ;;  %v17243_v56 = vld [vmem:[#allocation277_spill] sm:$0xff] }
 0x2a6   :  { %7718 = vmatpush1.bf16.msra.mxu1 %v17229_v62  ;;  %v17240_v62 = vld [vmem:[#allocation275_spill] sm:$0xff] }
 0x2a7   :  { %7720 = vmatprep.subr.bf16.mxu1 %v17230_v19  ;;  %v17241_v19 = vld [vmem:[#allocation151_spill] sm:$0xff] }
 0x2a8   :  { %8302 = vmatpush1.bf16.msra.mxu0 %v17235_v49  ;;  %v17246_v49 = vld [vmem:[#allocation173_spill] sm:$0xff] }
 0x2a9   :  { %8304 = vmatprep.subr.bf16.mxu0 %v17236_v31  ;;  %v17247_v31 = vld [vmem:[#allocation73_spill] sm:$0xff] }
 0x2aa   :  { %7722 = vmatpush1.bf16.msra.mxu1 %v17233_v33  ;;  %v17244_v33 = vld [vmem:[#allocation280_spill] sm:$0xff] }
 0x2ab   :  { %7724 = vmatprep.subr.bf16.mxu1 %v17234_v58  ;;  %v17245_v58 = vld [vmem:[#allocation163_spill] sm:$0xff] }
 0x2ac   :  { %8306 = vmatpush1.bf16.msra.mxu0 %v17239_v2  ;;  %v17250_v2 = vand.u32 4294901760, %v17249_v54 }
 0x2ad   :  { %8308 = vmatprep.subr.bf16.mxu0 %v17240_v62 }
 0x2ae   :  { %7726 = vmatpush1.bf16.msra.mxu1 %v17237_v45  ;;  %v17248_v45 = vand.u32 4294901760, %v17247_v31  ;;  %v2219_v62 = vsub.f32 %v17249_v54, %v17250_v2  ;;  %v17261_v2 = vand.u32 4294901760, %v17260_v22  ;;  %v17262_v54 = vld [vmem:[#allocation185_spill] sm:$0xff] }
 0x2af   :  { %7728 = vmatprep.subr.bf16.mxu1 %v17238_v14 }
 0x2b0   :  { %8310 = vmatpush1.bf16.msra.mxu0 %v17243_v56  ;;  %v2207_v14 = vsub.f32 %v17247_v31, %v17248_v45  ;;  %v17254_v56 = vld [vmem:[#allocation75_spill] sm:$0xff]  ;;  %v17259_v45 = vand.u32 4294901760, %v17258_v26 }
 0x2b1   :  { %8312 = vmatprep.subr.bf16.mxu0 %v17244_v33  ;;  %v17255_v33 = vand.u32 4294901760, %v17254_v56 }
 0x2b2   :  { %7730 = vmatpush1.bf16.msra.mxu1 %v17241_v19  ;;  %v17252_v19 = vld [vmem:[#allocation287_spill] sm:$0xff]  ;;  %v2231_v31 = vsub.f32 %v17258_v26, %v17259_v45  ;;  %v17268_v45 = vand.u32 4294901760, %v11663_v42  ;;  %v17276_v42 = vand.u32 4294901760, %v17275_v11 }
 0x2b3   :  { %7732 = vmatprep.subr.bf16.mxu1 %v17242_v16  ;;  %v17253_v16 = vld [vmem:[#allocation175_spill] sm:$0xff] }
 0x2b4   :  { %8314 = vmatpush1.bf16.msra.mxu0 %v17251_v29  ;;  %v2243_v29 = vsub.f32 %v17260_v22, %v17261_v2 }
 0x2b5   :  { %8316 = vmatprep.subr.bf16.mxu0 %v17252_v19  ;;  %v2208_v19 = vand.u32 4294901760, %v2207_v14 }
 0x2b6   :  { %7734 = vmatpush1.bf16.msra.mxu1 %v17245_v58  ;;  %v2213_v58 = vsub.f32 %v17254_v56, %v17255_v33  ;;  %v17265_v33 = vand.u32 4294901760, %v17264_v57 }
 0x2b7   :  { %7736 = vmatprep.subr.bf16.mxu1 %v17246_v49  ;;  %v17257_v49 = vand.u32 4294901760, %v17256_v0 }
 0x2b8   :  { %8318 = vmatpush1.bf16.msra.mxu0 %v17263_v51  ;;  %v2196_v56 = vsub.f32 %v17264_v57, %v17265_v33  ;;  %v17273_v51 = vld [vmem:[#allocation187_spill] sm:$0xff]  ;;  %v2214_v22 = vand.u32 4294901760, %v2213_v58  ;;  %v2232_v33 = vand.u32 4294901760, %v2231_v31  ;;  %v2244_v57 = vand.u32 4294901760, %v2243_v29 }
 0x2b9   :  { %v2225_v4 = vsub.f32 %v17256_v0, %v17257_v49  ;;  %8320 = vmatprep.subr.bf16.mxu0 %v17266_v44  ;;  %v17267_v49 = vand.u32 4294901760, %v11653_v52  ;;  %v17269_v0 = vld [vmem:[#allocation83_spill] sm:$0xff]  ;;  %v17274_v44 = vld [vmem:[#allocation197_spill] sm:$0xff]  ;;  %v17282_v29 = vand.u32 4294901760, %v11533_v41  ;;  %v17289_v41 = vand.u32 4294901760, %v17192_v53 }
 0x2ba   :  { %7738 = vmatpush1.bf16.msra.mxu1 %v17253_v16  ;;  %v2220_v16 = vand.u32 4294901760, %v2219_v62  ;;  %v17270_v50 = vand.u32 4294901760, %v17269_v0  ;;  %v17297_v53 = vand.u32 4294901760, %v17103_v15  ;;  %v17304_v15 = vld [vmem:[#allocation105_spill] sm:$0xff] }
 0x2bb   :  { %7740 = vmatprep.subr.bf16.mxu1 %v17262_v54  ;;  %v8323_v26 = vpack.c.bf16 %v17268_v45, %v17267_v49  ;;  %v17271_v54 = vld [vmem:[#allocation84_spill] sm:$0xff]  ;;  %v2226_v35 = vand.u32 4294901760, %v2225_v4  ;;  %v2255_v49 = vsub.f32 %v17275_v11, %v17276_v42  ;;  %v17277_v45 = vld [vmem:[#allocation90_spill] sm:$0xff] }
 0x2bc   :  { %v2237_v2 = vsub.f32 %v17269_v0, %v17270_v50  ;;  %v17272_v14 = vand.u32 4294901760, %v17271_v54  ;;  %v7747_v52 = vpack.c.bf16 %v2220_v16, %v2208_v19  ;;  %v17278_v10 = vand.u32 4294901760, %v17277_v45  ;;  %v17279_v0 = vld [vmem:[#allocation296_spill] sm:$0xff]  ;;  %v17284_v16 = vld [vmem:[#allocation91_spill] sm:$0xff] }
 0x2bd   :  { %8322 = vmatpush1.bf16.msra.mxu0 %v17279_v0  ;;  %v17285_v42 = vand.u32 4294901760, %v17284_v16 }
 0x2be   :  { %v2249_v62 = vsub.f32 %v17271_v54, %v17272_v14  ;;  %7742 = vmatpush1.bf16.msra.mxu1 %v17273_v51  ;;  %v2267_v50 = vsub.f32 %v17277_v45, %v17278_v10  ;;  %v17280_v14 = vand.u32 4294901760, %v11680_v39  ;;  %v17281_v51 = vand.u32 4294901760, %v11688_v28  ;;  %8324 = vmatprep.subr.bf16.mxu0 %v8323_v26  ;;  %v17286_v10 = vld [vmem:[#allocation92_spill] sm:$0xff]  ;;  %v17288_v54 = vld [vmem:[#allocation199_spill] sm:$0xff] }
 0x2bf   :  { %7744 = vmatprep.subr.bf16.mxu1 %v17274_v44  ;;  %v17283_v44 = vand.u32 4294901760, %v11535_v32  ;;  %v2238_v19 = vand.u32 4294901760, %v2237_v2  ;;  %v2261_v11 = vsub.f32 %v17284_v16, %v17285_v42  ;;  %v17287_v45 = vand.u32 4294901760, %v17286_v10  ;;  %v17290_v2 = vld [vmem:[#allocation97_spill] sm:$0xff] }
 0x2c0   :  { %v8325_v4 = vpack.c.bf16 %v17281_v51, %v17280_v14  ;;  %v2250_v58 = vand.u32 4294901760, %v2249_v62  ;;  %v2197_v39 = vand.u32 4294901760, %v2196_v56  ;;  %v7749_v28 = vpack.c.bf16 %v2226_v35, %v2214_v22  ;;  %4219 = vmatmul.mubr.f32.vlgmr.msra.gmra.mrb[0].mxu0 %v17289_v41  ;;  %v17294_v56 = vld [vmem:[#allocation210_spill] sm:$0xff] }
 0x2c1   :  { %v8327_v31 = vpack.c.bf16 %v17283_v44, %v17282_v29  ;;  %v2273_v0 = vsub.f32 %v17286_v10, %v17287_v45  ;;  %v7751_v14 = vpack.c.bf16 %v2244_v57, %v2232_v33  ;;  %v2256_v32 = vand.u32 4294901760, %v2255_v49  ;;  %v17292_v29 = vld [vmem:[#allocation98_spill] sm:$0xff]  ;;  %4482 = vmatprep.mubr.f32.mxu0 %v17294_v56 }
 0x2c2   :  { %7746 = vmatpush1.bf16.msra.mxu1 %v17288_v54  ;;  %v2268_v26 = vand.u32 4294901760, %v2267_v50  ;;  %v17291_v62 = vand.u32 4294901760, %v17290_v2  ;;  %v17293_v44 = vand.u32 4294901760, %v17292_v29  ;;  %8326 = vmatpush1.bf16.msra.mxu0 %v8325_v4  ;;  %v17295_v35 = vand.u32 4294901760, %v17100_v9  ;;  %v17299_v50 = vld [vmem:[#allocation99_spill] sm:$0xff]  ;;  %v17302_v9 = vld [vmem:[#allocation100_spill] sm:$0xff] }
 0x2c3   :  { %7748 = vmatprep.subr.bf16.mxu1 %v7747_v52  ;;  %v17296_v57 = vand.u32 4294901760, %v17099_v12  ;;  %v17298_v54 = vand.u32 4294901760, %v17102_v46  ;;  %8328 = vmatprep.subr.bf16.mxu0 %v8327_v31  ;;  %v7753_v52 = vpack.c.bf16 %v2250_v58, %v2238_v19  ;;  %v2262_v49 = vand.u32 4294901760, %v2261_v11 }
 0x2c4   :  { %v2279_v51 = vsub.f32 %v17290_v2, %v17291_v62  ;;  %v2291_v42 = vsub.f32 %v17292_v29, %v17293_v44  ;;  %v2274_v45 = vand.u32 4294901760, %v2273_v0  ;;  %v17300_v41 = vand.u32 4294901760, %v17299_v50  ;;  %v17301_v62 = vld [vmem:[#allocation243_spill] sm:$0xff] }
 0x2c5   :  { %v8329_v22 = vpack.c.bf16 %v17296_v57, %v17295_v35  ;;  %v8331_v33 = vpack.c.bf16 %v17298_v54, %v17297_v53  ;;  %2198 = vmatmul.mubr.f32.vlgmr.msra.gmra.mrb[0].mxu1 %v2197_v39  ;;  %v17303_v12 = vand.u32 4294901760, %v17302_v9  ;;  %v17305_v35 = vand.u32 4294901760, %v17304_v15  ;;  %v17306_v39 = vld [vmem:[#allocation106_spill] sm:$0xff] }
 0x2c6   :  { %v2285_v4 = vsub.f32 %v17299_v50, %v17300_v41  ;;  %7750 = vmatpush1.bf16.msra.mxu1 %v7749_v28  ;;  %2589 = vmatprep.mubr.f32.mxu1 %v17301_v62  ;;  %v17307_v31 = vand.u32 4294901760, %v17306_v39  ;;  %v7755_v0 = vpack.c.bf16 %v2268_v26, %v2256_v32  ;;  %v2280_v19 = vand.u32 4294901760, %v2279_v51  ;;  %v17314_v32 = vld [vmem:[#allocation108_spill] sm:$0xff] }
 0x2c7   :  { %v2297_v44 = vsub.f32 %v17302_v9, %v17303_v12  ;;  %v2303_v46 = vsub.f32 %v17304_v15, %v17305_v35  ;;  %7752 = vmatprep.subr.bf16.mxu1 %v7751_v14  ;;  %v2292_v58 = vand.u32 4294901760, %v2291_v42  ;;  %8330 = vmatpush1.bf16.msra.mxu0 %v8329_v22  ;;  %v17308_v28 = vand.u32 4294901760, %v17108_v48  ;;  %v17312_v35 = vld [vmem:[#allocation107_spill] sm:$0xff] }
 0x2c8   :  { %v2315_v11 = vsub.f32 %v17306_v39, %v17307_v31  ;;  %v17309_v57 = vand.u32 4294901760, %v17107_v38  ;;  %8332 = vmatprep.subr.bf16.mxu0 %v8331_v33  ;;  %v7757_v54 = vpack.c.bf16 %v2274_v45, %v2262_v49  ;;  %v17310_v41 = vand.u32 4294901760, %v17111_v23  ;;  %v17316_v49 = vld [vmem:[#allocation113_spill] sm:$0xff]  ;;  %v17318_v45 = vld [vmem:[#allocation114_spill] sm:$0xff] }
 0x2c9   :  { %v17311_v62 = vand.u32 4294901760, %v17110_v6  ;;  %v17313_v15 = vand.u32 4294901760, %v17312_v35  ;;  %v17315_v26 = vand.u32 4294901760, %v17314_v32  ;;  %v2286_v48 = vand.u32 4294901760, %v2285_v4 }
 0x2ca   :  { %v8333_v53 = vpack.c.bf16 %v17309_v57, %v17308_v28  ;;  %7754 = vmatpush1.bf16.msra.mxu1 %v7753_v52  ;;  %v2298_v42 = vand.u32 4294901760, %v2297_v44  ;;  %v2304_v38 = vand.u32 4294901760, %v2303_v46  ;;  %v2316_v22 = vand.u32 4294901760, %v2315_v11 }
 0x2cb   :  { %v8335_v12 = vpack.c.bf16 %v17311_v62, %v17310_v41  ;;  %v2309_v14 = vsub.f32 %v17312_v35, %v17313_v15  ;;  %v2321_v51 = vsub.f32 %v17314_v32, %v17315_v26  ;;  %7756 = vmatprep.subr.bf16.mxu1 %v7755_v0  ;;  %v7759_v33 = vpack.c.bf16 %v2292_v58, %v2280_v19  ;;  %v17324_v19 = vld [vmem:[#allocation115_spill] sm:$0xff]  ;;  %v17326_v62 = vld [vmem:[#allocation116_spill] sm:$0xff] }
 0x2cc   :  { %v17317_v23 = vand.u32 4294901760, %v17316_v49  ;;  %v17319_v31 = vand.u32 4294901760, %v17318_v45  ;;  %8334 = vmatpush1.bf16.msra.mxu0 %v8333_v53  ;;  %v17320_v15 = vand.u32 4294901760, %v17116_v59  ;;  %v17321_v57 = vand.u32 4294901760, %v17115_v61 }
 0x2cd   :  { %v17322_v4 = vand.u32 4294901760, %v17119_v27  ;;  %v17323_v44 = vand.u32 4294901760, %v17118_v24  ;;  %8336 = vmatprep.subr.bf16.mxu0 %v8335_v12  ;;  %v2310_v11 = vand.u32 4294901760, %v2309_v14  ;;  %v2322_v0 = vand.u32 4294901760, %v2321_v51  ;;  %v17330_v14 = vld [vmem:[#allocation40_spill] sm:$0xff] }
 0x2ce   :  { %v2327_v6 = vsub.f32 %v17316_v49, %v17317_v23  ;;  %v2339_v28 = vsub.f32 %v17318_v45, %v17319_v31  ;;  %v8337_v52 = vpack.c.bf16 %v17321_v57, %v17320_v15  ;;  %v17325_v58 = vand.u32 4294901760, %v17324_v19  ;;  %7758 = vmatpush1.bf16.msra.mxu1 %v7757_v54  ;;  %v17328_v31 = vld [vmem:[#allocation39_spill] sm:$0xff] }
 0x2cf   :  { %v8339_v46 = vpack.c.bf16 %v17323_v44, %v17322_v4  ;;  %v17327_v26 = vand.u32 4294901760, %v17326_v62  ;;  %v7761_v59 = vpack.c.bf16 %v2298_v42, %v2286_v48  ;;  %v7763_v61 = vpack.c.bf16 %v2316_v22, %v2304_v38  ;;  %7760 = vmatprep.subr.bf16.mxu1 %v7759_v33  ;;  %v17335_v42 = vld [vmem:[#allocation237_spill] sm:$0xff] }
 0x2d0   :  { %v2333_v41 = vsub.f32 %v17324_v19, %v17325_v58  ;;  %v2328_v23 = vand.u32 4294901760, %v2327_v6  ;;  %v2340_v27 = vand.u32 4294901760, %v2339_v28  ;;  %v17329_v24 = vand.u32 4294901760, %v17328_v31  ;;  %8338 = vmatpush1.bf16.msra.mxu0 %v8337_v52  ;;  %v17337_v28 = vld [vmem:[#allocation42_spill] sm:$0xff]  ;;  %v17339_v52 = vld [vmem:[#allocation43_spill] sm:$0xff] }
 0x2d1   :  { %v2345_v53 = vsub.f32 %v17326_v62, %v17327_v26  ;;  %v17331_v51 = vand.u32 4294901760, %v17330_v14  ;;  %v17332_v57 = vand.u32 4294901760, %v17124_v20  ;;  %v17333_v4 = vand.u32 4294901760, %v17123_v21  ;;  %8340 = vmatprep.subr.bf16.mxu0 %v8339_v46  ;;  %v17341_v21 = vld [vmem:[#allocation51_spill] sm:$0xff] }
 0x2d2   :  { %v2351_v12 = vsub.f32 %v17328_v31, %v17329_v24  ;;  %v7765_v54 = vpack.c.bf16 %v2322_v0, %v2310_v11  ;;  %v17334_v48 = vand.u32 4294901760, %v17127_v37  ;;  %v17336_v38 = vand.u32 4294901760, %v17335_v42  ;;  %7762 = vmatpush1.bf16.msra.mxu1 %v7761_v59  ;;  %v17343_v11 = vld [vmem:[#allocation52_spill] sm:$0xff] }
 0x2d3   :  { %v2363_v15 = vsub.f32 %v17330_v14, %v17331_v51  ;;  %v8341_v44 = vpack.c.bf16 %v17333_v4, %v17332_v57  ;;  %v2334_v33 = vand.u32 4294901760, %v2333_v41  ;;  %v2346_v6 = vand.u32 4294901760, %v2345_v53  ;;  %7764 = vmatprep.subr.bf16.mxu1 %v7763_v61  ;;  %v17345_v57 = vld [vmem:[#allocation246_spill] sm:$0xff] }
 0x2d4   :  { %v8343_v22 = vpack.c.bf16 %v17336_v38, %v17334_v48  ;;  %v17338_v58 = vand.u32 4294901760, %v17337_v28  ;;  %v17340_v24 = vand.u32 4294901760, %v17339_v52  ;;  %v17342_v51 = vand.u32 4294901760, %v17341_v21  ;;  %v17347_v48 = vld [vmem:[#allocation248_spill] sm:$0xff]  ;;  %v17353_v14 = vld [vmem:[#allocation54_spill] sm:$0xff] }
 0x2d5   :  { %v17344_v37 = vand.u32 4294901760, %v17343_v11  ;;  %v7767_v41 = vpack.c.bf16 %v2340_v27, %v2328_v23  ;;  %v2352_v53 = vand.u32 4294901760, %v2351_v12  ;;  %v2364_v59 = vand.u32 4294901760, %v2363_v15  ;;  %8342 = vmatpush1.bf16.msra.mxu0 %v8341_v44  ;;  %v17355_v23 = vld [vmem:[#allocation55_spill] sm:$0xff] }
 0x2d6   :  { %v2357_v26 = vsub.f32 %v17337_v28, %v17338_v58  ;;  %v2369_v20 = vsub.f32 %v17339_v52, %v17340_v24  ;;  %v2375_v46 = vsub.f32 %v17341_v21, %v17342_v51  ;;  %v17346_v4 = vand.u32 4294901760, %v17345_v57  ;;  %8344 = vmatprep.subr.bf16.mxu0 %v8343_v22  ;;  %v17349_v24 = vld [vmem:[#allocation78_spill] sm:$0xff]  ;;  %v17351_v28 = vld [vmem:[#allocation79_spill] sm:$0xff]  ;;  %7766 = vmatpush1.bf16.msra.mxu1 %v7765_v54 }
 0x2d7   :  { %v2387_v0 = vsub.f32 %v17343_v11, %v17344_v37  ;;  %v17348_v42 = vand.u32 4294901760, %v17347_v48  ;;  %v7769_v58 = vpack.c.bf16 %v2346_v6, %v2334_v33  ;;  %v17350_v52 = vand.u32 4294901760, %v17349_v24  ;;  %7768 = vmatprep.subr.bf16.mxu1 %v7767_v41  ;;  %v17357_v33 = vld [vmem:[#allocation63_spill] sm:$0xff]  ;;  %v17363_v24 = vld [vmem:[#allocation249_spill] sm:$0xff] }
 0x2d8   :  { %v17352_v51 = vand.u32 4294901760, %v17351_v28  ;;  %v17354_v31 = vand.u32 4294901760, %v17353_v14  ;;  %v17356_v27 = vand.u32 4294901760, %v17355_v23  ;;  %v2358_v15 = vand.u32 4294901760, %v2357_v26  ;;  %v17365_v26 = vld [vmem:[#allocation251_spill] sm:$0xff] }
 0x2d9   :  { %v8345_v38 = vpack.c.bf16 %v17348_v42, %v17346_v4  ;;  %v2370_v44 = vand.u32 4294901760, %v2369_v20  ;;  %v2376_v37 = vand.u32 4294901760, %v2375_v46  ;;  %v2388_v57 = vand.u32 4294901760, %v2387_v0  ;;  %v17367_v46 = vld [vmem:[#allocation252_spill] sm:$0xff] }
 0x2da   :  { %v8347_v21 = vpack.c.bf16 %v17352_v51, %v17350_v52  ;;  %v2381_v61 = vsub.f32 %v17353_v14, %v17354_v31  ;;  %v2393_v12 = vsub.f32 %v17355_v23, %v17356_v27  ;;  %v7771_v22 = vpack.c.bf16 %v2364_v59, %v2352_v53  ;;  %v17359_v52 = vld [vmem:[#allocation64_spill] sm:$0xff]  ;;  %v17371_v23 = vld [vmem:[#allocation66_spill] sm:$0xff]  ;;  %7770 = vmatpush1.bf16.msra.mxu1 %v7769_v58 }
 0x2db   :  { %v17358_v6 = vand.u32 4294901760, %v17357_v33  ;;  %v17360_v4 = vand.u32 4294901760, %v17359_v52  ;;  %8346 = vmatpush1.bf16.msra.mxu0 %v8345_v38  ;;  %v17361_v31 = vld [vmem:[#allocation244_spill] sm:$0xff]  ;;  %v17364_v51 = vand.u32 4294901760, %v17363_v24  ;;  %v17366_v20 = vand.u32 4294901760, %v17365_v26  ;;  %v17373_v26 = vld [vmem:[#allocation125_spill] sm:$0xff] }
 0x2dc   :  { %v17362_v42 = vand.u32 4294901760, %v17361_v31  ;;  %v17368_v0 = vand.u32 4294901760, %v17367_v46  ;;  %8348 = vmatprep.subr.bf16.mxu0 %v8347_v21  ;;  %v2382_v53 = vand.u32 4294901760, %v2381_v61  ;;  %v2394_v59 = vand.u32 4294901760, %v2393_v12  ;;  %v17369_v27 = vld [vmem:[#allocation120_spill] sm:$0xff]  ;;  %7772 = vmatprep.subr.bf16.mxu1 %v7771_v22  ;;  %v17375_v61 = vld [vmem:[#allocation126_spill] sm:$0xff] }
 0x2dd   :  { %v2399_v28 = vsub.f32 %v17357_v33, %v17358_v6  ;;  %v2411_v48 = vsub.f32 %v17359_v52, %v17360_v4  ;;  %v17370_v6 = vand.u32 4294901760, %v17369_v27  ;;  %v17372_v4 = vand.u32 4294901760, %v17371_v23 }
 0x2de   :  { %v8349_v54 = vpack.c.bf16 %v17364_v51, %v17362_v42  ;;  %v8351_v41 = vpack.c.bf16 %v17368_v0, %v17366_v20  ;;  %v7773_v31 = vpack.c.bf16 %v2370_v44, %v2358_v15  ;;  %v7775_v24 = vpack.c.bf16 %v2388_v57, %v2376_v37 }
 0x2df   :  { %v2405_v33 = vsub.f32 %v17369_v27, %v17370_v6  ;;  %v2417_v38 = vsub.f32 %v17371_v23, %v17372_v4  ;;  %v2400_v42 = vand.u32 4294901760, %v2399_v28  ;;  %v2412_v51 = vand.u32 4294901760, %v2411_v48  ;;  %v17378_v6 = vld [vmem:[#allocation255_spill] sm:$0xff]  ;;  %v17382_v28 = vld [vmem:[#allocation128_spill] sm:$0xff] }
 0x2e0   :  { %v17374_v46 = vand.u32 4294901760, %v17373_v26  ;;  %v17376_v12 = vand.u32 4294901760, %v17375_v61  ;;  %8350 = vmatpush1.bf16.msra.mxu0 %v8349_v54  ;;  %v17377_v0 = vand.u32 4294901760, %v17148_v25  ;;  %v17379_v27 = vand.u32 4294901760, %v17378_v6  ;;  %7774 = vmatpush1.bf16.msra.mxu1 %v7773_v31  ;;  %v17384_v54 = vld [vmem:[#allocation129_spill] sm:$0xff] }
 0x2e1   :  { %8352 = vmatprep.subr.bf16.mxu0 %v8351_v41  ;;  %v7777_v58 = vpack.c.bf16 %v2394_v59, %v2382_v53  ;;  %v17380_v15 = vand.u32 4294901760, %v17151_v18  ;;  %v17381_v44 = vand.u32 4294901760, %v17150_v1  ;;  %v2406_v57 = vand.u32 4294901760, %v2405_v33  ;;  %v17386_v6 = vld [vmem:[#allocation137_spill] sm:$0xff]  ;;  %v17388_v53 = vld [vmem:[#allocation138_spill] sm:$0xff]  ;;  %7776 = vmatprep.subr.bf16.mxu1 %v7775_v24 }
 0x2e2   :  { %v2423_v21 = vsub.f32 %v17373_v26, %v17374_v46  ;;  %v2435_v20 = vsub.f32 %v17375_v61, %v17376_v12  ;;  %v8353_v4 = vpack.c.bf16 %v17379_v27, %v17377_v0  ;;  %v2418_v22 = vand.u32 4294901760, %v2417_v38 }
 0x2e3   :  { %v8355_v37 = vpack.c.bf16 %v17381_v44, %v17380_v15  ;;  %v17383_v48 = vand.u32 4294901760, %v17382_v28  ;;  %v17385_v12 = vand.u32 4294901760, %v17384_v54  ;;  %v17387_v27 = vand.u32 4294901760, %v17386_v6 }
 0x2e4   :  { %v17389_v18 = vand.u32 4294901760, %v17388_v53  ;;  %v7779_v33 = vpack.c.bf16 %v2412_v51, %v2400_v42  ;;  %v2424_v59 = vand.u32 4294901760, %v2423_v21  ;;  %v2436_v38 = vand.u32 4294901760, %v2435_v20  ;;  %8354 = vmatpush1.bf16.msra.mxu0 %v8353_v4  ;;  %v17396_v42 = vld [vmem:[#allocation141_spill] sm:$0xff]  ;;  %7778 = vmatpush1.bf16.msra.mxu1 %v7777_v58 }
 0x2e5   :  { %v2429_v46 = vsub.f32 %v17382_v28, %v17383_v48  ;;  %v2441_v25 = vsub.f32 %v17384_v54, %v17385_v12  ;;  %v2447_v41 = vsub.f32 %v17386_v6, %v17387_v27  ;;  %v17390_v31 = vand.u32 4294901760, %v17156_v7  ;;  %8356 = vmatprep.subr.bf16.mxu0 %v8355_v37  ;;  %v17394_v6 = vld [vmem:[#allocation139_spill] sm:$0xff] }
 0x2e6   :  { %v2459_v1 = vsub.f32 %v17388_v53, %v17389_v18  ;;  %v17391_v0 = vand.u32 4294901760, %v17155_v8  ;;  %v7781_v44 = vpack.c.bf16 %v2418_v22, %v2406_v57  ;;  %v17392_v48 = vand.u32 4294901760, %v17159_v43  ;;  %7780 = vmatprep.subr.bf16.mxu1 %v7779_v33  ;;  %v17398_v57 = vld [vmem:[#allocation148_spill] sm:$0xff]  ;;  %v17400_v22 = vld [vmem:[#allocation150_spill] sm:$0xff] }
 0x2e7   :  { %v17393_v12 = vand.u32 4294901760, %v17158_v63  ;;  %v17395_v54 = vand.u32 4294901760, %v17394_v6  ;;  %v17397_v51 = vand.u32 4294901760, %v17396_v42  ;;  %v2430_v7 = vand.u32 4294901760, %v2429_v46 }
 0x2e8   :  { %v8357_v15 = vpack.c.bf16 %v17391_v0, %v17390_v31  ;;  %v2442_v20 = vand.u32 4294901760, %v2441_v25  ;;  %v2448_v8 = vand.u32 4294901760, %v2447_v41  ;;  %v2460_v4 = vand.u32 4294901760, %v2459_v1  ;;  %7782 = vmatpush1.bf16.msra.mxu1 %v7781_v44 }
 0x2e9   :  { %v8359_v27 = vpack.c.bf16 %v17393_v12, %v17392_v48  ;;  %v2453_v24 = vsub.f32 %v17394_v6, %v17395_v54  ;;  %v2465_v21 = vsub.f32 %v17396_v42, %v17397_v51  ;;  %v7783_v37 = vpack.c.bf16 %v2436_v38, %v2424_v59  ;;  %v17406_v59 = vld [vmem:[#allocation152_spill] sm:$0xff]  ;;  %v17408_v12 = vld [vmem:[#allocation153_spill] sm:$0xff] }
 0x2ea   :  { %v17399_v43 = vand.u32 4294901760, %v17398_v57  ;;  %v17401_v18 = vand.u32 4294901760, %v17400_v22  ;;  %8358 = vmatpush1.bf16.msra.mxu0 %v8357_v15  ;;  %v17402_v54 = vand.u32 4294901760, %v17007_v5  ;;  %v17403_v0 = vand.u32 4294901760, %v17008_v3 }
 0x2eb   :  { %v17404_v46 = vand.u32 4294901760, %v17014_v55  ;;  %v17405_v25 = vand.u32 4294901760, %v17015_v34  ;;  %8360 = vmatprep.subr.bf16.mxu0 %v8359_v27  ;;  %v2454_v1 = vand.u32 4294901760, %v2453_v24  ;;  %v2466_v33 = vand.u32 4294901760, %v2465_v21  ;;  %7784 = vmatprep.subr.bf16.mxu1 %v7783_v37  ;;  %v17412_v24 = vld [vmem:[#allocation162_spill] sm:$0xff] }
 0x2ec   :  { %v2471_v63 = vsub.f32 %v17398_v57, %v17399_v43  ;;  %v2483_v31 = vsub.f32 %v17400_v22, %v17401_v18  ;;  %v8361_v58 = vpack.c.bf16 %v17403_v0, %v17402_v54  ;;  %v17407_v38 = vand.u32 4294901760, %v17406_v59  ;;  %v17410_v18 = vld [vmem:[#allocation160_spill] sm:$0xff] }
 0x2ed   :  { %v8363_v41 = vpack.c.bf16 %v17405_v25, %v17404_v46  ;;  %v17409_v51 = vand.u32 4294901760, %v17408_v12  ;;  %v7785_v5 = vpack.c.bf16 %v2442_v20, %v2430_v7  ;;  %v7787_v3 = vpack.c.bf16 %v2460_v4, %v2448_v8 }
 0x2ee   :  { %v2477_v48 = vsub.f32 %v17406_v59, %v17407_v38  ;;  %v2472_v43 = vand.u32 4294901760, %v2471_v63  ;;  %v2484_v55 = vand.u32 4294901760, %v2483_v31  ;;  %v17411_v34 = vand.u32 4294901760, %v17410_v18  ;;  %8362 = vmatpush1.bf16.msra.mxu0 %v8361_v58  ;;  %v17418_v63 = vld [vmem:[#allocation164_spill] sm:$0xff]  ;;  %v17420_v58 = vld [vmem:[#allocation165_spill] sm:$0xff] }
 0x2ef   :  { %v2489_v15 = vsub.f32 %v17408_v12, %v17409_v51  ;;  %v17413_v21 = vand.u32 4294901760, %v17412_v24  ;;  %v17414_v0 = vand.u32 4294901760, %v11740_v47  ;;  %v17415_v46 = vand.u32 4294901760, %v11747_v30  ;;  %8364 = vmatprep.subr.bf16.mxu0 %v8363_v41  ;;  %7786 = vmatpush1.bf16.msra.mxu1 %v7785_v5  ;;  %v17422_v30 = vld [vmem:[#allocation172_spill] sm:$0xff] }
 0x2f0   :  { %v2495_v27 = vsub.f32 %v17410_v18, %v17411_v34  ;;  %v7789_v44 = vpack.c.bf16 %v2466_v33, %v2454_v1  ;;  %v17416_v7 = vand.u32 4294901760, %v11752_v40  ;;  %v17417_v20 = vand.u32 4294901760, %v11754_v60  ;;  %v17424_v1 = vld [vmem:[#allocation174_spill] sm:$0xff]  ;;  %7788 = vmatprep.subr.bf16.mxu1 %v7787_v3 }
 0x2f1   :  { %v2507_v54 = vsub.f32 %v17412_v24, %v17413_v21  ;;  %v8365_v25 = vpack.c.bf16 %v17415_v46, %v17414_v0  ;;  %v2478_v4 = vand.u32 4294901760, %v2477_v48  ;;  %v2490_v37 = vand.u32 4294901760, %v2489_v15 }
 0x2f2   :  { %v8367_v8 = vpack.c.bf16 %v17417_v20, %v17416_v7  ;;  %v17419_v31 = vand.u32 4294901760, %v17418_v63  ;;  %v17421_v51 = vand.u32 4294901760, %v17420_v58  ;;  %v17423_v34 = vand.u32 4294901760, %v17422_v30  ;;  %v17429_v20 = vld [vmem:[#allocation276_spill] sm:$0xff] }
 0x2f3   :  { %v17425_v40 = vand.u32 4294901760, %v17424_v1  ;;  %v7791_v33 = vpack.c.bf16 %v2484_v55, %v2472_v43  ;;  %v2496_v48 = vand.u32 4294901760, %v2495_v27  ;;  %v2508_v15 = vand.u32 4294901760, %v2507_v54  ;;  %8366 = vmatpush1.bf16.msra.mxu0 %v8365_v25  ;;  %v17433_v43 = vld [vmem:[#allocation177_spill] sm:$0xff]  ;;  %7790 = vmatpush1.bf16.msra.mxu1 %v7789_v44 }
 0x2f4   :  { %v2501_v38 = vsub.f32 %v17418_v63, %v17419_v31  ;;  %v2513_v47 = vsub.f32 %v17420_v58, %v17421_v51  ;;  %v2519_v41 = vsub.f32 %v17422_v30, %v17423_v34  ;;  %v17426_v5 = vand.u32 4294901760, %v11758_v13  ;;  %8368 = vmatprep.subr.bf16.mxu0 %v8367_v8  ;;  %v17431_v34 = vld [vmem:[#allocation176_spill] sm:$0xff] }
 0x2f5   :  { %v2531_v60 = vsub.f32 %v17424_v1, %v17425_v40  ;;  %v17427_v21 = vand.u32 4294901760, %v11761_v36  ;;  %v7793_v46 = vpack.c.bf16 %v2490_v37, %v2478_v4  ;;  %v17428_v7 = vand.u32 4294901760, %v11771_v17  ;;  %7792 = vmatprep.subr.bf16.mxu1 %v7791_v33  ;;  %v17435_v4 = vld [vmem:[#allocation184_spill] sm:$0xff]  ;;  %v17437_v40 = vld [vmem:[#allocation186_spill] sm:$0xff] }
 0x2f6   :  { %v17430_v31 = vand.u32 4294901760, %v17429_v20  ;;  %v17432_v30 = vand.u32 4294901760, %v17431_v34  ;;  %v17434_v55 = vand.u32 4294901760, %v17433_v43  ;;  %v2502_v13 = vand.u32 4294901760, %v2501_v38  ;;  %v17441_v20 = vld [vmem:[#allocation279_spill] sm:$0xff]  ;;  %v17443_v38 = vld [vmem:[#allocation281_spill] sm:$0xff] }
 0x2f7   :  { %v8369_v0 = vpack.c.bf16 %v17427_v21, %v17426_v5  ;;  %v2514_v54 = vand.u32 4294901760, %v2513_v47  ;;  %v2520_v36 = vand.u32 4294901760, %v2519_v41  ;;  %v2532_v25 = vand.u32 4294901760, %v2531_v60  ;;  %v17445_v41 = vld [vmem:[#allocation282_spill] sm:$0xff]  ;;  %7794 = vmatpush1.bf16.msra.mxu1 %v7793_v46 }
 0x2f8   :  { %v8371_v51 = vpack.c.bf16 %v17430_v31, %v17428_v7  ;;  %v2525_v3 = vsub.f32 %v17431_v34, %v17432_v30  ;;  %v2537_v27 = vsub.f32 %v17433_v43, %v17434_v55  ;;  %v7795_v8 = vpack.c.bf16 %v2508_v15, %v2496_v48  ;;  %v17439_v30 = vld [vmem:[#allocation278_spill] sm:$0xff] }
 0x2f9   :  { %v17436_v17 = vand.u32 4294901760, %v17435_v4  ;;  %v17438_v5 = vand.u32 4294901760, %v17437_v40  ;;  %8370 = vmatpush1.bf16.msra.mxu0 %v8369_v0  ;;  %v17440_v7 = vand.u32 4294901760, %v17439_v30  ;;  %v17442_v31 = vand.u32 4294901760, %v17441_v20 }
 0x2fa   :  { %8372 = vmatprep.subr.bf16.mxu0 %v8371_v51  ;;  %v17444_v47 = vand.u32 4294901760, %v17443_v38  ;;  %v17446_v60 = vand.u32 4294901760, %v17445_v41  ;;  %v2526_v48 = vand.u32 4294901760, %v2525_v3  ;;  %v2538_v15 = vand.u32 4294901760, %v2537_v27  ;;  %7796 = vmatprep.subr.bf16.mxu1 %v7795_v8  ;;  %v17453_v3 = vld [vmem:[#allocation198_spill] sm:$0xff] }
 0x2fb   :  { %v2543_v37 = vsub.f32 %v17435_v4, %v17436_v17  ;;  %v2555_v21 = vsub.f32 %v17437_v40, %v17438_v5  ;;  %v8373_v44 = vpack.c.bf16 %v17442_v31, %v17440_v7  ;;  %v7797_v55 = vpack.c.bf16 %v2514_v54, %v2502_v13  ;;  %v17447_v4 = vld [vmem:[#allocation188_spill] sm:$0xff]  ;;  %v17449_v5 = vld [vmem:[#allocation189_spill] sm:$0xff] }
 0x2fc   :  { %v8375_v33 = vpack.c.bf16 %v17446_v60, %v17444_v47  ;;  %v7799_v17 = vpack.c.bf16 %v2532_v25, %v2520_v36  ;;  %v17448_v43 = vand.u32 4294901760, %v17447_v4  ;;  %v17450_v30 = vand.u32 4294901760, %v17449_v5  ;;  %v17451_v31 = vld [vmem:[#allocation196_spill] sm:$0xff]  ;;  %v17457_v36 = vld [vmem:[#allocation285_spill] sm:$0xff] }
 0x2fd   :  { %v2544_v51 = vand.u32 4294901760, %v2543_v37  ;;  %v2556_v7 = vand.u32 4294901760, %v2555_v21  ;;  %v17452_v38 = vand.u32 4294901760, %v17451_v31  ;;  %v17454_v27 = vand.u32 4294901760, %v17453_v3  ;;  %8374 = vmatpush1.bf16.msra.mxu0 %v8373_v44  ;;  %v17455_v13 = vld [vmem:[#allocation284_spill] sm:$0xff]  ;;  %v17461_v37 = vld [vmem:[#allocation289_spill] sm:$0xff]  ;;  %7798 = vmatpush1.bf16.msra.mxu1 %v7797_v55 }
 0x2fe   :  { %v2549_v0 = vsub.f32 %v17447_v4, %v17448_v43  ;;  %v2561_v20 = vsub.f32 %v17449_v5, %v17450_v30  ;;  %v17456_v54 = vand.u32 4294901760, %v17455_v13  ;;  %v17458_v43 = vand.u32 4294901760, %v17457_v36  ;;  %8376 = vmatprep.subr.bf16.mxu0 %v8375_v33  ;;  %v17459_v60 = vld [vmem:[#allocation288_spill] sm:$0xff]  ;;  %v17465_v44 = vld [vmem:[#allocation201_spill] sm:$0xff]  ;;  %7800 = vmatprep.subr.bf16.mxu1 %v7799_v17 }
 0x2ff   :  { %v2567_v47 = vsub.f32 %v17451_v31, %v17452_v38  ;;  %v2579_v46 = vsub.f32 %v17453_v3, %v17454_v27  ;;  %v7801_v41 = vpack.c.bf16 %v2538_v15, %v2526_v48  ;;  %v17460_v8 = vand.u32 4294901760, %v17459_v60  ;;  %v17463_v31 = vld [vmem:[#allocation200_spill] sm:$0xff]  ;;  %v17467_v15 = vld [vmem:[#allocation291_spill] sm:$0xff] }
 0x300   :  { %v8377_v25 = vpack.c.bf16 %v17458_v43, %v17456_v54  ;;  %v17462_v21 = vand.u32 4294901760, %v17461_v37  ;;  %v2550_v5 = vand.u32 4294901760, %v2549_v0  ;;  %v2562_v38 = vand.u32 4294901760, %v2561_v20  ;;  %v17469_v43 = vld [vmem:[#allocation292_spill] sm:$0xff]  ;;  %v17471_v0 = vld [vmem:[#allocation294_spill] sm:$0xff] }
 0x301   :  { %v17464_v4 = vand.u32 4294901760, %v17463_v31  ;;  %v17466_v3 = vand.u32 4294901760, %v17465_v44  ;;  %v7803_v54 = vpack.c.bf16 %v2556_v7, %v2544_v51  ;;  %v2568_v33 = vand.u32 4294901760, %v2567_v47  ;;  %7802 = vmatpush1.bf16.msra.mxu1 %v7801_v41  ;;  %v17475_v51 = vld [vmem:[#allocation297_spill] sm:$0xff]  ;;  %v17477_v47 = vld [vmem:[#allocation298_spill] sm:$0xff]  ;;  %v17481_v41 = vld [vmem:[#allocation208_spill] sm:$0xff] }
 0x302   :  { %v8379_v30 = vpack.c.bf16 %v17462_v21, %v17460_v8  ;;  %v2580_v48 = vand.u32 4294901760, %v2579_v46  ;;  %8378 = vmatpush1.bf16.msra.mxu0 %v8377_v25  ;;  %v17468_v36 = vand.u32 4294901760, %v17467_v15  ;;  %v17470_v60 = vand.u32 4294901760, %v17469_v43  ;;  %v17473_v8 = vld [vmem:[#allocation295_spill] sm:$0xff]  ;;  %v17479_v15 = vld [vmem:[#allocation73_spill] sm:$0xff] }
 0x303   :  { %v2573_v27 = vsub.f32 %v17463_v31, %v17464_v4  ;;  %v2585_v13 = vsub.f32 %v17465_v44, %v17466_v3  ;;  %v17472_v20 = vand.u32 4294901760, %v17471_v0  ;;  %v17474_v37 = vand.u32 4294901760, %v17473_v8  ;;  %7804 = vmatprep.subr.bf16.mxu1 %v7803_v54  ;;  %v17485_v54 = vld [vmem:[#allocation81_spill] sm:$0xff]  ;;  %v17490_v0 = vld [vmem:[#allocation247_spill] sm:$0xff]  ;;  %v17492_v8 = vld [vmem:[#allocation84_spill] sm:$0xff] }
 0x304   :  { %v8381_v55 = vpack.c.bf16 %v17470_v60, %v17468_v36  ;;  %8380 = vmatprep.subr.bf16.mxu0 %v8379_v30  ;;  %v7805_v21 = vpack.c.bf16 %v2562_v38, %v2550_v5  ;;  %v7807_v17 = vpack.c.bf16 %v2580_v48, %v2568_v33  ;;  %v17476_v7 = vand.u32 4294901760, %v17475_v51  ;;  %v17480_v36 = vld [vmem:[#allocation74_spill] sm:$0xff]  ;;  %v17482_v5 = vld [vmem:[#allocation75_spill] sm:$0xff]  ;;  %v17483_v38 = vld [vmem:[#allocation76_spill] sm:$0xff] }
 0x305   :  { %v8383_v4 = vpack.c.bf16 %v17474_v37, %v17472_v20  ;;  %v2574_v31 = vand.u32 4294901760, %v2573_v27  ;;  %v2586_v3 = vand.u32 4294901760, %v2585_v13  ;;  %v17478_v46 = vand.u32 4294901760, %v17477_v47  ;;  %v17484_v13 = vld [vmem:[#allocation262_spill] sm:$0xff]  ;;  %v17491_v20 = vld [vmem:[#allocation83_spill] sm:$0xff]  ;;  %v17496_v51 = vld [vmem:[#allocation229_spill] sm:$0xff] }
 0x306   :  { %8382 = vmatpush1.bf16.msra.mxu0 %v8381_v55  ;;  %7806 = vmatpush1.bf16.msra.mxu1 %v7805_v21  ;;  %v7811_v43 = vpack.c.bf16 %v17480_v36, %v17479_v15  ;;  %v7813_v27 = vpack.c.bf16 %v17483_v38, %v17482_v5  ;;  %v17486_v33 = vld [vmem:[#allocation82_spill] sm:$0xff]  ;;  %v17489_v55 = vld [vmem:[#allocation211_spill] sm:$0xff]  ;;  %v7817_v37 = vpack.c.bf16 %v17492_v8, %v17491_v20  ;;  %v17500_v36 = vld [vmem:[#allocation232_spill] sm:$0xff] }
 0x307   :  { %v8385_v25 = vpack.c.bf16 %v17478_v46, %v17476_v7  ;;  %8384 = vmatprep.subr.bf16.mxu0 %v8383_v4  ;;  %v7809_v30 = vpack.c.bf16 %v2586_v3, %v2574_v31  ;;  %7808 = vmatprep.subr.bf16.mxu1 %v7807_v17  ;;  %v7815_v48 = vpack.c.bf16 %v17486_v33, %v17485_v54  ;;  %v17487_v60 = vld [vmem:[#allocation214_spill] sm:$0xff]  ;;  %v17488_v31 = vld [vmem:[#allocation240_spill] sm:$0xff]  ;;  %v17493_v4 = vld [vmem:[#allocation89_spill] sm:$0xff] }
 0x308   :  { %v17494_v21 = vld [vmem:[#allocation90_spill] sm:$0xff]  ;;  %v17495_v17 = vld [vmem:[#allocation213_spill] sm:$0xff]  ;;  %v7823_v7 = vpack.c.bf16 %v17292_v29, %v17290_v2  ;;  %v17502_v2 = vld [vmem:[#allocation227_spill] sm:$0xff]  ;;  %v7847_v20 = vpack.c.bf16 %v17375_v61, %v17373_v26  ;;  %v7853_v26 = vpack.c.bf16 %v17396_v42, %v17394_v6  ;;  %v7859_v6 = vpack.c.bf16 %v17412_v24, %v17410_v18 }
 0x309   :  { %v7819_v3 = vpack.c.bf16 %v17494_v21, %v17493_v4  ;;  %v17497_v47 = vld [vmem:[#allocation230_spill] sm:$0xff]  ;;  %v17498_v46 = vld [vmem:[#allocation225_spill] sm:$0xff]  ;;  %v17511_v54 = vld [vmem:[#allocation80_spill] sm:$0xff] }
 0x30a   :  { %8386 = vmatpush1.bf16.msra.mxu0 %v8385_v25  ;;  %7810 = vmatpush1.bf16.msra.mxu1 %v7809_v30  ;;  %v7825_v25 = vpack.c.bf16 %v17302_v9, %v17299_v50  ;;  %v17499_v30 = vld [vmem:[#allocation105_spill] sm:$0xff]  ;;  %v7833_v50 = vpack.c.bf16 %v17326_v62, %v17324_v19  ;;  %v17504_v9 = vld [vmem:[#allocation39_spill] sm:$0xff]  ;;  %v17506_v5 = vld [vmem:[#allocation238_spill] sm:$0xff] }
 0x30b   :  { %8388 = vmatprep.subr.bf16.mxu0 %v17481_v41  ;;  %7812 = vmatprep.subr.bf16.mxu1 %v7811_v43  ;;  %v7827_v15 = vpack.c.bf16 %v17306_v39, %v17499_v30  ;;  %v17501_v43 = vld [vmem:[#allocation220_spill] sm:$0xff]  ;;  %v17503_v29 = vld [vmem:[#allocation233_spill] sm:$0xff]  ;;  %v17512_v33 = vld [vmem:[#allocation250_spill] sm:$0xff] }
 0x30c   :  { %v17505_v39 = vld [vmem:[#allocation40_spill] sm:$0xff]  ;;  %v17507_v38 = vld [vmem:[#allocation77_spill] sm:$0xff]  ;;  %v17513_v19 = vld [vmem:[#allocation55_spill] sm:$0xff] }
 0x30d   :  { %4484 = vmatmul.mubr.f32.vlgmr.msra.gmra.mrb[0].mxu0 %v17484_v13  ;;  %2591 = vmatmul.mubr.f32.vlgmr.msra.gmra.mrb[0].mxu1 %v17488_v31  ;;  %v7835_v41 = vpack.c.bf16 %v17505_v39, %v17504_v9  ;;  %v7841_v62 = vpack.c.bf16 %v17513_v19, %v17353_v14  ;;  %v17515_v31 = vld [vmem:[#allocation253_spill] sm:$0xff]  ;;  %v17518_v8 = vld [vmem:[#allocation259_spill] sm:$0xff]  ;;  %v17528_v42 = vld [vmem:[#allocation274_spill] sm:$0xff] }
 0x30e   :  { %8390 = vmatpush1.bf16.msra.mxu0 %v17487_v60  ;;  %4619 = vmatprep.mubr.f32.mxu0 %v17294_v56  ;;  %v7821_v56 = vpack.c.bf16 %v17286_v10, %v17284_v16  ;;  %v7829_v16 = vpack.c.bf16 %v17314_v32, %v17312_v35  ;;  %v7831_v10 = vpack.c.bf16 %v17318_v45, %v17316_v49  ;;  %v17508_v35 = vld [vmem:[#allocation42_spill] sm:$0xff]  ;;  %v17509_v32 = vld [vmem:[#allocation43_spill] sm:$0xff]  ;;  %v17520_v14 = vld [vmem:[#allocation129_spill] sm:$0xff] }
 0x30f   :  { %8392 = vmatprep.subr.bf16.mxu0 %v17489_v55  ;;  %7814 = vmatpush1.bf16.msra.mxu1 %v7813_v27  ;;  %v7837_v49 = vpack.c.bf16 %v17509_v32, %v17508_v35  ;;  %v17510_v45 = vld [vmem:[#allocation51_spill] sm:$0xff]  ;;  %v17516_v55 = vld [vmem:[#allocation256_spill] sm:$0xff]  ;;  %v17521_v4 = vld [vmem:[#allocation209_spill] sm:$0xff] }
 0x310   :  { %2791 = vmatprep.mubr.f32.mxu1 %v17490_v0  ;;  %7816 = vmatprep.subr.bf16.mxu1 %v7815_v48  ;;  %v7839_v27 = vpack.c.bf16 %v17343_v11, %v17510_v45  ;;  %v17514_v48 = vld [vmem:[#allocation63_spill] sm:$0xff]  ;;  %v17517_v0 = vld [vmem:[#allocation120_spill] sm:$0xff]  ;;  %v750_v21 = vcombine.high %v17521_v4, %v17521_v4  ;;  %v17534_v18 = vld [vmem:[#allocation177_spill] sm:$0xff] }
 0x311   :  { %v7843_v60 = vpack.c.bf16 %v17359_v52, %v17514_v48  ;;  %v7845_v11 = vpack.c.bf16 %v17371_v23, %v17517_v0  ;;  %v7849_v52 = vpack.c.bf16 %v17520_v14, %v17382_v28  ;;  %v17523_v23 = vld [vmem:[#allocation266_spill] sm:$0xff]  ;;  %v17525_v61 = vld [vmem:[#allocation15_spill] sm:$0xff]  ;;  %v7855_v28 = vpack.c.bf16 %v17400_v22, %v17398_v57  ;;  %v17531_v30 = vld [vmem:[#allocation172_spill] sm:$0xff] }
 0x312   :  { %8394 = vmatpush1.bf16.msra.mxu0 %v17495_v17  ;;  %v7861_v57 = vpack.c.bf16 %v17420_v58, %v17418_v63  ;;  %v7865_v24 = vpack.c.bf16 %v17534_v18, %v17431_v34  ;;  %v17536_v63 = vld [vmem:[#allocation184_spill] sm:$0xff]  ;;  %v17540_v34 = vld [vmem:[#allocation189_spill] sm:$0xff]  ;;  %v17543_v45 = vld [vmem:[#allocation290_spill] sm:$0xff] }
 0x313   :  { %8396 = vmatprep.subr.bf16.mxu0 %v17496_v51  ;;  %7818 = vmatpush1.bf16.msra.mxu1 %v7817_v37  ;;  %v17519_v37 = vld [vmem:[#allocation263_spill] sm:$0xff]  ;;  %v17524_v51 = vld [vmem:[#allocation269_spill] sm:$0xff]  ;;  %v7867_v58 = vpack.c.bf16 %v17437_v40, %v17536_v63  ;;  %v17539_v39 = vld [vmem:[#allocation188_spill] sm:$0xff] }
 0x314   :  { %7820 = vmatprep.subr.bf16.mxu1 %v7819_v3  ;;  %v17522_v3 = vld [vmem:[#allocation137_spill] sm:$0xff]  ;;  %v17541_v32 = vld [vmem:[#allocation196_spill] sm:$0xff]  ;;  %v677_v63 = vld [vmem:[#allocation6 + $0x660] sm:$0xff] }
 0x315   :  { %v7851_v17 = vpack.c.bf16 %v17388_v53, %v17522_v3  ;;  %v7857_v53 = vpack.c.bf16 %v17408_v12, %v17406_v59  ;;  %v7863_v59 = vpack.c.bf16 %v17424_v1, %v17531_v30  ;;  %v17532_v12 = vld [vmem:[#allocation277_spill] sm:$0xff]  ;;  %v17538_v1 = vld [vmem:[#allocation287_spill] sm:$0xff] }
 0x316   :  { %8398 = vmatpush1.bf16.msra.mxu0 %v17497_v47  ;;  %v17527_v47 = vld [vmem:[#allocation273_spill] sm:$0xff] }
 0x317   :  { %8400 = vmatprep.subr.bf16.mxu0 %v17498_v46  ;;  %7822 = vmatpush1.bf16.msra.mxu1 %v7821_v56  ;;  %v12858_v56 = vrot.slane %v750_v21, %v17525_v61  ;;  %v667_v9 = vld [vmem:[#allocation6 + $0x610] sm:$0xff]  ;;  %v672_v35 = vld [vmem:[#allocation6 + $0x638] sm:$0xff]  ;;  %v673_v61 = vld [vmem:[#allocation6 + $0x640] sm:$0xff] }
 0x318   :  { %7824 = vmatprep.subr.bf16.mxu1 %v7823_v7  ;;  %v17526_v7 = vld [vmem:[#allocation272_spill] sm:$0xff]  ;;  %v4639_v48 = vand.u32 4294901760, %v672_v35  ;;  %v17554_v18 = vld [vmem:[#allocation245_spill] sm:$0xff] }
 0x319   :  { %v766_v46 = vcombine.high %v12858_v56, %v12858_v56 }
 0x31a   :  { %8402 = vmatpush1.bf16.msra.mxu0 %v17500_v36  ;;  %v666_v36 = vld [vmem:[#allocation6 + $0x608] sm:$0xff] }
 0x31b   :  { %8404 = vmatprep.subr.bf16.mxu0 %v17501_v43  ;;  %7826 = vmatpush1.bf16.msra.mxu1 %v7825_v25  ;;  %v17529_v25 = vld [vmem:[#allocation275_spill] sm:$0xff]  ;;  %v12874_v22 = vand.u32 4294901760, %v766_v46  ;;  %v668_v43 = vld [vmem:[#allocation6 + $0x618] sm:$0xff] }
 0x31c   :  { %7828 = vmatprep.subr.bf16.mxu1 %v7827_v15  ;;  %v17533_v15 = vld [vmem:[#allocation280_spill] sm:$0xff] }
 0x31d   :  { %17530 = vst [vmem:[#allocation85_spill] sm:$0xff] %v12874_v22 }
 0x31e   :  { %8406 = vmatpush1.bf16.msra.mxu0 %v17502_v2  ;;  %v4627_v2 = vand.u32 4294901760, %v666_v36 }
 0x31f   :  { %8408 = vmatprep.subr.bf16.mxu0 %v17503_v29  ;;  %7830 = vmatpush1.bf16.msra.mxu1 %v7829_v16  ;;  %v12883_v16 = vsub.f32 %v766_v46, %v12874_v22  ;;  %v4631_v29 = vand.u32 4294901760, %v668_v43  ;;  %v678_v46 = vld [vmem:[#allocation6 + $0x668] sm:$0xff] }
 0x320   :  { %7832 = vmatprep.subr.bf16.mxu1 %v7831_v10  ;;  %v17537_v10 = vld [vmem:[#allocation283_spill] sm:$0xff] }
 0x321   :  { %17535 = vst [vmem:[#allocation86_spill] sm:$0xff] %v12883_v16  ;;  %v12896_v19 = vpack.c.bf16 %v4631_v29, %v4627_v2  ;;  %v12905_v14 = vsub.f32 %v668_v43, %v4631_v29  ;;  %v682_v29 = vld [vmem:[#allocation6 + $0x688] sm:$0xff] }
 0x322   :  { %8410 = vmatpush1.bf16.msra.mxu0 %v17506_v5  ;;  %v15664_v5 = vand.u32 4294901760, %v12883_v16 }
 0x323   :  { %8412 = vmatprep.subr.bf16.mxu0 %v17507_v38  ;;  %7834 = vmatpush1.bf16.msra.mxu1 %v7833_v50  ;;  %v665_v50 = vld [vmem:[#allocation6 + $0x600] sm:$0xff]  ;;  %v670_v38 = vld [vmem:[#allocation6 + $0x628] sm:$0xff]  ;;  %17545 = vst [vmem:[#allocation242_spill] sm:$0xff] %v12896_v19 }
 0x324   :  { %7836 = vmatprep.subr.bf16.mxu1 %v7835_v41  ;;  %v7869_v41 = vpack.c.bf16 %v17540_v34, %v17539_v39 }
 0x326   :  { %8414 = vmatpush1.bf16.msra.mxu0 %v17511_v54  ;;  %v4633_v54 = vand.u32 4294901760, %v667_v9 }
 0x327   :  { %8416 = vmatprep.subr.bf16.mxu0 %v17512_v33  ;;  %7838 = vmatpush1.bf16.msra.mxu1 %v7837_v49  ;;  %v17542_v49 = vld [vmem:[#allocation198_spill] sm:$0xff]  ;;  %v17544_v33 = vld [vmem:[#allocation293_spill] sm:$0xff] }
 0x328   :  { %7840 = vmatprep.subr.bf16.mxu1 %v7839_v27  ;;  %v7871_v40 = vpack.c.bf16 %v17542_v49, %v17541_v32  ;;  %v4629_v27 = vand.u32 4294901760, %v665_v50  ;;  %v4659_v49 = vand.u32 4294901760, %v682_v29 }
 0x32a   :  { %8418 = vmatpush1.bf16.msra.mxu0 %v17515_v31  ;;  %v671_v31 = vld [vmem:[#allocation6 + $0x630] sm:$0xff]  ;;  %v12908_v4 = vpack.c.bf16 %v4633_v54, %v4629_v27  ;;  %v12910_v21 = vsub.f32 %v665_v50, %v4629_v27  ;;  %v684_v50 = vld [vmem:[#allocation6 + $0x698] sm:$0xff] }
 0x32b   :  { %8420 = vmatprep.subr.bf16.mxu0 %v17516_v55  ;;  %7842 = vmatpush1.bf16.msra.mxu1 %v7841_v62  ;;  %v4635_v62 = vand.u32 4294901760, %v670_v38  ;;  %v17546_v55 = vld [vmem:[#allocation200_spill] sm:$0xff] }
 0x32c   :  { %7844 = vmatprep.subr.bf16.mxu1 %v7843_v60  ;;  %v669_v60 = vld [vmem:[#allocation6 + $0x620] sm:$0xff]  ;;  %v7873_v0 = vpack.c.bf16 %v17465_v44, %v17546_v55  ;;  %17549 = vst [vmem:[#allocation88_spill] sm:$0xff] %v12908_v4  ;;  %v12913_v44 = vsub.f32 %v667_v9, %v4633_v54  ;;  %v683_v27 = vld [vmem:[#allocation6 + $0x690] sm:$0xff] }
 0x32d   :  { %v4637_v3 = vand.u32 4294901760, %v669_v60 }
 0x32e   :  { %8422 = vmatpush1.bf16.msra.mxu0 %v17518_v8  ;;  %v676_v8 = vld [vmem:[#allocation6 + $0x658] sm:$0xff] }
 0x32f   :  { %8424 = vmatprep.subr.bf16.mxu0 %v17519_v37  ;;  %7846 = vmatpush1.bf16.msra.mxu1 %v7845_v11  ;;  %v4758_v11 = vsub.f32 %v12883_v16, %v15664_v5  ;;  %v12903_v37 = vsub.f32 %v666_v36, %v4627_v2  ;;  %v4651_v36 = vand.u32 4294901760, %v678_v46  ;;  %v711_v16 = vld [vmem:[#allocation6 + $0x770] sm:$0xff] }
 0x330   :  { %7848 = vmatprep.subr.bf16.mxu1 %v7847_v20  ;;  %v674_v20 = vld [vmem:[#allocation6 + $0x648] sm:$0xff] }
 0x331   :  { %17547 = vst [vmem:[#allocation87_spill] sm:$0xff] %v12903_v37 }
 0x332   :  { %8426 = vmatpush1.bf16.msra.mxu0 %v17523_v23  ;;  %v12915_v23 = vpack.c.bf16 %v4639_v48, %v4635_v62 }
 0x333   :  { %8428 = vmatprep.subr.bf16.mxu0 %v17524_v51  ;;  %7850 = vmatpush1.bf16.msra.mxu1 %v7849_v52  ;;  %v17548_v52 = vld [vmem:[#allocation296_spill] sm:$0xff]  ;;  %v4643_v51 = vand.u32 4294901760, %v674_v20 }
 0x334   :  { %7852 = vmatprep.subr.bf16.mxu1 %v7851_v17  ;;  %v4641_v17 = vand.u32 4294901760, %v671_v31  ;;  %17550 = vst [vmem:[#allocation93_spill] sm:$0xff] %v12915_v23 }
 0x336   :  { %8430 = vmatpush1.bf16.msra.mxu0 %v17526_v7  ;;  %v4759_v7 = vand.u32 4294901760, %v4758_v11 }
 0x337   :  { %8432 = vmatprep.subr.bf16.mxu0 %v17527_v47  ;;  %7854 = vmatpush1.bf16.msra.mxu1 %v7853_v26  ;;  %v4647_v26 = vand.u32 4294901760, %v676_v8  ;;  %v12917_v47 = vsub.f32 %v670_v38, %v4635_v62 }
 0x338   :  { %7856 = vmatprep.subr.bf16.mxu1 %v7855_v28  ;;  %v675_v28 = vld [vmem:[#allocation6 + $0x650] sm:$0xff] }
 0x339   :  { %17551 = vst [vmem:[#allocation94_spill] sm:$0xff] %v12917_v47  ;;  %v12943_v2 = vsub.f32 %v676_v8, %v4647_v26 }
 0x33a   :  { %8434 = vmatpush1.bf16.msra.mxu0 %v17528_v42  ;;  %v12922_v42 = vsub.f32 %v669_v60, %v4637_v3  ;;  %v688_v60 = vld [vmem:[#allocation6 + $0x6b8] sm:$0xff] }
 0x33b   :  { %8436 = vmatprep.subr.bf16.mxu0 %v17529_v25  ;;  %7858 = vmatpush1.bf16.msra.mxu1 %v7857_v53  ;;  %v12919_v53 = vsub.f32 %v672_v35, %v4639_v48  ;;  %v12924_v25 = vsub.f32 %v671_v31, %v4641_v17  ;;  %v686_v48 = vld [vmem:[#allocation6 + $0x6a8] sm:$0xff]  ;;  %v700_v35 = vld [vmem:[#allocation6 + $0x718] sm:$0xff] }
 0x33c   :  { %7860 = vmatprep.subr.bf16.mxu1 %v7859_v6  ;;  %v680_v6 = vld [vmem:[#allocation6 + $0x678] sm:$0xff] }
 0x33d   :  { %17552 = vst [vmem:[#allocation95_spill] sm:$0xff] %v12919_v53  ;;  %v4655_v43 = vand.u32 4294901760, %v680_v6 }
 0x33e   :  { %8438 = vmatpush1.bf16.msra.mxu0 %v17532_v12  ;;  %v4645_v12 = vand.u32 4294901760, %v673_v61 }
 0x33f   :  { %8440 = vmatprep.subr.bf16.mxu0 %v17533_v15  ;;  %7862 = vmatpush1.bf16.msra.mxu1 %v7861_v57  ;;  %v4649_v15 = vand.u32 4294901760, %v675_v28  ;;  %v12955_v32 = vpack.c.bf16 %v4655_v43, %v4651_v36  ;;  %v12961_v62 = vsub.f32 %v680_v6, %v4655_v43  ;;  %v692_v6 = vld [vmem:[#allocation6 + $0x6d8] sm:$0xff] }
 0x340   :  { %7864 = vmatprep.subr.bf16.mxu1 %v7863_v59  ;;  %v12931_v59 = vpack.c.bf16 %v4641_v17, %v4637_v3  ;;  %v12945_v9 = vsub.f32 %v673_v61, %v4645_v12  ;;  %v4667_v3 = vand.u32 4294901760, %v686_v48  ;;  %v4671_v17 = vand.u32 4294901760, %v688_v60 }
 0x341   :  { %v12947_v39 = vsub.f32 %v675_v28, %v4649_v15  ;;  %v12950_v34 = vpack.c.bf16 %v4649_v15, %v4645_v12  ;;  %17559 = vst [vmem:[#allocation109_spill] sm:$0xff] %v12955_v32  ;;  %v12977_v28 = vsub.f32 %v682_v29, %v4659_v49 }
 0x342   :  { %8442 = vmatpush1.bf16.msra.mxu0 %v17537_v10  ;;  %17553 = vst [vmem:[#allocation96_spill] sm:$0xff] %v12931_v59  ;;  %17557 = vst [vmem:[#allocation103_spill] sm:$0xff] %v12945_v9  ;;  %v13018_v10 = vand.u32 4294901760, %v12858_v56 }
 0x343   :  { %8444 = vmatprep.subr.bf16.mxu0 %v17538_v1  ;;  %7866 = vmatpush1.bf16.msra.mxu1 %v7865_v24  ;;  %v12937_v24 = vpack.c.bf16 %v4647_v26, %v4643_v51  ;;  %v12941_v1 = vsub.f32 %v674_v20, %v4643_v51  ;;  %17558 = vst [vmem:[#allocation104_spill] sm:$0xff] %v12950_v34  ;;  %v4665_v20 = vand.u32 4294901760, %v683_v27  ;;  %v685_v51 = vld [vmem:[#allocation6 + $0x6a0] sm:$0xff]  ;;  %v687_v26 = vld [vmem:[#allocation6 + $0x6b0] sm:$0xff]  ;;  %17562 = vst [vmem:[#allocation112_spill] sm:$0xff] %v12977_v28 }
 0x344   :  { %7868 = vmatprep.subr.bf16.mxu1 %v7867_v58  ;;  %v679_v58 = vld [vmem:[#allocation6 + $0x670] sm:$0xff]  ;;  %v4673_v43 = vand.u32 4294901760, %v687_v26  ;;  %17575 = vst [vmem:[#allocation57_spill] sm:$0xff] %v13018_v10 }
 0x345   :  { %17555 = vst [vmem:[#allocation101_spill] sm:$0xff] %v12937_v24  ;;  %17556 = vst [vmem:[#allocation102_spill] sm:$0xff] %v12941_v1  ;;  %v4657_v38 = vand.u32 4294901760, %v679_v58  ;;  %v12983_v15 = vsub.f32 %v683_v27, %v4665_v20  ;;  %v694_v27 = vld [vmem:[#allocation6 + $0x6e8] sm:$0xff] }
 0x346   :  { %8446 = vmatpush1.bf16.msra.mxu0 %v17543_v45  ;;  %v681_v45 = vld [vmem:[#allocation6 + $0x680] sm:$0xff]  ;;  %v13001_v5 = vsub.f32 %v687_v26, %v4673_v43 }
 0x347   :  { %8448 = vmatprep.subr.bf16.mxu0 %v17544_v33  ;;  %7870 = vmatpush1.bf16.msra.mxu1 %v7869_v41  ;;  %v4653_v41 = vand.u32 4294901760, %v677_v63  ;;  %v12959_v33 = vsub.f32 %v678_v46, %v4651_v36  ;;  %v12965_v55 = vsub.f32 %v679_v58, %v4657_v38  ;;  %v4661_v11 = vand.u32 4294901760, %v681_v45  ;;  %v690_v46 = vld [vmem:[#allocation6 + $0x6c8] sm:$0xff]  ;;  %17564 = vst [vmem:[#allocation118_spill] sm:$0xff] %v12983_v15  ;;  %v697_v26 = vld [vmem:[#allocation6 + $0x700] sm:$0xff] }
 0x348   :  { %7872 = vmatprep.subr.bf16.mxu1 %v7871_v40  ;;  %v4663_v40 = vand.u32 4294901760, %v684_v50  ;;  %v4669_v36 = vand.u32 4294901760, %v685_v51  ;;  %v12991_v58 = vpack.c.bf16 %v4671_v17, %v4667_v3  ;;  %v4675_v29 = vand.u32 4294901760, %v690_v46  ;;  %17570 = vst [vmem:[#allocation268_spill] sm:$0xff] %v13001_v5 }
 0x349   :  { %v12963_v31 = vsub.f32 %v677_v63, %v4653_v41  ;;  %v12981_v12 = vsub.f32 %v681_v45, %v4661_v11  ;;  %v12997_v45 = vsub.f32 %v688_v60, %v4671_v17  ;;  %v4683_v60 = vand.u32 4294901760, %v694_v27  ;;  %v693_v17 = vld [vmem:[#allocation6 + $0x6e0] sm:$0xff] }
 0x34a   :  { %8450 = vmatpush1.bf16.msra.mxu0 %v17548_v52  ;;  %v12973_v52 = vpack.c.bf16 %v4663_v40, %v4659_v49  ;;  %17566 = vst [vmem:[#allocation37_spill] sm:$0xff] %v12991_v58  ;;  %v13004_v63 = vpack.c.bf16 %v4673_v43, %v4669_v36  ;;  %v13013_v49 = vsub.f32 %v690_v46, %v4675_v29  ;;  %v698_v43 = vld [vmem:[#allocation6 + $0x708] sm:$0xff]  ;;  %v4685_v57 = vand.u32 4294901760, %v693_v17 }
 0x34b   :  { %8452 = vmatprep.subr.bf16.mxu0 %v12896_v19  ;;  %7874 = vmatpush1.bf16.msra.mxu1 %v7873_v0  ;;  %v12968_v0 = vpack.c.bf16 %v4657_v38, %v4653_v41  ;;  %17563 = vst [vmem:[#allocation117_spill] sm:$0xff] %v12981_v12  ;;  %v689_v41 = vld [vmem:[#allocation6 + $0x6c0] sm:$0xff]  ;;  %v691_v38 = vld [vmem:[#allocation6 + $0x6d0] sm:$0xff]  ;;  %17568 = vst [vmem:[#allocation46_spill] sm:$0xff] %v12997_v45 }
 0x34c   :  { %17561 = vst [vmem:[#allocation111_spill] sm:$0xff] %v12973_v52  ;;  %17571 = vst [vmem:[#allocation48_spill] sm:$0xff] %v13004_v63  ;;  %v4677_v61 = vand.u32 4294901760, %v689_v41  ;;  %v4681_v8 = vand.u32 4294901760, %v691_v38 }
 0x34d   :  { %4621 = vmatmul.mubr.f32.vlgmr.msra.gmra.mrb[0].mxu0 %v17484_v13  ;;  %17560 = vst [vmem:[#allocation110_spill] sm:$0xff] %v12968_v0  ;;  %17573 = vst [vmem:[#allocation270_spill] sm:$0xff] %v13013_v49 }
 0x34e   :  { %8454 = vmatpush1.bf16.msra.mxu0 %v12908_v4  ;;  %4760 = vmatprep.mubr.f32.mxu0 %v4759_v7  ;;  %v12979_v7 = vsub.f32 %v684_v50, %v4663_v40  ;;  %v4679_v50 = vand.u32 4294901760, %v692_v6  ;;  %v12995_v40 = vsub.f32 %v686_v48, %v4667_v3  ;;  %v13020_v54 = vsub.f32 %v689_v41, %v4677_v61  ;;  %v699_v41 = vld [vmem:[#allocation6 + $0x710] sm:$0xff] }
 0x34f   :  { %2794 = vmatmul.mubr.f32.vlgmr.msra.gmra.mrb[0].mxu1 %v17554_v18  ;;  %8456 = vmatprep.subr.bf16.mxu0 %v12915_v23  ;;  %v12986_v18 = vpack.c.bf16 %v4665_v20, %v4661_v11  ;;  %v696_v11 = vld [vmem:[#allocation6 + $0x6f8] sm:$0xff]  ;;  %v12999_v20 = vsub.f32 %v685_v51, %v4669_v36  ;;  %v695_v51 = vld [vmem:[#allocation6 + $0x6f0] sm:$0xff]  ;;  %v13022_v13 = vsub.f32 %v691_v38, %v4681_v8  ;;  %v4697_v38 = vand.u32 4294901760, %v699_v41 }
 0x350   :  { %17567 = vst [vmem:[#allocation45_spill] sm:$0xff] %v12995_v40  ;;  %v13009_v48 = vpack.c.bf16 %v4679_v50, %v4675_v29  ;;  %v4687_v3 = vand.u32 4294901760, %v696_v11  ;;  %v13015_v36 = vsub.f32 %v692_v6, %v4679_v50  ;;  %17576 = vst [vmem:[#allocation58_spill] sm:$0xff] %v13020_v54  ;;  %v13025_v30 = vpack.c.bf16 %v4681_v8, %v4677_v61  ;;  %v702_v61 = vld [vmem:[#allocation6 + $0x728] sm:$0xff] }
 0x351   :  { %17565 = vst [vmem:[#allocation119_spill] sm:$0xff] %v12986_v18  ;;  %17569 = vst [vmem:[#allocation267_spill] sm:$0xff] %v12999_v20  ;;  %v4691_v29 = vand.u32 4294901760, %v698_v43  ;;  %v4695_v50 = vand.u32 4294901760, %v700_v35  ;;  %v722_v54 = vld [vmem:[#allocation6 + $0x7c8] sm:$0xff] }
 0x352   :  { %8458 = vmatpush1.bf16.msra.mxu0 %v12931_v59  ;;  %17572 = vst [vmem:[#allocation49_spill] sm:$0xff] %v13009_v48  ;;  %17574 = vst [vmem:[#allocation271_spill] sm:$0xff] %v13015_v36  ;;  %v13030_v6 = vpack.c.bf16 %v4687_v3, %v4683_v60  ;;  %v13036_v8 = vsub.f32 %v696_v11, %v4687_v3  ;;  %v724_v36 = vld [vmem:[#allocation6 + $0x7d8] sm:$0xff] }
 0x353   :  { %8460 = vmatprep.subr.bf16.mxu0 %v12937_v24  ;;  %17577 = vst [vmem:[#allocation60_spill] sm:$0xff] %v13022_v13  ;;  %17578 = vst [vmem:[#allocation61_spill] sm:$0xff] %v13025_v30  ;;  %v13052_v11 = vpack.c.bf16 %v4695_v50, %v4691_v29 }
 0x354   :  { %17579 = vst [vmem:[#allocation121_spill] sm:$0xff] %v13030_v6  ;;  %17581 = vst [vmem:[#allocation122_spill] sm:$0xff] %v13036_v8  ;;  %v720_v8 = vld [vmem:[#allocation6 + $0x7b8] sm:$0xff] }
 0x355   :  { %17586 = vst [vmem:[#allocation135_spill] sm:$0xff] %v13052_v11 }
 0x356   :  { %8462 = vmatpush1.bf16.msra.mxu0 %v12950_v34  ;;  %v13056_v34 = vsub.f32 %v698_v43, %v4691_v29 }
 0x357   :  { %8464 = vmatprep.subr.bf16.mxu0 %v12955_v32  ;;  %v4693_v32 = vand.u32 4294901760, %v697_v26 }
 0x358   :  { %17587 = vst [vmem:[#allocation143_spill] sm:$0xff] %v13056_v34  ;;  %v713_v34 = vld [vmem:[#allocation6 + $0x780] sm:$0xff] }
 0x359   :  { %v13060_v24 = vsub.f32 %v697_v26, %v4693_v32  ;;  %v13066_v59 = vpack.c.bf16 %v4697_v38, %v4693_v32  ;;  %v4725_v13 = vand.u32 4294901760, %v713_v34 }
 0x35a   :  { %8466 = vmatpush1.bf16.msra.mxu0 %v12968_v0 }
 0x35b   :  { %8468 = vmatprep.subr.bf16.mxu0 %v12973_v52  ;;  %v13038_v52 = vsub.f32 %v693_v17, %v4685_v57  ;;  %v701_v17 = vld [vmem:[#allocation6 + $0x720] sm:$0xff]  ;;  %17589 = vst [vmem:[#allocation146_spill] sm:$0xff] %v13060_v24  ;;  %17591 = vst [vmem:[#allocation155_spill] sm:$0xff] %v13066_v59 }
 0x35c   :  { %v4701_v23 = vand.u32 4294901760, %v701_v17 }
 0x35d   :  { %17582 = vst [vmem:[#allocation123_spill] sm:$0xff] %v13038_v52 }
 0x35e   :  { %8470 = vmatpush1.bf16.msra.mxu0 %v12986_v18  ;;  %v13034_v18 = vsub.f32 %v694_v27, %v4683_v60  ;;  %v4699_v60 = vand.u32 4294901760, %v702_v61  ;;  %v13062_v27 = vsub.f32 %v699_v41, %v4697_v38  ;;  %v707_v41 = vld [vmem:[#allocation6 + $0x750] sm:$0xff]  ;;  %v710_v38 = vld [vmem:[#allocation6 + $0x768] sm:$0xff]  ;;  %v13079_v19 = vsub.f32 %v701_v17, %v4701_v23 }
 0x35f   :  { %8472 = vmatprep.subr.bf16.mxu0 %v12991_v58  ;;  %v4689_v58 = vand.u32 4294901760, %v695_v51 }
 0x360   :  { %17580 = vst [vmem:[#allocation68_spill] sm:$0xff] %v13034_v18  ;;  %17590 = vst [vmem:[#allocation147_spill] sm:$0xff] %v13062_v27  ;;  %v4715_v27 = vand.u32 4294901760, %v710_v38 }
 0x361   :  { %v13040_v46 = vsub.f32 %v695_v51, %v4689_v58  ;;  %v13047_v0 = vpack.c.bf16 %v4689_v58, %v4685_v57  ;;  %v703_v51 = vld [vmem:[#allocation6 + $0x730] sm:$0xff]  ;;  %v13058_v57 = vsub.f32 %v700_v35, %v4695_v50  ;;  %v706_v58 = vld [vmem:[#allocation6 + $0x748] sm:$0xff]  ;;  %v705_v50 = vld [vmem:[#allocation6 + $0x740] sm:$0xff]  ;;  %17595 = vst [vmem:[#allocation167_spill] sm:$0xff] %v13079_v19  ;;  %v4735_v19 = vand.u32 4294901760, %v720_v8 }
 0x362   :  { %8474 = vmatpush1.bf16.msra.mxu0 %v13004_v63  ;;  %v704_v63 = vld [vmem:[#allocation6 + $0x738] sm:$0xff]  ;;  %v4705_v4 = vand.u32 4294901760, %v703_v51  ;;  %v4707_v29 = vand.u32 4294901760, %v706_v58 }
 0x363   :  { %8476 = vmatprep.subr.bf16.mxu0 %v13009_v48  ;;  %17583 = vst [vmem:[#allocation131_spill] sm:$0xff] %v13040_v46  ;;  %v13044_v48 = vsub.f32 %v12858_v56, %v13018_v10  ;;  %17585 = vst [vmem:[#allocation134_spill] sm:$0xff] %v13047_v0  ;;  %v4703_v3 = vand.u32 4294901760, %v704_v63  ;;  %v4721_v46 = vand.u32 4294901760, %v711_v16 }
 0x364   :  { %17588 = vst [vmem:[#allocation144_spill] sm:$0xff] %v13058_v57  ;;  %v13081_v43 = vsub.f32 %v703_v51, %v4705_v4  ;;  %v13089_v56 = vpack.c.bf16 %v4705_v4, %v4701_v23  ;;  %v13098_v4 = vsub.f32 %v706_v58, %v4707_v29  ;;  %v717_v58 = vld [vmem:[#allocation6 + $0x7a0] sm:$0xff] }
 0x365   :  { %17584 = vst [vmem:[#allocation132_spill] sm:$0xff] %v13044_v48  ;;  %v13071_v35 = vpack.c.bf16 %v4703_v3, %v4699_v60  ;;  %v13077_v32 = vsub.f32 %v704_v63, %v4703_v3  ;;  %v17597_v10 = vand.u32 4294901760, %v13044_v48  ;;  %v4713_v63 = vand.u32 4294901760, %v707_v41  ;;  %v716_v3 = vld [vmem:[#allocation6 + $0x798] sm:$0xff] }
 0x366   :  { %8478 = vmatpush1.bf16.msra.mxu0 %v13025_v30  ;;  %v708_v30 = vld [vmem:[#allocation6 + $0x758] sm:$0xff]  ;;  %17596 = vst [vmem:[#allocation168_spill] sm:$0xff] %v13081_v43  ;;  %17598 = vst [vmem:[#allocation170_spill] sm:$0xff] %v13089_v56 }
 0x367   :  { %8480 = vmatprep.subr.bf16.mxu0 %v13030_v6  ;;  %17592 = vst [vmem:[#allocation156_spill] sm:$0xff] %v13071_v35  ;;  %v4711_v26 = vand.u32 4294901760, %v708_v30  ;;  %v13075_v6 = vsub.f32 %v702_v61, %v4699_v60  ;;  %17594 = vst [vmem:[#allocation159_spill] sm:$0xff] %v13077_v32  ;;  %v13086_v57 = vsub.f32 %v13044_v48, %v17597_v10  ;;  %v4709_v61 = vand.u32 4294901760, %v705_v50  ;;  %v714_v60 = vld [vmem:[#allocation6 + $0x788] sm:$0xff]  ;;  %v715_v10 = vld [vmem:[#allocation6 + $0x790] sm:$0xff] }
 0x368   :  { %17600 = vst [vmem:[#allocation179_spill] sm:$0xff] %v13098_v4  ;;  %v13104_v17 = vsub.f32 %v707_v41, %v4713_v63  ;;  %v4727_v32 = vand.u32 4294901760, %v716_v3 }
 0x369   :  { %17593 = vst [vmem:[#allocation158_spill] sm:$0xff] %v13075_v6  ;;  %v13094_v51 = vpack.c.bf16 %v4711_v26, %v4707_v29  ;;  %v13100_v23 = vsub.f32 %v708_v30, %v4711_v26  ;;  %v13102_v52 = vsub.f32 %v705_v50, %v4709_v61  ;;  %v718_v6 = vld [vmem:[#allocation6 + $0x7a8] sm:$0xff]  ;;  %v13107_v18 = vpack.c.bf16 %v4713_v63, %v4709_v61  ;;  %v719_v29 = vld [vmem:[#allocation6 + $0x7b0] sm:$0xff] }
 0x36a   :  { %8482 = vmatpush1.bf16.msra.mxu0 %v13047_v0  ;;  %v712_v0 = vld [vmem:[#allocation6 + $0x778] sm:$0xff]  ;;  %17603 = vst [vmem:[#allocation183_spill] sm:$0xff] %v13104_v17  ;;  %v13114_v50 = vsub.f32 %v710_v38, %v4715_v27  ;;  %v4731_v43 = vand.u32 4294901760, %v718_v6  ;;  %v13124_v30 = vsub.f32 %v711_v16, %v4721_v46  ;;  %v721_v38 = vld [vmem:[#allocation6 + $0x7c0] sm:$0xff]  ;;  %v13138_v16 = vsub.f32 %v713_v34, %v4725_v13 }
 0x36b   :  { %8484 = vmatprep.subr.bf16.mxu0 %v13052_v11  ;;  %v709_v11 = vld [vmem:[#allocation6 + $0x760] sm:$0xff]  ;;  %17599 = vst [vmem:[#allocation171_spill] sm:$0xff] %v13094_v51  ;;  %v4719_v24 = vand.u32 4294901760, %v712_v0  ;;  %17601 = vst [vmem:[#allocation180_spill] sm:$0xff] %v13100_v23  ;;  %v4733_v23 = vand.u32 4294901760, %v717_v58  ;;  %v4743_v17 = vand.u32 4294901760, %v724_v36 }
 0x36c   :  { %v4717_v48 = vand.u32 4294901760, %v709_v11  ;;  %17602 = vst [vmem:[#allocation182_spill] sm:$0xff] %v13102_v52  ;;  %17604 = vst [vmem:[#allocation191_spill] sm:$0xff] %v13107_v18  ;;  %v13146_v49 = vsub.f32 %v718_v6, %v4731_v43 }
 0x36d   :  { %v13112_v26 = vpack.c.bf16 %v4719_v24, %v4715_v27  ;;  %v13116_v41 = vsub.f32 %v712_v0, %v4719_v24  ;;  %v4737_v27 = vand.u32 4294901760, %v719_v29  ;;  %v723_v24 = vld [vmem:[#allocation6 + $0x7d0] sm:$0xff] }
 0x36e   :  { %8486 = vmatpush1.bf16.msra.mxu0 %v13066_v59  ;;  %v4729_v59 = vand.u32 4294901760, %v715_v10  ;;  %v13120_v61 = vpack.c.bf16 %v4721_v46, %v4717_v48  ;;  %v13122_v63 = vsub.f32 %v709_v11, %v4717_v48  ;;  %v4739_v46 = vand.u32 4294901760, %v722_v54  ;;  %17611 = vst [vmem:[#allocation207_spill] sm:$0xff] %v13146_v49 }
 0x36f   :  { %8488 = vmatprep.subr.bf16.mxu0 %v13071_v35  ;;  %v4723_v35 = vand.u32 4294901760, %v714_v60  ;;  %17605 = vst [vmem:[#allocation192_spill] sm:$0xff] %v13112_v26  ;;  %v13148_v11 = vsub.f32 %v720_v8, %v4735_v19  ;;  %v13155_v34 = vsub.f32 %v719_v29, %v4737_v27 }
 0x370   :  { %17606 = vst [vmem:[#allocation194_spill] sm:$0xff] %v13120_v61  ;;  %v13133_v48 = vpack.c.bf16 %v4729_v59, %v4725_v13  ;;  %v13142_v4 = vsub.f32 %v715_v10, %v4729_v59  ;;  %v13152_v13 = vsub.f32 %v717_v58, %v4733_v23  ;;  %v13162_v6 = vpack.c.bf16 %v4743_v17, %v4739_v46  ;;  %v727_v10 = vld [vmem:[#allocation6 + $0x7f0] sm:$0xff] }
 0x371   :  { %v13129_v0 = vsub.f32 %v714_v60, %v4723_v35  ;;  %v4745_v60 = vand.u32 4294901760, %v723_v24  ;;  %17613 = vst [vmem:[#allocation212_spill] sm:$0xff] %v13155_v34  ;;  %v13168_v58 = vsub.f32 %v724_v36, %v4743_v17  ;;  %v15769_v59 = vand.u32 4294901760, %v12910_v21 }
 0x372   :  { %8490 = vmatpush1.bf16.msra.mxu0 %v13089_v56  ;;  %v13131_v56 = vsub.f32 %v716_v3, %v4727_v32  ;;  %17609 = vst [vmem:[#allocation204_spill] sm:$0xff] %v13133_v48  ;;  %v726_v3 = vld [vmem:[#allocation6 + $0x7e8] sm:$0xff]  ;;  %17614 = vst [vmem:[#allocation239_spill] sm:$0xff] %v13162_v6  ;;  %v17619_v36 = vand.u32 4294901760, %v12903_v37 }
 0x373   :  { %8492 = vmatprep.subr.bf16.mxu0 %v13094_v51  ;;  %v13126_v51 = vpack.c.bf16 %v4727_v32, %v4723_v35  ;;  %v13144_v35 = vpack.c.bf16 %v4735_v19, %v4731_v43  ;;  %v4741_v32 = vand.u32 4294901760, %v721_v38  ;;  %v4747_v19 = vand.u32 4294901760, %v726_v3  ;;  %17615 = vst [vmem:[#allocation19_spill] sm:$0xff] %v13168_v58 }
 0x374   :  { %17608 = vst [vmem:[#allocation203_spill] sm:$0xff] %v13131_v56  ;;  %v4775_v17 = vsub.f32 %v12903_v37, %v17619_v36  ;;  %v4781_v36 = vsub.f32 %v12910_v21, %v15769_v59  ;;  %v15788_v59 = vand.u32 4294901760, %v12947_v39 }
 0x375   :  { %17607 = vst [vmem:[#allocation195_spill] sm:$0xff] %v13126_v51  ;;  %17610 = vst [vmem:[#allocation206_spill] sm:$0xff] %v13144_v35  ;;  %v13170_v29 = vpack.c.bf16 %v4745_v60, %v4741_v32  ;;  %v13173_v52 = vsub.f32 %v721_v38, %v4741_v32  ;;  %v17624_v38 = vand.u32 4294901760, %v12913_v44 }
 0x376   :  { %8494 = vmatpush1.bf16.msra.mxu0 %v13107_v18  ;;  %v728_v18 = vld [vmem:[#allocation6 + $0x7f8] sm:$0xff] }
 0x377   :  { %8496 = vmatprep.subr.bf16.mxu0 %v13112_v26  ;;  %v13150_v26 = vpack.c.bf16 %v4737_v27, %v4733_v23  ;;  %v4751_v8 = vand.u32 4294901760, %v728_v18  ;;  %v13166_v23 = vsub.f32 %v722_v54, %v4739_v46  ;;  %17616 = vst [vmem:[#allocation241_spill] sm:$0xff] %v13170_v29  ;;  %v725_v27 = vld [vmem:[#allocation6 + $0x7e0] sm:$0xff]  ;;  %17617 = vst [vmem:[#allocation22_spill] sm:$0xff] %v13173_v52  ;;  %v17620_v46 = vand.u32 4294901760, %v12905_v14 }
 0x378   :  { %v13179_v54 = vsub.f32 %v723_v24, %v4745_v60  ;;  %v4749_v56 = vand.u32 4294901760, %v725_v27  ;;  %v13194_v60 = vsub.f32 %v726_v3, %v4747_v19  ;;  %v17626_v24 = vand.u32 4294901760, %v12919_v53 }
 0x379   :  { %17612 = vst [vmem:[#allocation18_spill] sm:$0xff] %v13150_v26  ;;  %v4787_v43 = vsub.f32 %v12905_v14, %v17620_v46  ;;  %v13190_v32 = vpack.c.bf16 %v4751_v8, %v4747_v19  ;;  %v4776_v19 = vand.u32 4294901760, %v4775_v17  ;;  %v4782_v17 = vand.u32 4294901760, %v4781_v36 }
 0x37a   :  { %8498 = vmatpush1.bf16.msra.mxu0 %v13120_v61  ;;  %17618 = vst [vmem:[#allocation217_spill] sm:$0xff] %v13179_v54  ;;  %v4753_v61 = vand.u32 4294901760, %v727_v10  ;;  %17622 = vst [vmem:[#allocation221_spill] sm:$0xff] %v13194_v60  ;;  %v4811_v3 = vsub.f32 %v12919_v53, %v17626_v24 }
 0x37b   :  { %8500 = vmatprep.subr.bf16.mxu0 %v13126_v51  ;;  %17621 = vst [vmem:[#allocation216_spill] sm:$0xff] %v13190_v32  ;;  %v13196_v51 = vsub.f32 %v728_v18, %v4751_v8  ;;  %v4788_v8 = vand.u32 4294901760, %v4787_v43  ;;  %v15783_v43 = vand.u32 4294901760, %v12945_v9 }
 0x37c   :  { %v13224_v18 = vsub.f32 %v727_v10, %v4753_v61  ;;  %v17632_v10 = vand.u32 4294901760, %v12941_v1 }
 0x37d   :  { %17623 = vst [vmem:[#allocation215_spill] sm:$0xff] %v13196_v51  ;;  %v8515_v24 = vpack.c.bf16 %v4788_v8, %v4776_v19  ;;  %v4765_v19 = vand.u32 4294901760, %v13086_v57  ;;  %v4829_v8 = vsub.f32 %v12945_v9, %v15783_v43 }
 0x37e   :  { %8502 = vmatpush1.bf16.msra.mxu0 %v13133_v48  ;;  %v17625_v48 = vand.u32 4294901760, %v12917_v47  ;;  %17629 = vst [vmem:[#allocation236_spill] sm:$0xff] %v13224_v18  ;;  %v4823_v36 = vsub.f32 %v12941_v1, %v17632_v10  ;;  %v4841_v10 = vsub.f32 %v12947_v39, %v15788_v59  ;;  %v17633_v1 = vand.u32 4294901760, %v12959_v33 }
 0x37f   :  { %8504 = vmatprep.subr.bf16.mxu0 %v13144_v35  ;;  %v4793_v35 = vsub.f32 %v12913_v44, %v17624_v38  ;;  %v13217_v38 = vpack.c.bf16 %v4753_v61, %v4749_v56  ;;  %v4812_v61 = vand.u32 4294901760, %v4811_v3  ;;  %v15790_v3 = vand.u32 4294901760, %v12965_v55 }
 0x380   :  { %v4799_v37 = vsub.f32 %v12917_v47, %v17625_v48  ;;  %v13219_v48 = vsub.f32 %v725_v27, %v4749_v56  ;;  %v15780_v47 = vand.u32 4294901760, %v12943_v2  ;;  %v17631_v56 = vand.u32 4294901760, %v12924_v25 }
 0x381   :  { %17627 = vst [vmem:[#allocation23_spill] sm:$0xff] %v13217_v38  ;;  %v4824_v43 = vand.u32 4294901760, %v4823_v36  ;;  %v4842_v59 = vand.u32 4294901760, %v4841_v10  ;;  %v15798_v36 = vand.u32 4294901760, %v12995_v40 }
 0x382   :  { %8506 = vmatpush1.bf16.msra.mxu0 %v13150_v26  ;;  %17628 = vst [vmem:[#allocation26_spill] sm:$0xff] %v13219_v48  ;;  %v4794_v26 = vand.u32 4294901760, %v4793_v35  ;;  %v4800_v46 = vand.u32 4294901760, %v4799_v37  ;;  %v4817_v27 = vsub.f32 %v12924_v25, %v17631_v56  ;;  %v4835_v37 = vsub.f32 %v12943_v2, %v15780_v47 }
 0x383   :  { %8508 = vmatprep.subr.bf16.mxu0 %v13162_v6  ;;  %v17630_v6 = vand.u32 4294901760, %v12922_v42 }
 0x384   :  { %v8517_v35 = vpack.c.bf16 %v4794_v26, %v4782_v17  ;;  %v4818_v47 = vand.u32 4294901760, %v4817_v27  ;;  %v8519_v56 = vpack.c.bf16 %v4812_v61, %v4800_v46  ;;  %v4836_v9 = vand.u32 4294901760, %v4835_v37 }
 0x385   :  { %v4805_v53 = vsub.f32 %v12922_v42, %v17630_v6  ;;  %v15789_v6 = vand.u32 4294901760, %v12963_v31  ;;  %v4847_v26 = vsub.f32 %v12959_v33, %v17633_v1  ;;  %v4830_v27 = vand.u32 4294901760, %v4829_v8 }
 0x386   :  { %8510 = vmatpush1.bf16.msra.mxu0 %v13170_v29  ;;  %v15793_v29 = vand.u32 4294901760, %v12979_v7  ;;  %v15791_v46 = vand.u32 4294901760, %v12981_v12  ;;  %v15792_v61 = vand.u32 4294901760, %v12983_v15  ;;  %v15805_v1 = vand.u32 4294901760, %v12997_v45 }
 0x387   :  { %8512 = vmatprep.subr.bf16.mxu0 %v13190_v32  ;;  %v4806_v32 = vand.u32 4294901760, %v4805_v53  ;;  %v17634_v53 = vand.u32 4294901760, %v12961_v62  ;;  %v4865_v37 = vsub.f32 %v12965_v55, %v15790_v3  ;;  %v17635_v8 = vand.u32 4294901760, %v12977_v28 }
 0x388   :  { %v4848_v10 = vand.u32 4294901760, %v4847_v26  ;;  %v4889_v3 = vsub.f32 %v12983_v15, %v15792_v61  ;;  %v17636_v61 = vld [vmem:[#allocation270_spill] sm:$0xff] }
 0x389   :  { %v4859_v17 = vsub.f32 %v12961_v62, %v17634_v53  ;;  %v8521_v57 = vpack.c.bf16 %v4818_v47, %v4806_v32  ;;  %v4883_v47 = vsub.f32 %v12979_v7, %v15793_v29  ;;  %v8523_v32 = vpack.c.bf16 %v4836_v9, %v4824_v43 }
 0x38a   :  { %8514 = vmatpush1.bf16.msra.mxu0 %v13217_v38  ;;  %v4866_v26 = vand.u32 4294901760, %v4865_v37  ;;  %v15811_v29 = vand.u32 4294901760, %v17636_v61 }
 0x38b   :  { %8516 = vmatprep.subr.bf16.mxu0 %v8515_v24  ;;  %v4853_v24 = vsub.f32 %v12963_v31, %v15789_v6  ;;  %v4860_v53 = vand.u32 4294901760, %v4859_v17  ;;  %v8525_v6 = vpack.c.bf16 %v4842_v59, %v4830_v27  ;;  %v15812_v59 = vand.u32 4294901760, %v13001_v5 }
 0x38c   :  { %v4884_v27 = vand.u32 4294901760, %v4883_v47 }
 0x38d   :  { %4766 = vmatmul.mubr.f32.vlgmr.msra.gmra.mrb[0].mxu0 %v4765_v19  ;;  %v4871_v19 = vsub.f32 %v12977_v28, %v17635_v8  ;;  %v4895_v8 = vsub.f32 %v12995_v40, %v15798_v36  ;;  %v4854_v43 = vand.u32 4294901760, %v4853_v24  ;;  %v4890_v40 = vand.u32 4294901760, %v4889_v3 }
 0x38e   :  { %8518 = vmatpush1.bf16.msra.mxu0 %v8517_v35  ;;  %5157 = vmatprep.mubr.f32.mxu0 %v12874_v22  ;;  %v4877_v35 = vsub.f32 %v12981_v12, %v15791_v46  ;;  %v8527_v46 = vpack.c.bf16 %v4860_v53, %v4848_v10  ;;  %v17637_v22 = vld [vmem:[#allocation271_spill] sm:$0xff]  ;;  %v17638_v12 = vld [vmem:[#allocation58_spill] sm:$0xff]  ;;  %v4913_v37 = vsub.f32 %v13001_v5, %v15812_v59  ;;  %v17641_v10 = vld [vmem:[#allocation68_spill] sm:$0xff] }
 0x38f   :  { %8520 = vmatprep.subr.bf16.mxu0 %v8519_v56  ;;  %v4907_v56 = vsub.f32 %v12997_v45, %v15805_v1  ;;  %v4872_v17 = vand.u32 4294901760, %v4871_v19  ;;  %v15810_v38 = vand.u32 4294901760, %v17637_v22  ;;  %v15815_v15 = vand.u32 4294901760, %v17638_v12  ;;  %v17639_v1 = vld [vmem:[#allocation60_spill] sm:$0xff]  ;;  %v17645_v59 = vld [vmem:[#allocation143_spill] sm:$0xff] }
 0x390   :  { %v4878_v36 = vand.u32 4294901760, %v4877_v35  ;;  %v15817_v45 = vand.u32 4294901760, %v17639_v1  ;;  %v4896_v9 = vand.u32 4294901760, %v4895_v8  ;;  %v8529_v19 = vpack.c.bf16 %v4866_v26, %v4854_v43  ;;  %v17642_v35 = vld [vmem:[#allocation122_spill] sm:$0xff]  ;;  %v17646_v8 = vld [vmem:[#allocation144_spill] sm:$0xff] }
 0x391   :  { %v4908_v28 = vand.u32 4294901760, %v4907_v56  ;;  %v8531_v47 = vpack.c.bf16 %v4884_v27, %v4872_v17  ;;  %v4919_v3 = vsub.f32 %v17636_v61, %v15811_v29  ;;  %v4925_v56 = vsub.f32 %v17638_v12, %v15815_v15  ;;  %v17643_v27 = vld [vmem:[#allocation123_spill] sm:$0xff] }
 0x392   :  { %8522 = vmatpush1.bf16.msra.mxu0 %v8521_v57  ;;  %v17640_v57 = vand.u32 4294901760, %v12999_v20  ;;  %v4914_v17 = vand.u32 4294901760, %v4913_v37  ;;  %v17647_v12 = vand.u32 4294901760, %v17641_v10  ;;  %v17656_v29 = vand.u32 4294901760, %v17646_v8 }
 0x393   :  { %8524 = vmatprep.subr.bf16.mxu0 %v8523_v32  ;;  %v4931_v32 = vsub.f32 %v17637_v22, %v15810_v38  ;;  %v8535_v43 = vpack.c.bf16 %v4908_v28, %v4896_v9  ;;  %v17644_v38 = vld [vmem:[#allocation131_spill] sm:$0xff]  ;;  %v4920_v22 = vand.u32 4294901760, %v4919_v3  ;;  %v17648_v28 = vand.u32 4294901760, %v17642_v35 }
 0x394   :  { %v4901_v24 = vsub.f32 %v12999_v20, %v17640_v57  ;;  %v17651_v57 = vld [vmem:[#allocation158_spill] sm:$0xff] }
 0x395   :  { %v4932_v15 = vand.u32 4294901760, %v4931_v32  ;;  %v17653_v32 = vand.u32 4294901760, %v17643_v27 }
 0x396   :  { %8526 = vmatpush1.bf16.msra.mxu0 %v8525_v6  ;;  %v4937_v6 = vsub.f32 %v17639_v1, %v15817_v45  ;;  %v4902_v26 = vand.u32 4294901760, %v4901_v24  ;;  %v4943_v45 = vsub.f32 %v17641_v10, %v17647_v12  ;;  %v17649_v24 = vld [vmem:[#allocation146_spill] sm:$0xff]  ;;  %v17654_v10 = vand.u32 4294901760, %v17644_v38 }
 0x397   :  { %8528 = vmatprep.subr.bf16.mxu0 %v8527_v46  ;;  %v8533_v46 = vpack.c.bf16 %v4890_v40, %v4878_v36  ;;  %v4955_v40 = vsub.f32 %v17642_v35, %v17648_v28  ;;  %v4926_v36 = vand.u32 4294901760, %v4925_v56  ;;  %v15822_v37 = vand.u32 4294901760, %v17649_v24  ;;  %v17664_v1 = vld [vmem:[#allocation182_spill] sm:$0xff] }
 0x398   :  { %v4938_v9 = vand.u32 4294901760, %v4937_v6  ;;  %v8537_v53 = vpack.c.bf16 %v4914_v17, %v4902_v26  ;;  %v4949_v12 = vsub.f32 %v17643_v27, %v17653_v32  ;;  %v4961_v28 = vsub.f32 %v17644_v38, %v17654_v10 }
 0x399   :  { %v17655_v56 = vand.u32 4294901760, %v17645_v59  ;;  %v4979_v26 = vsub.f32 %v17646_v8, %v17656_v29  ;;  %v8539_v17 = vpack.c.bf16 %v4932_v15, %v4920_v22  ;;  %v4944_v3 = vand.u32 4294901760, %v4943_v45  ;;  %v17660_v22 = vld [vmem:[#allocation167_spill] sm:$0xff]  ;;  %v17661_v45 = vld [vmem:[#allocation168_spill] sm:$0xff] }
 0x39a   :  { %8530 = vmatpush1.bf16.msra.mxu0 %v8529_v19  ;;  %v17650_v19 = vld [vmem:[#allocation147_spill] sm:$0xff]  ;;  %v8541_v61 = vpack.c.bf16 %v4938_v9, %v4926_v36  ;;  %v4973_v32 = vsub.f32 %v17649_v24, %v15822_v37  ;;  %v17658_v38 = vand.u32 4294901760, %v17651_v57  ;;  %v4962_v36 = vand.u32 4294901760, %v4961_v28  ;;  %v17663_v8 = vld [vmem:[#allocation180_spill] sm:$0xff] }
 0x39b   :  { %8532 = vmatprep.subr.bf16.mxu0 %v8531_v47  ;;  %v17652_v47 = vld [vmem:[#allocation159_spill] sm:$0xff]  ;;  %v4967_v6 = vsub.f32 %v17645_v59, %v17655_v56  ;;  %v17657_v27 = vand.u32 4294901760, %v17650_v19  ;;  %v4980_v37 = vand.u32 4294901760, %v4979_v26  ;;  %v15834_v35 = vand.u32 4294901760, %v17663_v8 }
 0x39c   :  { %v4991_v56 = vsub.f32 %v17651_v57, %v17658_v38  ;;  %v17659_v59 = vand.u32 4294901760, %v17652_v47  ;;  %v4974_v38 = vand.u32 4294901760, %v4973_v32  ;;  %v15836_v20 = vand.u32 4294901760, %v17664_v1 }
 0x39d   :  { %v4985_v10 = vsub.f32 %v17650_v19, %v17657_v27  ;;  %v4968_v9 = vand.u32 4294901760, %v4967_v6  ;;  %v17662_v27 = vld [vmem:[#allocation179_spill] sm:$0xff]  ;;  %v15838_v32 = vand.u32 4294901760, %v13116_v41 }
 0x39e   :  { %8534 = vmatpush1.bf16.msra.mxu0 %v8533_v46  ;;  %v4956_v46 = vand.u32 4294901760, %v4955_v40  ;;  %v5003_v29 = vsub.f32 %v17652_v47, %v17659_v59  ;;  %v4950_v40 = vand.u32 4294901760, %v4949_v12  ;;  %v15835_v19 = vand.u32 4294901760, %v17662_v27  ;;  %v17665_v59 = vld [vmem:[#allocation183_spill] sm:$0xff] }
 0x39f   :  { %8536 = vmatprep.subr.bf16.mxu0 %v8535_v43  ;;  %v15847_v43 = vand.u32 4294901760, %v17661_v45  ;;  %v4986_v57 = vand.u32 4294901760, %v4985_v10  ;;  %v15837_v47 = vand.u32 4294901760, %v17665_v59  ;;  %v4992_v15 = vand.u32 4294901760, %v4991_v56 }
 0x3a0   :  { %v8543_v24 = vpack.c.bf16 %v4956_v46, %v4944_v3  ;;  %v5004_v5 = vand.u32 4294901760, %v5003_v29  ;;  %v8545_v28 = vpack.c.bf16 %v4962_v36, %v4950_v40  ;;  %v8547_v6 = vpack.c.bf16 %v4980_v37, %v4968_v9 }
 0x3a1   :  { %v5009_v3 = vsub.f32 %v17661_v45, %v15847_v43  ;;  %v5015_v26 = vsub.f32 %v17662_v27, %v15835_v19  ;;  %v15846_v46 = vand.u32 4294901760, %v13114_v50  ;;  %v5021_v10 = vsub.f32 %v17664_v1, %v15836_v20 }
 0x3a2   :  { %8538 = vmatpush1.bf16.msra.mxu0 %v8537_v53  ;;  %v17666_v53 = vand.u32 4294901760, %v17660_v22  ;;  %v8551_v37 = vpack.c.bf16 %v5004_v5, %v4992_v15  ;;  %v15839_v40 = vand.u32 4294901760, %v13122_v63  ;;  %v15840_v36 = vand.u32 4294901760, %v13124_v30 }
 0x3a3   :  { %8540 = vmatprep.subr.bf16.mxu0 %v8539_v17  ;;  %v5027_v17 = vsub.f32 %v17663_v8, %v15834_v35  ;;  %v5010_v29 = vand.u32 4294901760, %v5009_v3  ;;  %v15841_v9 = vand.u32 4294901760, %v13129_v0  ;;  %v5016_v19 = vand.u32 4294901760, %v5015_v26 }
 0x3a4   :  { %v4997_v12 = vsub.f32 %v17660_v22, %v17666_v53  ;;  %v17667_v53 = vld [vmem:[#allocation203_spill] sm:$0xff]  ;;  %v5051_v5 = vsub.f32 %v13116_v41, %v15838_v32  ;;  %v5045_v26 = vsub.f32 %v13122_v63, %v15839_v40 }
 0x3a5   :  { %v15844_v35 = vand.u32 4294901760, %v17667_v53  ;;  %v5028_v20 = vand.u32 4294901760, %v5027_v17  ;;  %v5057_v17 = vsub.f32 %v13124_v30, %v15840_v36 }
 0x3a6   :  { %8542 = vmatpush1.bf16.msra.mxu0 %v8541_v61  ;;  %v5033_v61 = vsub.f32 %v17665_v59, %v15837_v47  ;;  %v4998_v56 = vand.u32 4294901760, %v4997_v12  ;;  %v5039_v47 = vsub.f32 %v13114_v50, %v15846_v46  ;;  %v15843_v12 = vand.u32 4294901760, %v13142_v4 }
 0x3a7   :  { %8544 = vmatprep.subr.bf16.mxu0 %v8543_v24  ;;  %v8549_v24 = vpack.c.bf16 %v4986_v57, %v4974_v38  ;;  %v5022_v57 = vand.u32 4294901760, %v5021_v10  ;;  %v15842_v38 = vand.u32 4294901760, %v13138_v16  ;;  %v5063_v10 = vsub.f32 %v13129_v0, %v15841_v9 }
 0x3a8   :  { %v5034_v15 = vand.u32 4294901760, %v5033_v61  ;;  %v8553_v3 = vpack.c.bf16 %v5010_v29, %v4998_v56  ;;  %v5075_v61 = vsub.f32 %v17667_v53, %v15844_v35  ;;  %v8555_v56 = vpack.c.bf16 %v5028_v20, %v5016_v19 }
 0x3a9   :  { %v5040_v29 = vand.u32 4294901760, %v5039_v47  ;;  %v5069_v40 = vsub.f32 %v13138_v16, %v15842_v38  ;;  %v5081_v36 = vsub.f32 %v13142_v4, %v15843_v12  ;;  %v15860_v20 = vand.u32 4294901760, %v13152_v13 }
 0x3aa   :  { %8546 = vmatpush1.bf16.msra.mxu0 %v8545_v28  ;;  %v15845_v28 = vand.u32 4294901760, %v13146_v49  ;;  %v8557_v32 = vpack.c.bf16 %v5034_v15, %v5022_v57  ;;  %v15859_v19 = vand.u32 4294901760, %v13155_v34  ;;  %v5046_v47 = vand.u32 4294901760, %v5045_v26 }
 0x3ab   :  { %8548 = vmatprep.subr.bf16.mxu0 %v8547_v6  ;;  %v15850_v6 = vand.u32 4294901760, %v13148_v11  ;;  %v5064_v57 = vand.u32 4294901760, %v5063_v10  ;;  %v5076_v15 = vand.u32 4294901760, %v5075_v61  ;;  %v15858_v12 = vand.u32 4294901760, %v13166_v23 }
 0x3ac   :  { %v5087_v9 = vsub.f32 %v13146_v49, %v15845_v28  ;;  %v15851_v35 = vand.u32 4294901760, %v13168_v58  ;;  %v5070_v28 = vand.u32 4294901760, %v5069_v40  ;;  %v5082_v46 = vand.u32 4294901760, %v5081_v36 }
 0x3ad   :  { %v15857_v10 = vand.u32 4294901760, %v13173_v52  ;;  %v15853_v61 = vand.u32 4294901760, %v13179_v54  ;;  %v5111_v40 = vsub.f32 %v13166_v23, %v15858_v12  ;;  %v17701_v12 = vld [vmem:[#allocation68_spill] sm:$0xff] }
 0x3ae   :  { %8550 = vmatpush1.bf16.msra.mxu0 %v8549_v24  ;;  %v5052_v24 = vand.u32 4294901760, %v5051_v5  ;;  %v5058_v5 = vand.u32 4294901760, %v5057_v17  ;;  %v5088_v43 = vand.u32 4294901760, %v5087_v9  ;;  %v8563_v17 = vpack.c.bf16 %v5076_v15, %v5064_v57 }
 0x3af   :  { %8552 = vmatprep.subr.bf16.mxu0 %v8551_v37  ;;  %v5099_v37 = vsub.f32 %v13148_v11, %v15850_v6  ;;  %v5093_v6 = vsub.f32 %v13152_v13, %v15860_v20  ;;  %v5123_v36 = vsub.f32 %v13168_v58, %v15851_v35  ;;  %v15852_v9 = vand.u32 4294901760, %v13194_v60  ;;  %v17704_v20 = vld [vmem:[#allocation123_spill] sm:$0xff] }
 0x3b0   :  { %v8559_v38 = vpack.c.bf16 %v5052_v24, %v5040_v29  ;;  %v8561_v26 = vpack.c.bf16 %v5058_v5, %v5046_v47  ;;  %v5129_v47 = vsub.f32 %v13179_v54, %v15853_v61  ;;  %v15856_v5 = vand.u32 4294901760, %v13219_v48 }
 0x3b1   :  { %v5100_v49 = vand.u32 4294901760, %v5099_v37  ;;  %v5094_v24 = vand.u32 4294901760, %v5093_v6  ;;  %v15855_v57 = vand.u32 4294901760, %v13224_v18  ;;  %v5112_v15 = vand.u32 4294901760, %v5111_v40 }
 0x3b2   :  { %8554 = vmatpush1.bf16.msra.mxu0 %v8553_v3  ;;  %v5105_v3 = vsub.f32 %v13155_v34, %v15859_v19  ;;  %v5124_v35 = vand.u32 4294901760, %v5123_v36  ;;  %v5130_v6 = vand.u32 4294901760, %v5129_v47  ;;  %v17670_v47 = vld [vmem:[#allocation57_spill] sm:$0xff] }
 0x3b3   :  { %8556 = vmatprep.subr.bf16.mxu0 %v8555_v56  ;;  %v15854_v56 = vand.u32 4294901760, %v13196_v51  ;;  %v8567_v29 = vpack.c.bf16 %v5100_v49, %v5088_v43  ;;  %v5135_v49 = vsub.f32 %v13194_v60, %v15852_v9 }
 0x3b4   :  { %v5106_v37 = vand.u32 4294901760, %v5105_v3  ;;  %v5141_v3 = vsub.f32 %v13219_v48, %v15856_v5  ;;  %v17698_v5 = vld [vmem:[#allocation58_spill] sm:$0xff] }
 0x3b5   :  { %v5147_v43 = vsub.f32 %v13196_v51, %v15854_v56  ;;  %v5136_v40 = vand.u32 4294901760, %v5135_v49  ;;  %v17674_v49 = vld [vmem:[#allocation94_spill] sm:$0xff] }
 0x3b6   :  { %8558 = vmatpush1.bf16.msra.mxu0 %v8557_v32  ;;  %v8565_v32 = vpack.c.bf16 %v5082_v46, %v5070_v28  ;;  %v8569_v46 = vpack.c.bf16 %v5106_v37, %v5094_v24  ;;  %v5142_v61 = vand.u32 4294901760, %v5141_v3  ;;  %v17668_v37 = vld [vmem:[#allocation87_spill] sm:$0xff]  ;;  %v17682_v3 = vpack.c.bf16 %v12965_v55, %v12963_v31 }
 0x3b7   :  { %8560 = vmatprep.subr.bf16.mxu0 %v8559_v38  ;;  %v5117_v38 = vsub.f32 %v13173_v52, %v15857_v10  ;;  %v5148_v36 = vand.u32 4294901760, %v5147_v43 }
 0x3b9   :  { %v5118_v28 = vand.u32 4294901760, %v5117_v38  ;;  %v17669_v38 = vpack.c.bf16 %v12905_v14, %v17668_v37 }
 0x3ba   :  { %8562 = vmatpush1.bf16.msra.mxu0 %v8561_v26  ;;  %v5153_v26 = vsub.f32 %v13224_v18, %v15855_v57 }
 0x3bb   :  { %8564 = vmatprep.subr.bf16.mxu0 %v8563_v17  ;;  %v8571_v17 = vpack.c.bf16 %v5124_v35, %v5112_v15  ;;  %v8573_v9 = vpack.c.bf16 %v5130_v6, %v5118_v28  ;;  %v17671_v35 = vpack.c.bf16 %v12913_v44, %v12910_v21  ;;  %v17673_v15 = vld [vmem:[#allocation95_spill] sm:$0xff]  ;;  %v17681_v6 = vpack.c.bf16 %v12961_v62, %v12959_v33 }
 0x3bc   :  { %v5154_v56 = vand.u32 4294901760, %v5153_v26  ;;  %v17675_v43 = vpack.c.bf16 %v17673_v15, %v17674_v49  ;;  %v17683_v26 = vld [vmem:[#allocation112_spill] sm:$0xff] }
 0x3be   :  { %8566 = vmatpush1.bf16.msra.mxu0 %v8565_v32  ;;  %v8575_v32 = vpack.c.bf16 %v5148_v36, %v5136_v40  ;;  %v8577_v24 = vpack.c.bf16 %v5154_v56, %v5142_v61  ;;  %v17676_v61 = vpack.c.bf16 %v12924_v25, %v12922_v42  ;;  %v17685_v40 = vld [vmem:[#allocation118_spill] sm:$0xff]  ;;  %v17686_v36 = vld [vmem:[#allocation117_spill] sm:$0xff] }
 0x3bf   :  { %8568 = vmatprep.subr.bf16.mxu0 %v8567_v29  ;;  %v17672_v29 = vld [vmem:[#allocation86_spill] sm:$0xff] }
 0x3c2   :  { %8570 = vmatpush1.bf16.msra.mxu0 %v8569_v46  ;;  %v17679_v46 = vld [vmem:[#allocation103_spill] sm:$0xff] }
 0x3c3   :  { %8572 = vmatprep.subr.bf16.mxu0 %v8571_v17  ;;  %v17680_v28 = vpack.c.bf16 %v12947_v39, %v17679_v46  ;;  %v17684_v17 = vpack.c.bf16 %v12979_v7, %v17683_v26 }
 0x3c6   :  { %8574 = vmatpush1.bf16.msra.mxu0 %v8573_v9  ;;  %v17677_v9 = vld [vmem:[#allocation102_spill] sm:$0xff] }
 0x3c7   :  { %8576 = vmatprep.subr.bf16.mxu0 %v8575_v32  ;;  %v17678_v56 = vpack.c.bf16 %v12943_v2, %v17677_v9  ;;  %v17687_v32 = vpack.c.bf16 %v17685_v40, %v17686_v36 }
 0x3ca   :  { %8578 = vmatpush1.bf16.msra.mxu0 %v8577_v24  ;;  %v17688_v24 = vld [vmem:[#allocation46_spill] sm:$0xff] }
 0x3cb   :  { %8580 = vmatprep.subr.bf16.mxu0 %v17669_v38  ;;  %v17689_v38 = vld [vmem:[#allocation45_spill] sm:$0xff] }
 0x3cd   :  { %5159 = vmatmul.mubr.f32.vlgmr.msra.gmra.mrb[0].mxu0 %v17670_v47 }
 0x3ce   :  { %8582 = vmatpush1.bf16.msra.mxu0 %v17671_v35  ;;  %5359 = vmatprep.mubr.f32.mxu0 %v17672_v29  ;;  %v17690_v35 = vpack.c.bf16 %v17688_v24, %v17689_v38  ;;  %v17707_v24 = vld [vmem:[#allocation143_spill] sm:$0xff] }
 0x3cf   :  { %8584 = vmatprep.subr.bf16.mxu0 %v17675_v43  ;;  %v17691_v43 = vld [vmem:[#allocation268_spill] sm:$0xff] }
 0x3d2   :  { %8586 = vmatpush1.bf16.msra.mxu0 %v17676_v61  ;;  %v17692_v61 = vld [vmem:[#allocation267_spill] sm:$0xff] }
 0x3d3   :  { %8588 = vmatprep.subr.bf16.mxu0 %v17678_v56  ;;  %v17693_v56 = vpack.c.bf16 %v17691_v43, %v17692_v61  ;;  %v17710_v61 = vld [vmem:[#allocation146_spill] sm:$0xff] }
 0x3d6   :  { %8590 = vmatpush1.bf16.msra.mxu0 %v17680_v28  ;;  %v17694_v28 = vld [vmem:[#allocation271_spill] sm:$0xff] }
 0x3d7   :  { %8592 = vmatprep.subr.bf16.mxu0 %v17681_v6  ;;  %v17695_v6 = vld [vmem:[#allocation270_spill] sm:$0xff] }
 0x3d8   :  { %v17696_v57 = vpack.c.bf16 %v17694_v28, %v17695_v6  ;;  %v17713_v6 = vld [vmem:[#allocation158_spill] sm:$0xff] }
 0x3da   :  { %8594 = vmatpush1.bf16.msra.mxu0 %v17682_v3  ;;  %v17697_v3 = vld [vmem:[#allocation60_spill] sm:$0xff] }
 0x3db   :  { %8596 = vmatprep.subr.bf16.mxu0 %v17684_v17  ;;  %v17699_v10 = vpack.c.bf16 %v17697_v3, %v17698_v5  ;;  %v17700_v17 = vld [vmem:[#allocation122_spill] sm:$0xff] }
 0x3dc   :  { %v17702_v19 = vpack.c.bf16 %v17700_v17, %v17701_v12 }
 0x3de   :  { %8598 = vmatpush1.bf16.msra.mxu0 %v17687_v32  ;;  %v17703_v32 = vld [vmem:[#allocation131_spill] sm:$0xff] }
 0x3df   :  { %8600 = vmatprep.subr.bf16.mxu0 %v17690_v35  ;;  %v17705_v47 = vpack.c.bf16 %v17703_v32, %v17704_v20  ;;  %v17706_v35 = vld [vmem:[#allocation144_spill] sm:$0xff] }
 0x3e0   :  { %v17708_v43 = vpack.c.bf16 %v17706_v35, %v17707_v24 }
 0x3e2   :  { %8602 = vmatpush1.bf16.msra.mxu0 %v17693_v56  ;;  %v17709_v56 = vld [vmem:[#allocation147_spill] sm:$0xff] }
 0x3e3   :  { %8604 = vmatprep.subr.bf16.mxu0 %v17696_v57  ;;  %v17711_v28 = vpack.c.bf16 %v17709_v56, %v17710_v61  ;;  %v17712_v57 = vld [vmem:[#allocation159_spill] sm:$0xff] }
 0x3e4   :  { %v17714_v3 = vpack.c.bf16 %v17712_v57, %v17713_v6 }
 0x3e6   :  { %8606 = vmatpush1.bf16.msra.mxu0 %v17699_v10  ;;  %v17715_v10 = vpack.c.bf16 %v17661_v45, %v17660_v22 }
 0x3e7   :  { %8608 = vmatprep.subr.bf16.mxu0 %v17702_v19  ;;  %v17716_v19 = vpack.c.bf16 %v17663_v8, %v17662_v27 }
 0x3ea   :  { %8610 = vmatpush1.bf16.msra.mxu0 %v17705_v47  ;;  %v17717_v47 = vpack.c.bf16 %v17665_v59, %v17664_v1 }
 0x3eb   :  { %8612 = vmatprep.subr.bf16.mxu0 %v17708_v43  ;;  %v17718_v43 = vpack.c.bf16 %v13116_v41, %v13114_v50 }
 0x3ee   :  { %8614 = vmatpush1.bf16.msra.mxu0 %v17711_v28  ;;  %v17719_v28 = vpack.c.bf16 %v13124_v30, %v13122_v63 }
 0x3ef   :  { %8616 = vmatprep.subr.bf16.mxu0 %v17714_v3  ;;  %v17720_v3 = vpack.c.bf16 %v17667_v53, %v13129_v0 }
 0x3f2   :  { %8618 = vmatpush1.bf16.msra.mxu0 %v17715_v10  ;;  %v17721_v10 = vpack.c.bf16 %v13142_v4, %v13138_v16 }
 0x3f3   :  { %8620 = vmatprep.subr.bf16.mxu0 %v17716_v19  ;;  %v17722_v19 = vld [vmem:[#allocation207_spill] sm:$0xff] }
 0x3f4   :  { %v17723_v59 = vpack.c.bf16 %v13148_v11, %v17722_v19 }
 0x3f6   :  { %8622 = vmatpush1.bf16.msra.mxu0 %v17717_v47  ;;  %v17724_v47 = vpack.c.bf16 %v13155_v34, %v13152_v13  ;;  %v17730_v34 = vld [vmem:[#allocation132_spill] sm:$0xff] }
 0x3f7   :  { %8624 = vmatprep.subr.bf16.mxu0 %v17718_v43  ;;  %v17725_v43 = vpack.c.bf16 %v13168_v58, %v13166_v23  ;;  %v17733_v58 = vld [vmem:[#allocation93_spill] sm:$0xff] }
 0x3fa   :  { %8626 = vmatpush1.bf16.msra.mxu0 %v17719_v28  ;;  %v17726_v28 = vpack.c.bf16 %v13179_v54, %v13173_v52  ;;  %v17735_v54 = vld [vmem:[#allocation101_spill] sm:$0xff]  ;;  %v5926_v52 = vld [vmem:[#allocation8 + $0x68] sm:$0xff] }
 0x3fb   :  { %8628 = vmatprep.subr.bf16.mxu0 %v17720_v3  ;;  %v17727_v3 = vpack.c.bf16 %v13196_v51, %v13194_v60  ;;  %v17737_v51 = vld [vmem:[#allocation109_spill] sm:$0xff] }
 0x3fe   :  { %8630 = vmatpush1.bf16.msra.mxu0 %v17721_v10  ;;  %v17728_v10 = vpack.c.bf16 %v13224_v18, %v13219_v48  ;;  %v17740_v18 = vld [vmem:[#allocation119_spill] sm:$0xff] }
 0x3ff   :  { %8632 = vmatprep.subr.bf16.mxu0 %v17723_v59  ;;  %v17729_v59 = vld [vmem:[#allocation242_spill] sm:$0xff] }
 0x402   :  { %8634 = vmatpush1.bf16.msra.mxu0 %v17724_v47  ;;  %v17731_v47 = vld [vmem:[#allocation88_spill] sm:$0xff] }
 0x403   :  { %8636 = vmatprep.subr.bf16.mxu0 %v17725_v43  ;;  %v17732_v43 = vand.u32 4294901760, %v17672_v29 }
 0x406   :  { %8638 = vmatpush1.bf16.msra.mxu0 %v17726_v28  ;;  %v17734_v28 = vld [vmem:[#allocation96_spill] sm:$0xff] }
 0x407   :  { %8640 = vmatprep.subr.bf16.mxu0 %v17727_v3  ;;  %v17736_v3 = vld [vmem:[#allocation104_spill] sm:$0xff] }
 0x40a   :  { %8642 = vmatpush1.bf16.msra.mxu0 %v17728_v10  ;;  %v17738_v10 = vld [vmem:[#allocation110_spill] sm:$0xff] }
 0x40b   :  { %8644 = vmatprep.subr.bf16.mxu0 %v17729_v59  ;;  %v17739_v59 = vld [vmem:[#allocation111_spill] sm:$0xff] }
 0x40d   :  { %5362 = vmatmul.mubr.f32.vlgmr.msra.gmra.mrb[0].mxu0 %v17730_v34 }
 0x40e   :  { %8646 = vmatpush1.bf16.msra.mxu0 %v17731_v47  ;;  %5499 = vmatprep.mubr.f32.mxu0 %v17732_v43  ;;  %v17741_v47 = vld [vmem:[#allocation37_spill] sm:$0xff]  ;;  %v17743_v43 = vld [vmem:[#allocation48_spill] sm:$0xff] }
 0x40f   :  { %8648 = vmatprep.subr.bf16.mxu0 %v17733_v58 }
 0x412   :  { %8650 = vmatpush1.bf16.msra.mxu0 %v17734_v28  ;;  %v17745_v28 = vld [vmem:[#allocation49_spill] sm:$0xff] }
 0x413   :  { %8652 = vmatprep.subr.bf16.mxu0 %v17735_v54  ;;  %v17746_v54 = vld [vmem:[#allocation61_spill] sm:$0xff] }
 0x416   :  { %8654 = vmatpush1.bf16.msra.mxu0 %v17736_v3  ;;  %v17747_v3 = vld [vmem:[#allocation121_spill] sm:$0xff] }
 0x417   :  { %8656 = vmatprep.subr.bf16.mxu0 %v17737_v51  ;;  %v17748_v51 = vld [vmem:[#allocation134_spill] sm:$0xff] }
 0x41a   :  { %8658 = vmatpush1.bf16.msra.mxu0 %v17738_v10  ;;  %v17749_v10 = vld [vmem:[#allocation135_spill] sm:$0xff] }
 0x41b   :  { %8660 = vmatprep.subr.bf16.mxu0 %v17739_v59  ;;  %v17750_v59 = vld [vmem:[#allocation155_spill] sm:$0xff] }
 0x41e   :  { %8662 = vmatpush1.bf16.msra.mxu0 %v17740_v18  ;;  %v17751_v18 = vld [vmem:[#allocation156_spill] sm:$0xff] }
 0x41f   :  { %8664 = vmatprep.subr.bf16.mxu0 %v17741_v47  ;;  %v17752_v47 = vld [vmem:[#allocation170_spill] sm:$0xff] }
 0x422   :  { %v13575_v29 = vpop.f32.mrb[0].mxu1  ;;  %8666 = vmatpush1.bf16.msra.mxu0 %v17743_v43  ;;  %v17754_v43 = vld [vmem:[#allocation191_spill] sm:$0xff] }
 0x423   :  { %17742 = vst [vmem:[#allocation223_spill] sm:$0xff] %v13575_v29  ;;  %v13578_v58 = vpop.f32.mrb[1].mxu1  ;;  %8668 = vmatprep.subr.bf16.mxu0 %v17745_v28  ;;  %v17753_v29 = vld [vmem:[#allocation171_spill] sm:$0xff]  ;;  %v17756_v28 = vld [vmem:[#allocation194_spill] sm:$0xff] }
 0x424   :  { %17744 = vst [vmem:[#allocation235_spill] sm:$0xff] %v13578_v58  ;;  %v17755_v58 = vld [vmem:[#allocation192_spill] sm:$0xff] }
 0x426   :  { %8670 = vmatpush1.bf16.msra.mxu0 %v17746_v54  ;;  %v17757_v54 = vld [vmem:[#allocation195_spill] sm:$0xff] }
 0x427   :  { %8672 = vmatprep.subr.bf16.mxu0 %v17747_v3  ;;  %v17758_v3 = vld [vmem:[#allocation204_spill] sm:$0xff] }
 0x42a   :  { %8674 = vmatpush1.bf16.msra.mxu0 %v17748_v51  ;;  %v17759_v51 = vld [vmem:[#allocation206_spill] sm:$0xff] }
 0x42b   :  { %8676 = vmatprep.subr.bf16.mxu0 %v17749_v10  ;;  %v17760_v10 = vld [vmem:[#allocation18_spill] sm:$0xff] }
 0x42e   :  { %8678 = vmatpush1.bf16.msra.mxu0 %v17750_v59  ;;  %v17761_v59 = vld [vmem:[#allocation239_spill] sm:$0xff] }
 0x42f   :  { %8680 = vmatprep.subr.bf16.mxu0 %v17751_v18  ;;  %v17762_v18 = vld [vmem:[#allocation241_spill] sm:$0xff] }
 0x432   :  { %8682 = vmatpush1.bf16.msra.mxu0 %v17752_v47  ;;  %v17763_v47 = vld [vmem:[#allocation216_spill] sm:$0xff] }
 0x433   :  { %8684 = vmatprep.subr.bf16.mxu0 %v17753_v29 }
 0x436   :  { %8686 = vmatpush1.bf16.msra.mxu0 %v17754_v43  ;;  %v17764_v43 = vand.u32 4294901760, %v17668_v37  ;;  %v17772_v37 = vand.u32 4294901760, %v12924_v25 }
 0x437   :  { %8688 = vmatprep.subr.bf16.mxu0 %v17755_v58  ;;  %v17765_v58 = vand.u32 4294901760, %v12905_v14  ;;  %v17773_v14 = vand.u32 4294901760, %v17677_v9  ;;  %v17780_v9 = vand.u32 4294901760, %v12963_v31  ;;  %v17786_v31 = vld [vmem:[#allocation85_spill] sm:$0xff] }
 0x439   :  { %v8707_v29 = vpack.c.bf16 %v17765_v58, %v17764_v43  ;;  %v17774_v58 = vand.u32 4294901760, %v12943_v2  ;;  %v17781_v2 = vand.u32 4294901760, %v12965_v55  ;;  %v17787_v55 = vand.u32 4294901760, %v17689_v38 }
 0x43a   :  { %8690 = vmatpush1.bf16.msra.mxu0 %v17756_v28  ;;  %v17766_v28 = vld [vmem:[#allocation23_spill] sm:$0xff] }
 0x43b   :  { %8692 = vmatprep.subr.bf16.mxu0 %v17757_v54  ;;  %v17767_v54 = vand.u32 4294901760, %v12910_v21  ;;  %v8715_v43 = vpack.c.bf16 %v17774_v58, %v17773_v14  ;;  %v17775_v21 = vand.u32 4294901760, %v17679_v46  ;;  %v17782_v46 = vand.u32 4294901760, %v17683_v26 }
 0x43e   :  { %8694 = vmatpush1.bf16.msra.mxu0 %v17758_v3  ;;  %v17768_v3 = vand.u32 4294901760, %v12913_v44  ;;  %v17776_v44 = vand.u32 4294901760, %v12947_v39  ;;  %v17783_v39 = vand.u32 4294901760, %v12979_v7 }
 0x43f   :  { %8696 = vmatprep.subr.bf16.mxu0 %v17759_v51 }
 0x440   :  { %v8709_v51 = vpack.c.bf16 %v17768_v3, %v17767_v54  ;;  %v13624_v54 = vpack.c.bf16 %v17776_v44, %v17775_v21  ;;  %v5915_v21 = vld [vmem:[#allocation8 + $0x10] sm:$0xff]  ;;  %v5918_v44 = vld [vmem:[#allocation8 + $0x28] sm:$0xff] }
 0x442   :  { %8698 = vmatpush1.bf16.msra.mxu0 %v17760_v10  ;;  %v17769_v10 = vand.u32 4294901760, %v17674_v49  ;;  %v17777_v49 = vand.u32 4294901760, %v17730_v34  ;;  %v17784_v34 = vand.u32 4294901760, %v17686_v36 }
 0x443   :  { %8700 = vmatprep.subr.bf16.mxu0 %v17761_v59  ;;  %v17770_v59 = vand.u32 4294901760, %v17673_v15  ;;  %v17778_v15 = vand.u32 4294901760, %v12959_v33  ;;  %v17785_v33 = vand.u32 4294901760, %v17685_v40  ;;  %v5920_v40 = vld [vmem:[#allocation8 + $0x38] sm:$0xff] }
 0x444   :  { %v5991_v38 = vand.u32 4294901760, %v5920_v40 }
 0x445   :  { %v13650_v3 = vpack.c.bf16 %v17785_v33, %v17784_v34  ;;  %v5919_v34 = vld [vmem:[#allocation8 + $0x30] sm:$0xff]  ;;  %v5922_v33 = vld [vmem:[#allocation8 + $0x48] sm:$0xff] }
 0x446   :  { %8702 = vmatpush1.bf16.msra.mxu0 %v17762_v18  ;;  %v8711_v18 = vpack.c.bf16 %v17770_v59, %v17769_v10  ;;  %v13638_v59 = vpack.c.bf16 %v17781_v2, %v17780_v9  ;;  %v5916_v10 = vld [vmem:[#allocation8 + $0x18] sm:$0xff]  ;;  %v5985_v2 = vand.u32 4294901760, %v5915_v21 }
 0x447   :  { %8704 = vmatprep.subr.bf16.mxu0 %v17763_v47  ;;  %v17771_v47 = vand.u32 4294901760, %v12922_v42  ;;  %v17779_v42 = vand.u32 4294901760, %v12961_v62  ;;  %v5914_v62 = vld [vmem:[#allocation8 + $0x8] sm:$0xff]  ;;  %v5983_v58 = vand.u32 4294901760, %v5916_v10 }
 0x448   :  { %v5979_v7 = vand.u32 4294901760, %v5914_v62 }
 0x449   :  { %v8713_v48 = vpack.c.bf16 %v17772_v37, %v17771_v47  ;;  %v13632_v25 = vpack.c.bf16 %v17779_v42, %v17778_v15  ;;  %v13644_v47 = vpack.c.bf16 %v17783_v39, %v17782_v46  ;;  %v17788_v37 = vld [vmem:[#allocation46_spill] sm:$0xff]  ;;  %v17792_v42 = vld [vmem:[#allocation268_spill] sm:$0xff]  ;;  %v5987_v46 = vand.u32 4294901760, %v5918_v44 }
 0x44a   :  { %8706 = vmatpush1.bf16.msra.mxu0 %v17766_v28  ;;  %v17789_v26 = vand.u32 4294901760, %v17788_v37  ;;  %v17793_v9 = vand.u32 4294901760, %v17792_v42  ;;  %v5917_v39 = vld [vmem:[#allocation8 + $0x20] sm:$0xff]  ;;  %v13667_v37 = vsub.f32 %v5914_v62, %v5979_v7  ;;  %v13682_v62 = vsub.f32 %v5920_v40, %v5991_v38 }
 0x44b   :  { %8708 = vmatprep.subr.bf16.mxu0 %v8707_v29  ;;  %v5913_v29 = vld [vmem:[#allocation8] sm:$0xff]  ;;  %v13679_v60 = vsub.f32 %v5918_v44, %v5987_v46  ;;  %v5927_v44 = vld [vmem:[#allocation8 + $0x70] sm:$0xff] }
 0x44c   :  { %v13657_v14 = vpack.c.bf16 %v17789_v26, %v17787_v55  ;;  %v5981_v36 = vand.u32 4294901760, %v5913_v29  ;;  %v13665_v55 = vpack.c.bf16 %v5983_v58, %v5979_v7  ;;  %17795 = vst [vmem:[#allocation27_spill] sm:$0xff] %v13667_v37  ;;  %v13669_v26 = vsub.f32 %v5916_v10, %v5983_v58  ;;  %17802 = vst [vmem:[#allocation34_spill] sm:$0xff] %v13682_v62  ;;  %v5928_v58 = vld [vmem:[#allocation8 + $0x78] sm:$0xff]  ;;  %v13694_v62 = vld [vmem:[#allocation8 + $0x80] sm:$0xff] }
 0x44d   :  { %5503 = vmatmul.mubr.f32.vlgmr.msra.gmra.mrb[0].mxu0 %v17777_v49  ;;  %v17790_v49 = vld [vmem:[#allocation267_spill] sm:$0xff]  ;;  %17801 = vst [vmem:[#allocation31_spill] sm:$0xff] %v13679_v60  ;;  %v5989_v10 = vand.u32 4294901760, %v5917_v39  ;;  %v5995_v7 = vand.u32 4294901760, %v5922_v33 }
 0x44e   :  { %8710 = vmatpush1.bf16.msra.mxu0 %v8709_v51  ;;  %5766 = vmatprep.mubr.f32.mxu0 %v17786_v31  ;;  %v17791_v15 = vand.u32 4294901760, %v17790_v49  ;;  %17794 = vst [vmem:[#allocation231_spill] sm:$0xff] %v13665_v55  ;;  %17796 = vst [vmem:[#allocation30_spill] sm:$0xff] %v13669_v26  ;;  %v13671_v28 = vsub.f32 %v5913_v29, %v5981_v36  ;;  %v5921_v49 = vld [vmem:[#allocation8 + $0x40] sm:$0xff]  ;;  %v5923_v31 = vld [vmem:[#allocation8 + $0x50] sm:$0xff]  ;;  %v13673_v42 = vpack.c.bf16 %v5985_v2, %v5981_v36 }
 0x44f   :  { %8712 = vmatprep.subr.bf16.mxu0 %v8711_v18  ;;  %v5924_v18 = vld [vmem:[#allocation8 + $0x58] sm:$0xff]  ;;  %8836 = vmatprep.subr.bf16.mxu1 %v13665_v55  ;;  %v5993_v29 = vand.u32 4294901760, %v5919_v34  ;;  %v5930_v55 = vld [vmem:[#allocation8 + $0x88] sm:$0xff] }
 0x450   :  { %v13663_v51 = vpack.c.bf16 %v17793_v9, %v17791_v15  ;;  %17797 = vst [vmem:[#allocation219_spill] sm:$0xff] %v13671_v28  ;;  %17798 = vst [vmem:[#allocation218_spill] sm:$0xff] %v13673_v42  ;;  %v13675_v15 = vsub.f32 %v5915_v21, %v5985_v2  ;;  %v13677_v9 = vpack.c.bf16 %v5991_v38, %v5987_v46  ;;  %8838 = vmatpush1.bf16.msra.mxu1 %v13673_v42  ;;  %v5925_v28 = vld [vmem:[#allocation8 + $0x60] sm:$0xff] }
 0x451   :  { %v5999_v36 = vand.u32 4294901760, %v5924_v18  ;;  %v5997_v21 = vand.u32 4294901760, %v5921_v49  ;;  %v6001_v2 = vand.u32 4294901760, %v5923_v31  ;;  %v13688_v46 = vsub.f32 %v5917_v39, %v5989_v10 }
 0x452   :  { %17799 = vst [vmem:[#allocation224_spill] sm:$0xff] %v13675_v15  ;;  %17800 = vst [vmem:[#allocation222_spill] sm:$0xff] %v13677_v9  ;;  %8714 = vmatpush1.bf16.msra.mxu0 %v8713_v48  ;;  %v6003_v15 = vand.u32 4294901760, %v5926_v52  ;;  %8840 = vmatprep.subr.bf16.mxu1 %v13677_v9  ;;  %v13686_v48 = vpack.c.bf16 %v5993_v29, %v5989_v10  ;;  %v13690_v40 = vsub.f32 %v5919_v34, %v5993_v29  ;;  %v5931_v9 = vld [vmem:[#allocation8 + $0x90] sm:$0xff] }
 0x453   :  { %8716 = vmatprep.subr.bf16.mxu0 %v8715_v43  ;;  %v13692_v38 = vsub.f32 %v5922_v33, %v5995_v7  ;;  %v5932_v43 = vld [vmem:[#allocation8 + $0x98] sm:$0xff]  ;;  %v13696_v42 = vpack.c.bf16 %v5999_v36, %v5995_v7  ;;  %v13698_v60 = vsub.f32 %v5924_v18, %v5999_v36  ;;  %v13700_v26 = vpack.c.bf16 %v6001_v2, %v5997_v21 }
 0x454   :  { %17803 = vst [vmem:[#allocation228_spill] sm:$0xff] %v13686_v48  ;;  %17804 = vst [vmem:[#allocation226_spill] sm:$0xff] %v13690_v40  ;;  %v13702_v37 = vsub.f32 %v5921_v49, %v5997_v21  ;;  %v13705_v39 = vsub.f32 %v5923_v31, %v6001_v2  ;;  %v6007_v34 = vand.u32 4294901760, %v5928_v58  ;;  %v13707_v33 = vsub.f32 %v5926_v52, %v6003_v15  ;;  %v5934_v21 = vld [vmem:[#allocation8 + $0xa8] sm:$0xff]  ;;  %v5936_v2 = vld [vmem:[#allocation8 + $0xb8] sm:$0xff] }
 0x455   :  { %17805 = vst [vmem:[#allocation234_spill] sm:$0xff] %v13692_v38  ;;  %17806 = vst [vmem:[#allocation35_spill] sm:$0xff] %v13696_v42  ;;  %v6005_v10 = vand.u32 4294901760, %v5925_v28  ;;  %8842 = vmatpush1.bf16.msra.mxu1 %v13686_v48  ;;  %v6009_v29 = vand.u32 4294901760, %v5927_v44  ;;  %v6011_v18 = vand.u32 4294901760, %v5930_v55  ;;  %v6015_v7 = vand.u32 4294901760, %v5932_v43 }
 0x456   :  { %17807 = vst [vmem:[#allocation41_spill] sm:$0xff] %v13698_v60  ;;  %17808 = vst [vmem:[#allocation44_spill] sm:$0xff] %v13700_v26  ;;  %8718 = vmatpush1.bf16.msra.mxu0 %v13624_v54  ;;  %v6013_v36 = vand.u32 4294901760, %v13694_v62  ;;  %8844 = vmatprep.subr.bf16.mxu1 %v13696_v42  ;;  %v13713_v49 = vpack.c.bf16 %v6007_v34, %v6003_v15  ;;  %v13715_v54 = vsub.f32 %v5928_v58, %v6007_v34  ;;  %v17820_v38 = vld [vmem:[#allocation60_spill] sm:$0xff] }
 0x457   :  { %17809 = vst [vmem:[#allocation53_spill] sm:$0xff] %v13702_v37  ;;  %17810 = vst [vmem:[#allocation56_spill] sm:$0xff] %v13705_v39  ;;  %8720 = vmatprep.subr.bf16.mxu0 %v13632_v25  ;;  %v13717_v31 = vsub.f32 %v5925_v28, %v6005_v10  ;;  %v6017_v52 = vand.u32 4294901760, %v5931_v9  ;;  %v17817_v39 = vld [vmem:[#allocation271_spill] sm:$0xff]  ;;  %v17819_v60 = vand.u32 4294901760, %v17698_v5  ;;  %v17821_v40 = vand.u32 4294901760, %v17820_v38 }
 0x458   :  { %17811 = vst [vmem:[#allocation65_spill] sm:$0xff] %v13707_v33  ;;  %17812 = vst [vmem:[#allocation254_spill] sm:$0xff] %v13713_v49  ;;  %v17815_v33 = vld [vmem:[#allocation270_spill] sm:$0xff]  ;;  %v17818_v48 = vand.u32 4294901760, %v17817_v39  ;;  %v13731_v15 = vsub.f32 %v5927_v44, %v6009_v29  ;;  %v13733_v58 = vsub.f32 %v5930_v55, %v6011_v18  ;;  %v5935_v34 = vld [vmem:[#allocation8 + $0xb0] sm:$0xff]  ;;  %v17823_v39 = vand.u32 4294901760, %v17701_v12 }
 0x459   :  { %17813 = vst [vmem:[#allocation258_spill] sm:$0xff] %v13715_v54  ;;  %17814 = vst [vmem:[#allocation257_spill] sm:$0xff] %v13717_v31  ;;  %v17816_v25 = vand.u32 4294901760, %v17815_v33  ;;  %v13729_v42 = vpack.c.bf16 %v17821_v40, %v17819_v60  ;;  %v5933_v28 = vld [vmem:[#allocation8 + $0xa0] sm:$0xff]  ;;  %v13735_v31 = vld [vmem:[#allocation8 + $0xc8] sm:$0xff]  ;;  %v13744_v5 = vsub.f32 %v5932_v43, %v6015_v7  ;;  %v13747_v60 = vsub.f32 %v13694_v62, %v6013_v36 }
 0x45a   :  { %17822 = vst [vmem:[#allocation67_spill] sm:$0xff] %v13733_v58  ;;  %8722 = vmatpush1.bf16.msra.mxu0 %v13638_v59  ;;  %v13749_v44 = vsub.f32 %v5931_v9, %v6017_v52  ;;  %v5940_v55 = vld [vmem:[#allocation8 + $0xd8] sm:$0xff]  ;;  %v13751_v40 = vld [vmem:[#allocation8 + $0xc0] sm:$0xff]  ;;  %v17828_v59 = vand.u32 4294901760, %v17704_v20  ;;  %v17829_v12 = vand.u32 4294901760, %v17703_v32  ;;  %8846 = vmatpush1.bf16.msra.mxu1 %v13700_v26  ;;  %v6019_v43 = vand.u32 4294901760, %v5934_v21 }
 0x45b   :  { %v13723_v37 = vpack.c.bf16 %v17818_v48, %v17816_v25  ;;  %v17824_v48 = vand.u32 4294901760, %v17700_v17  ;;  %17825 = vst [vmem:[#allocation72_spill] sm:$0xff] %v13744_v5  ;;  %17826 = vst [vmem:[#allocation261_spill] sm:$0xff] %v13747_v60  ;;  %8724 = vmatprep.subr.bf16.mxu0 %v13644_v47  ;;  %v13761_v17 = vpack.c.bf16 %v6009_v29, %v6005_v10  ;;  %v6023_v62 = vand.u32 4294901760, %v5936_v2  ;;  %v13763_v25 = vld [vmem:[#allocation8 + $0xd0] sm:$0xff]  ;;  %v13778_v26 = vld [vmem:[#allocation8 + $0xe0] sm:$0xff] }
 0x45c   :  { %17827 = vst [vmem:[#allocation260_spill] sm:$0xff] %v13749_v44  ;;  %v13758_v38 = vpack.c.bf16 %v17829_v12, %v17828_v59  ;;  %8848 = vmatprep.subr.bf16.mxu1 %v13713_v49  ;;  %v13766_v9 = vpack.c.bf16 %v6015_v7, %v6011_v18  ;;  %v6025_v47 = vand.u32 4294901760, %v5935_v34  ;;  %v6027_v20 = vand.u32 4294901760, %v13735_v31  ;;  %v13776_v12 = vld [vmem:[#allocation8 + $0xf8] sm:$0xff] }
 0x45d   :  { %v13742_v33 = vpack.c.bf16 %v17824_v48, %v17823_v39  ;;  %17830 = vst [vmem:[#allocation265_spill] sm:$0xff] %v13761_v17  ;;  %v6021_v39 = vand.u32 4294901760, %v5933_v28  ;;  %v13769_v48 = vld [vmem:[#allocation8 + $0xe8] sm:$0xff]  ;;  %v13771_v32 = vsub.f32 %v5934_v21, %v6019_v43  ;;  %v13773_v59 = vsub.f32 %v5936_v2, %v6023_v62  ;;  %v13789_v2 = vld [vmem:[#allocation8 + $0xf0] sm:$0xff] }
 0x45e   :  { %17831 = vst [vmem:[#allocation264_spill] sm:$0xff] %v13766_v9  ;;  %v6031_v10 = vand.u32 4294901760, %v5940_v55  ;;  %v6029_v29 = vand.u32 4294901760, %v13751_v40  ;;  %8726 = vmatpush1.bf16.msra.mxu0 %v13650_v3  ;;  %v13783_v7 = vsub.f32 %v5935_v34, %v6025_v47  ;;  %v13786_v49 = vsub.f32 %v13735_v31, %v6027_v20  ;;  %8850 = vmatpush1.bf16.msra.mxu1 %v13761_v17  ;;  %v13803_v34 = vld [vmem:[#allocation8 + $0x118] sm:$0xff] }
 0x45f   :  { %17832 = vst [vmem:[#allocation70_spill] sm:$0xff] %v13771_v32  ;;  %17833 = vst [vmem:[#allocation130_spill] sm:$0xff] %v13773_v59  ;;  %v13781_v18 = vsub.f32 %v5933_v28, %v6021_v39  ;;  %v6033_v21 = vand.u32 4294901760, %v13763_v25  ;;  %v13791_v59 = vld [vmem:[#allocation8 + $0x108] sm:$0xff]  ;;  %8728 = vmatprep.subr.bf16.mxu0 %v13657_v14  ;;  %v13795_v32 = vpack.c.bf16 %v6017_v52, %v6013_v36  ;;  %v6035_v31 = vand.u32 4294901760, %v13769_v48 }
 0x460   :  { %17835 = vst [vmem:[#allocation142_spill] sm:$0xff] %v13783_v7  ;;  %17836 = vst [vmem:[#allocation145_spill] sm:$0xff] %v13786_v49  ;;  %v13797_v3 = vsub.f32 %v5940_v55, %v6031_v10  ;;  %v13800_v28 = vsub.f32 %v13751_v40, %v6029_v29  ;;  %v13805_v49 = vld [vmem:[#allocation8 + $0x100] sm:$0xff]  ;;  %8852 = vmatprep.subr.bf16.mxu1 %v13766_v9  ;;  %v13808_v7 = vpack.c.bf16 %v6023_v62, %v6019_v43  ;;  %v13815_v55 = vld [vmem:[#allocation8 + $0x110] sm:$0xff] }
 0x461   :  { %17834 = vst [vmem:[#allocation133_spill] sm:$0xff] %v13781_v18  ;;  %17837 = vst [vmem:[#allocation154_spill] sm:$0xff] %v13795_v32  ;;  %v13811_v14 = vsub.f32 %v13763_v25, %v6033_v21  ;;  %v6039_v36 = vand.u32 4294901760, %v13776_v12  ;;  %v15907_v52 = vand.u32 4294901760, %v13778_v26  ;;  %v13817_v40 = vpack.c.bf16 %v6025_v47, %v6021_v39  ;;  %v13824_v43 = vld [vmem:[#allocation8 + $0x128] sm:$0xff]  ;;  %v13826_v62 = vld [vmem:[#allocation8 + $0x138] sm:$0xff] }
 0x462   :  { %17838 = vst [vmem:[#allocation157_spill] sm:$0xff] %v13797_v3  ;;  %17839 = vst [vmem:[#allocation166_spill] sm:$0xff] %v13800_v28  ;;  %v13820_v17 = vsub.f32 %v13769_v48, %v6035_v31  ;;  %v6041_v28 = vand.u32 4294901760, %v13789_v2  ;;  %8730 = vmatpush1.bf16.msra.mxu0 %v13663_v51  ;;  %v6047_v47 = vand.u32 4294901760, %v13803_v34  ;;  %v13841_v9 = vld [vmem:[#allocation8 + $0x130] sm:$0xff]  ;;  %8854 = vmatpush1.bf16.msra.mxu1 %v13795_v32  ;;  %v6049_v48 = vand.u32 4294901760, %v13815_v55 }
 0x463   :  { %17840 = vst [vmem:[#allocation169_spill] sm:$0xff] %v13808_v7  ;;  %17841 = vst [vmem:[#allocation178_spill] sm:$0xff] %v13811_v14  ;;  %v13830_v25 = vsub.f32 %v13776_v12, %v6039_v36  ;;  %v13835_v39 = vsub.f32 %v13778_v26, %v15907_v52  ;;  %8732 = vmatprep.subr.bf16.mxu0 %v13723_v37  ;;  %v13845_v51 = vpack.c.bf16 %v6031_v10, %v6027_v20  ;;  %v5953_v3 = vld [vmem:[#allocation8 + $0x140] sm:$0xff] }
 0x464   :  { %17842 = vst [vmem:[#allocation181_spill] sm:$0xff] %v13817_v40  ;;  %17843 = vst [vmem:[#allocation190_spill] sm:$0xff] %v13820_v17  ;;  %v13839_v17 = vld [vmem:[#allocation8 + $0x120] sm:$0xff]  ;;  %v13848_v12 = vsub.f32 %v13789_v2, %v6041_v28  ;;  %v17848_v52 = vand.u32 4294901760, %v13791_v59  ;;  %8856 = vmatprep.subr.bf16.mxu1 %v13808_v7  ;;  %v13860_v37 = vsub.f32 %v13803_v34, %v6047_v47  ;;  %v17851_v20 = vand.u32 4294901760, %v13805_v49 }
 0x465   :  { %17844 = vst [vmem:[#allocation193_spill] sm:$0xff] %v13830_v25  ;;  %17845 = vst [vmem:[#allocation202_spill] sm:$0xff] %v13835_v39  ;;  %v13856_v25 = vld [vmem:[#allocation8 + $0x148] sm:$0xff]  ;;  %v6051_v2 = vand.u32 4294901760, %v13824_v43  ;;  %v6055_v32 = vand.u32 4294901760, %v13826_v62  ;;  %v13874_v7 = vsub.f32 %v13815_v55, %v6049_v48  ;;  %v6053_v34 = vand.u32 4294901760, %v13839_v17 }
 0x466   :  { %17846 = vst [vmem:[#allocation205_spill] sm:$0xff] %v13845_v51  ;;  %17847 = vst [vmem:[#allocation286_spill] sm:$0xff] %v13848_v12  ;;  %v13853_v39 = vsub.f32 %v13791_v59, %v17848_v52  ;;  %v13865_v10 = vsub.f32 %v13805_v49, %v17851_v20  ;;  %v5956_v52 = vld [vmem:[#allocation8 + $0x158] sm:$0xff]  ;;  %v17854_v12 = vand.u32 4294901760, %v17706_v35  ;;  %v5955_v20 = vld [vmem:[#allocation8 + $0x150] sm:$0xff]  ;;  %8734 = vmatpush1.bf16.msra.mxu0 %v13729_v42  ;;  %v6059_v35 = vand.u32 4294901760, %v13856_v25 }
 0x467   :  { %17850 = vst [vmem:[#allocation17_spill] sm:$0xff] %v13860_v37  ;;  %17855 = vst [vmem:[#allocation21_spill] sm:$0xff] %v13874_v7  ;;  %v6057_v37 = vand.u32 4294901760, %v13841_v9  ;;  %v13879_v18 = vpack.c.bf16 %v6033_v21, %v6029_v29  ;;  %v13882_v44 = vsub.f32 %v13824_v43, %v6051_v2  ;;  %v5960_v55 = vld [vmem:[#allocation8 + $0x178] sm:$0xff]  ;;  %8736 = vmatprep.subr.bf16.mxu0 %v13742_v33  ;;  %8858 = vmatpush1.bf16.msra.mxu1 %v13817_v40  ;;  %v5959_v33 = vld [vmem:[#allocation8 + $0x170] sm:$0xff] }
 0x468   :  { %17849 = vst [vmem:[#allocation16_spill] sm:$0xff] %v13853_v39  ;;  %17852 = vst [vmem:[#allocation20_spill] sm:$0xff] %v13865_v10  ;;  %v17853_v39 = vand.u32 4294901760, %v17707_v24  ;;  %v5958_v10 = vld [vmem:[#allocation8 + $0x168] sm:$0xff]  ;;  %v13885_v24 = vsub.f32 %v13826_v62, %v6055_v32  ;;  %v13893_v42 = vsub.f32 %v13839_v17, %v6053_v34  ;;  %v6063_v21 = vand.u32 4294901760, %v5956_v52  ;;  %8860 = vmatprep.subr.bf16.mxu1 %v13845_v51 }
 0x469   :  { %17856 = vst [vmem:[#allocation24_spill] sm:$0xff] %v13879_v18  ;;  %17857 = vst [vmem:[#allocation25_spill] sm:$0xff] %v13882_v44  ;;  %v13896_v29 = vsub.f32 %v13841_v9, %v6057_v37  ;;  %v13900_v43 = vsub.f32 %v13856_v25, %v6059_v35  ;;  %v6061_v62 = vand.u32 4294901760, %v5953_v3  ;;  %v6067_v44 = vand.u32 4294901760, %v5958_v10 }
 0x46a   :  { %v8739_v14 = vpack.c.bf16 %v17854_v12, %v17853_v39  ;;  %17858 = vst [vmem:[#allocation28_spill] sm:$0xff] %v13885_v24  ;;  %v5957_v39 = vld [vmem:[#allocation8 + $0x160] sm:$0xff]  ;;  %v13890_v12 = vpack.c.bf16 %v6039_v36, %v6035_v31  ;;  %17860 = vst [vmem:[#allocation32_spill] sm:$0xff] %v13893_v42  ;;  %v6065_v24 = vand.u32 4294901760, %v5955_v20  ;;  %v17863_v40 = vand.u32 4294901760, %v17710_v61  ;;  %8738 = vmatpush1.bf16.msra.mxu0 %v13758_v38 }
 0x46b   :  { %17861 = vst [vmem:[#allocation33_spill] sm:$0xff] %v13896_v29  ;;  %17862 = vst [vmem:[#allocation36_spill] sm:$0xff] %v13900_v43  ;;  %v17864_v31 = vand.u32 4294901760, %v17709_v56  ;;  %v13906_v17 = vsub.f32 %v5956_v52, %v6063_v21  ;;  %v6071_v42 = vand.u32 4294901760, %v5960_v55  ;;  %v6069_v9 = vand.u32 4294901760, %v5957_v39  ;;  %8862 = vmatpush1.bf16.msra.mxu1 %v13879_v18 }
 0x46c   :  { %17859 = vst [vmem:[#allocation29_spill] sm:$0xff] %v13890_v12  ;;  %v17866_v51 = vand.u32 4294901760, %v17713_v6  ;;  %v17867_v25 = vand.u32 4294901760, %v17712_v57  ;;  %v13913_v29 = vsub.f32 %v5953_v3, %v6061_v62  ;;  %v13915_v7 = vsub.f32 %v5955_v20, %v6065_v24  ;;  %8740 = vmatprep.subr.bf16.mxu0 %v8739_v14  ;;  %8864 = vmatprep.subr.bf16.mxu1 %v13890_v12 }
 0x46d   :  { %v8741_v36 = vpack.c.bf16 %v17864_v31, %v17863_v40  ;;  %17865 = vst [vmem:[#allocation38_spill] sm:$0xff] %v13906_v17  ;;  %v13917_v60 = vsub.f32 %v5958_v10, %v6067_v44  ;;  %v17870_v61 = vand.u32 4294901760, %v13778_v26  ;;  %v13924_v40 = vsub.f32 %v5960_v55, %v6071_v42 }
 0x46e   :  { %v8743_v43 = vpack.c.bf16 %v17867_v25, %v17866_v51  ;;  %17868 = vst [vmem:[#allocation47_spill] sm:$0xff] %v13913_v29  ;;  %v6073_v38 = vand.u32 4294901760, %v5959_v33  ;;  %v13926_v6 = vsub.f32 %v5957_v39, %v6069_v9  ;;  %v17873_v57 = vand.u32 4294901760, %v13791_v59 }
 0x46f   :  { %17869 = vst [vmem:[#allocation50_spill] sm:$0xff] %v13917_v60  ;;  %v13922_v56 = vpack.c.bf16 %v6041_v28, %v17870_v61  ;;  %8742 = vmatpush1.bf16.msra.mxu0 %v8741_v36  ;;  %v17875_v14 = vand.u32 4294901760, %v17660_v22  ;;  %v17876_v26 = vand.u32 4294901760, %v17661_v45  ;;  %v17877_v10 = vand.u32 4294901760, %v17662_v27  ;;  %v17883_v45 = vld [vmem:[#allocation183_spill] sm:$0xff]  ;;  %v17908_v61 = vld [vmem:[#allocation217_spill] sm:$0xff] }
 0x470   :  { %17872 = vst [vmem:[#allocation62_spill] sm:$0xff] %v13926_v6  ;;  %v13931_v3 = vpack.c.bf16 %v6047_v47, %v17873_v57  ;;  %v13933_v51 = vsub.f32 %v5959_v33, %v6073_v38  ;;  %8744 = vmatprep.subr.bf16.mxu0 %v8743_v43  ;;  %v17878_v52 = vand.u32 4294901760, %v17663_v8  ;;  %v17879_v59 = vand.u32 4294901760, %v13805_v49  ;;  %v17904_v36 = vld [vmem:[#allocation19_spill] sm:$0xff] }
 0x471   :  { %17871 = vst [vmem:[#allocation59_spill] sm:$0xff] %v13922_v56  ;;  %v8745_v28 = vpack.c.bf16 %v17876_v26, %v17875_v14  ;;  %8866 = vmatpush1.bf16.msra.mxu1 %v13922_v56  ;;  %v13949_v55 = vpack.c.bf16 %v6055_v32, %v6051_v2  ;;  %v17882_v22 = vand.u32 4294901760, %v17664_v1  ;;  %v17884_v39 = vand.u32 4294901760, %v17883_v45  ;;  %v17910_v14 = vld [vmem:[#allocation221_spill] sm:$0xff]  ;;  %v17912_v26 = vld [vmem:[#allocation215_spill] sm:$0xff]  ;;  %v17918_v45 = vld [vmem:[#allocation242_spill] sm:$0xff] }
 0x472   :  { %17874 = vst [vmem:[#allocation69_spill] sm:$0xff] %v13931_v3  ;;  %v8747_v20 = vpack.c.bf16 %v17878_v52, %v17877_v10  ;;  %v13946_v47 = vpack.c.bf16 %v6049_v48, %v17879_v59  ;;  %8868 = vmatprep.subr.bf16.mxu1 %v13931_v3  ;;  %v17885_v8 = vand.u32 4294901760, %v13114_v50  ;;  %v17886_v27 = vand.u32 4294901760, %v13116_v41  ;;  %v17914_v52 = vld [vmem:[#allocation26_spill] sm:$0xff] }
 0x473   :  { %17881 = vst [vmem:[#allocation124_spill] sm:$0xff] %v13949_v55  ;;  %8746 = vmatpush1.bf16.msra.mxu0 %v8745_v28  ;;  %v8749_v43 = vpack.c.bf16 %v17884_v39, %v17882_v22  ;;  %v13960_v49 = vpack.c.bf16 %v6057_v37, %v6053_v34  ;;  %v13963_v32 = vpack.c.bf16 %v6063_v21, %v6059_v35  ;;  %v17889_v1 = vand.u32 4294901760, %v13122_v63  ;;  %v17919_v39 = vld [vmem:[#allocation57_spill] sm:$0xff] }
 0x474   :  { %17880 = vst [vmem:[#allocation71_spill] sm:$0xff] %v13946_v47  ;;  %8748 = vmatprep.subr.bf16.mxu0 %v8747_v20  ;;  %v8751_v33 = vpack.c.bf16 %v17886_v27, %v17885_v8  ;;  %v17890_v48 = vand.u32 4294901760, %v13124_v30  ;;  %v17891_v50 = vand.u32 4294901760, %v13129_v0  ;;  %v17892_v41 = vand.u32 4294901760, %v17667_v53  ;;  %v17916_v20 = vld [vmem:[#allocation236_spill] sm:$0xff]  ;;  %v17921_v8 = vld [vmem:[#allocation85_spill] sm:$0xff] }
 0x475   :  { %8870 = vmatpush1.bf16.msra.mxu1 %v13946_v47  ;;  %17887 = vst [vmem:[#allocation127_spill] sm:$0xff] %v13960_v49  ;;  %17888 = vst [vmem:[#allocation136_spill] sm:$0xff] %v13963_v32  ;;  %v13974_v37 = vpack.c.bf16 %v6065_v24, %v6061_v62  ;;  %v13977_v34 = vpack.c.bf16 %v6071_v42, %v6067_v44  ;;  %v17895_v63 = vand.u32 4294901760, %v13138_v16  ;;  %v17896_v30 = vand.u32 4294901760, %v13142_v4  ;;  %v17901_v42 = vld [vmem:[#allocation212_spill] sm:$0xff]  ;;  %v17922_v27 = vld [vmem:[#allocation93_spill] sm:$0xff] }
 0x476   :  { %8872 = vmatprep.subr.bf16.mxu1 %v13949_v55  ;;  %v8753_v2 = vpack.c.bf16 %v17890_v48, %v17889_v1  ;;  %v8755_v31 = vpack.c.bf16 %v17892_v41, %v17891_v50  ;;  %v17897_v0 = vand.u32 4294901760, %v17722_v19  ;;  %v17898_v53 = vand.u32 4294901760, %v13148_v11  ;;  %v17906_v11 = vld [vmem:[#allocation22_spill] sm:$0xff]  ;;  %v17924_v1 = vld [vmem:[#allocation101_spill] sm:$0xff]  ;;  %v17925_v48 = vld [vmem:[#allocation104_spill] sm:$0xff] }
 0x477   :  { %8750 = vmatpush1.bf16.msra.mxu0 %v8749_v43  ;;  %17893 = vst [vmem:[#allocation140_spill] sm:$0xff] %v13974_v37  ;;  %17894 = vst [vmem:[#allocation149_spill] sm:$0xff] %v13977_v34  ;;  %v8757_v35 = vpack.c.bf16 %v17896_v30, %v17895_v63  ;;  %v13988_v24 = vpack.c.bf16 %v6073_v38, %v6069_v9  ;;  %v17900_v44 = vand.u32 4294901760, %v13152_v13  ;;  %v17902_v16 = vand.u32 4294901760, %v17901_v42  ;;  %v17920_v43 = vld [vmem:[#allocation88_spill] sm:$0xff]  ;;  %v17927_v50 = vld [vmem:[#allocation110_spill] sm:$0xff] }
 0x478   :  { %8752 = vmatprep.subr.bf16.mxu0 %v8751_v33  ;;  %v8759_v21 = vpack.c.bf16 %v17898_v53, %v17897_v0  ;;  %v17903_v4 = vand.u32 4294901760, %v13166_v23  ;;  %v17905_v19 = vand.u32 4294901760, %v17904_v36  ;;  %v17907_v9 = vand.u32 4294901760, %v17906_v11  ;;  %v17923_v33 = vld [vmem:[#allocation96_spill] sm:$0xff]  ;;  %v17928_v41 = vld [vmem:[#allocation111_spill] sm:$0xff]  ;;  %v17930_v63 = vld [vmem:[#allocation37_spill] sm:$0xff] }
 0x479   :  { %8874 = vmatpush1.bf16.msra.mxu1 %v13960_v49  ;;  %17899 = vst [vmem:[#allocation151_spill] sm:$0xff] %v13988_v24  ;;  %v8761_v62 = vpack.c.bf16 %v17902_v16, %v17900_v44  ;;  %v17909_v38 = vand.u32 4294901760, %v17908_v61  ;;  %v17911_v13 = vand.u32 4294901760, %v17910_v14  ;;  %v17913_v28 = vand.u32 4294901760, %v17912_v26  ;;  %v17931_v30 = vld [vmem:[#allocation48_spill] sm:$0xff]  ;;  %v17933_v0 = vld [vmem:[#allocation61_spill] sm:$0xff] }
 0x47a   :  { %8876 = vmatprep.subr.bf16.mxu1 %v13963_v32  ;;  %v8763_v25 = vpack.c.bf16 %v17905_v19, %v17903_v4  ;;  %v17915_v23 = vand.u32 4294901760, %v17914_v52  ;;  %v17917_v59 = vand.u32 4294901760, %v17916_v20  ;;  %v17934_v53 = vld [vmem:[#allocation121_spill] sm:$0xff]  ;;  %v17936_v44 = vld [vmem:[#allocation135_spill] sm:$0xff]  ;;  %v17938_v16 = vld [vmem:[#allocation156_spill] sm:$0xff]  ;;  %v15988_v3 = vand.u32 4294901760, %v13744_v5 }
 0x47b   :  { %8754 = vmatpush1.bf16.msra.mxu0 %v8753_v2  ;;  %v8765_v57 = vpack.c.bf16 %v17909_v38, %v17907_v9  ;;  %v8767_v10 = vpack.c.bf16 %v17913_v28, %v17911_v13  ;;  %v17926_v2 = vld [vmem:[#allocation109_spill] sm:$0xff]  ;;  %v17937_v42 = vld [vmem:[#allocation155_spill] sm:$0xff]  ;;  %v17942_v19 = vld [vmem:[#allocation192_spill] sm:$0xff] }
 0x47c   :  { %8756 = vmatprep.subr.bf16.mxu0 %v8755_v31  ;;  %v8769_v22 = vpack.c.bf16 %v17917_v59, %v17915_v23  ;;  %v17929_v31 = vld [vmem:[#allocation119_spill] sm:$0xff]  ;;  %v17945_v9 = vld [vmem:[#allocation204_spill] sm:$0xff]  ;;  %v17946_v61 = vld [vmem:[#allocation206_spill] sm:$0xff] }
 0x47d   :  { %8878 = vmatpush1.bf16.msra.mxu1 %v13974_v37  ;;  %v17940_v4 = vld [vmem:[#allocation171_spill] sm:$0xff]  ;;  %v17947_v38 = vld [vmem:[#allocation18_spill] sm:$0xff]  ;;  %v17949_v14 = vld [vmem:[#allocation241_spill] sm:$0xff] }
 0x47e   :  { %8880 = vmatprep.subr.bf16.mxu1 %v13977_v34  ;;  %v17941_v36 = vld [vmem:[#allocation191_spill] sm:$0xff]  ;;  %v17950_v13 = vld [vmem:[#allocation216_spill] sm:$0xff] }
 0x47f   :  { %8758 = vmatpush1.bf16.msra.mxu0 %v8757_v35  ;;  %v17932_v35 = vld [vmem:[#allocation49_spill] sm:$0xff]  ;;  %v17944_v11 = vld [vmem:[#allocation195_spill] sm:$0xff] }
 0x480   :  { %8760 = vmatprep.subr.bf16.mxu0 %v8759_v21  ;;  %v17935_v21 = vld [vmem:[#allocation134_spill] sm:$0xff]  ;;  %v17951_v26 = vld [vmem:[#allocation23_spill] sm:$0xff]  ;;  %v5963_v59 = vld [vmem:[#allocation8 + $0x190] sm:$0xff] }
 0x481   :  { %8882 = vmatpush1.bf16.msra.mxu1 %v13988_v24  ;;  %v5962_v28 = vld [vmem:[#allocation8 + $0x188] sm:$0xff]  ;;  %v5961_v52 = vld [vmem:[#allocation8 + $0x180] sm:$0xff] }
 0x482   :  { %v6075_v23 = vand.u32 4294901760, %v5962_v28 }
 0x483   :  { %8762 = vmatpush1.bf16.msra.mxu0 %v8761_v62  ;;  %v17939_v62 = vld [vmem:[#allocation170_spill] sm:$0xff] }
 0x484   :  { %8764 = vmatprep.subr.bf16.mxu0 %v8763_v25  ;;  %v17943_v25 = vld [vmem:[#allocation194_spill] sm:$0xff] }
 0x487   :  { %8766 = vmatpush1.bf16.msra.mxu0 %v8765_v57  ;;  %v17948_v57 = vld [vmem:[#allocation239_spill] sm:$0xff] }
 0x488   :  { %8768 = vmatprep.subr.bf16.mxu0 %v8767_v10  ;;  %v5964_v10 = vld [vmem:[#allocation8 + $0x198] sm:$0xff] }
 0x489   :  { %v6079_v20 = vand.u32 4294901760, %v5964_v10 }
 0x48b   :  { %8770 = vmatpush1.bf16.msra.mxu0 %v8769_v22  ;;  %v6077_v22 = vand.u32 4294901760, %v5961_v52 }
 0x48c   :  { %8772 = vmatprep.subr.bf16.mxu0 %v17918_v45  ;;  %v5966_v45 = vld [vmem:[#allocation8 + $0x1a8] sm:$0xff] }
 0x48e   :  { %5768 = vmatmul.mubr.f32.vlgmr.msra.gmra.mrb[0].mxu0 %v17919_v39 }
 0x48f   :  { %8774 = vmatpush1.bf16.msra.mxu0 %v17920_v43  ;;  %5903 = vmatprep.mubr.f32.mxu0 %v17921_v8  ;;  %v5968_v43 = vld [vmem:[#allocation8 + $0x1b8] sm:$0xff]  ;;  %v6081_v8 = vand.u32 4294901760, %v5963_v59 }
 0x490   :  { %8776 = vmatprep.subr.bf16.mxu0 %v17922_v27  ;;  %v6083_v27 = vand.u32 4294901760, %v5966_v45 }
 0x493   :  { %8778 = vmatpush1.bf16.msra.mxu0 %v17923_v33  ;;  %v6087_v33 = vand.u32 4294901760, %v5968_v43 }
 0x494   :  { %8780 = vmatprep.subr.bf16.mxu0 %v17924_v1  ;;  %v5965_v1 = vld [vmem:[#allocation8 + $0x1a0] sm:$0xff] }
 0x497   :  { %8782 = vmatpush1.bf16.msra.mxu0 %v17925_v48  ;;  %v5967_v48 = vld [vmem:[#allocation8 + $0x1b0] sm:$0xff] }
 0x498   :  { %8784 = vmatprep.subr.bf16.mxu0 %v17926_v2  ;;  %v5970_v2 = vld [vmem:[#allocation8 + $0x1c8] sm:$0xff] }
 0x49b   :  { %8786 = vmatpush1.bf16.msra.mxu0 %v17927_v50  ;;  %v14047_v50 = vpack.c.bf16 %v6079_v20, %v6075_v23 }
 0x49c   :  { %8788 = vmatprep.subr.bf16.mxu0 %v17928_v41  ;;  %v14049_v41 = vsub.f32 %v5962_v28, %v6075_v23  ;;  %v5975_v28 = vld [vmem:[#allocation8 + $0x1f0] sm:$0xff] }
 0x49d   :  { %17952 = vst [vmem:[#allocation161_spill] sm:$0xff] %v14047_v50  ;;  %8884 = vmatprep.subr.bf16.mxu1 %v14047_v50 }
 0x49f   :  { %8790 = vmatpush1.bf16.msra.mxu0 %v17929_v31  ;;  %v14053_v31 = vsub.f32 %v5961_v52, %v6077_v22 }
 0x4a0   :  { %8792 = vmatprep.subr.bf16.mxu0 %v17930_v63  ;;  %v5972_v63 = vld [vmem:[#allocation8 + $0x1d8] sm:$0xff] }
 0x4a3   :  { %8794 = vmatpush1.bf16.msra.mxu0 %v17931_v30  ;;  %v5969_v30 = vld [vmem:[#allocation8 + $0x1c0] sm:$0xff] }
 0x4a4   :  { %8796 = vmatprep.subr.bf16.mxu0 %v17932_v35  ;;  %v5971_v35 = vld [vmem:[#allocation8 + $0x1d0] sm:$0xff] }
 0x4a7   :  { %8798 = vmatpush1.bf16.msra.mxu0 %v17933_v0  ;;  %v14055_v0 = vpack.c.bf16 %v6081_v8, %v6077_v22 }
 0x4a8   :  { %8800 = vmatprep.subr.bf16.mxu0 %v17934_v53  ;;  %v14057_v53 = vsub.f32 %v5963_v59, %v6081_v8  ;;  %v6105_v8 = vand.u32 4294901760, %v5975_v28 }
 0x4a9   :  { %17953 = vst [vmem:[#allocation163_spill] sm:$0xff] %v14055_v0  ;;  %8886 = vmatpush1.bf16.msra.mxu1 %v14055_v0 }
 0x4ab   :  { %8802 = vmatpush1.bf16.msra.mxu0 %v17935_v21  ;;  %v14059_v21 = vpack.c.bf16 %v6087_v33, %v6083_v27 }
 0x4ac   :  { %8804 = vmatprep.subr.bf16.mxu0 %v17936_v44  ;;  %v14061_v44 = vsub.f32 %v5966_v45, %v6083_v27  ;;  %v17961_v27 = vld [vmem:[#allocation27_spill] sm:$0xff] }
 0x4ad   :  { %17954 = vst [vmem:[#allocation173_spill] sm:$0xff] %v14059_v21  ;;  %8888 = vmatprep.subr.bf16.mxu1 %v14059_v21 }
 0x4af   :  { %8806 = vmatpush1.bf16.msra.mxu0 %v17937_v42  ;;  %v5974_v42 = vld [vmem:[#allocation8 + $0x1e8] sm:$0xff] }
 0x4b0   :  { %8808 = vmatprep.subr.bf16.mxu0 %v17938_v16  ;;  %v14064_v16 = vsub.f32 %v5968_v43, %v6087_v33  ;;  %v15933_v33 = vand.u32 4294901760, %v17961_v27 }
 0x4b3   :  { %8810 = vmatpush1.bf16.msra.mxu0 %v17939_v62  ;;  %v6085_v62 = vand.u32 4294901760, %v5965_v1 }
 0x4b4   :  { %8812 = vmatprep.subr.bf16.mxu0 %v17940_v4  ;;  %v6089_v4 = vand.u32 4294901760, %v5967_v48 }
 0x4b7   :  { %8814 = vmatpush1.bf16.msra.mxu0 %v17941_v36  ;;  %v6091_v36 = vand.u32 4294901760, %v5970_v2 }
 0x4b8   :  { %8816 = vmatprep.subr.bf16.mxu0 %v17942_v19  ;;  %v6095_v19 = vand.u32 4294901760, %v5972_v63 }
 0x4ba   :  { %v14078_v52 = vsub.f32 %v5972_v63, %v6095_v19 }
 0x4bb   :  { %8818 = vmatpush1.bf16.msra.mxu0 %v17943_v25  ;;  %v6093_v25 = vand.u32 4294901760, %v5969_v30 }
 0x4bc   :  { %8820 = vmatprep.subr.bf16.mxu0 %v17944_v11  ;;  %v6097_v11 = vand.u32 4294901760, %v5971_v35  ;;  %17958 = vst [vmem:[#allocation197_spill] sm:$0xff] %v14078_v52 }
 0x4be   :  { %v14080_v23 = vpack.c.bf16 %v6097_v11, %v6093_v25  ;;  %v14084_v59 = vsub.f32 %v5971_v35, %v6097_v11 }
 0x4bf   :  { %8822 = vmatpush1.bf16.msra.mxu0 %v17945_v9  ;;  %v5976_v9 = vld [vmem:[#allocation8 + $0x1f8] sm:$0xff] }
 0x4c0   :  { %8824 = vmatprep.subr.bf16.mxu0 %v17946_v61  ;;  %v6099_v61 = vand.u32 4294901760, %v5974_v42  ;;  %17959 = vst [vmem:[#allocation91_spill] sm:$0xff] %v14080_v23  ;;  %17960 = vst [vmem:[#allocation92_spill] sm:$0xff] %v14084_v59  ;;  %v6103_v22 = vand.u32 4294901760, %v5976_v9 }
 0x4c2   :  { %v14086_v45 = vsub.f32 %v5974_v42, %v6099_v61  ;;  %v17966_v42 = vld [vmem:[#allocation224_spill] sm:$0xff] }
 0x4c3   :  { %8826 = vmatpush1.bf16.msra.mxu0 %v17947_v38  ;;  %v5973_v38 = vld [vmem:[#allocation8 + $0x1e0] sm:$0xff] }
 0x4c4   :  { %8828 = vmatprep.subr.bf16.mxu0 %v17948_v57  ;;  %v14068_v57 = vpack.c.bf16 %v6089_v4, %v6085_v62  ;;  %v6101_v43 = vand.u32 4294901760, %v5973_v38 }
 0x4c6   :  { %17955 = vst [vmem:[#allocation175_spill] sm:$0xff] %v14068_v57  ;;  %8890 = vmatpush1.bf16.msra.mxu1 %v14068_v57  ;;  %v14097_v35 = vsub.f32 %v5973_v38, %v6101_v43  ;;  %v17969_v38 = vld [vmem:[#allocation31_spill] sm:$0xff]  ;;  %v17971_v57 = vld [vmem:[#allocation226_spill] sm:$0xff] }
 0x4c7   :  { %8830 = vmatpush1.bf16.msra.mxu0 %v17949_v14  ;;  %v14070_v14 = vsub.f32 %v5965_v1, %v6085_v62  ;;  %v17962_v1 = vld [vmem:[#allocation30_spill] sm:$0xff]  ;;  %v14093_v62 = vpack.c.bf16 %v6103_v22, %v6099_v61 }
 0x4c8   :  { %8832 = vmatprep.subr.bf16.mxu0 %v17950_v13  ;;  %v14072_v13 = vsub.f32 %v5967_v48, %v6089_v4  ;;  %v15938_v48 = vand.u32 4294901760, %v17962_v1  ;;  %v15942_v4 = vand.u32 4294901760, %v17966_v42 }
 0x4c9   :  { %17964 = vst [vmem:[#allocation199_spill] sm:$0xff] %v14093_v62 }
 0x4ca   :  { %17956 = vst [vmem:[#allocation185_spill] sm:$0xff] %v14072_v13  ;;  %v6139_v11 = vsub.f32 %v17962_v1, %v15938_v48  ;;  %v6145_v61 = vsub.f32 %v17966_v42, %v15942_v4  ;;  %v15960_v48 = vand.u32 4294901760, %v17971_v57 }
 0x4cb   :  { %8834 = vmatpush1.bf16.msra.mxu0 %v17951_v26  ;;  %v14074_v26 = vsub.f32 %v5970_v2, %v6091_v36  ;;  %v17963_v2 = vld [vmem:[#allocation219_spill] sm:$0xff] }
 0x4cc   :  { %v15941_v63 = vand.u32 4294901760, %v17963_v2 }
 0x4ce   :  { %5905 = vmatmul.mubr.f32.vlgmr.msra.gmra.mrb[0].mxu0 %v17919_v39  ;;  %v14051_v39 = vsub.f32 %v5964_v10, %v6079_v20  ;;  %v14076_v10 = vpack.c.bf16 %v6095_v19, %v6091_v36  ;;  %v14082_v20 = vsub.f32 %v5969_v30, %v6093_v25  ;;  %v14095_v30 = vsub.f32 %v5976_v9, %v6103_v22 }
 0x4cf   :  { %v14100_v36 = vpack.c.bf16 %v6105_v8, %v6101_v43  ;;  %v14102_v19 = vsub.f32 %v5975_v28, %v6105_v8  ;;  %v6127_v25 = vsub.f32 %v17961_v27, %v15933_v33  ;;  %v6133_v9 = vsub.f32 %v17963_v2, %v15941_v63  ;;  %v17970_v28 = vld [vmem:[#allocation34_spill] sm:$0xff] }
 0x4d0   :  { %17957 = vst [vmem:[#allocation187_spill] sm:$0xff] %v14076_v10  ;;  %8892 = vmatprep.subr.bf16.mxu1 %v14076_v10  ;;  %17965 = vst [vmem:[#allocation97_spill] sm:$0xff] %v14095_v30  ;;  %v15953_v22 = vand.u32 4294901760, %v17969_v38  ;;  %v15956_v43 = vand.u32 4294901760, %v17970_v28  ;;  %v6140_v33 = vand.u32 4294901760, %v6139_v11  ;;  %v15957_v10 = vand.u32 4294901760, %v13688_v46 }
 0x4d1   :  { %17967 = vst [vmem:[#allocation98_spill] sm:$0xff] %v14100_v36  ;;  %17968 = vst [vmem:[#allocation210_spill] sm:$0xff] %v14102_v19  ;;  %8894 = vmatpush1.bf16.msra.mxu1 %v14080_v23  ;;  %v6128_v8 = vand.u32 4294901760, %v6127_v25  ;;  %v6134_v21 = vand.u32 4294901760, %v6133_v9  ;;  %v6146_v63 = vand.u32 4294901760, %v6145_v61  ;;  %v6169_v11 = vsub.f32 %v17971_v57, %v15960_v48 }
 0x4d2   :  { %8896 = vmatprep.subr.bf16.mxu1 %v14093_v62  ;;  %v6151_v4 = vsub.f32 %v17969_v38, %v15953_v22  ;;  %v6163_v0 = vsub.f32 %v17970_v28, %v15956_v43  ;;  %v6157_v25 = vsub.f32 %v13688_v46, %v15957_v10  ;;  %v17972_v62 = vld [vmem:[#allocation234_spill] sm:$0xff]  ;;  %v17974_v22 = vld [vmem:[#allocation41_spill] sm:$0xff] }
 0x4d3   :  { %v8899_v50 = vpack.c.bf16 %v6140_v33, %v6128_v8  ;;  %v15965_v9 = vand.u32 4294901760, %v17972_v62  ;;  %v14135_v61 = vpack.c.bf16 %v6146_v63, %v6134_v21  ;;  %v15966_v34 = vand.u32 4294901760, %v17974_v22  ;;  %v17975_v10 = vld [vmem:[#allocation53_spill] sm:$0xff] }
 0x4d4   :  { %v6152_v23 = vand.u32 4294901760, %v6151_v4  ;;  %v6164_v24 = vand.u32 4294901760, %v6163_v0  ;;  %v6158_v43 = vand.u32 4294901760, %v6157_v25  ;;  %v6170_v33 = vand.u32 4294901760, %v6169_v11  ;;  %v17977_v0 = vld [vmem:[#allocation56_spill] sm:$0xff]  ;;  %v17978_v4 = vld [vmem:[#allocation65_spill] sm:$0xff] }
 0x4d5   :  { %17973 = vst [vmem:[#allocation99_spill] sm:$0xff] %v14135_v61  ;;  %8898 = vmatpush1.bf16.msra.mxu1 %v14100_v36  ;;  %v6175_v8 = vsub.f32 %v17972_v62, %v15965_v9  ;;  %v15969_v37 = vand.u32 4294901760, %v17975_v10  ;;  %v6187_v21 = vsub.f32 %v17974_v22, %v15966_v34  ;;  %v15974_v63 = vand.u32 4294901760, %v17977_v0  ;;  %v17980_v34 = vld [vmem:[#allocation257_spill] sm:$0xff] }
 0x4d6   :  { %8900 = vmatprep.subr.bf16.mxu1 %v8899_v50  ;;  %v14143_v48 = vpack.c.bf16 %v6164_v24, %v6152_v23  ;;  %v15975_v32 = vand.u32 4294901760, %v17978_v4  ;;  %v14150_v36 = vpack.c.bf16 %v6170_v33, %v6158_v43  ;;  %v15976_v9 = vand.u32 4294901760, %v13715_v54 }
 0x4d7   :  { %v6176_v25 = vand.u32 4294901760, %v6175_v8  ;;  %v6181_v11 = vsub.f32 %v17975_v10, %v15969_v37  ;;  %v6188_v50 = vand.u32 4294901760, %v6187_v21  ;;  %v6193_v24 = vsub.f32 %v17977_v0, %v15974_v63  ;;  %v18036_v0 = vld [vmem:[#allocation166_spill] sm:$0xff] }
 0x4d8   :  { %17976 = vst [vmem:[#allocation243_spill] sm:$0xff] %v14143_v48  ;;  %17979 = vst [vmem:[#allocation100_spill] sm:$0xff] %v14150_v36  ;;  %v6199_v23 = vsub.f32 %v17978_v4, %v15975_v32  ;;  %v15985_v49 = vand.u32 4294901760, %v17980_v34  ;;  %v6211_v33 = vsub.f32 %v13715_v54, %v15976_v9  ;;  %v15986_v8 = vand.u32 4294901760, %v13731_v15  ;;  %v18038_v54 = vld [vmem:[#allocation190_spill] sm:$0xff] }
 0x4d9   :  { %v6182_v43 = vand.u32 4294901760, %v6181_v11  ;;  %v15987_v37 = vand.u32 4294901760, %v13733_v58  ;;  %v14168_v21 = vpack.c.bf16 %v6188_v50, %v6176_v25  ;;  %v6194_v55 = vand.u32 4294901760, %v6193_v24  ;;  %v17983_v50 = vld [vmem:[#allocation261_spill] sm:$0xff] }
 0x4da   :  { %v6200_v47 = vand.u32 4294901760, %v6199_v23  ;;  %v6205_v63 = vsub.f32 %v17980_v34, %v15985_v49  ;;  %v6212_v32 = vand.u32 4294901760, %v6211_v33  ;;  %v6217_v11 = vsub.f32 %v13731_v15, %v15986_v8  ;;  %v17984_v23 = vld [vmem:[#allocation260_spill] sm:$0xff] }
 0x4db   :  { %17981 = vst [vmem:[#allocation106_spill] sm:$0xff] %v14168_v21  ;;  %v6223_v9 = vsub.f32 %v13733_v58, %v15987_v37  ;;  %v14180_v56 = vpack.c.bf16 %v6194_v55, %v6182_v43  ;;  %v15989_v24 = vand.u32 4294901760, %v17983_v50  ;;  %v15990_v12 = vand.u32 4294901760, %v17984_v23 }
 0x4dc   :  { %v6206_v25 = vand.u32 4294901760, %v6205_v63  ;;  %v14184_v18 = vpack.c.bf16 %v6212_v32, %v6200_v47  ;;  %v6218_v33 = vand.u32 4294901760, %v6217_v11  ;;  %v6235_v8 = vsub.f32 %v13744_v5, %v15988_v3  ;;  %v17986_v63 = vld [vmem:[#allocation70_spill] sm:$0xff]  ;;  %v18041_v5 = vld [vmem:[#allocation16_spill] sm:$0xff]  ;;  %v18050_v10 = vld [vmem:[#allocation99_spill] sm:$0xff] }
 0x4dd   :  { %17982 = vst [vmem:[#allocation107_spill] sm:$0xff] %v14180_v56  ;;  %v6224_v49 = vand.u32 4294901760, %v6223_v9  ;;  %v6229_v37 = vsub.f32 %v17983_v50, %v15989_v24  ;;  %v6241_v55 = vsub.f32 %v17984_v23, %v15990_v12  ;;  %v15991_v43 = vand.u32 4294901760, %v17986_v63  ;;  %v17987_v56 = vld [vmem:[#allocation130_spill] sm:$0xff]  ;;  %v17989_v9 = vld [vmem:[#allocation133_spill] sm:$0xff] }
 0x4de   :  { %17985 = vst [vmem:[#allocation108_spill] sm:$0xff] %v14184_v18  ;;  %v15995_v21 = vand.u32 4294901760, %v17987_v56  ;;  %v14197_v47 = vpack.c.bf16 %v6218_v33, %v6206_v25  ;;  %v6236_v32 = vand.u32 4294901760, %v6235_v8  ;;  %v15996_v11 = vand.u32 4294901760, %v17989_v9  ;;  %v17990_v18 = vld [vmem:[#allocation142_spill] sm:$0xff] }
 0x4df   :  { %v15997_v36 = vand.u32 4294901760, %v17990_v18  ;;  %v6230_v3 = vand.u32 4294901760, %v6229_v37  ;;  %v6242_v48 = vand.u32 4294901760, %v6241_v55  ;;  %v6247_v24 = vsub.f32 %v17986_v63, %v15991_v43  ;;  %v17992_v37 = vld [vmem:[#allocation145_spill] sm:$0xff] }
 0x4e0   :  { %17988 = vst [vmem:[#allocation113_spill] sm:$0xff] %v14197_v47  ;;  %v6259_v12 = vsub.f32 %v17987_v56, %v15995_v21  ;;  %v14207_v61 = vpack.c.bf16 %v6236_v32, %v6224_v49  ;;  %v6253_v8 = vsub.f32 %v17989_v9, %v15996_v11  ;;  %v15998_v33 = vand.u32 4294901760, %v17992_v37  ;;  %v17994_v63 = vld [vmem:[#allocation157_spill] sm:$0xff]  ;;  %v17995_v32 = vld [vmem:[#allocation166_spill] sm:$0xff] }
 0x4e1   :  { %v6265_v25 = vsub.f32 %v17990_v18, %v15997_v36  ;;  %v14216_v55 = vpack.c.bf16 %v6242_v48, %v6230_v3  ;;  %v6248_v47 = vand.u32 4294901760, %v6247_v24  ;;  %v16001_v23 = vand.u32 4294901760, %v17994_v63  ;;  %v17997_v3 = vld [vmem:[#allocation178_spill] sm:$0xff] }
 0x4e2   :  { %17991 = vst [vmem:[#allocation114_spill] sm:$0xff] %v14207_v61  ;;  %v6260_v43 = vand.u32 4294901760, %v6259_v12  ;;  %v6254_v50 = vand.u32 4294901760, %v6253_v8  ;;  %v6271_v49 = vsub.f32 %v17992_v37, %v15998_v33  ;;  %v16002_v11 = vand.u32 4294901760, %v17995_v32  ;;  %v17998_v24 = vld [vmem:[#allocation190_spill] sm:$0xff]  ;;  %v18000_v33 = vld [vmem:[#allocation193_spill] sm:$0xff] }
 0x4e3   :  { %17993 = vst [vmem:[#allocation115_spill] sm:$0xff] %v14216_v55  ;;  %v6266_v21 = vand.u32 4294901760, %v6265_v25  ;;  %v6283_v36 = vsub.f32 %v17994_v63, %v16001_v23  ;;  %v16006_v48 = vand.u32 4294901760, %v17997_v3  ;;  %v16007_v12 = vand.u32 4294901760, %v17998_v24  ;;  %v18001_v23 = vld [vmem:[#allocation202_spill] sm:$0xff] }
 0x4e4   :  { %v14223_v61 = vpack.c.bf16 %v6260_v43, %v6248_v47  ;;  %v6272_v8 = vand.u32 4294901760, %v6271_v49  ;;  %v6277_v25 = vsub.f32 %v17995_v32, %v16002_v11  ;;  %v16008_v37 = vand.u32 4294901760, %v18000_v33  ;;  %v18002_v49 = vld [vmem:[#allocation286_spill] sm:$0xff]  ;;  %v18054_v58 = vld [vmem:[#allocation107_spill] sm:$0xff] }
 0x4e5   :  { %v14230_v55 = vpack.c.bf16 %v6266_v21, %v6254_v50  ;;  %v6284_v18 = vand.u32 4294901760, %v6283_v36  ;;  %v6289_v43 = vsub.f32 %v17997_v3, %v16006_v48  ;;  %v6295_v47 = vsub.f32 %v17998_v24, %v16007_v12 }
 0x4e6   :  { %17996 = vst [vmem:[#allocation116_spill] sm:$0xff] %v14223_v61  ;;  %v16013_v61 = vand.u32 4294901760, %v18001_v23  ;;  %v6278_v21 = vand.u32 4294901760, %v6277_v25  ;;  %v6307_v50 = vsub.f32 %v18000_v33, %v16008_v37  ;;  %v16014_v11 = vand.u32 4294901760, %v18002_v49  ;;  %v18005_v33 = vld [vmem:[#allocation17_spill] sm:$0xff] }
 0x4e7   :  { %17999 = vst [vmem:[#allocation237_spill] sm:$0xff] %v14230_v55  ;;  %v18003_v55 = vld [vmem:[#allocation16_spill] sm:$0xff]  ;;  %v14248_v36 = vpack.c.bf16 %v6284_v18, %v6272_v8  ;;  %v6290_v63 = vand.u32 4294901760, %v6289_v43  ;;  %v6296_v9 = vand.u32 4294901760, %v6295_v47  ;;  %v16018_v24 = vand.u32 4294901760, %v18005_v33  ;;  %v18008_v47 = vld [vmem:[#allocation21_spill] sm:$0xff] }
 0x4e8   :  { %v16015_v32 = vand.u32 4294901760, %v18003_v55  ;;  %v6301_v48 = vsub.f32 %v18001_v23, %v16013_v61  ;;  %v6308_v12 = vand.u32 4294901760, %v6307_v50  ;;  %v6313_v25 = vsub.f32 %v18002_v49, %v16014_v11  ;;  %v18007_v8 = vld [vmem:[#allocation20_spill] sm:$0xff] }
 0x4e9   :  { %18004 = vst [vmem:[#allocation52_spill] sm:$0xff] %v14248_v36  ;;  %v14260_v3 = vpack.c.bf16 %v6290_v63, %v6278_v21  ;;  %v16020_v43 = vand.u32 4294901760, %v18007_v8  ;;  %v16021_v36 = vand.u32 4294901760, %v18008_v47  ;;  %v6331_v11 = vsub.f32 %v18005_v33, %v16018_v24 }
 0x4ea   :  { %v6319_v37 = vsub.f32 %v18003_v55, %v16015_v32  ;;  %v6302_v18 = vand.u32 4294901760, %v6301_v48  ;;  %v14264_v56 = vpack.c.bf16 %v6308_v12, %v6296_v9  ;;  %v6314_v50 = vand.u32 4294901760, %v6313_v25  ;;  %v18010_v48 = vld [vmem:[#allocation25_spill] sm:$0xff] }
 0x4eb   :  { %18006 = vst [vmem:[#allocation246_spill] sm:$0xff] %v14260_v3  ;;  %v6325_v32 = vsub.f32 %v18007_v8, %v16020_v43  ;;  %v6337_v63 = vsub.f32 %v18008_v47, %v16021_v36  ;;  %v16023_v21 = vand.u32 4294901760, %v18010_v48  ;;  %v18011_v3 = vld [vmem:[#allocation28_spill] sm:$0xff]  ;;  %v6332_v12 = vand.u32 4294901760, %v6331_v11 }
 0x4ec   :  { %18009 = vst [vmem:[#allocation248_spill] sm:$0xff] %v14264_v56  ;;  %v6320_v61 = vand.u32 4294901760, %v6319_v37  ;;  %v16026_v55 = vand.u32 4294901760, %v18011_v3  ;;  %v14277_v9 = vpack.c.bf16 %v6314_v50, %v6302_v18  ;;  %v18013_v37 = vld [vmem:[#allocation32_spill] sm:$0xff]  ;;  %v18014_v56 = vld [vmem:[#allocation33_spill] sm:$0xff] }
 0x4ed   :  { %v16027_v25 = vand.u32 4294901760, %v18013_v37  ;;  %v16028_v49 = vand.u32 4294901760, %v18014_v56  ;;  %v6326_v24 = vand.u32 4294901760, %v6325_v32  ;;  %v6338_v33 = vand.u32 4294901760, %v6337_v63  ;;  %v18016_v32 = vld [vmem:[#allocation36_spill] sm:$0xff] }
 0x4ee   :  { %18012 = vst [vmem:[#allocation78_spill] sm:$0xff] %v14277_v9  ;;  %v6343_v43 = vsub.f32 %v18010_v48, %v16023_v21  ;;  %v6355_v36 = vsub.f32 %v18011_v3, %v16026_v55  ;;  %v14287_v47 = vpack.c.bf16 %v6332_v12, %v6320_v61  ;;  %v16029_v50 = vand.u32 4294901760, %v18016_v32 }
 0x4ef   :  { %v6349_v11 = vsub.f32 %v18013_v37, %v16027_v25  ;;  %v6361_v18 = vsub.f32 %v18014_v56, %v16028_v49  ;;  %v14296_v63 = vpack.c.bf16 %v6338_v33, %v6326_v24  ;;  %v16030_v48 = vand.u32 4294901760, %v13906_v17  ;;  %v18047_v37 = vld [vmem:[#allocation235_spill] sm:$0xff] }
 0x4f0   :  { %18015 = vst [vmem:[#allocation79_spill] sm:$0xff] %v14287_v47  ;;  %v6344_v9 = vand.u32 4294901760, %v6343_v43  ;;  %v6356_v21 = vand.u32 4294901760, %v6355_v36  ;;  %v6367_v61 = vsub.f32 %v18016_v32, %v16029_v50  ;;  %v16031_v12 = vand.u32 4294901760, %v13913_v29 }
 0x4f1   :  { %18017 = vst [vmem:[#allocation54_spill] sm:$0xff] %v14296_v63  ;;  %v6350_v8 = vand.u32 4294901760, %v6349_v11  ;;  %v6362_v55 = vand.u32 4294901760, %v6361_v18  ;;  %v6379_v49 = vsub.f32 %v13906_v17, %v16030_v48  ;;  %v16032_v33 = vand.u32 4294901760, %v13915_v7 }
 0x4f2   :  { %v14303_v25 = vpack.c.bf16 %v6356_v21, %v6344_v9  ;;  %v16033_v24 = vand.u32 4294901760, %v13917_v60  ;;  %v6368_v43 = vand.u32 4294901760, %v6367_v61  ;;  %v6373_v11 = vsub.f32 %v13913_v29, %v16031_v12 }
 0x4f3   :  { %v14310_v36 = vpack.c.bf16 %v6362_v55, %v6350_v8  ;;  %v16034_v18 = vand.u32 4294901760, %v13924_v40  ;;  %v6380_v50 = vand.u32 4294901760, %v6379_v49  ;;  %v6385_v21 = vsub.f32 %v13915_v7, %v16032_v33 }
 0x4f4   :  { %18018 = vst [vmem:[#allocation64_spill] sm:$0xff] %v14303_v25  ;;  %v6391_v9 = vsub.f32 %v13917_v60, %v16033_v24  ;;  %v16037_v48 = vand.u32 4294901760, %v13926_v6  ;;  %v6374_v55 = vand.u32 4294901760, %v6373_v11  ;;  %v16035_v61 = vand.u32 4294901760, %v13933_v51 }
 0x4f5   :  { %18019 = vst [vmem:[#allocation244_spill] sm:$0xff] %v14310_v36  ;;  %v6403_v8 = vsub.f32 %v13924_v40, %v16034_v18  ;;  %v14327_v12 = vpack.c.bf16 %v6380_v50, %v6368_v43  ;;  %v6386_v49 = vand.u32 4294901760, %v6385_v21  ;;  %v16036_v11 = vand.u32 4294901760, %v14049_v41 }
 0x4f6   :  { %v6392_v36 = vand.u32 4294901760, %v6391_v9  ;;  %v6397_v33 = vsub.f32 %v13926_v6, %v16037_v48  ;;  %v6409_v24 = vsub.f32 %v13933_v51, %v16035_v61  ;;  %v16038_v63 = vand.u32 4294901760, %v14051_v39 }
 0x4f7   :  { %v6404_v25 = vand.u32 4294901760, %v6403_v8  ;;  %v14337_v18 = vpack.c.bf16 %v6386_v49, %v6374_v55  ;;  %v16039_v50 = vand.u32 4294901760, %v14053_v31  ;;  %v16040_v43 = vand.u32 4294901760, %v14057_v53 }
 0x4f8   :  { %v6398_v47 = vand.u32 4294901760, %v6397_v33  ;;  %v6410_v9 = vand.u32 4294901760, %v6409_v24  ;;  %v6415_v8 = vsub.f32 %v14049_v41, %v16036_v11  ;;  %v6427_v61 = vsub.f32 %v14051_v39, %v16038_v63 }
 0x4f9   :  { %18020 = vst [vmem:[#allocation249_spill] sm:$0xff] %v14337_v18  ;;  %v14341_v21 = vpack.c.bf16 %v6404_v25, %v6392_v36  ;;  %v6421_v55 = vsub.f32 %v14053_v31, %v16039_v50  ;;  %v6433_v33 = vsub.f32 %v14057_v53, %v16040_v43  ;;  %v16041_v25 = vand.u32 4294901760, %v14061_v44 }
 0x4fa   :  { %v16042_v24 = vand.u32 4294901760, %v14064_v16  ;;  %v14357_v36 = vpack.c.bf16 %v6410_v9, %v6398_v47  ;;  %v6416_v49 = vand.u32 4294901760, %v6415_v8  ;;  %v6428_v11 = vand.u32 4294901760, %v6427_v61 }
 0x4fb   :  { %18021 = vst [vmem:[#allocation251_spill] sm:$0xff] %v14341_v21  ;;  %v16045_v48 = vand.u32 4294901760, %v14070_v14  ;;  %v6422_v21 = vand.u32 4294901760, %v6421_v55  ;;  %v6434_v63 = vand.u32 4294901760, %v6433_v33  ;;  %v6439_v50 = vsub.f32 %v14061_v44, %v16041_v25 }
 0x4fc   :  { %18022 = vst [vmem:[#allocation252_spill] sm:$0xff] %v14357_v36  ;;  %v6451_v43 = vsub.f32 %v14064_v16, %v16042_v24  ;;  %v14366_v18 = vpack.c.bf16 %v6428_v11, %v6416_v49  ;;  %v16043_v61 = vand.u32 4294901760, %v14072_v13  ;;  %v16044_v33 = vand.u32 4294901760, %v14074_v26 }
 0x4fd   :  { %v6445_v47 = vsub.f32 %v14070_v14, %v16045_v48  ;;  %v14372_v9 = vpack.c.bf16 %v6434_v63, %v6422_v21  ;;  %v6440_v8 = vand.u32 4294901760, %v6439_v50  ;;  %v16046_v11 = vand.u32 4294901760, %v14078_v52 }
 0x4fe   :  { %18023 = vst [vmem:[#allocation66_spill] sm:$0xff] %v14366_v18  ;;  %v6452_v55 = vand.u32 4294901760, %v6451_v43  ;;  %v6457_v25 = vsub.f32 %v14072_v13, %v16043_v61  ;;  %v16047_v49 = vand.u32 4294901760, %v14082_v20  ;;  %v6463_v63 = vsub.f32 %v14074_v26, %v16044_v33 }
 0x4ff   :  { %18024 = vst [vmem:[#allocation125_spill] sm:$0xff] %v14372_v9  ;;  %v6446_v36 = vand.u32 4294901760, %v6445_v47  ;;  %v16048_v50 = vand.u32 4294901760, %v14084_v59  ;;  %v6475_v21 = vsub.f32 %v14078_v52, %v16046_v11  ;;  %v16050_v33 = vand.u32 4294901760, %v14095_v30 }
 0x500   :  { %v14380_v24 = vpack.c.bf16 %v6452_v55, %v6440_v8  ;;  %v6458_v43 = vand.u32 4294901760, %v6457_v25  ;;  %v6469_v47 = vsub.f32 %v14082_v20, %v16047_v49  ;;  %v6464_v61 = vand.u32 4294901760, %v6463_v63 }
 0x501   :  { %v6481_v8 = vsub.f32 %v14084_v59, %v16048_v50  ;;  %v16049_v55 = vand.u32 4294901760, %v14086_v45  ;;  %v6476_v25 = vand.u32 4294901760, %v6475_v21  ;;  %v16052_v9 = vand.u32 4294901760, %v14097_v35 }
 0x502   :  { %18025 = vst [vmem:[#allocation126_spill] sm:$0xff] %v14380_v24  ;;  %v14397_v48 = vpack.c.bf16 %v6458_v43, %v6446_v36  ;;  %v6470_v24 = vand.u32 4294901760, %v6469_v47  ;;  %v6499_v63 = vsub.f32 %v14095_v30, %v16050_v33  ;;  %v16051_v50 = vand.u32 4294901760, %v14102_v19 }
 0x503   :  { %v6482_v11 = vand.u32 4294901760, %v6481_v8  ;;  %v6487_v49 = vsub.f32 %v14086_v45, %v16049_v55  ;;  %v14407_v18 = vpack.c.bf16 %v6476_v25, %v6464_v61  ;;  %v6493_v36 = vsub.f32 %v14097_v35, %v16052_v9  ;;  %v18034_v61 = vld [vmem:[#allocation145_spill] sm:$0xff]  ;;  %v18046_v9 = vld [vmem:[#allocation223_spill] sm:$0xff] }
 0x504   :  { %18026 = vst [vmem:[#allocation255_spill] sm:$0xff] %v14397_v48  ;;  %v6500_v47 = vand.u32 4294901760, %v6499_v63  ;;  %v6505_v8 = vsub.f32 %v14102_v19, %v16051_v50  ;;  %v18035_v63 = vld [vmem:[#allocation157_spill] sm:$0xff]  ;;  %v730_v50 = vstv %s729_s2 }
 0x505   :  { %18027 = vst [vmem:[#allocation128_spill] sm:$0xff] %v14407_v18  ;;  %v14412_v43 = vpack.c.bf16 %v6482_v11, %v6470_v24  ;;  %v6488_v21 = vand.u32 4294901760, %v6487_v49  ;;  %v6494_v55 = vand.u32 4294901760, %v6493_v36  ;;  %v18032_v24 = vld [vmem:[#allocation133_spill] sm:$0xff]  ;;  %v18033_v49 = vld [vmem:[#allocation142_spill] sm:$0xff]  ;;  %v9219_v3 = vadd.f32 %v18046_v9, %v730_v50 }
 0x506   :  { %v6506_v33 = vand.u32 4294901760, %v6505_v8  ;;  %v18037_v36 = vld [vmem:[#allocation178_spill] sm:$0xff]  ;;  %v18042_v8 = vld [vmem:[#allocation17_spill] sm:$0xff]  ;;  %v9221_v4 = vadd.f32 %v18047_v37, %v730_v50 }
 0x507   :  { %v14417_v48 = vpack.c.bf16 %v6500_v47, %v6488_v21  ;;  %v18039_v21 = vld [vmem:[#allocation193_spill] sm:$0xff]  ;;  %v18043_v47 = vld [vmem:[#allocation20_spill] sm:$0xff] }
 0x508   :  { %v14423_v18 = vpack.c.bf16 %v6506_v33, %v6494_v55  ;;  %v18040_v33 = vld [vmem:[#allocation286_spill] sm:$0xff]  ;;  %v18044_v11 = vld [vmem:[#allocation21_spill] sm:$0xff]  ;;  %v18052_v55 = vld [vmem:[#allocation100_spill] sm:$0xff] }
 0x5a1   :  { %v5906_v32 = vpop.f32.mrb[0].mxu0 }
 0x5a2   :  { %v9220_v17 = vadd.f32 %v9219_v3, %v5906_v32  ;;  %v5908_v34 = vpop.f32.mrb[1].mxu0  ;;  %v18051_v3 = vld [vmem:[#allocation243_spill] sm:$0xff] }
 0x5a3   :  { %v9222_v29 = vadd.f32 %v9221_v4, %v5908_v34 }
 0x5a4   :  { %v5911_v60 = vmax.f32 %v9220_v17, 0.0 }
 0x5a5   :  { %v5912_v6 = vmax.f32 %v9222_v29, 0.0 }
 0x5a6   :  { %v14479_v25 = vand.u32 4294901760, %v5911_v60 }
 0x5a7   :  { %v14481_v9 = vand.u32 4294901760, %v5912_v6 }
 0x5a8   :  { %18048 = vst [vmem:[#allocation138_spill] sm:$0xff] %v14479_v25  ;;  %v14486_v37 = vsub.f32 %v5911_v60, %v14479_v25  ;;  %v18055_v60 = vld [vmem:[#allocation108_spill] sm:$0xff] }
 0x5a9   :  { %v14491_v4 = vsub.f32 %v5912_v6, %v14481_v9 }
 0x5aa   :  { %18049 = vst [vmem:[#allocation139_spill] sm:$0xff] %v14486_v37  ;;  %v16074_v17 = vand.u32 4294901760, %v14486_v37 }
 0x5ab   :  { %v16077_v29 = vand.u32 4294901760, %v14491_v4 }
 0x5ac   :  { %v6116_v32 = vsub.f32 %v14486_v37, %v16074_v17  ;;  %v18053_v17 = vld [vmem:[#allocation106_spill] sm:$0xff]  ;;  %v18056_v37 = vld [vmem:[#allocation113_spill] sm:$0xff] }
 0x5ad   :  { %v6110_v50 = vsub.f32 %v14491_v4, %v16077_v29  ;;  %v18097_v29 = vld [vmem:[#allocation70_spill] sm:$0xff] }
 0x5ae   :  { %v6117_v34 = vand.u32 4294901760, %v6116_v32  ;;  %v18058_v32 = vld [vmem:[#allocation115_spill] sm:$0xff] }
 0x5af   :  { %v6111_v6 = vand.u32 4294901760, %v6110_v50  ;;  %v18057_v50 = vld [vmem:[#allocation114_spill] sm:$0xff] }
 0x5b1   :  { %6112 = vmatprep.mubr.f32.mxu1 %v6111_v6  ;;  %v18061_v6 = vld [vmem:[#allocation52_spill] sm:$0xff] }
 0x5b2   :  { %6118 = vmatmul.mubr.f32.vlgmr.msra.gmra.mrb[2].mxu1 %v6117_v34  ;;  %v18059_v34 = vld [vmem:[#allocation116_spill] sm:$0xff] }
 0x5b3   :  { %8902 = vmatpush1.bf16.msra.mxu1 %v18050_v10  ;;  %6509 = vmatprep.mubr.f32.mxu1 %v14481_v9  ;;  %v18060_v10 = vld [vmem:[#allocation237_spill] sm:$0xff] }
 0x5b4   :  { %8904 = vmatprep.subr.bf16.mxu1 %v18051_v3  ;;  %v18062_v3 = vld [vmem:[#allocation246_spill] sm:$0xff] }
 0x5b7   :  { %8906 = vmatpush1.bf16.msra.mxu1 %v18052_v55  ;;  %v18063_v55 = vld [vmem:[#allocation248_spill] sm:$0xff] }
 0x5b8   :  { %8908 = vmatprep.subr.bf16.mxu1 %v18053_v17  ;;  %v18064_v17 = vld [vmem:[#allocation78_spill] sm:$0xff] }
 0x5bb   :  { %8910 = vmatpush1.bf16.msra.mxu1 %v18054_v58  ;;  %v18065_v58 = vld [vmem:[#allocation79_spill] sm:$0xff] }
 0x5bc   :  { %8912 = vmatprep.subr.bf16.mxu1 %v18055_v60  ;;  %v18066_v60 = vld [vmem:[#allocation54_spill] sm:$0xff] }
 0x5bf   :  { %8914 = vmatpush1.bf16.msra.mxu1 %v18056_v37  ;;  %v18067_v37 = vld [vmem:[#allocation64_spill] sm:$0xff] }
 0x5c0   :  { %8916 = vmatprep.subr.bf16.mxu1 %v18057_v50  ;;  %v18068_v50 = vld [vmem:[#allocation244_spill] sm:$0xff] }
 0x5c3   :  { %8918 = vmatpush1.bf16.msra.mxu1 %v18058_v32  ;;  %v18069_v32 = vld [vmem:[#allocation249_spill] sm:$0xff] }
 0x5c4   :  { %8920 = vmatprep.subr.bf16.mxu1 %v18059_v34  ;;  %v18070_v34 = vld [vmem:[#allocation251_spill] sm:$0xff] }
 0x5c7   :  { %8922 = vmatpush1.bf16.msra.mxu1 %v18060_v10  ;;  %v18071_v10 = vld [vmem:[#allocation252_spill] sm:$0xff] }
 0x5c8   :  { %8924 = vmatprep.subr.bf16.mxu1 %v18061_v6  ;;  %v18072_v6 = vld [vmem:[#allocation66_spill] sm:$0xff] }
 0x5cb   :  { %8926 = vmatpush1.bf16.msra.mxu1 %v18062_v3  ;;  %v18073_v3 = vld [vmem:[#allocation125_spill] sm:$0xff] }
 0x5cc   :  { %8928 = vmatprep.subr.bf16.mxu1 %v18063_v55  ;;  %v18074_v55 = vld [vmem:[#allocation126_spill] sm:$0xff] }
 0x5cf   :  { %8930 = vmatpush1.bf16.msra.mxu1 %v18064_v17  ;;  %v18075_v17 = vld [vmem:[#allocation255_spill] sm:$0xff] }
 0x5d0   :  { %8932 = vmatprep.subr.bf16.mxu1 %v18065_v58  ;;  %v18076_v58 = vld [vmem:[#allocation128_spill] sm:$0xff] }
 0x5d3   :  { %8934 = vmatpush1.bf16.msra.mxu1 %v18066_v60  ;;  %v18078_v60 = vpack.c.bf16 %v17966_v42, %v17963_v2 }
 0x5d4   :  { %8936 = vmatprep.subr.bf16.mxu1 %v18067_v37  ;;  %v18079_v37 = vpack.c.bf16 %v17970_v28, %v17969_v38 }
 0x5d7   :  { %8938 = vmatpush1.bf16.msra.mxu1 %v18068_v50  ;;  %v18083_v50 = vld [vmem:[#allocation53_spill] sm:$0xff] }
 0x5d8   :  { %8940 = vmatprep.subr.bf16.mxu1 %v14327_v12  ;;  %v18077_v12 = vpack.c.bf16 %v17962_v1, %v17961_v27 }
 0x5db   :  { %8942 = vmatpush1.bf16.msra.mxu1 %v18069_v32 }
 0x5dc   :  { %8944 = vmatprep.subr.bf16.mxu1 %v18070_v34  ;;  %v18085_v34 = vld [vmem:[#allocation258_spill] sm:$0xff] }
 0x5df   :  { %8946 = vmatpush1.bf16.msra.mxu1 %v18071_v10  ;;  %v18086_v10 = vld [vmem:[#allocation65_spill] sm:$0xff] }
 0x5e0   :  { %8948 = vmatprep.subr.bf16.mxu1 %v18072_v6  ;;  %v18087_v6 = vpack.c.bf16 %v18085_v34, %v18086_v10 }
 0x5e3   :  { %8950 = vmatpush1.bf16.msra.mxu1 %v18073_v3  ;;  %v18088_v3 = vld [vmem:[#allocation257_spill] sm:$0xff] }
 0x5e4   :  { %8952 = vmatprep.subr.bf16.mxu1 %v18074_v55  ;;  %v18089_v55 = vpack.c.bf16 %v13731_v15, %v18088_v3 }
 0x5e7   :  { %8954 = vmatpush1.bf16.msra.mxu1 %v18075_v17  ;;  %v18090_v17 = vld [vmem:[#allocation72_spill] sm:$0xff] }
 0x5e8   :  { %8956 = vmatprep.subr.bf16.mxu1 %v18076_v58  ;;  %v18091_v58 = vld [vmem:[#allocation67_spill] sm:$0xff] }
 0x5eb   :  { %8958 = vmatpush1.bf16.msra.mxu1 %v14412_v43  ;;  %v18082_v43 = vld [vmem:[#allocation56_spill] sm:$0xff] }
 0x5ec   :  { %8960 = vmatprep.subr.bf16.mxu1 %v14417_v48  ;;  %v18080_v48 = vpack.c.bf16 %v17971_v57, %v13688_v46  ;;  %v18084_v32 = vpack.c.bf16 %v18082_v43, %v18083_v50 }
 0x5ef   :  { %8962 = vmatpush1.bf16.msra.mxu1 %v14423_v18  ;;  %v18081_v18 = vpack.c.bf16 %v17974_v22, %v17972_v62 }
 0x5f0   :  { %8964 = vmatprep.subr.bf16.mxu1 %v18077_v12  ;;  %v18092_v12 = vpack.c.bf16 %v18090_v17, %v18091_v58 }
 0x5f2   :  { %6511 = vmatmul.mubr.f32.vlgmr.msra.gmra.mrb[2].mxu1 %v14479_v25 }
 0x5f3   :  { %8966 = vmatpush1.bf16.msra.mxu1 %v18078_v60  ;;  %6711 = vmatprep.mubr.f32.mxu1 %v14491_v4  ;;  %v18093_v60 = vld [vmem:[#allocation260_spill] sm:$0xff] }
 0x5f4   :  { %8968 = vmatprep.subr.bf16.mxu1 %v18079_v37  ;;  %v18094_v37 = vld [vmem:[#allocation261_spill] sm:$0xff] }
 0x5f7   :  { %8970 = vmatpush1.bf16.msra.mxu1 %v18080_v48  ;;  %v18095_v48 = vpack.c.bf16 %v18093_v60, %v18094_v37 }
 0x5f8   :  { %8972 = vmatprep.subr.bf16.mxu1 %v18081_v18  ;;  %v18096_v18 = vld [vmem:[#allocation130_spill] sm:$0xff] }
 0x5f9   :  { %v18098_v25 = vpack.c.bf16 %v18096_v18, %v18097_v29 }
 0x5fb   :  { %8974 = vmatpush1.bf16.msra.mxu1 %v18084_v32  ;;  %v18099_v32 = vpack.c.bf16 %v18033_v49, %v18032_v24 }
 0x5fc   :  { %8976 = vmatprep.subr.bf16.mxu1 %v18087_v6  ;;  %v18100_v6 = vpack.c.bf16 %v18035_v63, %v18034_v61  ;;  %v18107_v63 = vld [vmem:[#allocation25_spill] sm:$0xff] }
 0x5ff   :  { %8978 = vmatpush1.bf16.msra.mxu1 %v18089_v55  ;;  %v18101_v55 = vpack.c.bf16 %v18037_v36, %v18036_v0 }
 0x600   :  { %8980 = vmatprep.subr.bf16.mxu1 %v18092_v12  ;;  %v18102_v12 = vpack.c.bf16 %v18039_v21, %v18038_v54  ;;  %v18112_v54 = vld [vmem:[#allocation36_spill] sm:$0xff] }
 0x603   :  { %8982 = vmatpush1.bf16.msra.mxu1 %v18095_v48  ;;  %v18103_v48 = vpack.c.bf16 %v18040_v33, %v18001_v23 }
 0x604   :  { %8984 = vmatprep.subr.bf16.mxu1 %v18098_v25  ;;  %v18104_v25 = vpack.c.bf16 %v18042_v8, %v18041_v5 }
 0x607   :  { %8986 = vmatpush1.bf16.msra.mxu1 %v18099_v32  ;;  %v18105_v32 = vpack.c.bf16 %v18044_v11, %v18043_v47 }
 0x608   :  { %8988 = vmatprep.subr.bf16.mxu1 %v18100_v6  ;;  %v18106_v6 = vld [vmem:[#allocation28_spill] sm:$0xff] }
 0x609   :  { %v18108_v36 = vpack.c.bf16 %v18106_v6, %v18107_v63 }
 0x60b   :  { %8990 = vmatpush1.bf16.msra.mxu1 %v18101_v55  ;;  %v18109_v55 = vld [vmem:[#allocation32_spill] sm:$0xff] }
 0x60c   :  { %8992 = vmatprep.subr.bf16.mxu1 %v18102_v12  ;;  %v18110_v21 = vpack.c.bf16 %v18014_v56, %v18109_v55  ;;  %v18111_v12 = vld [vmem:[#allocation38_spill] sm:$0xff] }
 0x60d   :  { %v18113_v33 = vpack.c.bf16 %v18111_v12, %v18112_v54 }
 0x60f   :  { %8994 = vmatpush1.bf16.msra.mxu1 %v18103_v48  ;;  %v18114_v48 = vld [vmem:[#allocation47_spill] sm:$0xff] }
 0x610   :  { %8996 = vmatprep.subr.bf16.mxu1 %v18104_v25  ;;  %v18115_v8 = vpack.c.bf16 %v13915_v7, %v18114_v48  ;;  %v18116_v25 = vld [vmem:[#allocation50_spill] sm:$0xff] }
 0x611   :  { %v18117_v11 = vpack.c.bf16 %v13924_v40, %v18116_v25 }
 0x613   :  { %8998 = vmatpush1.bf16.msra.mxu1 %v18105_v32  ;;  %v18118_v32 = vld [vmem:[#allocation62_spill] sm:$0xff] }
 0x614   :  { %9000 = vmatprep.subr.bf16.mxu1 %v18108_v36  ;;  %v18119_v6 = vpack.c.bf16 %v13933_v51, %v18118_v32  ;;  %v18120_v36 = vpack.c.bf16 %v14051_v39, %v14049_v41 }
 0x617   :  { %9002 = vmatpush1.bf16.msra.mxu1 %v18110_v21  ;;  %v18121_v21 = vpack.c.bf16 %v14057_v53, %v14053_v31 }
 0x618   :  { %9004 = vmatprep.subr.bf16.mxu1 %v18113_v33  ;;  %v18122_v33 = vpack.c.bf16 %v14064_v16, %v14061_v44 }
 0x61b   :  { %9006 = vmatpush1.bf16.msra.mxu1 %v18115_v8  ;;  %v18123_v8 = vpack.c.bf16 %v14072_v13, %v14070_v14  ;;  %v18129_v13 = vld [vmem:[#allocation139_spill] sm:$0xff] }
 0x61c   :  { %9008 = vmatprep.subr.bf16.mxu1 %v18117_v11  ;;  %v18124_v11 = vpack.c.bf16 %v14078_v52, %v14074_v26  ;;  %v18132_v52 = vld [vmem:[#allocation222_spill] sm:$0xff] }
 0x61f   :  { %9010 = vmatpush1.bf16.msra.mxu1 %v18119_v6  ;;  %v18125_v6 = vpack.c.bf16 %v14084_v59, %v14082_v20  ;;  %v18134_v59 = vld [vmem:[#allocation35_spill] sm:$0xff] }
 0x620   :  { %9012 = vmatprep.subr.bf16.mxu1 %v18120_v36  ;;  %v18126_v36 = vpack.c.bf16 %v14095_v30, %v14086_v45  ;;  %v18136_v30 = vld [vmem:[#allocation254_spill] sm:$0xff] }
 0x623   :  { %9014 = vmatpush1.bf16.msra.mxu1 %v18121_v21  ;;  %v18127_v21 = vpack.c.bf16 %v14102_v19, %v14097_v35  ;;  %v18139_v19 = vld [vmem:[#allocation154_spill] sm:$0xff] }
 0x624   :  { %9016 = vmatprep.subr.bf16.mxu1 %v18122_v33  ;;  %v18128_v33 = vld [vmem:[#allocation231_spill] sm:$0xff] }
 0x627   :  { %9018 = vmatpush1.bf16.msra.mxu1 %v18123_v8  ;;  %v18130_v8 = vld [vmem:[#allocation218_spill] sm:$0xff] }
 0x628   :  { %9020 = vmatprep.subr.bf16.mxu1 %v18124_v11  ;;  %v18131_v11 = vand.u32 4294901760, %v14491_v4  ;;  %v18141_v4 = vld [vmem:[#allocation181_spill] sm:$0xff] }
 0x62b   :  { %9022 = vmatpush1.bf16.msra.mxu1 %v18125_v6  ;;  %v18133_v6 = vld [vmem:[#allocation228_spill] sm:$0xff] }
 0x62c   :  { %9024 = vmatprep.subr.bf16.mxu1 %v18126_v36  ;;  %v18135_v36 = vld [vmem:[#allocation44_spill] sm:$0xff] }
 0x62f   :  { %9026 = vmatpush1.bf16.msra.mxu1 %v18127_v21  ;;  %v18137_v21 = vld [vmem:[#allocation265_spill] sm:$0xff] }
 0x630   :  { %9028 = vmatprep.subr.bf16.mxu1 %v18128_v33  ;;  %v18138_v33 = vld [vmem:[#allocation264_spill] sm:$0xff] }
 0x632   :  { %6714 = vmatmul.mubr.f32.vlgmr.msra.gmra.mrb[2].mxu1 %v18129_v13 }
 0x633   :  { %9030 = vmatpush1.bf16.msra.mxu1 %v18130_v8  ;;  %6851 = vmatprep.mubr.f32.mxu1 %v18131_v11  ;;  %v18140_v8 = vld [vmem:[#allocation169_spill] sm:$0xff] }
 0x634   :  { %9032 = vmatprep.subr.bf16.mxu1 %v18132_v52  ;;  %v18142_v11 = vld [vmem:[#allocation205_spill] sm:$0xff]  ;;  %v18143_v52 = vld [vmem:[#allocation24_spill] sm:$0xff] }
 0x637   :  { %9034 = vmatpush1.bf16.msra.mxu1 %v18133_v6  ;;  %v18144_v6 = vld [vmem:[#allocation29_spill] sm:$0xff] }
 0x638   :  { %9036 = vmatprep.subr.bf16.mxu1 %v18134_v59  ;;  %v18145_v59 = vld [vmem:[#allocation59_spill] sm:$0xff] }
 0x63b   :  { %9038 = vmatpush1.bf16.msra.mxu1 %v18135_v36  ;;  %v18146_v36 = vld [vmem:[#allocation69_spill] sm:$0xff] }
 0x63c   :  { %9040 = vmatprep.subr.bf16.mxu1 %v18136_v30  ;;  %v18147_v30 = vld [vmem:[#allocation71_spill] sm:$0xff] }
 0x63f   :  { %9042 = vmatpush1.bf16.msra.mxu1 %v18137_v21  ;;  %v18148_v21 = vld [vmem:[#allocation124_spill] sm:$0xff] }
 0x640   :  { %9044 = vmatprep.subr.bf16.mxu1 %v18138_v33  ;;  %v18149_v33 = vld [vmem:[#allocation127_spill] sm:$0xff] }
 0x643   :  { %9046 = vmatpush1.bf16.msra.mxu1 %v18139_v19  ;;  %v18150_v19 = vld [vmem:[#allocation136_spill] sm:$0xff] }
 0x644   :  { %9048 = vmatprep.subr.bf16.mxu1 %v18140_v8  ;;  %v18151_v8 = vld [vmem:[#allocation140_spill] sm:$0xff] }
 0x647   :  { %9050 = vmatpush1.bf16.msra.mxu1 %v18141_v4  ;;  %v18152_v4 = vld [vmem:[#allocation149_spill] sm:$0xff] }
 0x648   :  { %9052 = vmatprep.subr.bf16.mxu1 %v18142_v11  ;;  %v18153_v11 = vld [vmem:[#allocation151_spill] sm:$0xff] }
 0x64b   :  { %9054 = vmatpush1.bf16.msra.mxu1 %v18143_v52  ;;  %v18154_v52 = vld [vmem:[#allocation161_spill] sm:$0xff] }
 0x64c   :  { %9056 = vmatprep.subr.bf16.mxu1 %v18144_v6  ;;  %v18155_v6 = vld [vmem:[#allocation163_spill] sm:$0xff] }
 0x64f   :  { %9058 = vmatpush1.bf16.msra.mxu1 %v18145_v59  ;;  %v18156_v59 = vld [vmem:[#allocation173_spill] sm:$0xff] }
 0x650   :  { %9060 = vmatprep.subr.bf16.mxu1 %v18146_v36  ;;  %v18157_v36 = vld [vmem:[#allocation175_spill] sm:$0xff] }
 0x653   :  { %9062 = vmatpush1.bf16.msra.mxu1 %v18147_v30  ;;  %v18158_v30 = vld [vmem:[#allocation187_spill] sm:$0xff] }
 0x654   :  { %9064 = vmatprep.subr.bf16.mxu1 %v18148_v21  ;;  %v18159_v21 = vld [vmem:[#allocation91_spill] sm:$0xff] }
 0x657   :  { %9066 = vmatpush1.bf16.msra.mxu1 %v18149_v33  ;;  %v18160_v33 = vld [vmem:[#allocation199_spill] sm:$0xff] }
 0x658   :  { %9068 = vmatprep.subr.bf16.mxu1 %v18150_v19 }
 0x65b   :  { %9070 = vmatpush1.bf16.msra.mxu1 %v18151_v8  ;;  %v18161_v8 = vand.u32 4294901760, %v17961_v27  ;;  %v18169_v27 = vand.u32 4294901760, %v13688_v46  ;;  %v18176_v46 = vand.u32 4294901760, %v18085_v34  ;;  %v18183_v34 = vand.u32 4294901760, %v18097_v29 }
 0x65c   :  { %9072 = vmatprep.subr.bf16.mxu1 %v18152_v4  ;;  %v18162_v4 = vand.u32 4294901760, %v17962_v1  ;;  %v18170_v1 = vand.u32 4294901760, %v17971_v57  ;;  %v18177_v57 = vand.u32 4294901760, %v18088_v3  ;;  %v18184_v3 = vand.u32 4294901760, %v18096_v18  ;;  %v18193_v18 = vld [vmem:[#allocation190_spill] sm:$0xff] }
 0x65e   :  { %v9091_v19 = vpack.c.bf16 %v18162_v4, %v18161_v8  ;;  %v18188_v4 = vld [vmem:[#allocation157_spill] sm:$0xff] }
 0x65f   :  { %9074 = vmatpush1.bf16.msra.mxu1 %v18153_v11  ;;  %v18163_v11 = vld [vmem:[#allocation98_spill] sm:$0xff] }
 0x660   :  { %9076 = vmatprep.subr.bf16.mxu1 %v18154_v52  ;;  %v18164_v52 = vand.u32 4294901760, %v17963_v2  ;;  %v9097_v2 = vpack.c.bf16 %v18170_v1, %v18169_v27  ;;  %v18191_v1 = vld [vmem:[#allocation178_spill] sm:$0xff] }
 0x661   :  { %v18192_v29 = vand.u32 4294901760, %v18191_v1  ;;  %v18229_v1 = vld [vmem:[#allocation197_spill] sm:$0xff] }
 0x663   :  { %9078 = vmatpush1.bf16.msra.mxu1 %v18155_v6  ;;  %v18165_v6 = vand.u32 4294901760, %v17966_v42  ;;  %v18172_v42 = vand.u32 4294901760, %v17974_v22  ;;  %v18179_v22 = vand.u32 4294901760, %v18091_v58  ;;  %v18186_v58 = vand.u32 4294901760, %v18033_v49 }
 0x664   :  { %9080 = vmatprep.subr.bf16.mxu1 %v18156_v59  ;;  %v18197_v49 = vand.u32 4294901760, %v18001_v23 }
 0x665   :  { %v9093_v59 = vpack.c.bf16 %v18165_v6, %v18164_v52  ;;  %v18171_v52 = vand.u32 4294901760, %v17972_v62  ;;  %v18178_v62 = vand.u32 4294901760, %v13731_v15  ;;  %v18185_v15 = vand.u32 4294901760, %v18032_v24 }
 0x667   :  { %9082 = vmatpush1.bf16.msra.mxu1 %v18157_v36  ;;  %v18166_v36 = vand.u32 4294901760, %v17969_v38 }
 0x668   :  { %9084 = vmatprep.subr.bf16.mxu1 %v18158_v30  ;;  %v18167_v30 = vand.u32 4294901760, %v17970_v28 }
 0x66b   :  { %9086 = vmatpush1.bf16.msra.mxu1 %v18159_v21  ;;  %v9095_v21 = vpack.c.bf16 %v18167_v30, %v18166_v36  ;;  %v18173_v30 = vand.u32 4294901760, %v18083_v50  ;;  %v18180_v50 = vand.u32 4294901760, %v18090_v17  ;;  %v9111_v36 = vpack.c.bf16 %v18184_v3, %v18183_v34 }
 0x66c   :  { %9088 = vmatprep.subr.bf16.mxu1 %v18160_v33  ;;  %v18168_v33 = vand.u32 4294901760, %v18129_v13  ;;  %v18174_v13 = vand.u32 4294901760, %v18082_v43  ;;  %v18181_v43 = vand.u32 4294901760, %v18094_v37  ;;  %v18187_v17 = vand.u32 4294901760, %v18034_v61 }
 0x66d   :  { %v9107_v8 = vpack.c.bf16 %v18180_v50, %v18179_v22  ;;  %v18189_v37 = vand.u32 4294901760, %v18188_v4  ;;  %v18206_v22 = vand.u32 4294901760, %v18107_v63  ;;  %v18207_v50 = vld [vmem:[#allocation28_spill] sm:$0xff]  ;;  %v18213_v3 = vand.u32 4294901760, %v18114_v48 }
 0x66e   :  { %v9101_v38 = vpack.c.bf16 %v18174_v13, %v18173_v30  ;;  %v18198_v30 = vld [vmem:[#allocation286_spill] sm:$0xff]  ;;  %v18208_v23 = vand.u32 4294901760, %v18207_v50  ;;  %v18214_v63 = vand.u32 4294901760, %v13915_v7  ;;  %v18220_v48 = vand.u32 4294901760, %v14051_v39  ;;  %v18256_v50 = vld [vmem:[#allocation59_spill] sm:$0xff] }
 0x66f   :  { %9090 = vmatpush1.bf16.msra.mxu1 %v18163_v11  ;;  %v9115_v27 = vpack.c.bf16 %v18189_v37, %v18187_v17  ;;  %v18199_v61 = vand.u32 4294901760, %v18198_v30  ;;  %v18221_v7 = vand.u32 4294901760, %v14053_v31  ;;  %v18228_v39 = vand.u32 4294901760, %v14074_v26  ;;  %v18240_v30 = vld [vmem:[#allocation231_spill] sm:$0xff] }
 0x670   :  { %9092 = vmatprep.subr.bf16.mxu1 %v9091_v19  ;;  %v9099_v19 = vpack.c.bf16 %v18172_v42, %v18171_v52  ;;  %v18194_v52 = vand.u32 4294901760, %v18193_v18  ;;  %v18195_v42 = vld [vmem:[#allocation193_spill] sm:$0xff]  ;;  %v18230_v31 = vand.u32 4294901760, %v18229_v1 }
 0x671   :  { %v18196_v24 = vand.u32 4294901760, %v18195_v42  ;;  %v9121_v13 = vpack.c.bf16 %v18199_v61, %v18197_v49  ;;  %v18242_v61 = vld [vmem:[#allocation218_spill] sm:$0xff] }
 0x672   :  { %6855 = vmatmul.mubr.f32.vlgmr.msra.gmra.mrb[2].mxu1 %v18168_v33  ;;  %v9105_v33 = vpack.c.bf16 %v18178_v62, %v18177_v57  ;;  %v18204_v57 = vld [vmem:[#allocation21_spill] sm:$0xff] }
 0x673   :  { %9094 = vmatpush1.bf16.msra.mxu1 %v9093_v59  ;;  %7118 = vmatprep.mubr.f32.mxu1 %v14481_v9  ;;  %v18175_v59 = vand.u32 4294901760, %v18086_v10  ;;  %v18182_v10 = vand.u32 4294901760, %v18093_v60  ;;  %v18190_v60 = vand.u32 4294901760, %v18036_v0  ;;  %v18205_v62 = vand.u32 4294901760, %v18204_v57  ;;  %v18251_v57 = vld [vmem:[#allocation169_spill] sm:$0xff] }
 0x674   :  { %9096 = vmatprep.subr.bf16.mxu1 %v9095_v21  ;;  %v9113_v21 = vpack.c.bf16 %v18186_v58, %v18185_v15  ;;  %v18215_v15 = vand.u32 4294901760, %v18116_v25  ;;  %v18222_v25 = vand.u32 4294901760, %v14057_v53  ;;  %v18231_v53 = vand.u32 4294901760, %v14082_v20  ;;  %v18241_v20 = vld [vmem:[#allocation138_spill] sm:$0xff] }
 0x675   :  { %v9103_v28 = vpack.c.bf16 %v18176_v46, %v18175_v59  ;;  %v9109_v6 = vpack.c.bf16 %v18182_v10, %v18181_v43  ;;  %v18201_v59 = vld [vmem:[#allocation17_spill] sm:$0xff]  ;;  %v18209_v43 = vand.u32 4294901760, %v18109_v55  ;;  %v18216_v55 = vand.u32 4294901760, %v13924_v40 }
 0x676   :  { %v18202_v0 = vand.u32 4294901760, %v18201_v59  ;;  %v9141_v4 = vpack.c.bf16 %v18222_v25, %v18221_v7  ;;  %v18223_v40 = vand.u32 4294901760, %v14061_v44  ;;  %v18247_v59 = vld [vmem:[#allocation254_spill] sm:$0xff] }
 0x677   :  { %9098 = vmatpush1.bf16.msra.mxu1 %v9097_v2  ;;  %v9117_v2 = vpack.c.bf16 %v18192_v29, %v18190_v60  ;;  %v9135_v58 = vpack.c.bf16 %v18216_v55, %v18215_v15  ;;  %v9147_v29 = vpack.c.bf16 %v18230_v31, %v18228_v39  ;;  %v18268_v15 = vld [vmem:[#allocation175_spill] sm:$0xff] }
 0x678   :  { %9100 = vmatprep.subr.bf16.mxu1 %v9099_v19  ;;  %v9119_v19 = vpack.c.bf16 %v18196_v24, %v18194_v52  ;;  %v18235_v52 = vld [vmem:[#allocation97_spill] sm:$0xff]  ;;  %v18237_v24 = vand.u32 4294901760, %v14097_v35  ;;  %v18246_v35 = vld [vmem:[#allocation44_spill] sm:$0xff]  ;;  %v18269_v55 = vld [vmem:[#allocation187_spill] sm:$0xff] }
 0x67b   :  { %9102 = vmatpush1.bf16.msra.mxu1 %v9101_v38  ;;  %v18200_v38 = vand.u32 4294901760, %v18041_v5  ;;  %v18210_v5 = vand.u32 4294901760, %v18014_v56  ;;  %v18217_v56 = vand.u32 4294901760, %v18118_v32  ;;  %v18224_v32 = vand.u32 4294901760, %v14064_v16 }
 0x67c   :  { %9104 = vmatprep.subr.bf16.mxu1 %v9103_v28  ;;  %v18203_v28 = vand.u32 4294901760, %v18043_v47  ;;  %v18212_v47 = vand.u32 4294901760, %v18111_v12  ;;  %v18219_v12 = vand.u32 4294901760, %v14049_v41  ;;  %v18234_v16 = vand.u32 4294901760, %v14086_v45  ;;  %v18243_v45 = vld [vmem:[#allocation222_spill] sm:$0xff] }
 0x67d   :  { %v9123_v46 = vpack.c.bf16 %v18202_v0, %v18200_v38  ;;  %v9129_v10 = vpack.c.bf16 %v18210_v5, %v18209_v43  ;;  %v9143_v37 = vpack.c.bf16 %v18224_v32, %v18223_v40  ;;  %v18245_v38 = vld [vmem:[#allocation35_spill] sm:$0xff]  ;;  %v18248_v0 = vld [vmem:[#allocation265_spill] sm:$0xff]  ;;  %v18259_v43 = vld [vmem:[#allocation124_spill] sm:$0xff] }
 0x67e   :  { %v9139_v17 = vpack.c.bf16 %v18220_v48, %v18219_v12  ;;  %v18260_v5 = vld [vmem:[#allocation127_spill] sm:$0xff]  ;;  %v7264_v12 = vstv %s7297_s26 }
 0x67f   :  { %9106 = vmatpush1.bf16.msra.mxu1 %v9105_v33  ;;  %v9125_v33 = vpack.c.bf16 %v18205_v62, %v18203_v28  ;;  %v18250_v28 = vld [vmem:[#allocation154_spill] sm:$0xff]  ;;  %v18252_v62 = vld [vmem:[#allocation181_spill] sm:$0xff] }
 0x680   :  { %9108 = vmatprep.subr.bf16.mxu1 %v9107_v8  ;;  %v9127_v8 = vpack.c.bf16 %v18208_v23, %v18206_v22  ;;  %v18255_v22 = vld [vmem:[#allocation29_spill] sm:$0xff] }
 0x681   :  { %v18257_v23 = vld [vmem:[#allocation69_spill] sm:$0xff] }
 0x683   :  { %9110 = vmatpush1.bf16.msra.mxu1 %v9109_v6  ;;  %v18211_v6 = vand.u32 4294901760, %v18112_v54  ;;  %v18218_v54 = vand.u32 4294901760, %v13933_v51  ;;  %v18225_v51 = vand.u32 4294901760, %v14070_v14  ;;  %v18236_v14 = vand.u32 4294901760, %v18235_v52 }
 0x684   :  { %9112 = vmatprep.subr.bf16.mxu1 %v9111_v36  ;;  %v9133_v36 = vpack.c.bf16 %v18214_v63, %v18213_v3  ;;  %v18265_v3 = vld [vmem:[#allocation161_spill] sm:$0xff]  ;;  %v18266_v63 = vld [vmem:[#allocation163_spill] sm:$0xff] }
 0x685   :  { %v9131_v34 = vpack.c.bf16 %v18212_v47, %v18211_v6  ;;  %v9151_v42 = vpack.c.bf16 %v18236_v14, %v18234_v16  ;;  %v18262_v6 = vld [vmem:[#allocation140_spill] sm:$0xff]  ;;  %v18263_v47 = vld [vmem:[#allocation149_spill] sm:$0xff] }
 0x687   :  { %9114 = vmatpush1.bf16.msra.mxu1 %v9113_v21  ;;  %v9137_v21 = vpack.c.bf16 %v18218_v54, %v18217_v56  ;;  %v18271_v56 = vld [vmem:[#allocation199_spill] sm:$0xff]  ;;  %v5978_v54 = vstv %s7296_s25 }
 0x688   :  { %9116 = vmatprep.subr.bf16.mxu1 %v9115_v27  ;;  %v18226_v27 = vld [vmem:[#allocation185_spill] sm:$0xff] }
 0x689   :  { %v18227_v41 = vand.u32 4294901760, %v18226_v27 }
 0x68b   :  { %9118 = vmatpush1.bf16.msra.mxu1 %v9117_v2  ;;  %v9145_v60 = vpack.c.bf16 %v18227_v41, %v18225_v51  ;;  %v18232_v2 = vld [vmem:[#allocation92_spill] sm:$0xff] }
 0x68c   :  { %9120 = vmatprep.subr.bf16.mxu1 %v9119_v19  ;;  %v18233_v44 = vand.u32 4294901760, %v18232_v2  ;;  %v18238_v19 = vld [vmem:[#allocation210_spill] sm:$0xff] }
 0x68d   :  { %v18239_v26 = vand.u32 4294901760, %v18238_v19 }
 0x68e   :  { %v9149_v18 = vpack.c.bf16 %v18233_v44, %v18231_v53 }
 0x68f   :  { %9122 = vmatpush1.bf16.msra.mxu1 %v9121_v13  ;;  %v9153_v49 = vpack.c.bf16 %v18239_v26, %v18237_v24  ;;  %v18244_v13 = vld [vmem:[#allocation228_spill] sm:$0xff] }
 0x690   :  { %9124 = vmatprep.subr.bf16.mxu1 %v9123_v46  ;;  %v18249_v46 = vld [vmem:[#allocation264_spill] sm:$0xff] }
 0x693   :  { %9126 = vmatpush1.bf16.msra.mxu1 %v9125_v33  ;;  %v18254_v33 = vld [vmem:[#allocation24_spill] sm:$0xff] }
 0x694   :  { %9128 = vmatprep.subr.bf16.mxu1 %v9127_v8  ;;  %v18258_v8 = vld [vmem:[#allocation71_spill] sm:$0xff] }
 0x697   :  { %9130 = vmatpush1.bf16.msra.mxu1 %v9129_v10  ;;  %v18261_v10 = vld [vmem:[#allocation136_spill] sm:$0xff] }
 0x698   :  { %9132 = vmatprep.subr.bf16.mxu1 %v9131_v34  ;;  %v18264_v34 = vld [vmem:[#allocation151_spill] sm:$0xff] }
 0x69b   :  { %9134 = vmatpush1.bf16.msra.mxu1 %v9133_v36  ;;  %v18267_v36 = vld [vmem:[#allocation173_spill] sm:$0xff] }
 0x69c   :  { %9136 = vmatprep.subr.bf16.mxu1 %v9135_v58  ;;  %v18270_v58 = vld [vmem:[#allocation91_spill] sm:$0xff] }
 0x69f   :  { %9138 = vmatpush1.bf16.msra.mxu1 %v9137_v21 }
 0x6a0   :  { %9140 = vmatprep.subr.bf16.mxu1 %v9139_v17 }
 0x6a3   :  { %9142 = vmatpush1.bf16.msra.mxu1 %v9141_v4 }
 0x6a4   :  { %9144 = vmatprep.subr.bf16.mxu1 %v9143_v37 }
 0x6a7   :  { %9146 = vmatpush1.bf16.msra.mxu1 %v9145_v60 }
 0x6a8   :  { %9148 = vmatprep.subr.bf16.mxu1 %v9147_v29 }
 0x6ab   :  { %9150 = vmatpush1.bf16.msra.mxu1 %v9149_v18 }
 0x6ac   :  { %9152 = vmatprep.subr.bf16.mxu1 %v9151_v42 }
 0x6af   :  { %9154 = vmatpush1.bf16.msra.mxu1 %v9153_v49 }
 0x6b0   :  { %9156 = vmatprep.subr.bf16.mxu1 %v18240_v30 }
 0x6b2   :  { %7120 = vmatmul.mubr.f32.vlgmr.msra.gmra.mrb[2].mxu1 %v18241_v20 }
 0x6b3   :  { %9158 = vmatpush1.bf16.msra.mxu1 %v18242_v61  ;;  %7255 = vmatprep.mubr.f32.mxu1 %v14481_v9  ;;  %v18253_v9 = vld [vmem:[#allocation205_spill] sm:$0xff] }
 0x6b4   :  { %9160 = vmatprep.subr.bf16.mxu1 %v18243_v45 }
 0x6b7   :  { %9162 = vmatpush1.bf16.msra.mxu1 %v18244_v13 }
 0x6b8   :  { %9164 = vmatprep.subr.bf16.mxu1 %v18245_v38 }
 0x6bb   :  { %9166 = vmatpush1.bf16.msra.mxu1 %v18246_v35 }
 0x6bc   :  { %9168 = vmatprep.subr.bf16.mxu1 %v18247_v59 }
 0x6bf   :  { %9170 = vmatpush1.bf16.msra.mxu1 %v18248_v0 }
 0x6c0   :  { %9172 = vmatprep.subr.bf16.mxu1 %v18249_v46 }
 0x6c3   :  { %9174 = vmatpush1.bf16.msra.mxu1 %v18250_v28 }
 0x6c4   :  { %9176 = vmatprep.subr.bf16.mxu1 %v18251_v57 }
 0x6c7   :  { %9178 = vmatpush1.bf16.msra.mxu1 %v18252_v62 }
 0x6c8   :  { %9180 = vmatprep.subr.bf16.mxu1 %v18253_v9 }
 0x6cb   :  { %9182 = vmatpush1.bf16.msra.mxu1 %v18254_v33 }
 0x6cc   :  { %9184 = vmatprep.subr.bf16.mxu1 %v18255_v22 }
 0x6cf   :  { %9186 = vmatpush1.bf16.msra.mxu1 %v18256_v50 }
 0x6d0   :  { %9188 = vmatprep.subr.bf16.mxu1 %v18257_v23 }
 0x6d3   :  { %9190 = vmatpush1.bf16.msra.mxu1 %v18258_v8 }
 0x6d4   :  { %9192 = vmatprep.subr.bf16.mxu1 %v18259_v43 }
 0x6d7   :  { %9194 = vmatpush1.bf16.msra.mxu1 %v18260_v5 }
 0x6d8   :  { %9196 = vmatprep.subr.bf16.mxu1 %v18261_v10 }
 0x6db   :  { %9198 = vmatpush1.bf16.msra.mxu1 %v18262_v6 }
 0x6dc   :  { %9200 = vmatprep.subr.bf16.mxu1 %v18263_v47 }
 0x6df   :  { %9202 = vmatpush1.bf16.msra.mxu1 %v18264_v34 }
 0x6e0   :  { %9204 = vmatprep.subr.bf16.mxu1 %v18265_v3 }
 0x6e3   :  { %9206 = vmatpush1.bf16.msra.mxu1 %v18266_v63 }
 0x6e4   :  { %9208 = vmatprep.subr.bf16.mxu1 %v18267_v36 }
 0x6e7   :  { %9210 = vmatpush1.bf16.msra.mxu1 %v18268_v15 }
 0x6e8   :  { %9212 = vmatprep.subr.bf16.mxu1 %v18269_v55 }
 0x6eb   :  { %9214 = vmatpush1.bf16.msra.mxu1 %v18270_v58 }
 0x6ec   :  { %9216 = vmatprep.subr.bf16.mxu1 %v18271_v56 }
 0x6ef   :  { %9218 = vmatpush1.bf16.msra.mxu1 %v18163_v11 }
 0x6f2   :  { %7257 = vmatmul.mubr.f32.vlgmr.msra.gmra.mrb[2].mxu1 %v18241_v20 }
 0x7c5   :  { %v7258_v21 = vpop.f32.mrb[2].mxu1 }
 0x7c6   :  { %v9223_v48 = vadd.f32 %v7258_v21, %v5978_v54  ;;  %v7260_v17 = vpop.f32.mrb[3].mxu1 }
 0x7c7   :  { %v9224_v7 = vadd.f32 %v7260_v17, %v5978_v54 }
 0x7c8   :  { %v7265_v25 = vmul.f32 %v9223_v48, %v7264_v12 }
 0x7c9   :  { %v7266_v4 = vmul.f32 %v9224_v7, %v7264_v12 }
 0x7cb   :  { %v7269_v40 = vcombine.low %v7265_v25, %v7266_v4 }
 0x7cd   :  { %7298 = vst.sshfl [vmem:[#allocation10] sm:$0x33 pattern:$0x76325410] %v7269_v40 }
 0x7ce   :  { %9390 = shalt.err (!%p9387_p5)
}
 0x7cf   :  { %s9391_s10 = scalar_lea.hbm %s14852_s4, 64 }
 0x7d0   :  { %p9392_p6 = scmp.ne.s32.totalorder %s14852_s4, %s9391_s10  ;;  %p9395_p7 = scmp.lt.u32.totalorder %s9391_s10, %s14852_s4 }
 0x7d2   :  { %p9397_p8 = pnand %p9395_p7, %p9392_p6 }
 0x7d4   :  { %9400 = shalt.err (!%p9397_p8)
}
 0x7d5   :  { %7288 = dma.vmem_to_hbm [thread:$0]  %s7286_s6, 64, %s14852_s4, [#allocation4]  }
 0x7d6   :  { %9407 = dma.done.wait [#allocation4], 64  }
 0x7d7   :  { %9408 = vsyncadd [#allocation4], 4294967232 }
 0x7d8   :  { %7292 = vsyncpa [#allocation3], 1 }
 0x7d9   :  { %7293 = vsyncpa [#allocation7], 1 }
 0x7da   :  { %7294 = vsyncpa [#allocation4], 1 }
 0x7db   :  { %7295 = vsyncpa [#allocation5], 1 }

</bundles_post_ra>
